<compile_context>
chip_gen: v7x
topology: tpu7x:2x2x1
jax: 0.10.0
libtpu: 0.0.40
codegen_flags: <defaults>
</compile_context>

<pallas_src>
import math
import functools
import numpy as np
import jax
import jax.numpy as jnp
from jax import lax
from jax.experimental import pallas as pl
from jax.experimental.pallas import tpu as pltpu


# ------------------------------ in-kernel helpers ------------------------------

def _layernorm(x, eps):
    # torch LayerNorm(elementwise_affine=False): biased variance over last dim
    mu = jnp.mean(x, axis=-1, keepdims=True)
    xc = x - mu
    var = jnp.mean(xc * xc, axis=-1, keepdims=True)
    return xc * lax.rsqrt(var + eps)


def _rmsnorm(x, g, eps):
    ms = jnp.mean(x * x, axis=-1, keepdims=True)
    return x * lax.rsqrt(ms + eps) * g


def _gelu_tanh(x):
    c = math.sqrt(2.0 / math.pi)
    return 0.5 * x * (1.0 + jnp.tanh(c * (x + 0.044715 * x * x * x)))


# --------------------------------- the kernel ----------------------------------

def _vace_block_kernel(num_heads, eps,
                       c_ref, x_ref, e_ref, ctx_ref, cosd_ref, sind_ref,
                       mod_ref, bp_w, bp_b,
                       saq_w, saq_b, sak_w, sak_b, sav_w, sav_b, sao_w, sao_b,
                       sa_gq, sa_gk,
                       caq_w, caq_b, cak_w, cak_b, cav_w, cav_b, cao_w, cao_b,
                       ca_gq, ca_gk,
                       f1_w, f1_b, f2_w, f2_b,
                       ap_w, ap_b,
                       skip_ref, cout_ref):
    f32 = jnp.float32
    bf16 = jnp.bfloat16

    c = c_ref[...]                         # (L, C) f32
    x = x_ref[...]                         # (L, C)
    ctx = ctx_ref[...]                     # (Lk, C)
    L, C = c.shape
    d = C // num_heads
    h2 = d // 2

    cosd = cosd_ref[...][None]             # (1, L, d)
    sind = sind_ref[...][None]             # (1, L, d)  ([-sin | +sin] layout)

    def lin(t, w, b):
        # bf16 MXU operands (weights stored bf16), f32 accumulation, f32 bias add.
        return jnp.dot(t.astype(bf16), w[...], preferred_element_type=f32) + b[...]

    def split_heads(t):                    # (Lt, C) -> (H, Lt, d)
        return t.reshape(t.shape[0], num_heads, d).transpose(1, 0, 2)

    def merge_heads(t):                    # (H, Lt, d) -> (Lt, C)
        return t.transpose(1, 0, 2).reshape(t.shape[1], C)

    def rope(t):
        # t: (H, L, d) with per-head [even-pairs | odd-pairs] channel layout.
        sw = jnp.concatenate([t[:, :, h2:], t[:, :, :h2]], axis=-1)   # half-swap
        return t * cosd + sw * sind

    def attention(qh, kh, vh):
        # qh/kh/vh: (H, Lq/Lk, d); 1/sqrt(d) already folded into qh via the gains.
        s = jnp.einsum('hqd,hkd->hqk', qh.astype(bf16), kh.astype(bf16),
                       preferred_element_type=f32)
        m = jnp.max(s, axis=-1, keepdims=True)
        p = jnp.exp(s - m)
        denom = jnp.sum(p, axis=-1, keepdims=True)
        p = p * pl.reciprocal(denom, approx=True)
        return jnp.einsum('hqk,hkd->hqd', p.astype(bf16), vh.astype(bf16),
                          preferred_element_type=f32)

    # before_proj(c) + x     (block_id == 0)
    c = lin(c, bp_w, bp_b) + x

    # e = modulation + e, 6 chunks of (1, C); repeat_e is identity (chunk seq dim == 1)
    e = mod_ref[0] + e_ref[...]                          # (6, C)
    e0, e1, e2 = e[0:1, :], e[1:2, :], e[2:3, :]
    e3, e4, e5 = e[3:4, :], e[4:5, :], e[5:6, :]

    # ---- self attention (RMSNorm q/k + RoPE) ----
    y_in = _layernorm(c, eps) * (1.0 + e1) + e0
    q = _rmsnorm(lin(y_in, saq_w, saq_b), sa_gq[...], eps)   # gain carries 1/sqrt(d)
    k = _rmsnorm(lin(y_in, sak_w, sak_b), sa_gk[...], eps)
    v = lin(y_in, sav_w, sav_b)
    o = attention(rope(split_heads(q)), rope(split_heads(k)), split_heads(v))
    c = c + lin(merge_heads(o), sao_w, sao_b) * e2

    # ---- t2v cross attention (norm3 = Identity since cross_attn_norm=False) ----
    qc = _rmsnorm(lin(c, caq_w, caq_b), ca_gq[...], eps)     # gain carries 1/sqrt(d)
    kc = _rmsnorm(lin(ctx, cak_w, cak_b), ca_gk[...], eps)
    vc = lin(ctx, cav_w, cav_b)
    oc = attention(split_heads(qc), split_heads(kc), split_heads(vc))
    c = c + lin(merge_heads(oc), cao_w, cao_b)

    # ---- FFN (GELU-tanh) ----
    h_in = _layernorm(c, eps) * (1.0 + e4) + e3
    h = _gelu_tanh(lin(h_in, f1_w, f1_b))
    c = c + lin(h, f2_w, f2_b) * e5

    # ---- after_proj skip ----
    skip_ref[...] = lin(c, ap_w, ap_b)
    cout_ref[...] = c


# ---------------------------------- wrapper ------------------------------------

PARAM_ORDER = ('modulation', 'bp_w', 'bp_b',
               'saq_w', 'saq_b', 'sak_w', 'sak_b', 'sav_w', 'sav_b', 'sao_w', 'sao_b',
               'sa_gq', 'sa_gk',
               'caq_w', 'caq_b', 'cak_w', 'cak_b', 'cav_w', 'cav_b', 'cao_w', 'cao_b',
               'ca_gq', 'ca_gk',
               'f1_w', 'f1_b', 'f2_w', 'f2_b',
               'ap_w', 'ap_b')


def vace_wan_attention_block(c, x, e, freqs, context, params, *, num_heads, eps=1e-6):
    B, L, C = c.shape
    assert C % num_heads == 0
    d = C // num_heads
    assert d % 2 == 0
    assert L <= freqs.shape[0], "RoPE freqs table too short for sequence length"

    # Permute self-attn q/k projection outputs (+ biases, RMSNorm gains) so each
    # head's channels become [even-pair slots | odd-pair slots]; the per-head q.k
    # dot product is invariant, and RoPE turns into a half-swap (no interleaving).
    perm = np.concatenate(
        [h * d + np.concatenate([np.arange(0, d, 2), np.arange(1, d, 2)])
         for h in range(num_heads)])
    kp = dict(params)
    for wname, bname, gname in (('saq_w', 'saq_b', 'sa_gq'),
                                ('sak_w', 'sak_b', 'sa_gk')):
        kp[wname] = params[wname][:, perm]
        kp[bname] = params[bname][:, perm]
        kp[gname] = params[gname][:, perm]

    # Fold the 1/sqrt(head_dim) attention scale into the q gains (RoPE is a
    # rotation, so pre-scaling q is equivalent) -> no in-kernel score scaling.
    scale = 1.0 / math.sqrt(d)
    kp['sa_gq'] = kp['sa_gq'] * scale
    kp['ca_gq'] = kp['ca_gq'] * scale

    # Weight matrices become bf16 MXU operands; biases / gains / modulation stay f32.
    for name in PARAM_ORDER:
        if name.endswith('_w'):
            kp[name] = kp[name].astype(jnp.bfloat16)
        else:
            kp[name] = kp[name].astype(jnp.float32)

    # RoPE tables pre-expanded to (L, head_dim) matching the permuted layout:
    #   rot(t) = t * cosd + half_swap(t) * sind
    ang = freqs[:L].astype(jnp.float32)                  # (L, d//2) angles
    cos_t, sin_t = jnp.cos(ang), jnp.sin(ang)
    cosd = jnp.concatenate([cos_t, cos_t], axis=-1)      # (L, d)
    sind = jnp.concatenate([-sin_t, sin_t], axis=-1)     # (L, d)

    def bspec(shape):                                    # per-batch, batch squeezed
        n = len(shape)
        return pl.BlockSpec((None,) + tuple(shape[1:]),
                            lambda b, n=n: (b,) + (0,) * (n - 1))

    def fspec(shape):                                    # grid-invariant (weights)
        n = len(shape)
        return pl.BlockSpec(tuple(shape), lambda b, n=n: (0,) * n)

    c32 = c.astype(jnp.float32)
    x32 = x.astype(jnp.float32)
    e32 = e.astype(jnp.float32)
    ctx32 = context.astype(jnp.float32)

    inputs = [c32, x32, e32, ctx32, cosd, sind] + [kp[name] for name in PARAM_ORDER]
    in_specs = ([bspec(c32.shape), bspec(x32.shape), bspec(e32.shape),
                 bspec(ctx32.shape), fspec(cosd.shape), fspec(sind.shape)]
                + [fspec(kp[name].shape) for name in PARAM_ORDER])

    out_shape = (jax.ShapeDtypeStruct((B, L, C), jnp.float32),
                 jax.ShapeDtypeStruct((B, L, C), jnp.float32))
    out_specs = (bspec((B, L, C)), bspec((B, L, C)))

    # VMEM budget: double-buffered inputs/outputs + headroom, capped for v7x (64 MiB/TC).
    footprint = sum(int(np.prod(a.shape)) * a.dtype.itemsize for a in inputs)
    footprint += 2 * L * C * 4
    vmem_limit = int(min(48 * 1024 * 1024, 2 * footprint + 16 * 1024 * 1024))

    kernel = functools.partial(_vace_block_kernel, num_heads, eps)
    return pl.pallas_call(
        kernel,
        grid=(B,),
        in_specs=in_specs,
        out_specs=out_specs,
        out_shape=out_shape,
        compiler_params=pltpu.CompilerParams(
            dimension_semantics=("parallel",),
            vmem_limit_bytes=vmem_limit),
    )(*inputs)


# ----------------------------- reference & params ------------------------------

def init_params(key, dim, ffn_dim):
    def nxt():
        nonlocal key
        key, sub = jax.random.split(key)
        return sub

    def w(shape, scale=0.02):
        return (scale * jax.random.normal(nxt(), shape)).astype(jnp.float32)

    p = {'modulation': w((1, 6, dim), 0.5),
         'bp_w': w((dim, dim)), 'bp_b': w((1, dim)),
         'ap_w': w((dim, dim)), 'ap_b': w((1, dim)),
         'f1_w': w((dim, ffn_dim)), 'f1_b': w((1, ffn_dim)),
         'f2_w': w((ffn_dim, dim)), 'f2_b': w((1, dim))}
    for pre in ('sa', 'ca'):
        for name in ('q', 'k', 'v', 'o'):
            p[f'{pre}{name}_w'] = w((dim, dim))
            p[f'{pre}{name}_b'] = w((1, dim))
        p[f'{pre}_gq'] = 1.0 + w((1, dim), 0.1)
        p[f'{pre}_gk'] = 1.0 + w((1, dim), 0.1)
    return p


def reference_forward(c, x, e, freqs, context, p, num_heads, eps):
    # Pure-JAX f32 reference with unpermuted weights and standard interleaved RoPE.
    B, L, C = c.shape
    d = C // num_heads
    cos = jnp.cos(freqs[:L])
    sin = jnp.sin(freqs[:L])

    def lin(t, w, b): return t @ w + b
    def ln(t):
        mu = t.mean(-1, keepdims=True)
        var = ((t - mu) ** 2).mean(-1, keepdims=True)
        return (t - mu) / jnp.sqrt(var + eps)
    def rms(t, g): return t * lax.rsqrt((t * t).mean(-1, keepdims=True) + eps) * g

    def rope(t):
        th = t.reshape(B, L, num_heads, d // 2, 2)
        te, to = th[..., 0], th[..., 1]
        cc, ss = cos[None, :, None, :], sin[None, :, None, :]
        return jnp.stack([te * cc - to * ss, te * ss + to * cc], -1).reshape(B, L, C)

    def attn(q, k, v):
        Lq, Lk = q.shape[1], k.shape[1]
        qh = q.reshape(B, Lq, num_heads, d).transpose(0, 2, 1, 3)
        kh = k.reshape(B, Lk, num_heads, d).transpose(0, 2, 1, 3)
        vh = v.reshape(B, Lk, num_heads, d).transpose(0, 2, 1, 3)
        s = jnp.einsum('bhqd,bhkd->bhqk', qh, kh) / math.sqrt(d)
        o = jnp.einsum('bhqk,bhkd->bhqd', jax.nn.softmax(s, -1), vh)
        return o.transpose(0, 2, 1, 3).reshape(B, Lq, C)

    emod = p['modulation'] + e
    ch = [emod[:, i:i + 1] for i in range(6)]

    c = lin(c, p['bp_w'], p['bp_b']) + x
    y_in = ln(c) * (1 + ch[1]) + ch[0]
    q = rms(lin(y_in, p['saq_w'], p['saq_b']), p['sa_gq'])
    k = rms(lin(y_in, p['sak_w'], p['sak_b']), p['sa_gk'])
    v = lin(y_in, p['sav_w'], p['sav_b'])
    y = lin(attn(rope(q), rope(k), v), p['sao_w'], p['sao_b'])
    c = c + y * ch[2]
    qc = rms(lin(c, p['caq_w'], p['caq_b']), p['ca_gq'])
    kc = rms(lin(context, p['cak_w'], p['cak_b']), p['ca_gk'])
    vc = lin(context, p['cav_w'], p['cav_b'])
    c = c + lin(attn(qc, kc, vc), p['cao_w'], p['cao_b'])
    h = jax.nn.gelu(lin(ln(c) * (1 + ch[4]) + ch[3], p['f1_w'], p['f1_b']), approximate=True)
    c = c + lin(h, p['f2_w'], p['f2_b']) * ch[5]
    return lin(c, p['ap_w'], p['ap_b']), c


# ------------------------------------ main --------------------------------------

if __name__ == "__main__":
    B, L, C = 2, 32, 128
    NUM_HEADS, FFN_DIM, L_CTX = 4, 256, 16
    d = C // NUM_HEADS

    key = jax.random.PRNGKey(0)
    kc, kx, ke, kctx, kparam = jax.random.split(key, 5)
    c_in = jax.random.normal(kc, (B, L, C), jnp.float32)
    x_in = jax.random.normal(kx, (B, L, C), jnp.float32)
    e_in = jax.random.normal(ke, (B, 6, C), jnp.float32)
    ctx_in = jax.random.normal(kctx, (B, L_CTX, C), jnp.float32)

    # RoPE freqs table: [1024, head_dim // 2] angles (complex-pair rotation)
    pos = jnp.arange(1024, dtype=jnp.float32)[:, None]
    inv = 1.0 / (10000.0 ** (jnp.arange(0, d, 2, dtype=jnp.float32) / d))
    freqs = pos * inv[None, :]

    params = init_params(kparam, C, FFN_DIM)

    skip, c_out = vace_wan_attention_block(c_in, x_in, e_in, freqs, ctx_in, params,
                                           num_heads=NUM_HEADS)
    jax.block_until_ready((skip, c_out))

    ref_skip, ref_c = reference_forward(c_in, x_in, e_in, freqs, ctx_in, params,
                                        NUM_HEADS, 1e-6)
    # bf16 MXU operands vs a pure-f32 reference -> 3e-2 tolerance.
    assert np.allclose(np.asarray(skip), np.asarray(ref_skip), rtol=3e-2, atol=3e-2)
    assert np.allclose(np.asarray(c_out), np.asarray(ref_c), rtol=3e-2, atol=3e-2)
    print("KERNEL_OK")
</pallas_src>

<mosaic_0001>
module attributes {stable_mosaic.version = 11 : i64} {
  func.func @_vace_block_kernel(%arg0: i32, %arg1: memref<1x32x128xf32, #tpu.memory_space<vmem>>, %arg2: memref<1x32x128xf32, #tpu.memory_space<vmem>>, %arg3: memref<1x6x128xf32, #tpu.memory_space<vmem>>, %arg4: memref<1x16x128xf32, #tpu.memory_space<vmem>>, %arg5: memref<32x32xf32, #tpu.memory_space<vmem>>, %arg6: memref<32x32xf32, #tpu.memory_space<vmem>>, %arg7: memref<1x6x128xf32, #tpu.memory_space<vmem>>, %arg8: memref<128x128xbf16, #tpu.memory_space<vmem>>, %arg9: memref<1x128xf32, #tpu.memory_space<vmem>>, %arg10: memref<128x128xbf16, #tpu.memory_space<vmem>>, %arg11: memref<1x128xf32, #tpu.memory_space<vmem>>, %arg12: memref<128x128xbf16, #tpu.memory_space<vmem>>, %arg13: memref<1x128xf32, #tpu.memory_space<vmem>>, %arg14: memref<128x128xbf16, #tpu.memory_space<vmem>>, %arg15: memref<1x128xf32, #tpu.memory_space<vmem>>, %arg16: memref<128x128xbf16, #tpu.memory_space<vmem>>, %arg17: memref<1x128xf32, #tpu.memory_space<vmem>>, %arg18: memref<1x128xf32, #tpu.memory_space<vmem>>, %arg19: memref<1x128xf32, #tpu.memory_space<vmem>>, %arg20: memref<128x128xbf16, #tpu.memory_space<vmem>>, %arg21: memref<1x128xf32, #tpu.memory_space<vmem>>, %arg22: memref<128x128xbf16, #tpu.memory_space<vmem>>, %arg23: memref<1x128xf32, #tpu.memory_space<vmem>>, %arg24: memref<128x128xbf16, #tpu.memory_space<vmem>>, %arg25: memref<1x128xf32, #tpu.memory_space<vmem>>, %arg26: memref<128x128xbf16, #tpu.memory_space<vmem>>, %arg27: memref<1x128xf32, #tpu.memory_space<vmem>>, %arg28: memref<1x128xf32, #tpu.memory_space<vmem>>, %arg29: memref<1x128xf32, #tpu.memory_space<vmem>>, %arg30: memref<128x256xbf16, #tpu.memory_space<vmem>>, %arg31: memref<1x256xf32, #tpu.memory_space<vmem>>, %arg32: memref<256x128xbf16, #tpu.memory_space<vmem>>, %arg33: memref<1x128xf32, #tpu.memory_space<vmem>>, %arg34: memref<128x128xbf16, #tpu.memory_space<vmem>>, %arg35: memref<1x128xf32, #tpu.memory_space<vmem>>, %arg36: memref<1x32x128xf32, #tpu.memory_space<vmem>>, %arg37: memref<1x32x128xf32, #tpu.memory_space<vmem>>) attributes {dimension_semantics = [#tpu.dimension_semantics<parallel>], iteration_bounds = array<i64: 2>, scalar_prefetch = 0 : i64, scratch_operands = 0 : i64, tpu.core_type = #tpu.core_type<tc>, window_params = [{transform_indices = @transform_0, window_bounds = array<i64: 1, 32, 128>}, {transform_indices = @transform_1, window_bounds = array<i64: 1, 32, 128>}, {transform_indices = @transform_2, window_bounds = array<i64: 1, 6, 128>}, {transform_indices = @transform_3, window_bounds = array<i64: 1, 16, 128>}, {pipeline_mode = #tpu.pipeline_mode<synchronous>, transform_indices = @transform_4, window_bounds = array<i64: 32, 32>}, {pipeline_mode = #tpu.pipeline_mode<synchronous>, transform_indices = @transform_5, window_bounds = array<i64: 32, 32>}, {pipeline_mode = #tpu.pipeline_mode<synchronous>, transform_indices = @transform_6, window_bounds = array<i64: 1, 6, 128>}, {pipeline_mode = #tpu.pipeline_mode<synchronous>, transform_indices = @transform_7, window_bounds = array<i64: 128, 128>}, {pipeline_mode = #tpu.pipeline_mode<synchronous>, transform_indices = @transform_8, window_bounds = array<i64: 1, 128>}, {pipeline_mode = #tpu.pipeline_mode<synchronous>, transform_indices = @transform_9, window_bounds = array<i64: 128, 128>}, {pipeline_mode = #tpu.pipeline_mode<synchronous>, transform_indices = @transform_10, window_bounds = array<i64: 1, 128>}, {pipeline_mode = #tpu.pipeline_mode<synchronous>, transform_indices = @transform_11, window_bounds = array<i64: 128, 128>}, {pipeline_mode = #tpu.pipeline_mode<synchronous>, transform_indices = @transform_12, window_bounds = array<i64: 1, 128>}, {pipeline_mode = #tpu.pipeline_mode<synchronous>, transform_indices = @transform_13, window_bounds = array<i64: 128, 128>}, {pipeline_mode = #tpu.pipeline_mode<synchronous>, transform_indices = @transform_14, window_bounds = array<i64: 1, 128>}, {pipeline_mode = #tpu.pipeline_mode<synchronous>, transform_indices = @transform_15, window_bounds = array<i64: 128, 128>}, {pipeline_mode = #tpu.pipeline_mode<synchronous>, transform_indices = @transform_16, window_bounds = array<i64: 1, 128>}, {pipeline_mode = #tpu.pipeline_mode<synchronous>, transform_indices = @transform_17, window_bounds = array<i64: 1, 128>}, {pipeline_mode = #tpu.pipeline_mode<synchronous>, transform_indices = @transform_18, window_bounds = array<i64: 1, 128>}, {pipeline_mode = #tpu.pipeline_mode<synchronous>, transform_indices = @transform_19, window_bounds = array<i64: 128, 128>}, {pipeline_mode = #tpu.pipeline_mode<synchronous>, transform_indices = @transform_20, window_bounds = array<i64: 1, 128>}, {pipeline_mode = #tpu.pipeline_mode<synchronous>, transform_indices = @transform_21, window_bounds = array<i64: 128, 128>}, {pipeline_mode = #tpu.pipeline_mode<synchronous>, transform_indices = @transform_22, window_bounds = array<i64: 1, 128>}, {pipeline_mode = #tpu.pipeline_mode<synchronous>, transform_indices = @transform_23, window_bounds = array<i64: 128, 128>}, {pipeline_mode = #tpu.pipeline_mode<synchronous>, transform_indices = @transform_24, window_bounds = array<i64: 1, 128>}, {pipeline_mode = #tpu.pipeline_mode<synchronous>, transform_indices = @transform_25, window_bounds = array<i64: 128, 128>}, {pipeline_mode = #tpu.pipeline_mode<synchronous>, transform_indices = @transform_26, window_bounds = array<i64: 1, 128>}, {pipeline_mode = #tpu.pipeline_mode<synchronous>, transform_indices = @transform_27, window_bounds = array<i64: 1, 128>}, {pipeline_mode = #tpu.pipeline_mode<synchronous>, transform_indices = @transform_28, window_bounds = array<i64: 1, 128>}, {pipeline_mode = #tpu.pipeline_mode<synchronous>, transform_indices = @transform_29, window_bounds = array<i64: 128, 256>}, {pipeline_mode = #tpu.pipeline_mode<synchronous>, transform_indices = @transform_30, window_bounds = array<i64: 1, 256>}, {pipeline_mode = #tpu.pipeline_mode<synchronous>, transform_indices = @transform_31, window_bounds = array<i64: 256, 128>}, {pipeline_mode = #tpu.pipeline_mode<synchronous>, transform_indices = @transform_32, window_bounds = array<i64: 1, 128>}, {pipeline_mode = #tpu.pipeline_mode<synchronous>, transform_indices = @transform_33, window_bounds = array<i64: 128, 128>}, {pipeline_mode = #tpu.pipeline_mode<synchronous>, transform_indices = @transform_34, window_bounds = array<i64: 1, 128>}, {transform_indices = @transform_35, window_bounds = array<i64: 1, 32, 128>}, {transform_indices = @transform_36, window_bounds = array<i64: 1, 32, 128>}]} {
    %c0 = arith.constant 0 : index
    %c0_0 = arith.constant 0 : index
    %c0_1 = arith.constant 0 : index
    %0 = vector.load %arg1[%c0, %c0_0, %c0_1] : memref<1x32x128xf32, #tpu.memory_space<vmem>>, vector<1x32x128xf32>
    %1 = vector.shape_cast %0 : vector<1x32x128xf32> to vector<32x128xf32>
    %c0_2 = arith.constant 0 : index
    %c0_3 = arith.constant 0 : index
    %c0_4 = arith.constant 0 : index
    %2 = vector.load %arg2[%c0_2, %c0_3, %c0_4] : memref<1x32x128xf32, #tpu.memory_space<vmem>>, vector<1x32x128xf32>
    %3 = vector.shape_cast %2 : vector<1x32x128xf32> to vector<32x128xf32>
    %c0_5 = arith.constant 0 : index
    %c0_6 = arith.constant 0 : index
    %c0_7 = arith.constant 0 : index
    %4 = vector.load %arg4[%c0_5, %c0_6, %c0_7] : memref<1x16x128xf32, #tpu.memory_space<vmem>>, vector<1x16x128xf32>
    %5 = vector.shape_cast %4 : vector<1x16x128xf32> to vector<16x128xf32>
    %c0_8 = arith.constant 0 : index
    %c0_9 = arith.constant 0 : index
    %6 = vector.load %arg5[%c0_8, %c0_9] : memref<32x32xf32, #tpu.memory_space<vmem>>, vector<32x32xf32>
    %7 = vector.shape_cast %6 : vector<32x32xf32> to vector<1x32x32xf32>
    %c0_10 = arith.constant 0 : index
    %c0_11 = arith.constant 0 : index
    %8 = vector.load %arg6[%c0_10, %c0_11] : memref<32x32xf32, #tpu.memory_space<vmem>>, vector<32x32xf32>
    %9 = vector.shape_cast %8 : vector<32x32xf32> to vector<1x32x32xf32>
    %10 = arith.truncf %1 : vector<32x128xf32> to vector<32x128xbf16>
    %c0_12 = arith.constant 0 : index
    %c0_13 = arith.constant 0 : index
    %11 = vector.load %arg8[%c0_12, %c0_13] : memref<128x128xbf16, #tpu.memory_space<vmem>>, vector<128x128xbf16>
    %cst = arith.constant dense<0.000000e+00> : vector<32x128xf32>
    %12 = tpu.matmul %10, %11, %cst {dimension_numbers = #tpu.dot_dimension_numbers<[1], [0], [0], [1], [0, 0, 1, 1], [], []>} : vector<32x128xbf16>, vector<128x128xbf16>, vector<32x128xf32> -> vector<32x128xf32>
    %c0_14 = arith.constant 0 : index
    %c0_15 = arith.constant 0 : index
    %13 = vector.load %arg9[%c0_14, %c0_15] : memref<1x128xf32, #tpu.memory_space<vmem>>, vector<1x128xf32>
    %14 = vector.broadcast %13 : vector<1x128xf32> to vector<32x128xf32>
    %15 = arith.addf %12, %14 : vector<32x128xf32>
    %16 = arith.addf %15, %3 : vector<32x128xf32>
    %c0_16 = arith.constant 0 : index
    %c0_17 = arith.constant 0 : index
    %c0_18 = arith.constant 0 : index
    %17 = vector.load %arg7[%c0_16, %c0_17, %c0_18] : memref<1x6x128xf32, #tpu.memory_space<vmem>>, vector<1x6x128xf32>
    %18 = vector.shape_cast %17 : vector<1x6x128xf32> to vector<6x128xf32>
    %c0_19 = arith.constant 0 : index
    %c0_20 = arith.constant 0 : index
    %c0_21 = arith.constant 0 : index
    %19 = vector.load %arg3[%c0_19, %c0_20, %c0_21] : memref<1x6x128xf32, #tpu.memory_space<vmem>>, vector<1x6x128xf32>
    %20 = vector.shape_cast %19 : vector<1x6x128xf32> to vector<6x128xf32>
    %21 = arith.addf %18, %20 : vector<6x128xf32>
    %22 = vector.extract_strided_slice %21 {offsets = [0, 0], sizes = [1, 128], strides = [1, 1]} : vector<6x128xf32> to vector<1x128xf32>
    %23 = vector.extract_strided_slice %21 {offsets = [1, 0], sizes = [1, 128], strides = [1, 1]} : vector<6x128xf32> to vector<1x128xf32>
    %24 = vector.extract_strided_slice %21 {offsets = [2, 0], sizes = [1, 128], strides = [1, 1]} : vector<6x128xf32> to vector<1x128xf32>
    %25 = vector.extract_strided_slice %21 {offsets = [3, 0], sizes = [1, 128], strides = [1, 1]} : vector<6x128xf32> to vector<1x128xf32>
    %26 = vector.extract_strided_slice %21 {offsets = [4, 0], sizes = [1, 128], strides = [1, 1]} : vector<6x128xf32> to vector<1x128xf32>
    %27 = vector.extract_strided_slice %21 {offsets = [5, 0], sizes = [1, 128], strides = [1, 1]} : vector<6x128xf32> to vector<1x128xf32>
    %cst_22 = arith.constant dense<0.000000e+00> : vector<32xf32>
    %28 = vector.multi_reduction <add>, %16, %cst_22 [1] : vector<32x128xf32> to vector<32xf32>
    %29 = vector.shape_cast %28 : vector<32xf32> to vector<32x1xf32>
    %cst_23 = arith.constant 1.280000e+02 : f32
    %30 = vector.broadcast %cst_23 : f32 to vector<32x1xf32>
    %31 = arith.divf %29, %30 : vector<32x1xf32>
    %32 = vector.broadcast %31 : vector<32x1xf32> to vector<32x128xf32>
    %33 = arith.subf %16, %32 : vector<32x128xf32>
    %34 = arith.mulf %33, %33 : vector<32x128xf32>
    %cst_24 = arith.constant dense<0.000000e+00> : vector<32xf32>
    %35 = vector.multi_reduction <add>, %34, %cst_24 [1] : vector<32x128xf32> to vector<32xf32>
    %36 = vector.shape_cast %35 : vector<32xf32> to vector<32x1xf32>
    %cst_25 = arith.constant 1.280000e+02 : f32
    %37 = vector.broadcast %cst_25 : f32 to vector<32x1xf32>
    %38 = arith.divf %36, %37 : vector<32x1xf32>
    %cst_26 = arith.constant 9.99999997E-7 : f32
    %39 = vector.broadcast %cst_26 : f32 to vector<32x1xf32>
    %40 = arith.addf %38, %39 : vector<32x1xf32>
    %41 = math.rsqrt %40 : vector<32x1xf32>
    %42 = vector.broadcast %41 : vector<32x1xf32> to vector<32x128xf32>
    %43 = arith.mulf %33, %42 : vector<32x128xf32>
    %cst_27 = arith.constant 1.000000e+00 : f32
    %44 = vector.broadcast %cst_27 : f32 to vector<1x128xf32>
    %45 = arith.addf %44, %23 : vector<1x128xf32>
    %46 = vector.broadcast %45 : vector<1x128xf32> to vector<32x128xf32>
    %47 = arith.mulf %43, %46 : vector<32x128xf32>
    %48 = vector.broadcast %22 : vector<1x128xf32> to vector<32x128xf32>
    %49 = arith.addf %47, %48 : vector<32x128xf32>
    %50 = arith.truncf %49 : vector<32x128xf32> to vector<32x128xbf16>
    %c0_28 = arith.constant 0 : index
    %c0_29 = arith.constant 0 : index
    %51 = vector.load %arg10[%c0_28, %c0_29] : memref<128x128xbf16, #tpu.memory_space<vmem>>, vector<128x128xbf16>
    %cst_30 = arith.constant dense<0.000000e+00> : vector<32x128xf32>
    %52 = tpu.matmul %50, %51, %cst_30 {dimension_numbers = #tpu.dot_dimension_numbers<[1], [0], [0], [1], [0, 0, 1, 1], [], []>} : vector<32x128xbf16>, vector<128x128xbf16>, vector<32x128xf32> -> vector<32x128xf32>
    %c0_31 = arith.constant 0 : index
    %c0_32 = arith.constant 0 : index
    %53 = vector.load %arg11[%c0_31, %c0_32] : memref<1x128xf32, #tpu.memory_space<vmem>>, vector<1x128xf32>
    %54 = vector.broadcast %53 : vector<1x128xf32> to vector<32x128xf32>
    %55 = arith.addf %52, %54 : vector<32x128xf32>
    %c0_33 = arith.constant 0 : index
    %c0_34 = arith.constant 0 : index
    %56 = vector.load %arg18[%c0_33, %c0_34] : memref<1x128xf32, #tpu.memory_space<vmem>>, vector<1x128xf32>
    %57 = arith.mulf %55, %55 : vector<32x128xf32>
    %cst_35 = arith.constant dense<0.000000e+00> : vector<32xf32>
    %58 = vector.multi_reduction <add>, %57, %cst_35 [1] : vector<32x128xf32> to vector<32xf32>
    %59 = vector.shape_cast %58 : vector<32xf32> to vector<32x1xf32>
    %cst_36 = arith.constant 1.280000e+02 : f32
    %60 = vector.broadcast %cst_36 : f32 to vector<32x1xf32>
    %61 = arith.divf %59, %60 : vector<32x1xf32>
    %cst_37 = arith.constant 9.99999997E-7 : f32
    %62 = vector.broadcast %cst_37 : f32 to vector<32x1xf32>
    %63 = arith.addf %61, %62 : vector<32x1xf32>
    %64 = math.rsqrt %63 : vector<32x1xf32>
    %65 = vector.broadcast %64 : vector<32x1xf32> to vector<32x128xf32>
    %66 = arith.mulf %55, %65 : vector<32x128xf32>
    %67 = vector.broadcast %56 : vector<1x128xf32> to vector<32x128xf32>
    %68 = arith.mulf %66, %67 : vector<32x128xf32>
    %69 = arith.truncf %49 : vector<32x128xf32> to vector<32x128xbf16>
    %c0_38 = arith.constant 0 : index
    %c0_39 = arith.constant 0 : index
    %70 = vector.load %arg12[%c0_38, %c0_39] : memref<128x128xbf16, #tpu.memory_space<vmem>>, vector<128x128xbf16>
    %cst_40 = arith.constant dense<0.000000e+00> : vector<32x128xf32>
    %71 = tpu.matmul %69, %70, %cst_40 {dimension_numbers = #tpu.dot_dimension_numbers<[1], [0], [0], [1], [0, 0, 1, 1], [], []>} : vector<32x128xbf16>, vector<128x128xbf16>, vector<32x128xf32> -> vector<32x128xf32>
    %c0_41 = arith.constant 0 : index
    %c0_42 = arith.constant 0 : index
    %72 = vector.load %arg13[%c0_41, %c0_42] : memref<1x128xf32, #tpu.memory_space<vmem>>, vector<1x128xf32>
    %73 = vector.broadcast %72 : vector<1x128xf32> to vector<32x128xf32>
    %74 = arith.addf %71, %73 : vector<32x128xf32>
    %c0_43 = arith.constant 0 : index
    %c0_44 = arith.constant 0 : index
    %75 = vector.load %arg19[%c0_43, %c0_44] : memref<1x128xf32, #tpu.memory_space<vmem>>, vector<1x128xf32>
    %76 = arith.mulf %74, %74 : vector<32x128xf32>
    %cst_45 = arith.constant dense<0.000000e+00> : vector<32xf32>
    %77 = vector.multi_reduction <add>, %76, %cst_45 [1] : vector<32x128xf32> to vector<32xf32>
    %78 = vector.shape_cast %77 : vector<32xf32> to vector<32x1xf32>
    %cst_46 = arith.constant 1.280000e+02 : f32
    %79 = vector.broadcast %cst_46 : f32 to vector<32x1xf32>
    %80 = arith.divf %78, %79 : vector<32x1xf32>
    %cst_47 = arith.constant 9.99999997E-7 : f32
    %81 = vector.broadcast %cst_47 : f32 to vector<32x1xf32>
    %82 = arith.addf %80, %81 : vector<32x1xf32>
    %83 = math.rsqrt %82 : vector<32x1xf32>
    %84 = vector.broadcast %83 : vector<32x1xf32> to vector<32x128xf32>
    %85 = arith.mulf %74, %84 : vector<32x128xf32>
    %86 = vector.broadcast %75 : vector<1x128xf32> to vector<32x128xf32>
    %87 = arith.mulf %85, %86 : vector<32x128xf32>
    %88 = arith.truncf %49 : vector<32x128xf32> to vector<32x128xbf16>
    %c0_48 = arith.constant 0 : index
    %c0_49 = arith.constant 0 : index
    %89 = vector.load %arg14[%c0_48, %c0_49] : memref<128x128xbf16, #tpu.memory_space<vmem>>, vector<128x128xbf16>
    %cst_50 = arith.constant dense<0.000000e+00> : vector<32x128xf32>
    %90 = tpu.matmul %88, %89, %cst_50 {dimension_numbers = #tpu.dot_dimension_numbers<[1], [0], [0], [1], [0, 0, 1, 1], [], []>} : vector<32x128xbf16>, vector<128x128xbf16>, vector<32x128xf32> -> vector<32x128xf32>
    %c0_51 = arith.constant 0 : index
    %c0_52 = arith.constant 0 : index
    %91 = vector.load %arg15[%c0_51, %c0_52] : memref<1x128xf32, #tpu.memory_space<vmem>>, vector<1x128xf32>
    %92 = vector.broadcast %91 : vector<1x128xf32> to vector<32x128xf32>
    %93 = arith.addf %90, %92 : vector<32x128xf32>
    %94 = vector.shape_cast %68 : vector<32x128xf32> to vector<32x4x32xf32>
    %95 = tpu.transpose %94, [1, 0, 2] : vector<32x4x32xf32> -> vector<4x32x32xf32>
    %96 = vector.extract_strided_slice %95 {offsets = [0, 0, 16], sizes = [4, 32, 16], strides = [1, 1, 1]} : vector<4x32x32xf32> to vector<4x32x16xf32>
    %97 = vector.extract_strided_slice %95 {offsets = [0, 0, 0], sizes = [4, 32, 16], strides = [1, 1, 1]} : vector<4x32x32xf32> to vector<4x32x16xf32>
    %98 = tpu.concatenate %96, %97 in 2 : vector<4x32x16xf32>, vector<4x32x16xf32> -> vector<4x32x32xf32>
    %99 = vector.broadcast %7 : vector<1x32x32xf32> to vector<4x32x32xf32>
    %100 = arith.mulf %95, %99 : vector<4x32x32xf32>
    %101 = vector.broadcast %9 : vector<1x32x32xf32> to vector<4x32x32xf32>
    %102 = arith.mulf %98, %101 : vector<4x32x32xf32>
    %103 = arith.addf %100, %102 : vector<4x32x32xf32>
    %104 = vector.shape_cast %87 : vector<32x128xf32> to vector<32x4x32xf32>
    %105 = tpu.transpose %104, [1, 0, 2] : vector<32x4x32xf32> -> vector<4x32x32xf32>
    %106 = vector.extract_strided_slice %105 {offsets = [0, 0, 16], sizes = [4, 32, 16], strides = [1, 1, 1]} : vector<4x32x32xf32> to vector<4x32x16xf32>
    %107 = vector.extract_strided_slice %105 {offsets = [0, 0, 0], sizes = [4, 32, 16], strides = [1, 1, 1]} : vector<4x32x32xf32> to vector<4x32x16xf32>
    %108 = tpu.concatenate %106, %107 in 2 : vector<4x32x16xf32>, vector<4x32x16xf32> -> vector<4x32x32xf32>
    %109 = vector.broadcast %7 : vector<1x32x32xf32> to vector<4x32x32xf32>
    %110 = arith.mulf %105, %109 : vector<4x32x32xf32>
    %111 = vector.broadcast %9 : vector<1x32x32xf32> to vector<4x32x32xf32>
    %112 = arith.mulf %108, %111 : vector<4x32x32xf32>
    %113 = arith.addf %110, %112 : vector<4x32x32xf32>
    %114 = vector.shape_cast %93 : vector<32x128xf32> to vector<32x4x32xf32>
    %115 = tpu.transpose %114, [1, 0, 2] : vector<32x4x32xf32> -> vector<4x32x32xf32>
    %116 = arith.truncf %103 : vector<4x32x32xf32> to vector<4x32x32xbf16>
    %117 = arith.truncf %113 : vector<4x32x32xf32> to vector<4x32x32xbf16>
    "tpu.trace_start"() <{level = 10 : i32, message = "hqd,hkd->hqk"}> : () -> ()
    %cst_53 = arith.constant dense<0.000000e+00> : vector<4x32x32xf32>
    %118 = tpu.matmul %116, %117, %cst_53 {dimension_numbers = #tpu.dot_dimension_numbers<[2], [2], [1], [1], [0, 0, 0, 1, 1, 1], [0], [0]>} : vector<4x32x32xbf16>, vector<4x32x32xbf16>, vector<4x32x32xf32> -> vector<4x32x32xf32>
    "tpu.trace_stop"() : () -> ()
    %cst_54 = arith.constant dense<0xFF800000> : vector<4x32xf32>
    %119 = vector.multi_reduction <maximumf>, %118, %cst_54 [2] : vector<4x32x32xf32> to vector<4x32xf32>
    %120 = vector.shape_cast %119 : vector<4x32xf32> to vector<4x32x1xf32>
    %121 = vector.broadcast %120 : vector<4x32x1xf32> to vector<4x32x32xf32>
    %122 = arith.subf %118, %121 : vector<4x32x32xf32>
    %123 = math.exp %122 : vector<4x32x32xf32>
    %cst_55 = arith.constant dense<0.000000e+00> : vector<4x32xf32>
    %124 = vector.multi_reduction <add>, %123, %cst_55 [2] : vector<4x32x32xf32> to vector<4x32xf32>
    %125 = vector.shape_cast %124 : vector<4x32xf32> to vector<4x32x1xf32>
    %126 = tpu.reciprocal %125 {approx = true} : vector<4x32x1xf32> -> vector<4x32x1xf32>
    %127 = vector.broadcast %126 : vector<4x32x1xf32> to vector<4x32x32xf32>
    %128 = arith.mulf %123, %127 : vector<4x32x32xf32>
    %129 = arith.truncf %128 : vector<4x32x32xf32> to vector<4x32x32xbf16>
    %130 = arith.truncf %115 : vector<4x32x32xf32> to vector<4x32x32xbf16>
    "tpu.trace_start"() <{level = 10 : i32, message = "hqk,hkd->hqd"}> : () -> ()
    %cst_56 = arith.constant dense<0.000000e+00> : vector<4x32x32xf32>
    %131 = tpu.matmul %129, %130, %cst_56 {dimension_numbers = #tpu.dot_dimension_numbers<[2], [1], [1], [2], [0, 0, 0, 1, 1, 2], [0], [0]>} : vector<4x32x32xbf16>, vector<4x32x32xbf16>, vector<4x32x32xf32> -> vector<4x32x32xf32>
    "tpu.trace_stop"() : () -> ()
    %132 = tpu.transpose %131, [1, 0, 2] : vector<4x32x32xf32> -> vector<32x4x32xf32>
    %133 = vector.shape_cast %132 : vector<32x4x32xf32> to vector<32x128xf32>
    %134 = arith.truncf %133 : vector<32x128xf32> to vector<32x128xbf16>
    %c0_57 = arith.constant 0 : index
    %c0_58 = arith.constant 0 : index
    %135 = vector.load %arg16[%c0_57, %c0_58] : memref<128x128xbf16, #tpu.memory_space<vmem>>, vector<128x128xbf16>
    %cst_59 = arith.constant dense<0.000000e+00> : vector<32x128xf32>
    %136 = tpu.matmul %134, %135, %cst_59 {dimension_numbers = #tpu.dot_dimension_numbers<[1], [0], [0], [1], [0, 0, 1, 1], [], []>} : vector<32x128xbf16>, vector<128x128xbf16>, vector<32x128xf32> -> vector<32x128xf32>
    %c0_60 = arith.constant 0 : index
    %c0_61 = arith.constant 0 : index
    %137 = vector.load %arg17[%c0_60, %c0_61] : memref<1x128xf32, #tpu.memory_space<vmem>>, vector<1x128xf32>
    %138 = vector.broadcast %137 : vector<1x128xf32> to vector<32x128xf32>
    %139 = arith.addf %136, %138 : vector<32x128xf32>
    %140 = vector.broadcast %24 : vector<1x128xf32> to vector<32x128xf32>
    %141 = arith.mulf %139, %140 : vector<32x128xf32>
    %142 = arith.addf %16, %141 : vector<32x128xf32>
    %143 = arith.truncf %142 : vector<32x128xf32> to vector<32x128xbf16>
    %c0_62 = arith.constant 0 : index
    %c0_63 = arith.constant 0 : index
    %144 = vector.load %arg20[%c0_62, %c0_63] : memref<128x128xbf16, #tpu.memory_space<vmem>>, vector<128x128xbf16>
    %cst_64 = arith.constant dense<0.000000e+00> : vector<32x128xf32>
    %145 = tpu.matmul %143, %144, %cst_64 {dimension_numbers = #tpu.dot_dimension_numbers<[1], [0], [0], [1], [0, 0, 1, 1], [], []>} : vector<32x128xbf16>, vector<128x128xbf16>, vector<32x128xf32> -> vector<32x128xf32>
    %c0_65 = arith.constant 0 : index
    %c0_66 = arith.constant 0 : index
    %146 = vector.load %arg21[%c0_65, %c0_66] : memref<1x128xf32, #tpu.memory_space<vmem>>, vector<1x128xf32>
    %147 = vector.broadcast %146 : vector<1x128xf32> to vector<32x128xf32>
    %148 = arith.addf %145, %147 : vector<32x128xf32>
    %c0_67 = arith.constant 0 : index
    %c0_68 = arith.constant 0 : index
    %149 = vector.load %arg28[%c0_67, %c0_68] : memref<1x128xf32, #tpu.memory_space<vmem>>, vector<1x128xf32>
    %150 = arith.mulf %148, %148 : vector<32x128xf32>
    %cst_69 = arith.constant dense<0.000000e+00> : vector<32xf32>
    %151 = vector.multi_reduction <add>, %150, %cst_69 [1] : vector<32x128xf32> to vector<32xf32>
    %152 = vector.shape_cast %151 : vector<32xf32> to vector<32x1xf32>
    %cst_70 = arith.constant 1.280000e+02 : f32
    %153 = vector.broadcast %cst_70 : f32 to vector<32x1xf32>
    %154 = arith.divf %152, %153 : vector<32x1xf32>
    %cst_71 = arith.constant 9.99999997E-7 : f32
    %155 = vector.broadcast %cst_71 : f32 to vector<32x1xf32>
    %156 = arith.addf %154, %155 : vector<32x1xf32>
    %157 = math.rsqrt %156 : vector<32x1xf32>
    %158 = vector.broadcast %157 : vector<32x1xf32> to vector<32x128xf32>
    %159 = arith.mulf %148, %158 : vector<32x128xf32>
    %160 = vector.broadcast %149 : vector<1x128xf32> to vector<32x128xf32>
    %161 = arith.mulf %159, %160 : vector<32x128xf32>
    %162 = arith.truncf %5 : vector<16x128xf32> to vector<16x128xbf16>
    %c0_72 = arith.constant 0 : index
    %c0_73 = arith.constant 0 : index
    %163 = vector.load %arg22[%c0_72, %c0_73] : memref<128x128xbf16, #tpu.memory_space<vmem>>, vector<128x128xbf16>
    %cst_74 = arith.constant dense<0.000000e+00> : vector<16x128xf32>
    %164 = tpu.matmul %162, %163, %cst_74 {dimension_numbers = #tpu.dot_dimension_numbers<[1], [0], [0], [1], [0, 0, 1, 1], [], []>} : vector<16x128xbf16>, vector<128x128xbf16>, vector<16x128xf32> -> vector<16x128xf32>
    %c0_75 = arith.constant 0 : index
    %c0_76 = arith.constant 0 : index
    %165 = vector.load %arg23[%c0_75, %c0_76] : memref<1x128xf32, #tpu.memory_space<vmem>>, vector<1x128xf32>
    %166 = vector.broadcast %165 : vector<1x128xf32> to vector<16x128xf32>
    %167 = arith.addf %164, %166 : vector<16x128xf32>
    %c0_77 = arith.constant 0 : index
    %c0_78 = arith.constant 0 : index
    %168 = vector.load %arg29[%c0_77, %c0_78] : memref<1x128xf32, #tpu.memory_space<vmem>>, vector<1x128xf32>
    %169 = arith.mulf %167, %167 : vector<16x128xf32>
    %cst_79 = arith.constant dense<0.000000e+00> : vector<16xf32>
    %170 = vector.multi_reduction <add>, %169, %cst_79 [1] : vector<16x128xf32> to vector<16xf32>
    %171 = vector.shape_cast %170 : vector<16xf32> to vector<16x1xf32>
    %cst_80 = arith.constant 1.280000e+02 : f32
    %172 = vector.broadcast %cst_80 : f32 to vector<16x1xf32>
    %173 = arith.divf %171, %172 : vector<16x1xf32>
    %cst_81 = arith.constant 9.99999997E-7 : f32
    %174 = vector.broadcast %cst_81 : f32 to vector<16x1xf32>
    %175 = arith.addf %173, %174 : vector<16x1xf32>
    %176 = math.rsqrt %175 : vector<16x1xf32>
    %177 = vector.broadcast %176 : vector<16x1xf32> to vector<16x128xf32>
    %178 = arith.mulf %167, %177 : vector<16x128xf32>
    %179 = vector.broadcast %168 : vector<1x128xf32> to vector<16x128xf32>
    %180 = arith.mulf %178, %179 : vector<16x128xf32>
    %181 = arith.truncf %5 : vector<16x128xf32> to vector<16x128xbf16>
    %c0_82 = arith.constant 0 : index
    %c0_83 = arith.constant 0 : index
    %182 = vector.load %arg24[%c0_82, %c0_83] : memref<128x128xbf16, #tpu.memory_space<vmem>>, vector<128x128xbf16>
    %cst_84 = arith.constant dense<0.000000e+00> : vector<16x128xf32>
    %183 = tpu.matmul %181, %182, %cst_84 {dimension_numbers = #tpu.dot_dimension_numbers<[1], [0], [0], [1], [0, 0, 1, 1], [], []>} : vector<16x128xbf16>, vector<128x128xbf16>, vector<16x128xf32> -> vector<16x128xf32>
    %c0_85 = arith.constant 0 : index
    %c0_86 = arith.constant 0 : index
    %184 = vector.load %arg25[%c0_85, %c0_86] : memref<1x128xf32, #tpu.memory_space<vmem>>, vector<1x128xf32>
    %185 = vector.broadcast %184 : vector<1x128xf32> to vector<16x128xf32>
    %186 = arith.addf %183, %185 : vector<16x128xf32>
    %187 = vector.shape_cast %161 : vector<32x128xf32> to vector<32x4x32xf32>
    %188 = tpu.transpose %187, [1, 0, 2] : vector<32x4x32xf32> -> vector<4x32x32xf32>
    %189 = vector.shape_cast %180 : vector<16x128xf32> to vector<16x4x32xf32>
    %190 = tpu.transpose %189, [1, 0, 2] : vector<16x4x32xf32> -> vector<4x16x32xf32>
    %191 = vector.shape_cast %186 : vector<16x128xf32> to vector<16x4x32xf32>
    %192 = tpu.transpose %191, [1, 0, 2] : vector<16x4x32xf32> -> vector<4x16x32xf32>
    %193 = arith.truncf %188 : vector<4x32x32xf32> to vector<4x32x32xbf16>
    %194 = arith.truncf %190 : vector<4x16x32xf32> to vector<4x16x32xbf16>
    "tpu.trace_start"() <{level = 10 : i32, message = "hqd,hkd->hqk"}> : () -> ()
    %cst_87 = arith.constant dense<0.000000e+00> : vector<4x32x16xf32>
    %195 = tpu.matmul %193, %194, %cst_87 {dimension_numbers = #tpu.dot_dimension_numbers<[2], [2], [1], [1], [0, 0, 0, 1, 1, 1], [0], [0]>} : vector<4x32x32xbf16>, vector<4x16x32xbf16>, vector<4x32x16xf32> -> vector<4x32x16xf32>
    "tpu.trace_stop"() : () -> ()
    %cst_88 = arith.constant dense<0xFF800000> : vector<4x32xf32>
    %196 = vector.multi_reduction <maximumf>, %195, %cst_88 [2] : vector<4x32x16xf32> to vector<4x32xf32>
    %197 = vector.shape_cast %196 : vector<4x32xf32> to vector<4x32x1xf32>
    %198 = vector.broadcast %197 : vector<4x32x1xf32> to vector<4x32x16xf32>
    %199 = arith.subf %195, %198 : vector<4x32x16xf32>
    %200 = math.exp %199 : vector<4x32x16xf32>
    %cst_89 = arith.constant dense<0.000000e+00> : vector<4x32xf32>
    %201 = vector.multi_reduction <add>, %200, %cst_89 [2] : vector<4x32x16xf32> to vector<4x32xf32>
    %202 = vector.shape_cast %201 : vector<4x32xf32> to vector<4x32x1xf32>
    %203 = tpu.reciprocal %202 {approx = true} : vector<4x32x1xf32> -> vector<4x32x1xf32>
    %204 = vector.broadcast %203 : vector<4x32x1xf32> to vector<4x32x16xf32>
    %205 = arith.mulf %200, %204 : vector<4x32x16xf32>
    %206 = arith.truncf %205 : vector<4x32x16xf32> to vector<4x32x16xbf16>
    %207 = arith.truncf %192 : vector<4x16x32xf32> to vector<4x16x32xbf16>
    "tpu.trace_start"() <{level = 10 : i32, message = "hqk,hkd->hqd"}> : () -> ()
    %cst_90 = arith.constant dense<0.000000e+00> : vector<4x32x32xf32>
    %208 = tpu.matmul %206, %207, %cst_90 {dimension_numbers = #tpu.dot_dimension_numbers<[2], [1], [1], [2], [0, 0, 0, 1, 1, 2], [0], [0]>} : vector<4x32x16xbf16>, vector<4x16x32xbf16>, vector<4x32x32xf32> -> vector<4x32x32xf32>
    "tpu.trace_stop"() : () -> ()
    %209 = tpu.transpose %208, [1, 0, 2] : vector<4x32x32xf32> -> vector<32x4x32xf32>
    %210 = vector.shape_cast %209 : vector<32x4x32xf32> to vector<32x128xf32>
    %211 = arith.truncf %210 : vector<32x128xf32> to vector<32x128xbf16>
    %c0_91 = arith.constant 0 : index
    %c0_92 = arith.constant 0 : index
    %212 = vector.load %arg26[%c0_91, %c0_92] : memref<128x128xbf16, #tpu.memory_space<vmem>>, vector<128x128xbf16>
    %cst_93 = arith.constant dense<0.000000e+00> : vector<32x128xf32>
    %213 = tpu.matmul %211, %212, %cst_93 {dimension_numbers = #tpu.dot_dimension_numbers<[1], [0], [0], [1], [0, 0, 1, 1], [], []>} : vector<32x128xbf16>, vector<128x128xbf16>, vector<32x128xf32> -> vector<32x128xf32>
    %c0_94 = arith.constant 0 : index
    %c0_95 = arith.constant 0 : index
    %214 = vector.load %arg27[%c0_94, %c0_95] : memref<1x128xf32, #tpu.memory_space<vmem>>, vector<1x128xf32>
    %215 = vector.broadcast %214 : vector<1x128xf32> to vector<32x128xf32>
    %216 = arith.addf %213, %215 : vector<32x128xf32>
    %217 = arith.addf %142, %216 : vector<32x128xf32>
    %cst_96 = arith.constant dense<0.000000e+00> : vector<32xf32>
    %218 = vector.multi_reduction <add>, %217, %cst_96 [1] : vector<32x128xf32> to vector<32xf32>
    %219 = vector.shape_cast %218 : vector<32xf32> to vector<32x1xf32>
    %cst_97 = arith.constant 1.280000e+02 : f32
    %220 = vector.broadcast %cst_97 : f32 to vector<32x1xf32>
    %221 = arith.divf %219, %220 : vector<32x1xf32>
    %222 = vector.broadcast %221 : vector<32x1xf32> to vector<32x128xf32>
    %223 = arith.subf %217, %222 : vector<32x128xf32>
    %224 = arith.mulf %223, %223 : vector<32x128xf32>
    %cst_98 = arith.constant dense<0.000000e+00> : vector<32xf32>
    %225 = vector.multi_reduction <add>, %224, %cst_98 [1] : vector<32x128xf32> to vector<32xf32>
    %226 = vector.shape_cast %225 : vector<32xf32> to vector<32x1xf32>
    %cst_99 = arith.constant 1.280000e+02 : f32
    %227 = vector.broadcast %cst_99 : f32 to vector<32x1xf32>
    %228 = arith.divf %226, %227 : vector<32x1xf32>
    %cst_100 = arith.constant 9.99999997E-7 : f32
    %229 = vector.broadcast %cst_100 : f32 to vector<32x1xf32>
    %230 = arith.addf %228, %229 : vector<32x1xf32>
    %231 = math.rsqrt %230 : vector<32x1xf32>
    %232 = vector.broadcast %231 : vector<32x1xf32> to vector<32x128xf32>
    %233 = arith.mulf %223, %232 : vector<32x128xf32>
    %cst_101 = arith.constant 1.000000e+00 : f32
    %234 = vector.broadcast %cst_101 : f32 to vector<1x128xf32>
    %235 = arith.addf %234, %26 : vector<1x128xf32>
    %236 = vector.broadcast %235 : vector<1x128xf32> to vector<32x128xf32>
    %237 = arith.mulf %233, %236 : vector<32x128xf32>
    %238 = vector.broadcast %25 : vector<1x128xf32> to vector<32x128xf32>
    %239 = arith.addf %237, %238 : vector<32x128xf32>
    %240 = arith.truncf %239 : vector<32x128xf32> to vector<32x128xbf16>
    %c0_102 = arith.constant 0 : index
    %c0_103 = arith.constant 0 : index
    %241 = vector.load %arg30[%c0_102, %c0_103] : memref<128x256xbf16, #tpu.memory_space<vmem>>, vector<128x256xbf16>
    %cst_104 = arith.constant dense<0.000000e+00> : vector<32x256xf32>
    %242 = tpu.matmul %240, %241, %cst_104 {dimension_numbers = #tpu.dot_dimension_numbers<[1], [0], [0], [1], [0, 0, 1, 1], [], []>} : vector<32x128xbf16>, vector<128x256xbf16>, vector<32x256xf32> -> vector<32x256xf32>
    %c0_105 = arith.constant 0 : index
    %c0_106 = arith.constant 0 : index
    %243 = vector.load %arg31[%c0_105, %c0_106] : memref<1x256xf32, #tpu.memory_space<vmem>>, vector<1x256xf32>
    %244 = vector.broadcast %243 : vector<1x256xf32> to vector<32x256xf32>
    %245 = arith.addf %242, %244 : vector<32x256xf32>
    %cst_107 = arith.constant 5.000000e-01 : f32
    %246 = vector.broadcast %cst_107 : f32 to vector<32x256xf32>
    %247 = arith.mulf %246, %245 : vector<32x256xf32>
    %cst_108 = arith.constant 4.471500e-02 : f32
    %248 = vector.broadcast %cst_108 : f32 to vector<32x256xf32>
    %249 = arith.mulf %248, %245 : vector<32x256xf32>
    %250 = arith.mulf %249, %245 : vector<32x256xf32>
    %251 = arith.mulf %250, %245 : vector<32x256xf32>
    %252 = arith.addf %245, %251 : vector<32x256xf32>
    %cst_109 = arith.constant 0.797884583 : f32
    %253 = vector.broadcast %cst_109 : f32 to vector<32x256xf32>
    %254 = arith.mulf %253, %252 : vector<32x256xf32>
    %255 = math.tanh %254 : vector<32x256xf32>
    %cst_110 = arith.constant 1.000000e+00 : f32
    %256 = vector.broadcast %cst_110 : f32 to vector<32x256xf32>
    %257 = arith.addf %256, %255 : vector<32x256xf32>
    %258 = arith.mulf %247, %257 : vector<32x256xf32>
    %259 = arith.truncf %258 : vector<32x256xf32> to vector<32x256xbf16>
    %c0_111 = arith.constant 0 : index
    %c0_112 = arith.constant 0 : index
    %260 = vector.load %arg32[%c0_111, %c0_112] : memref<256x128xbf16, #tpu.memory_space<vmem>>, vector<256x128xbf16>
    %cst_113 = arith.constant dense<0.000000e+00> : vector<32x128xf32>
    %261 = tpu.matmul %259, %260, %cst_113 {dimension_numbers = #tpu.dot_dimension_numbers<[1], [0], [0], [1], [0, 0, 1, 1], [], []>} : vector<32x256xbf16>, vector<256x128xbf16>, vector<32x128xf32> -> vector<32x128xf32>
    %c0_114 = arith.constant 0 : index
    %c0_115 = arith.constant 0 : index
    %262 = vector.load %arg33[%c0_114, %c0_115] : memref<1x128xf32, #tpu.memory_space<vmem>>, vector<1x128xf32>
    %263 = vector.broadcast %262 : vector<1x128xf32> to vector<32x128xf32>
    %264 = arith.addf %261, %263 : vector<32x128xf32>
    %265 = vector.broadcast %27 : vector<1x128xf32> to vector<32x128xf32>
    %266 = arith.mulf %264, %265 : vector<32x128xf32>
    %267 = arith.addf %217, %266 : vector<32x128xf32>
    %268 = arith.truncf %267 : vector<32x128xf32> to vector<32x128xbf16>
    %c0_116 = arith.constant 0 : index
    %c0_117 = arith.constant 0 : index
    %269 = vector.load %arg34[%c0_116, %c0_117] : memref<128x128xbf16, #tpu.memory_space<vmem>>, vector<128x128xbf16>
    %cst_118 = arith.constant dense<0.000000e+00> : vector<32x128xf32>
    %270 = tpu.matmul %268, %269, %cst_118 {dimension_numbers = #tpu.dot_dimension_numbers<[1], [0], [0], [1], [0, 0, 1, 1], [], []>} : vector<32x128xbf16>, vector<128x128xbf16>, vector<32x128xf32> -> vector<32x128xf32>
    %c0_119 = arith.constant 0 : index
    %c0_120 = arith.constant 0 : index
    %271 = vector.load %arg35[%c0_119, %c0_120] : memref<1x128xf32, #tpu.memory_space<vmem>>, vector<1x128xf32>
    %272 = vector.broadcast %271 : vector<1x128xf32> to vector<32x128xf32>
    %273 = arith.addf %270, %272 : vector<32x128xf32>
    %c0_121 = arith.constant 0 : index
    %c0_122 = arith.constant 0 : index
    %c0_123 = arith.constant 0 : index
    %274 = vector.load %arg36[%c0_121, %c0_122, %c0_123] : memref<1x32x128xf32, #tpu.memory_space<vmem>>, vector<1x32x128xf32>
    %275 = vector.shape_cast %274 : vector<1x32x128xf32> to vector<32x128xf32>
    %276 = vector.shape_cast %273 : vector<32x128xf32> to vector<1x32x128xf32>
    tpu.vector_store %arg36[%c0_121, %c0_122, %c0_123], %276 {strides = array<i32>} : memref<1x32x128xf32, #tpu.memory_space<vmem>>, vector<1x32x128xf32>,
    %c0_124 = arith.constant 0 : index
    %c0_125 = arith.constant 0 : index
    %c0_126 = arith.constant 0 : index
    %277 = vector.load %arg37[%c0_124, %c0_125, %c0_126] : memref<1x32x128xf32, #tpu.memory_space<vmem>>, vector<1x32x128xf32>
    %278 = vector.shape_cast %277 : vector<1x32x128xf32> to vector<32x128xf32>
    %279 = vector.shape_cast %267 : vector<32x128xf32> to vector<1x32x128xf32>
    tpu.vector_store %arg37[%c0_124, %c0_125, %c0_126], %279 {strides = array<i32>} : memref<1x32x128xf32, #tpu.memory_space<vmem>>, vector<1x32x128xf32>,
    return
  }
  func.func @transform_0(%arg0: i32) -> (i32, i32, i32) {
    %c0_i32 = arith.constant 0 : i32
    %c0_i32_0 = arith.constant 0 : i32
    %c0_i32_1 = arith.constant 0 : i32
    return %arg0, %c0_i32, %c0_i32_0 : i32, i32, i32
  }
  func.func @transform_1(%arg0: i32) -> (i32, i32, i32) {
    %c0_i32 = arith.constant 0 : i32
    %c0_i32_0 = arith.constant 0 : i32
    %c0_i32_1 = arith.constant 0 : i32
    return %arg0, %c0_i32, %c0_i32_0 : i32, i32, i32
  }
  func.func @transform_2(%arg0: i32) -> (i32, i32, i32) {
    %c0_i32 = arith.constant 0 : i32
    %c0_i32_0 = arith.constant 0 : i32
    %c0_i32_1 = arith.constant 0 : i32
    return %arg0, %c0_i32, %c0_i32_0 : i32, i32, i32
  }
  func.func @transform_3(%arg0: i32) -> (i32, i32, i32) {
    %c0_i32 = arith.constant 0 : i32
    %c0_i32_0 = arith.constant 0 : i32
    %c0_i32_1 = arith.constant 0 : i32
    return %arg0, %c0_i32, %c0_i32_0 : i32, i32, i32
  }
  func.func @transform_4(%arg0: i32) -> (i32, i32) {
    %c0_i32 = arith.constant 0 : i32
    %c0_i32_0 = arith.constant 0 : i32
    %c0_i32_1 = arith.constant 0 : i32
    return %c0_i32, %c0_i32_0 : i32, i32
  }
  func.func @transform_5(%arg0: i32) -> (i32, i32) {
    %c0_i32 = arith.constant 0 : i32
    %c0_i32_0 = arith.constant 0 : i32
    %c0_i32_1 = arith.constant 0 : i32
    return %c0_i32, %c0_i32_0 : i32, i32
  }
  func.func @transform_6(%arg0: i32) -> (i32, i32, i32) {
    %c0_i32 = arith.constant 0 : i32
    %c0_i32_0 = arith.constant 0 : i32
    %c0_i32_1 = arith.constant 0 : i32
    %c0_i32_2 = arith.constant 0 : i32
    return %c0_i32, %c0_i32_0, %c0_i32_1 : i32, i32, i32
  }
  func.func @transform_7(%arg0: i32) -> (i32, i32) {
    %c0_i32 = arith.constant 0 : i32
    %c0_i32_0 = arith.constant 0 : i32
    %c0_i32_1 = arith.constant 0 : i32
    return %c0_i32, %c0_i32_0 : i32, i32
  }
  func.func @transform_8(%arg0: i32) -> (i32, i32) {
    %c0_i32 = arith.constant 0 : i32
    %c0_i32_0 = arith.constant 0 : i32
    %c0_i32_1 = arith.constant 0 : i32
    return %c0_i32, %c0_i32_0 : i32, i32
  }
  func.func @transform_9(%arg0: i32) -> (i32, i32) {
    %c0_i32 = arith.constant 0 : i32
    %c0_i32_0 = arith.constant 0 : i32
    %c0_i32_1 = arith.constant 0 : i32
    return %c0_i32, %c0_i32_0 : i32, i32
  }
  func.func @transform_10(%arg0: i32) -> (i32, i32) {
    %c0_i32 = arith.constant 0 : i32
    %c0_i32_0 = arith.constant 0 : i32
    %c0_i32_1 = arith.constant 0 : i32
    return %c0_i32, %c0_i32_0 : i32, i32
  }
  func.func @transform_11(%arg0: i32) -> (i32, i32) {
    %c0_i32 = arith.constant 0 : i32
    %c0_i32_0 = arith.constant 0 : i32
    %c0_i32_1 = arith.constant 0 : i32
    return %c0_i32, %c0_i32_0 : i32, i32
  }
  func.func @transform_12(%arg0: i32) -> (i32, i32) {
    %c0_i32 = arith.constant 0 : i32
    %c0_i32_0 = arith.constant 0 : i32
    %c0_i32_1 = arith.constant 0 : i32
    return %c0_i32, %c0_i32_0 : i32, i32
  }
  func.func @transform_13(%arg0: i32) -> (i32, i32) {
    %c0_i32 = arith.constant 0 : i32
    %c0_i32_0 = arith.constant 0 : i32
    %c0_i32_1 = arith.constant 0 : i32
    return %c0_i32, %c0_i32_0 : i32, i32
  }
  func.func @transform_14(%arg0: i32) -> (i32, i32) {
    %c0_i32 = arith.constant 0 : i32
    %c0_i32_0 = arith.constant 0 : i32
    %c0_i32_1 = arith.constant 0 : i32
    return %c0_i32, %c0_i32_0 : i32, i32
  }
  func.func @transform_15(%arg0: i32) -> (i32, i32) {
    %c0_i32 = arith.constant 0 : i32
    %c0_i32_0 = arith.constant 0 : i32
    %c0_i32_1 = arith.constant 0 : i32
    return %c0_i32, %c0_i32_0 : i32, i32
  }
  func.func @transform_16(%arg0: i32) -> (i32, i32) {
    %c0_i32 = arith.constant 0 : i32
    %c0_i32_0 = arith.constant 0 : i32
    %c0_i32_1 = arith.constant 0 : i32
    return %c0_i32, %c0_i32_0 : i32, i32
  }
  func.func @transform_17(%arg0: i32) -> (i32, i32) {
    %c0_i32 = arith.constant 0 : i32
    %c0_i32_0 = arith.constant 0 : i32
    %c0_i32_1 = arith.constant 0 : i32
    return %c0_i32, %c0_i32_0 : i32, i32
  }
  func.func @transform_18(%arg0: i32) -> (i32, i32) {
    %c0_i32 = arith.constant 0 : i32
    %c0_i32_0 = arith.constant 0 : i32
    %c0_i32_1 = arith.constant 0 : i32
    return %c0_i32, %c0_i32_0 : i32, i32
  }
  func.func @transform_19(%arg0: i32) -> (i32, i32) {
    %c0_i32 = arith.constant 0 : i32
    %c0_i32_0 = arith.constant 0 : i32
    %c0_i32_1 = arith.constant 0 : i32
    return %c0_i32, %c0_i32_0 : i32, i32
  }
  func.func @transform_20(%arg0: i32) -> (i32, i32) {
    %c0_i32 = arith.constant 0 : i32
    %c0_i32_0 = arith.constant 0 : i32
    %c0_i32_1 = arith.constant 0 : i32
    return %c0_i32, %c0_i32_0 : i32, i32
  }
  func.func @transform_21(%arg0: i32) -> (i32, i32) {
    %c0_i32 = arith.constant 0 : i32
    %c0_i32_0 = arith.constant 0 : i32
    %c0_i32_1 = arith.constant 0 : i32
    return %c0_i32, %c0_i32_0 : i32, i32
  }
  func.func @transform_22(%arg0: i32) -> (i32, i32) {
    %c0_i32 = arith.constant 0 : i32
    %c0_i32_0 = arith.constant 0 : i32
    %c0_i32_1 = arith.constant 0 : i32
    return %c0_i32, %c0_i32_0 : i32, i32
  }
  func.func @transform_23(%arg0: i32) -> (i32, i32) {
    %c0_i32 = arith.constant 0 : i32
    %c0_i32_0 = arith.constant 0 : i32
    %c0_i32_1 = arith.constant 0 : i32
    return %c0_i32, %c0_i32_0 : i32, i32
  }
  func.func @transform_24(%arg0: i32) -> (i32, i32) {
    %c0_i32 = arith.constant 0 : i32
    %c0_i32_0 = arith.constant 0 : i32
    %c0_i32_1 = arith.constant 0 : i32
    return %c0_i32, %c0_i32_0 : i32, i32
  }
  func.func @transform_25(%arg0: i32) -> (i32, i32) {
    %c0_i32 = arith.constant 0 : i32
    %c0_i32_0 = arith.constant 0 : i32
    %c0_i32_1 = arith.constant 0 : i32
    return %c0_i32, %c0_i32_0 : i32, i32
  }
  func.func @transform_26(%arg0: i32) -> (i32, i32) {
    %c0_i32 = arith.constant 0 : i32
    %c0_i32_0 = arith.constant 0 : i32
    %c0_i32_1 = arith.constant 0 : i32
    return %c0_i32, %c0_i32_0 : i32, i32
  }
  func.func @transform_27(%arg0: i32) -> (i32, i32) {
    %c0_i32 = arith.constant 0 : i32
    %c0_i32_0 = arith.constant 0 : i32
    %c0_i32_1 = arith.constant 0 : i32
    return %c0_i32, %c0_i32_0 : i32, i32
  }
  func.func @transform_28(%arg0: i32) -> (i32, i32) {
    %c0_i32 = arith.constant 0 : i32
    %c0_i32_0 = arith.constant 0 : i32
    %c0_i32_1 = arith.constant 0 : i32
    return %c0_i32, %c0_i32_0 : i32, i32
  }
  func.func @transform_29(%arg0: i32) -> (i32, i32) {
    %c0_i32 = arith.constant 0 : i32
    %c0_i32_0 = arith.constant 0 : i32
    %c0_i32_1 = arith.constant 0 : i32
    return %c0_i32, %c0_i32_0 : i32, i32
  }
  func.func @transform_30(%arg0: i32) -> (i32, i32) {
    %c0_i32 = arith.constant 0 : i32
    %c0_i32_0 = arith.constant 0 : i32
    %c0_i32_1 = arith.constant 0 : i32
    return %c0_i32, %c0_i32_0 : i32, i32
  }
  func.func @transform_31(%arg0: i32) -> (i32, i32) {
    %c0_i32 = arith.constant 0 : i32
    %c0_i32_0 = arith.constant 0 : i32
    %c0_i32_1 = arith.constant 0 : i32
    return %c0_i32, %c0_i32_0 : i32, i32
  }
  func.func @transform_32(%arg0: i32) -> (i32, i32) {
    %c0_i32 = arith.constant 0 : i32
    %c0_i32_0 = arith.constant 0 : i32
    %c0_i32_1 = arith.constant 0 : i32
    return %c0_i32, %c0_i32_0 : i32, i32
  }
  func.func @transform_33(%arg0: i32) -> (i32, i32) {
    %c0_i32 = arith.constant 0 : i32
    %c0_i32_0 = arith.constant 0 : i32
    %c0_i32_1 = arith.constant 0 : i32
    return %c0_i32, %c0_i32_0 : i32, i32
  }
  func.func @transform_34(%arg0: i32) -> (i32, i32) {
    %c0_i32 = arith.constant 0 : i32
    %c0_i32_0 = arith.constant 0 : i32
    %c0_i32_1 = arith.constant 0 : i32
    return %c0_i32, %c0_i32_0 : i32, i32
  }
  func.func @transform_35(%arg0: i32) -> (i32, i32, i32) {
    %c0_i32 = arith.constant 0 : i32
    %c0_i32_0 = arith.constant 0 : i32
    %c0_i32_1 = arith.constant 0 : i32
    return %arg0, %c0_i32, %c0_i32_0 : i32, i32, i32
  }
  func.func @transform_36(%arg0: i32) -> (i32, i32, i32) {
    %c0_i32 = arith.constant 0 : i32
    %c0_i32_0 = arith.constant 0 : i32
    %c0_i32_1 = arith.constant 0 : i32
    return %arg0, %c0_i32, %c0_i32_0 : i32, i32, i32
  }
}

</mosaic_0001>

<bundles_post_ra>
// kernel: tpu_custom_call.1
= control target key start
LH: loop header
LB: loop body
LE: loop exit
PB: predicated region body
PF: predicated region fallthrough
CT: control target
= control target key end

     0   :  { %s11495_s6 = smov 1   ;;  %s11496_s10 = smov 2   ;;  %s14416_s0 = inlined_call_operand.smem [shape: u32[37], index: -1, kind: input, shape index: {}] }
   0x1   :  { %s11573_s5 = sld [smem:[%s14416_s0]]   ;;  %s11497_s14 = smov 3  }
   0x2   :  { %s11578_s9 = sld [smem:[%s14416_s0 + %s11495_s6]]   ;;  %s11498_s18 = smov 4  }
   0x3   :  { %s11583_s13 = sld [smem:[%s14416_s0 + %s11496_s10]]   ;;  %s11499_s22 = smov 5  }
   0x4   :  { %s11588_s17 = sld [smem:[%s14416_s0 + %s11497_s14]]   ;;  %s11500_s26 = smov 6  }
   0x5   :  { %s11593_s21 = sld [smem:[%s14416_s0 + %s11498_s18]]   ;;  %s11501_s30 = smov 7  }
   0x6   :  { %s11598_s25 = sld [smem:[%s14416_s0 + %s11499_s22]]   ;;  %s11502_s4 = smov 8  }
   0x7   :  { %s11603_s29 = sld [smem:[%s14416_s0 + %s11500_s26]]   ;;  %s11503_s10 = smov 9  }
   0x8   :  { %14462 = sst [smem:[#allocation42_spill]] %s11578_s9  ;;  %s11504_s15 = smov 10  }
   0x9   :  { %14463 = sst [smem:[#allocation43_spill]] %s11583_s13  ;;  %s11505_s20 = smov 11  }
   0xa   :  { %14464 = sst [smem:[#allocation44_spill]] %s11588_s17  ;;  %s11506_s26 = smov 12  }
   0xb   :  { %14465 = sst [smem:[#allocation45_spill]] %s11593_s21  ;;  %s11507_s1 = smov 13  }
   0xc   :  { %s11608_s3 = sld [smem:[%s14416_s0 + %s11501_s30]]   ;;  %s11508_s7 = smov 14  }
   0xd   :  { %14466 = sst [smem:[#allocation46_spill]] %s11603_s29  ;;  %s11510_s22 = smov 16  }
   0xe   :  { %s11613_s8 = sld [smem:[%s14416_s0 + %s11502_s4]]   ;;  %s11511_s28 = smov 17  }
   0xf   :  { %s11618_s14 = sld [smem:[%s14416_s0 + %s11503_s10]]  }
  0x10   :  { %s11623_s19 = sld [smem:[%s14416_s0 + %s11504_s15]]   ;;  %s11509_s15 = smov 15  }
  0x11   :  { %s11628_s24 = sld [smem:[%s14416_s0 + %s11505_s20]]  }
  0x12   :  { %14467 = sst [smem:[#allocation47_spill]] %s11608_s3 }
  0x13   :  { %s11633_s30 = sld [smem:[%s14416_s0 + %s11506_s26]]  }
  0x14   :  { %14468 = sst [smem:[#allocation48_spill]] %s11613_s8 }
  0x15   :  { %14469 = sst [smem:[#allocation49_spill]] %s11618_s14 }
  0x16   :  { %14470 = sst [smem:[#allocation50_spill]] %s11623_s19 }
  0x17   :  { %14471 = sst [smem:[#allocation51_spill]] %s11628_s24 }
  0x18   :  { %s11638_s6 = sld [smem:[%s14416_s0 + %s11507_s1]]  }
  0x19   :  { %14472 = sst [smem:[#allocation52_spill]] %s11633_s30 }
  0x1a   :  { %s11643_s12 = sld [smem:[%s14416_s0 + %s11508_s7]]   ;;  %s11512_s7 = smov 18  }
  0x1b   :  { %s11648_s20 = sld [smem:[%s14416_s0 + %s11509_s15]]   ;;  %s11513_s15 = smov 19  }
  0x1c   :  { %s11653_s27 = sld [smem:[%s14416_s0 + %s11510_s22]]   ;;  %s11514_s22 = smov 20  }
  0x1d   :  { %s11658_s4 = sld [smem:[%s14416_s0 + %s11511_s28]]   ;;  %s11515_s28 = smov 21  }
  0x1e   :  { %s11668_s19 = sld [smem:[%s14416_s0 + %s11513_s15]]   ;;  %s11517_s15 = smov 23  }
  0x1f   :  { %s11688_s30 = sld [smem:[%s14416_s0 + %s11517_s15]]   ;;  %s11521_s15 = smov 27  }
  0x20   :  { %14473 = sst [smem:[#allocation53_spill]] %s11643_s12 }
  0x21   :  { %14474 = sst [smem:[#allocation54_spill]] %s11648_s20 }
  0x22   :  { %14475 = sst [smem:[#allocation55_spill]] %s11653_s27 }
  0x23   :  { %14476 = sst [smem:[#allocation56_spill]] %s11658_s4 }
  0x24   :  { %s11663_s12 = sld [smem:[%s14416_s0 + %s11512_s7]]   ;;  %s11516_s7 = smov 22  }
  0x25   :  { %s11673_s27 = sld [smem:[%s14416_s0 + %s11514_s22]]   ;;  %s11518_s22 = smov 24  }
  0x26   :  { %s11678_s4 = sld [smem:[%s14416_s0 + %s11515_s28]]   ;;  %s11519_s28 = smov 25  }
  0x27   :  { %s11698_s29 = sld [smem:[%s14416_s0 + %s11519_s28]]   ;;  %s11523_s28 = smov 29  }
  0x28   :  { %s11708_s13 = sld [smem:[%s14416_s0 + %s11521_s15]]   ;;  %s11525_s15 = smov 31  }
  0x29   :  { %s11718_s8 = sld [smem:[%s14416_s0 + %s11523_s28]]   ;;  %s11527_s28 = smov 33  }
  0x2a   :  { %14477 = sst [smem:[#allocation57_spill]] %s11663_s12 }
  0x2b   :  { %14478 = sst [smem:[#allocation58_spill]] %s11673_s27 }
  0x2c   :  { %14479 = sst [smem:[#allocation59_spill]] %s11678_s4 }
  0x2d   :  { %s11683_s12 = sld [smem:[%s14416_s0 + %s11516_s7]]   ;;  %s11520_s7 = smov 26  }
  0x2e   :  { %s11693_s27 = sld [smem:[%s14416_s0 + %s11518_s22]]   ;;  %s11522_s22 = smov 28  }
  0x2f   :  { %14482 = sst [smem:[#allocation62_spill]] %s11698_s29 }
  0x30   :  { %14484 = sst [smem:[#allocation64_spill]] %s11708_s13 }
  0x31   :  { %14486 = sst [smem:[#allocation66_spill]] %s11718_s8 }
  0x32   :  { %s11728_s13 = sld [smem:[%s14416_s0 + %s11525_s15]]   ;;  %s11529_s15 = smov 35  }
  0x33   :  { %14480 = sst [smem:[#allocation60_spill]] %s11683_s12 }
  0x34   :  { %14481 = sst [smem:[#allocation61_spill]] %s11693_s27 }
  0x35   :  { %s11703_s12 = sld [smem:[%s14416_s0 + %s11520_s7]]   ;;  %s11524_s7 = smov 30  }
  0x36   :  { %s11713_s27 = sld [smem:[%s14416_s0 + %s11522_s22]]   ;;  %s11526_s22 = smov 32  }
  0x37   :  { %s11738_s8 = sld [smem:[%s14416_s0 + %s11527_s28]]  }
  0x38   :  { %s11748_s17 = sld [smem:[%s14416_s0 + %s11529_s15]]  }
  0x3b   :  { %14483 = sst [smem:[#allocation63_spill]] %s11703_s12 }
  0x3c   :  { %14485 = sst [smem:[#allocation65_spill]] %s11713_s27 }
  0x3d   :  { %s11723_s12 = sld [smem:[%s14416_s0 + %s11524_s7]]   ;;  %s11528_s7 = smov 34  }
  0x3e   :  { %s11733_s27 = sld [smem:[%s14416_s0 + %s11526_s22]]   ;;  %s11530_s22 = smov 36  }
  0x3f   :  { %14490 = sst [smem:[#allocation70_spill]] %s11748_s17 }
  0x43   :  { %14487 = sst [smem:[#allocation67_spill]] %s11723_s12 }
  0x44   :  { %14488 = sst [smem:[#allocation68_spill]] %s11733_s27 }
  0x45   :  { %s11743_s12 = sld [smem:[%s14416_s0 + %s11528_s7]]  }
  0x46   :  { %s11753_s27 = sld [smem:[%s14416_s0 + %s11530_s22]]  }
  0x4b   :  { %14489 = sst [smem:[#allocation69_spill]] %s11743_s12 }
  0x4c   :  { %79 = vsyncpa [#allocation3], 0 }
  0x4d   :  { %81 = vsyncpa [#allocation3 + $0x1], 0 }
  0x4e   :  { %82 = vsyncpa [#allocation6], 0 }
  0x4f   :  { %84 = vsyncpa [#allocation6 + $0x1], 0 }
  0x50   :  { %85 = vsyncpa [#allocation9], 0 }
  0x51   :  { %86 = vsyncpa [#allocation12], 0 }
  0x52   :  { %87 = vsyncpa [#allocation15], 0 }
  0x53   :  { %88 = vsyncpa [#allocation18], 0 }
  0x54   :  { %89 = vsyncpa [#allocation21], 0 }
  0x55   :  { %90 = vsyncpa [#allocation24], 0 }
  0x56   :  { %91 = vsyncpa [#allocation27], 0 }
  0x57   :  { %92 = vsyncpa [#allocation4], 0 }
  0x58   :  { %94 = vsyncpa [#allocation4 + $0x1], 0 }
  0x59   :  { %95 = vsyncpa [#allocation30], 0 }
  0x5a   :  { %97 = vsyncpa [#allocation30 + $0x1], 0  ;;  %s11755_s28 = smov 0   ;;  %s11757_s1 = smov 0  }
  0x5b   :  { %s11759_s0 = smov 0   ;;  %s11761_s2 = smov 0  }
  0x5c LB: > { %s14491_s14 = sld [smem:[#allocation49_spill]]  ;;  %s14492_s9 = sld [smem:[#allocation42_spill]]  ;;  %s11493_s2 = sphi %s11761_s2, %s14580_s2   ;;  %s11489_s0 = sphi %s11759_s0, %s14582_s0   ;;  %s11485_s1 = sphi %s11757_s1, %s14584_s1   ;;  %s11481_s28 = sphi %s11755_s28, %s14583_s28  }
  0x5d   : > { %s14493_s29 = sld [smem:[#allocation62_spill]]  ;;  %s14494_s24 = sld [smem:[#allocation51_spill]] }
  0x5e   : > { %s14495_s20 = sld [smem:[#allocation54_spill]]  ;;  %s14496_s4 = sld [smem:[#allocation59_spill]] }
  0x5f   : > { %s14497_s21 = sld [smem:[#allocation45_spill]]  ;;  %s14498_s3 = sld [smem:[#allocation47_spill]] }
  0x60   : > { %14499 = sst [smem:[#allocation71_spill]] %s11481_s28  ;;  %s11531_s7 = smov [#allocation8]  }
  0x61   : > { %14500 = sst [smem:[#allocation72_spill]] %s11489_s0  ;;  %s927_s10 = sshll.u32 %s11531_s7, 4  ;;  %s11781_s10 = int_to_ptr.vmem [resolvable:$true] %s927_s10 }
  0x62   : > { %s11776_s11 = sadd.s32 4294967295, %s11493_s2   ;;  %p9519_p0 = scmp.ge.s32.totalorder %s11493_s2, 1 }
  0x63   : > { %p14420_p1 = scmp.eq.s32.totalorder %s11776_s11, 0  ;;  %p915_p2 = scmp.lt.s32.totalorder %s11493_s2, 3 }
  0x64   : > { %s11532_s16 = smov [#allocation11]   ;;  %s11533_s23 = smov [#allocation14]  }
  0x65   : > { %p11783_p3 = pnand %p9519_p0, %p915_p2  ;;  %s956_s18 = sshll.u32 %s11532_s16, 4  ;;  %s11796_s18 = int_to_ptr.vmem [resolvable:$true] %s956_s18 }
  0x66   : > { %s11798_s26 = sshll.u32 %s11533_s23, 4  ;;  %s10909_s7 = scalar_lea.hbm %s14497_s21, 512  ;;  %s989_s26 = int_to_ptr.vmem [resolvable:$true] %s11798_s26 }
  0x67   : > { %s14501_s15 = scalar_select %p11783_p3, 1, 0 }
  0x68   : > { %p10359_p5 = pneg %p11783_p3  ;;  %p10910_p7 = scmp.ne.s32.totalorder %s14497_s21, %s10909_s7 }
  0x69   : > { %p10916_p11 = scmp.lt.u32.totalorder %s10909_s7, %s14497_s21 }
  0x6a   : > { %p11792_p6 = pnand %p10359_p5, %p14420_p1 }
  0x6c   : > { %s14502_s22 = scalar_select %p11792_p6, 1, 0 }
  0x6d   : > { %p11804_p8 = pneg %p11792_p6 }
  0x6f   : > { %s14503_s17 = scalar_select %p11804_p8, 1, 0 }
  0x70   : > { %p10912_p9 = pnand %p11804_p8, %p10910_p7 }
  0x72   : > { %p10913_p10 = pneg %p10912_p9 }
  0x74   : > { %p10918_p12 = pnand %p10916_p11, %p10913_p10 }
  0x76   : > { %10921 = shalt.err (!%p10918_p12)
}
  0x77   : > { %s10922_s16 = scalar_lea.vmem %s11781_s10, 512  ;;  %p10930_p5 = scmp.lt.s32.totalorder %s11781_s10, %s11781_s10 }
  0x78   : > { %p10923_p13 = scmp.ne.s32.totalorder %s11781_s10, %s10922_s16  ;;  %p10931_p4 = scmp.lt.s32.totalorder %s10922_s16, %s10922_s16 }
  0x7a   : > { %p10925_p0 = pnand %p10923_p13, %p11804_p8  ;;  %p10932_p1 = por %p10931_p4, %p10930_p5 }
  0x7c   : > { %p10926_p2 = pneg %p10925_p0 }
  0x7e   : > { %p10933_p3 = pnand %p10932_p1, %p10926_p2 }
  0x80   : > { %10936 = shalt.err (!%p10933_p3)
}
  0x81   : > { %s14422_s23 = smov 128   ;;  %s14424_s7 = smov 8  }
  0x82   : > { %10362 = dma.hbm_to_vmem [thread:$0]  (!%p11792_p6), %s14497_s21, 512, %s11781_s10, [#allocation9], %s14422_s23, %s14422_s23, %s14424_s7  }
  0x83   : > { %s10937_s12 = scalar_lea.hbm %s14498_s3, 1024 }
  0x84   : > { %p10938_p7 = scmp.ne.s32.totalorder %s14498_s3, %s10937_s12  ;;  %p10944_p3 = scmp.lt.u32.totalorder %s10937_s12, %s14498_s3 }
  0x86   : > { %p10940_p4 = pnand %p10938_p7, %p11804_p8 }
  0x88   : > { %p10941_p1 = pneg %p10940_p4 }
  0x8a   : > { %p10946_p9 = pnand %p10944_p3, %p10941_p1 }
  0x8c   : > { %10949 = shalt.err (!%p10946_p9)
}
  0x8d   : > { %s10950_s16 = scalar_lea.vmem %s11796_s18, 1024  ;;  %p10958_p13 = scmp.lt.s32.totalorder %s11796_s18, %s11796_s18 }
  0x8e   : > { %p10951_p10 = scmp.ne.s32.totalorder %s11796_s18, %s10950_s16  ;;  %p10959_p0 = scmp.lt.s32.totalorder %s10950_s16, %s10950_s16 }
  0x90   : > { %p10953_p11 = pnand %p10951_p10, %p11804_p8  ;;  %p10960_p2 = por %p10959_p0, %p10958_p13 }
  0x92   : > { %p10954_p12 = pneg %p10953_p11 }
  0x94   : > { %p10961_p5 = pnand %p10960_p2, %p10954_p12 }
  0x96   : > { %10964 = shalt.err (!%p10961_p5)
}
  0x97   : > { %s14428_s10 = smov 64   ;;  %s14430_s12 = smov 4  }
  0x98   : > { %10368 = dma.hbm_to_vmem [thread:$0]  (!%p11792_p6), %s14498_s3, 1024, %s11796_s18, [#allocation12], %s14428_s10, %s14428_s10, %s14430_s12  }
  0x99   : > { %s10965_s16 = scalar_lea.hbm %s14494_s24, 1024 }
  0x9a   : > { %p10966_p7 = scmp.ne.s32.totalorder %s14494_s24, %s10965_s16  ;;  %p10972_p3 = scmp.lt.u32.totalorder %s10965_s16, %s14494_s24 }
  0x9c   : > { %p10968_p4 = pnand %p10966_p7, %p11804_p8 }
  0x9e   : > { %p10969_p1 = pneg %p10968_p4 }
  0xa0   : > { %p10974_p9 = pnand %p10972_p3, %p10969_p1 }
  0xa2   : > { %10977 = shalt.err (!%p10974_p9)
}
  0xa3   : > { %s10978_s23 = scalar_lea.vmem %s989_s26, 1024  ;;  %p10986_p13 = scmp.lt.s32.totalorder %s989_s26, %s989_s26 }
  0xa4   : > { %p10979_p10 = scmp.ne.s32.totalorder %s989_s26, %s10978_s23  ;;  %p10987_p0 = scmp.lt.s32.totalorder %s10978_s23, %s10978_s23 }
  0xa6   : > { %p10981_p11 = pnand %p10979_p10, %p11804_p8  ;;  %p10988_p2 = por %p10987_p0, %p10986_p13 }
  0xa8   : > { %p10982_p12 = pneg %p10981_p11 }
  0xaa   : > { %p10989_p5 = pnand %p10988_p2, %p10982_p12 }
  0xac   : > { %10992 = shalt.err (!%p10989_p5)
}
  0xad   : > { %10374 = dma.hbm_to_vmem [thread:$0]  (!%p11792_p6), %s14494_s24, 1024, %s989_s26, [#allocation15], %s14428_s10, %s14428_s10, %s14430_s12  }
  0xae   : > { %s11538_s18 = smov [#allocation17]   ;;  %s11539_s7 = smov [#allocation20]  }
  0xaf   : > { %s1020_s16 = sshll.u32 %s11538_s18, 4  ;;  %s1058_s3 = sshll.u32 %s11539_s7, 4  ;;  %s1021_s16 = int_to_ptr.vmem [resolvable:$true] %s1020_s16  ;;  %s1059_s3 = int_to_ptr.vmem [resolvable:$true] %s1058_s3 }
  0xb0   : > { %s10993_s23 = scalar_lea.hbm %s14495_s20, 1024 }
  0xb1   : > { %p10994_p7 = scmp.ne.s32.totalorder %s14495_s20, %s10993_s23  ;;  %p11000_p3 = scmp.lt.u32.totalorder %s10993_s23, %s14495_s20 }
  0xb3   : > { %p10996_p4 = pnand %p10994_p7, %p11804_p8 }
  0xb5   : > { %p10997_p1 = pneg %p10996_p4 }
  0xb7   : > { %p11002_p9 = pnand %p11000_p3, %p10997_p1 }
  0xb9   : > { %11005 = shalt.err (!%p11002_p9)
}
  0xba   : > { %s11006_s21 = scalar_lea.vmem %s1021_s16, 1024  ;;  %p11014_p13 = scmp.lt.s32.totalorder %s1021_s16, %s1021_s16 }
  0xbb   : > { %p11007_p10 = scmp.ne.s32.totalorder %s1021_s16, %s11006_s21  ;;  %p11015_p0 = scmp.lt.s32.totalorder %s11006_s21, %s11006_s21 }
  0xbd   : > { %p11009_p11 = pnand %p11007_p10, %p11804_p8  ;;  %p11016_p2 = por %p11015_p0, %p11014_p13 }
  0xbf   : > { %p11010_p12 = pneg %p11009_p11 }
  0xc1   : > { %p11017_p5 = pnand %p11016_p2, %p11010_p12 }
  0xc3   : > { %11020 = shalt.err (!%p11017_p5)
}
  0xc4   : > { %10380 = dma.hbm_to_vmem [thread:$0]  (!%p11792_p6), %s14495_s20, 1024, %s1021_s16, [#allocation18], %s14428_s10, %s14428_s10, %s14430_s12  }
  0xc5   : > { %s11021_s26 = scalar_lea.hbm %s14496_s4, 1024 }
  0xc6   : > { %p11022_p7 = scmp.ne.s32.totalorder %s14496_s4, %s11021_s26  ;;  %p11028_p3 = scmp.lt.u32.totalorder %s11021_s26, %s14496_s4 }
  0xc8   : > { %p11024_p4 = pnand %p11022_p7, %p11804_p8 }
  0xca   : > { %p11025_p1 = pneg %p11024_p4 }
  0xcc   : > { %p11030_p9 = pnand %p11028_p3, %p11025_p1 }
  0xce   : > { %11033 = shalt.err (!%p11030_p9)
}
  0xcf   : > { %s11034_s21 = scalar_lea.vmem %s1059_s3, 1024  ;;  %p11042_p13 = scmp.lt.s32.totalorder %s1059_s3, %s1059_s3 }
  0xd0   : > { %p11035_p10 = scmp.ne.s32.totalorder %s1059_s3, %s11034_s21  ;;  %p11043_p0 = scmp.lt.s32.totalorder %s11034_s21, %s11034_s21 }
  0xd2   : > { %p11037_p11 = pnand %p11035_p10, %p11804_p8  ;;  %p11044_p2 = por %p11043_p0, %p11042_p13 }
  0xd4   : > { %p11038_p12 = pneg %p11037_p11 }
  0xd6   : > { %p11045_p5 = pnand %p11044_p2, %p11038_p12 }
  0xd8   : > { %11048 = shalt.err (!%p11045_p5)
}
  0xd9   : > { %10386 = dma.hbm_to_vmem [thread:$0]  (!%p11792_p6), %s14496_s4, 1024, %s1059_s3, [#allocation21], %s14428_s10, %s14428_s10, %s14430_s12  }
  0xda   : > { %s11540_s7 = smov [#allocation23]   ;;  %s11049_s16 = scalar_lea.hbm %s14493_s29, 1024 }
  0xdb   : > { %s1090_s18 = sshll.u32 %s11540_s7, 4  ;;  %p11050_p7 = scmp.ne.s32.totalorder %s14493_s29, %s11049_s16  ;;  %s1091_s18 = int_to_ptr.vmem [resolvable:$true] %s1090_s18 }
  0xdc   : > { %p11056_p3 = scmp.lt.u32.totalorder %s11049_s16, %s14493_s29 }
  0xdd   : > { %p11052_p4 = pnand %p11050_p7, %p11804_p8 }
  0xdf   : > { %p11053_p1 = pneg %p11052_p4 }
  0xe1   : > { %p11058_p9 = pnand %p11056_p3, %p11053_p1 }
  0xe3   : > { %11061 = shalt.err (!%p11058_p9)
}
  0xe4   : > { %s11062_s23 = scalar_lea.vmem %s1091_s18, 1024  ;;  %p11070_p13 = scmp.lt.s32.totalorder %s1091_s18, %s1091_s18 }
  0xe5   : > { %p11063_p10 = scmp.ne.s32.totalorder %s1091_s18, %s11062_s23  ;;  %p11071_p0 = scmp.lt.s32.totalorder %s11062_s23, %s11062_s23 }
  0xe7   : > { %p11065_p11 = pnand %p11063_p10, %p11804_p8  ;;  %p11072_p2 = por %p11071_p0, %p11070_p13 }
  0xe9   : > { %p11066_p12 = pneg %p11065_p11 }
  0xeb   : > { %p11073_p5 = pnand %p11072_p2, %p11066_p12 }
  0xed   : > { %11076 = shalt.err (!%p11073_p5)
}
  0xee   : > { %10392 = dma.hbm_to_vmem [thread:$0]  (!%p11792_p6), %s14493_s29, 1024, %s1091_s18, [#allocation24], %s14428_s10, %s14428_s10, %s14430_s12  }
  0xef   : > { %s9518_s3 = sadd.s32 4294967294, %s11493_s2   ;;  %s11897_s26 = sadd.s32 1, %s11493_s2  }
  0xf0   : > { %14504 = sst [smem:[#allocation73_spill]] %s11897_s26  ;;  %s107_s21 = ssub.s32 %s11493_s2, %s11897_s26 }
  0xf1   : > { %s110_s7 = sadd.s32 1, %s11489_s0  ;;  %p108_p7 = scmp.eq.s32.totalorder %s107_s21, 0 }
  0xf2   : > { %p117_p4 = scmp.ne.s32.totalorder %s11489_s0, %s11485_s1  ;;  %p118_p1 = scmp.eq.s32.totalorder %s11493_s2, 0 }
  0xf3   : > { %p123_p3 = scmp.ne.s32.totalorder %s11485_s1, %s11481_s28  ;;  %p14506_p10 = scmp.eq.s32.totalorder %s11776_s11, 0 }
  0xf4   : > { %s11908_s16 = scalar_select %p108_p7, %s11489_s0, %s110_s7  }
  0xf5   : > { %p119_p9 = por %p118_p1, %p117_p4  ;;  %p11912_p11 = por %p14506_p10, %p123_p3 }
  0xf6   : > { %14505 = sst [smem:[#allocation74_spill]] %s11908_s16  ;;  %p876_p12 = scmp.eq.s32.totalorder %s11776_s11, 1 }
  0xf7   : > { %s14507_s18 = scalar_select %p11912_p11, 1, 0 }
  0xf8   : > { %p882_p13 = scmp.eq.s32.totalorder %s9518_s3, 1  ;;  %p10429_p0 = scmp.lt.s32.totalorder %s11493_s2, 2 }
  0xf9   : > { %s11919_s23 = sand.u32 1, %s11489_s0   ;;  %p11921_p2 = por %p876_p12, %p117_p4 }
  0xfa   : > { %p11925_p5 = por %p882_p13, %p123_p3  ;;  %s14441_s10 = sshll.u32 %s11919_s23, 5 }
  0xfb   : > { %s14508_s21 = scalar_select %p11921_p2, 1, 0 }
  0xfc   : > { %s14509_s7 = scalar_select %p11925_p5, 1, 0 }
  0xfd   : > { %s14440_s12 = sshll.u32 %s11493_s2, 9  ;;  %p11931_p7 = pnand %p10429_p0, %p119_p9 }
  0xfe   : > { %14510 = sst [smem:[#allocation75_spill]] %s14509_s7  ;;  %s1172_s3 = sand.u32 1, %s11493_s2  }
  0xff   : > { %s14511_s4 = scalar_select %p11931_p7, 1, 0 }
 0x100   : > { %s11939_s20 = scalar_lea.hbm %s14492_s9, %s14440_s12  ;;  %s1176_s24 = scalar_lea.vmem [#allocation5], %s14441_s10 }
 0x101   : > { %s1183_s29 = sshll.u32 %s1176_s24, 4  ;;  %s11541_s16 = smov [#allocation10]   ;;  %s11943_s29 = int_to_ptr.vmem [resolvable:$true] %s1183_s29 }
 0x102   : > { %s11945_s0 = sshll.u32 %s11541_s16, 4  ;;  %s11947_s26 = scalar_lea.sflag [#allocation6], %s1172_s3  ;;  %s941_s0 = int_to_ptr.vmem [resolvable:$true] %s11945_s0 }
 0x103   : > { %s11077_s7 = scalar_lea.hbm %s11939_s20, 512  ;;  %p11953_p1 = pneg %p11931_p7 }
 0x104   : > { %p11078_p4 = scmp.ne.s32.totalorder %s11939_s20, %s11077_s7  ;;  %s11082_s10 = scalar_lea.hbm %s14492_s9, 1024 }
 0x105   : > { %s14512_s12 = scalar_select %p11953_p1, 1, 0 }
 0x106   : > { %p11080_p3 = pnand %p11953_p1, %p11078_p4  ;;  %p11083_p10 = scmp.lt.u32.totalorder %s11939_s20, %s14492_s9 }
 0x107   : > { %p11084_p12 = scmp.lt.u32.totalorder %s11082_s10, %s11077_s7  ;;  %p11086_p0 = scmp.lt.u32.totalorder %s11077_s7, %s11939_s20 }
 0x108   : > { %p11081_p9 = pneg %p11080_p3 }
 0x109   : > { %p11085_p13 = por %p11084_p12, %p11083_p10 }
 0x10b   : > { %p11087_p5 = por %p11086_p0, %p11085_p13 }
 0x10d   : > { %p11088_p2 = pnand %p11087_p5, %p11081_p9 }
 0x10f   : > { %11091 = shalt.err (!%p11088_p2)
}
 0x110   : > { %s11092_s24 = scalar_lea.vmem %s11943_s29, 512  ;;  %s11542_s16 = smov [#allocation5]  }
 0x111   : > { %p11093_p11 = scmp.ne.s32.totalorder %s11943_s29, %s11092_s24  ;;  %s11097_s3 = sshll.u32 %s11542_s16, 4  ;;  %s11098_s3 = int_to_ptr.vmem [resolvable:$false] %s11097_s3 }
 0x112   : > { %s11099_s28 = scalar_lea.vmem %s11098_s3, 1024  ;;  %p11100_p4 = scmp.lt.s32.totalorder %s11943_s29, %s11098_s3 }
 0x113   : > { %p11095_p6 = pnand %p11093_p11, %p11953_p1  ;;  %p11101_p3 = scmp.lt.s32.totalorder %s11099_s28, %s11092_s24 }
 0x115   : > { %p11096_p8 = pneg %p11095_p6  ;;  %p11102_p10 = por %p11101_p3, %p11100_p4 }
 0x117   : > { %p11103_p12 = pnand %p11102_p10, %p11096_p8 }
 0x119   : > { %11106 = shalt.err (!%p11103_p12)
}
 0x11a   : > { %s14513_s10 = smov 8   ;;  %s14514_s7 = smov 128  }
 0x11b   : > { %10405 = dma.hbm_to_vmem [thread:$0]  (!%p11931_p7), %s11939_s20, 512, %s11943_s29, %s11947_s26, %s14514_s7, %s14514_s7, %s14513_s10  }
 0x11c   : > { %s11107_s16 = scalar_lea.hbm %s11598_s25, 512  ;;  %p14515_p11 = scmp.ne.s32.totalorder %s14503_s17, 0 }
 0x11d   : > { %p11108_p6 = scmp.ne.s32.totalorder %s11598_s25, %s11107_s16  ;;  %p11114_p5 = scmp.lt.u32.totalorder %s11107_s16, %s11598_s25 }
 0x11f   : > { %p11110_p8 = pnand %p11108_p6, %p14515_p11 }
 0x121   : > { %p11111_p2 = pneg %p11110_p8 }
 0x123   : > { %p11116_p9 = pnand %p11114_p5, %p11111_p2 }
 0x125   : > { %11119 = shalt.err (!%p11116_p9)
}
 0x126   : > { %s11120_s28 = scalar_lea.vmem %s941_s0, 512  ;;  %p11128_p3 = scmp.lt.s32.totalorder %s941_s0, %s941_s0 }
 0x127   : > { %p11121_p13 = scmp.ne.s32.totalorder %s941_s0, %s11120_s28  ;;  %p11129_p10 = scmp.lt.s32.totalorder %s11120_s28, %s11120_s28 }
 0x129   : > { %p11123_p0 = pnand %p11121_p13, %p14515_p11  ;;  %p11130_p12 = por %p11129_p10, %p11128_p3 }
 0x12b   : > { %p11124_p4 = pneg %p11123_p0 }
 0x12d   : > { %p11131_p1 = pnand %p11130_p12, %p11124_p4 }
 0x12f   : > { %11134 = shalt.err (!%p11131_p1)
}
 0x130   : > { %p14516_p7 = scmp.ne.s32.totalorder %s14502_s22, 0  ;;  %s11543_s29 = smov [#allocation13]  }
 0x131   : > { %s972_s20 = sshll.u32 %s11543_s29, 4  ;;  %s11544_s24 = smov [#allocation16]   ;;  %s973_s20 = int_to_ptr.vmem [resolvable:$true] %s972_s20 }
 0x132   : > { %10365 = dma.hbm_to_vmem [thread:$0]  (!%p14516_p7), %s11598_s25, 512, %s941_s0, [#allocation9], %s14514_s7, %s14514_s7, %s14513_s10  }
 0x133   : > { %s1004_s3 = sshll.u32 %s11544_s24, 4  ;;  %s11135_s16 = scalar_lea.hbm %s14491_s14, 1024  ;;  %s1005_s3 = int_to_ptr.vmem [resolvable:$true] %s1004_s3 }
 0x134   : > { %p11136_p6 = scmp.ne.s32.totalorder %s14491_s14, %s11135_s16  ;;  %p11142_p2 = scmp.lt.u32.totalorder %s11135_s16, %s14491_s14 }
 0x136   : > { %p11138_p1 = pnand %p11136_p6, %p14515_p11 }
 0x138   : > { %p11139_p8 = pneg %p11138_p1 }
 0x13a   : > { %p11144_p5 = pnand %p11142_p2, %p11139_p8 }
 0x13c   : > { %11147 = shalt.err (!%p11144_p5)
}
 0x13d   : > { %s11148_s28 = scalar_lea.vmem %s973_s20, 1024  ;;  %p11156_p4 = scmp.lt.s32.totalorder %s973_s20, %s973_s20 }
 0x13e   : > { %p11149_p9 = scmp.ne.s32.totalorder %s973_s20, %s11148_s28  ;;  %p11157_p3 = scmp.lt.s32.totalorder %s11148_s28, %s11148_s28 }
 0x140   : > { %p11151_p13 = pnand %p11149_p9, %p14515_p11  ;;  %p11158_p10 = por %p11157_p3, %p11156_p4 }
 0x142   : > { %p11152_p0 = pneg %p11151_p13 }
 0x144   : > { %p11159_p12 = pnand %p11158_p10, %p11152_p0 }
 0x146   : > { %11162 = shalt.err (!%p11159_p12)
}
 0x147   : > { %s14517_s0 = smov 4   ;;  %s14518_s29 = smov 64  }
 0x148   : > { %10371 = dma.hbm_to_vmem [thread:$0]  (!%p14516_p7), %s14491_s14, 1024, %s973_s20, [#allocation12], %s14518_s29, %s14518_s29, %s14517_s0  }
 0x149   : > { %s11163_s24 = scalar_lea.hbm %s11638_s6, 1024 }
 0x14a   : > { %p11164_p6 = scmp.ne.s32.totalorder %s11638_s6, %s11163_s24  ;;  %p11170_p2 = scmp.lt.u32.totalorder %s11163_s24, %s11638_s6 }
 0x14c   : > { %p11166_p1 = pnand %p11164_p6, %p14515_p11 }
 0x14e   : > { %p11167_p8 = pneg %p11166_p1 }
 0x150   : > { %p11172_p5 = pnand %p11170_p2, %p11167_p8 }
 0x152   : > { %11175 = shalt.err (!%p11172_p5)
}
 0x153   : > { %s11176_s16 = scalar_lea.vmem %s1005_s3, 1024  ;;  %p11184_p4 = scmp.lt.s32.totalorder %s1005_s3, %s1005_s3 }
 0x154   : > { %p11177_p9 = scmp.ne.s32.totalorder %s1005_s3, %s11176_s16  ;;  %p11185_p3 = scmp.lt.s32.totalorder %s11176_s16, %s11176_s16 }
 0x156   : > { %p11179_p13 = pnand %p11177_p9, %p14515_p11  ;;  %p11186_p10 = por %p11185_p3, %p11184_p4 }
 0x158   : > { %p11180_p0 = pneg %p11179_p13 }
 0x15a   : > { %p11187_p12 = pnand %p11186_p10, %p11180_p0 }
 0x15c   : > { %11190 = shalt.err (!%p11187_p12)
}
 0x15d   : > { %10377 = dma.hbm_to_vmem [thread:$0]  (!%p14516_p7), %s11638_s6, 1024, %s1005_s3, [#allocation15], %s14518_s29, %s14518_s29, %s14517_s0  }
 0x15e   : > { %s11545_s20 = smov [#allocation19]   ;;  %s11546_s24 = smov [#allocation22]  }
 0x15f   : > { %s1042_s28 = sshll.u32 %s11545_s20, 4  ;;  %s1074_s9 = sshll.u32 %s11546_s24, 4  ;;  %s1043_s28 = int_to_ptr.vmem [resolvable:$true] %s1042_s28  ;;  %s1075_s9 = int_to_ptr.vmem [resolvable:$true] %s1074_s9 }
 0x160   : > { %s11191_s16 = scalar_lea.hbm %s11668_s19, 1024 }
 0x161   : > { %p11192_p6 = scmp.ne.s32.totalorder %s11668_s19, %s11191_s16  ;;  %p11198_p2 = scmp.lt.u32.totalorder %s11191_s16, %s11668_s19 }
 0x163   : > { %p11194_p1 = pnand %p11192_p6, %p14515_p11 }
 0x165   : > { %p11195_p8 = pneg %p11194_p1 }
 0x167   : > { %p11200_p5 = pnand %p11198_p2, %p11195_p8 }
 0x169   : > { %11203 = shalt.err (!%p11200_p5)
}
 0x16a   : > { %s11204_s14 = scalar_lea.vmem %s1043_s28, 1024  ;;  %p11212_p4 = scmp.lt.s32.totalorder %s1043_s28, %s1043_s28 }
 0x16b   : > { %p11205_p9 = scmp.ne.s32.totalorder %s1043_s28, %s11204_s14  ;;  %p11213_p3 = scmp.lt.s32.totalorder %s11204_s14, %s11204_s14 }
 0x16d   : > { %p11207_p13 = pnand %p11205_p9, %p14515_p11  ;;  %p11214_p10 = por %p11213_p3, %p11212_p4 }
 0x16f   : > { %p11208_p0 = pneg %p11207_p13 }
 0x171   : > { %p11215_p12 = pnand %p11214_p10, %p11208_p0 }
 0x173   : > { %11218 = shalt.err (!%p11215_p12)
}
 0x174   : > { %10383 = dma.hbm_to_vmem [thread:$0]  (!%p14516_p7), %s11668_s19, 1024, %s1043_s28, [#allocation18], %s14518_s29, %s14518_s29, %s14517_s0  }
 0x175   : > { %s11219_s3 = scalar_lea.hbm %s11688_s30, 1024 }
 0x176   : > { %p11220_p6 = scmp.ne.s32.totalorder %s11688_s30, %s11219_s3  ;;  %p11226_p2 = scmp.lt.u32.totalorder %s11219_s3, %s11688_s30 }
 0x178   : > { %p11222_p1 = pnand %p11220_p6, %p14515_p11 }
 0x17a   : > { %p11223_p8 = pneg %p11222_p1 }
 0x17c   : > { %p11228_p5 = pnand %p11226_p2, %p11223_p8 }
 0x17e   : > { %11231 = shalt.err (!%p11228_p5)
}
 0x17f   : > { %s11232_s14 = scalar_lea.vmem %s1075_s9, 1024  ;;  %p11240_p4 = scmp.lt.s32.totalorder %s1075_s9, %s1075_s9 }
 0x180   : > { %p11233_p9 = scmp.ne.s32.totalorder %s1075_s9, %s11232_s14  ;;  %p11241_p3 = scmp.lt.s32.totalorder %s11232_s14, %s11232_s14 }
 0x182   : > { %p11235_p13 = pnand %p11233_p9, %p14515_p11  ;;  %p11242_p10 = por %p11241_p3, %p11240_p4 }
 0x184   : > { %p11236_p0 = pneg %p11235_p13 }
 0x186   : > { %p11243_p12 = pnand %p11242_p10, %p11236_p0 }
 0x188   : > { %11246 = shalt.err (!%p11243_p12)
}
 0x189   : > { %10389 = dma.hbm_to_vmem [thread:$0]  (!%p14516_p7), %s11688_s30, 1024, %s1075_s9, [#allocation21], %s14518_s29, %s14518_s29, %s14517_s0  }
 0x18a   : > { %s11547_s20 = smov [#allocation25]   ;;  %s11548_s24 = smov [#allocation26]  }
 0x18b   : > { %s1118_s28 = sshll.u32 %s11547_s20, 4  ;;  %s1134_s16 = sshll.u32 %s11548_s24, 4  ;;  %s1119_s28 = int_to_ptr.vmem [resolvable:$true] %s1118_s28  ;;  %s1135_s16 = int_to_ptr.vmem [resolvable:$true] %s1134_s16 }
 0x18c   : > { %s11247_s3 = scalar_lea.hbm %s11728_s13, 2048 }
 0x18d   : > { %p11248_p6 = scmp.ne.s32.totalorder %s11728_s13, %s11247_s3  ;;  %p11254_p2 = scmp.lt.u32.totalorder %s11247_s3, %s11728_s13 }
 0x18f   : > { %p11250_p1 = pnand %p11248_p6, %p14515_p11 }
 0x191   : > { %p11251_p8 = pneg %p11250_p1 }
 0x193   : > { %p11256_p5 = pnand %p11254_p2, %p11251_p8 }
 0x195   : > { %11259 = shalt.err (!%p11256_p5)
}
 0x196   : > { %s11260_s14 = scalar_lea.vmem %s1119_s28, 2048  ;;  %p11268_p4 = scmp.lt.s32.totalorder %s1119_s28, %s1119_s28 }
 0x197   : > { %p11261_p9 = scmp.ne.s32.totalorder %s1119_s28, %s11260_s14  ;;  %p11269_p3 = scmp.lt.s32.totalorder %s11260_s14, %s11260_s14 }
 0x199   : > { %p11263_p13 = pnand %p11261_p9, %p14515_p11  ;;  %p11270_p10 = por %p11269_p3, %p11268_p4 }
 0x19b   : > { %p11264_p0 = pneg %p11263_p13 }
 0x19d   : > { %p11271_p12 = pnand %p11270_p10, %p11264_p0 }
 0x19f   : > { %11274 = shalt.err (!%p11271_p12)
}
 0x1a0   : > { %10395 = dma.hbm_to_vmem [thread:$0]  (!%p14516_p7), %s11728_s13, 2048, %s1119_s28, [#allocation24], %s14518_s29, %s14518_s29, %s14517_s0  }
 0x1a1   : > { %s11275_s9 = scalar_lea.hbm %s11738_s8, 1024 }
 0x1a2   : > { %p11276_p6 = scmp.ne.s32.totalorder %s11738_s8, %s11275_s9  ;;  %p11282_p2 = scmp.lt.u32.totalorder %s11275_s9, %s11738_s8 }
 0x1a4   : > { %p11278_p1 = pnand %p11276_p6, %p14515_p11 }
 0x1a6   : > { %p11279_p8 = pneg %p11278_p1 }
 0x1a8   : > { %p11284_p5 = pnand %p11282_p2, %p11279_p8 }
 0x1aa   : > { %11287 = shalt.err (!%p11284_p5)
}
 0x1ab   : > { %s11288_s20 = scalar_lea.vmem %s1135_s16, 1024  ;;  %p11296_p4 = scmp.lt.s32.totalorder %s1135_s16, %s1135_s16 }
 0x1ac   : > { %p11289_p9 = scmp.ne.s32.totalorder %s1135_s16, %s11288_s20  ;;  %p11297_p3 = scmp.lt.s32.totalorder %s11288_s20, %s11288_s20 }
 0x1ae   : > { %p11291_p13 = pnand %p11289_p9, %p14515_p11  ;;  %p11298_p10 = por %p11297_p3, %p11296_p4 }
 0x1b0   : > { %p11292_p0 = pneg %p11291_p13 }
 0x1b2   : > { %p11299_p12 = pnand %p11298_p10, %p11292_p0 }
 0x1b4   : > { %11302 = shalt.err (!%p11299_p12)
}
 0x1b5   : > { %10398 = dma.hbm_to_vmem [thread:$0]  (!%p14516_p7), %s11738_s8, 1024, %s1135_s16, [#allocation27], %s14518_s29, %s14518_s29, %s14517_s0  }
 0x1b6   : > { %s14519_s17 = sshll.u32 %s11493_s2, 9  ;;  %s14520_s24 = sshll.u32 %s11919_s23, 5 }
 0x1b7   : > { %s12071_s28 = scalar_lea.hbm %s11573_s5, %s14519_s17  ;;  %s1155_s22 = scalar_lea.vmem [#allocation2], %s14520_s24 }
 0x1b8   : > { %s1162_s3 = sshll.u32 %s1155_s22, 4  ;;  %s9540_s14 = sshll.u32 %s11919_s23, 4  ;;  %s12076_s3 = int_to_ptr.vmem [resolvable:$true] %s1162_s3 }
 0x1b9   : > { %s1152_s9 = scalar_lea.sflag [#allocation3], %s11919_s23  ;;  %s11303_s20 = scalar_lea.hbm %s12071_s28, 512 }
 0x1ba   : > { %p11304_p11 = scmp.ne.s32.totalorder %s12071_s28, %s11303_s20  ;;  %p14521_p6 = scmp.ne.s32.totalorder %s14512_s12, 0 }
 0x1bb   : > { %s11308_s0 = scalar_lea.hbm %s11573_s5, 1024  ;;  %p11309_p7 = scmp.lt.u32.totalorder %s12071_s28, %s11573_s5 }
 0x1bc   : > { %p11306_p1 = pnand %p11304_p11, %p14521_p6  ;;  %p11310_p2 = scmp.lt.u32.totalorder %s11308_s0, %s11303_s20 }
 0x1bd   : > { %p11312_p9 = scmp.lt.u32.totalorder %s11303_s20, %s12071_s28 }
 0x1be   : > { %p11307_p8 = pneg %p11306_p1  ;;  %p11311_p5 = por %p11310_p2, %p11309_p7 }
 0x1c0   : > { %p11313_p13 = por %p11312_p9, %p11311_p5 }
 0x1c2   : > { %p11314_p0 = pnand %p11313_p13, %p11307_p8 }
 0x1c4   : > { %11317 = shalt.err (!%p11314_p0)
}
 0x1c5   : > { %s11318_s29 = scalar_lea.vmem %s12076_s3, 512  ;;  %s11549_s16 = smov [#allocation2]  }
 0x1c6   : > { %p11319_p4 = scmp.ne.s32.totalorder %s12076_s3, %s11318_s29  ;;  %s11323_s17 = sshll.u32 %s11549_s16, 4  ;;  %s11324_s17 = int_to_ptr.vmem [resolvable:$false] %s11323_s17 }
 0x1c7   : > { %s11325_s24 = scalar_lea.vmem %s11324_s17, 1024  ;;  %p11326_p12 = scmp.lt.s32.totalorder %s12076_s3, %s11324_s17 }
 0x1c8   : > { %p11321_p3 = pnand %p11319_p4, %p14521_p6  ;;  %p11327_p11 = scmp.lt.s32.totalorder %s11325_s24, %s11318_s29 }
 0x1ca   : > { %p11322_p10 = pneg %p11321_p3  ;;  %p11328_p1 = por %p11327_p11, %p11326_p12 }
 0x1cc   : > { %p11329_p7 = pnand %p11328_p1, %p11322_p10 }
 0x1ce   : > { %11332 = shalt.err (!%p11329_p7)
}
 0x1cf   : > { %p14522_p8 = scmp.ne.s32.totalorder %s14511_s4, 0  ;;  %s14523_s22 = sld [smem:[#allocation44_spill]] }
 0x1d0   : > { %s9788_s20 = sshll.u32 %s11493_s2, 8  ;;  %s1204_s0 = scalar_lea.vmem [#allocation7], %s9540_s14 }
 0x1d1   : > { %10402 = dma.hbm_to_vmem [thread:$0]  (!%p14522_p8), %s12071_s28, 512, %s12076_s3, %s1152_s9, %s14514_s7, %s14514_s7, %s14513_s10  }
 0x1d2   : > { %s1211_s29 = sshll.u32 %s1204_s0, 4  ;;  %s12107_s29 = int_to_ptr.vmem [resolvable:$true] %s1211_s29 }
 0x1d5   : > { %s12105_s16 = scalar_lea.hbm %s14523_s22, %s9788_s20  ;;  %s11338_s24 = scalar_lea.hbm %s14523_s22, 512 }
 0x1d6   : > { %s11333_s17 = scalar_lea.hbm %s12105_s16, 256  ;;  %p11339_p13 = scmp.lt.u32.totalorder %s12105_s16, %s14523_s22 }
 0x1d7   : > { %p11334_p2 = scmp.ne.s32.totalorder %s12105_s16, %s11333_s17  ;;  %p11340_p0 = scmp.lt.u32.totalorder %s11338_s24, %s11333_s17 }
 0x1d8   : > { %p11342_p3 = scmp.lt.u32.totalorder %s11333_s17, %s12105_s16 }
 0x1d9   : > { %p11336_p5 = pnand %p11334_p2, %p14521_p6  ;;  %p11341_p4 = por %p11340_p0, %p11339_p13 }
 0x1db   : > { %p11337_p9 = pneg %p11336_p5  ;;  %p11343_p10 = por %p11342_p3, %p11341_p4 }
 0x1dd   : > { %p11344_p12 = pnand %p11343_p10, %p11337_p9 }
 0x1df   : > { %11347 = shalt.err (!%p11344_p12)
}
 0x1e0   : > { %s11348_s23 = scalar_lea.vmem %s12107_s29, 256  ;;  %s11550_s28 = smov [#allocation7]  }
 0x1e1   : > { %p11349_p11 = scmp.ne.s32.totalorder %s12107_s29, %s11348_s23  ;;  %s11353_s3 = sshll.u32 %s11550_s28, 4  ;;  %s11354_s3 = int_to_ptr.vmem [resolvable:$false] %s11353_s3 }
 0x1e2   : > { %s11355_s14 = scalar_lea.vmem %s11354_s3, 512  ;;  %p11356_p2 = scmp.lt.s32.totalorder %s12107_s29, %s11354_s3 }
 0x1e3   : > { %p11351_p1 = pnand %p11349_p11, %p14521_p6  ;;  %p11357_p5 = scmp.lt.s32.totalorder %s11355_s14, %s11348_s23 }
 0x1e5   : > { %p11352_p7 = pneg %p11351_p1  ;;  %p11358_p13 = por %p11357_p5, %p11356_p2 }
 0x1e7   : > { %p11359_p0 = pnand %p11358_p13, %p11352_p7 }
 0x1e9   : > { %11362 = shalt.err (!%p11359_p0)
}
 0x1ea   : > { %10408 = dma.hbm_to_vmem [thread:$0]  (!%p14522_p8), %s12105_s16, 256, %s12107_s29, %s11947_s26, %s14514_s7, %s14514_s7, %s14513_s10  }
 0x1eb   : > { %p14524_p6 = scmp.ne.s32.totalorder %s14501_s15, 0 }
 0x1ed   : > { %1223 = sbr.rel (%p14524_p6) target bundleno = 5759 (0x167f), region = 160 }
 0x1f4   : > { %s12133_s12 = sand.u32 1, %s11485_s1   ;;  %p14525_p9 = scmp.ne.s32.totalorder %s14507_s18, 0 }
 0x1f5   : > { %s12136_s9 = sshll.u32 %s12133_s12, 5  ;;  %s1226_s4 = scalar_lea.sflag [#allocation3], %s12133_s12 }
 0x1f6   : > { %s12140_s20 = scalar_lea.vmem [#allocation2], %s12136_s9 }
 0x1f7   : > { %11436 = dma.done.wait (%p14525_p9), %s1226_s4, 512  }
 0x1f8   : > { %11438 = vsyncadd (%p14525_p9), %s1226_s4, 4294966784  ;;  %s1234_s15 = sand.u32 1, %s11776_s11   ;;  %s12148_s10 = scalar_lea.vmem [#allocation5], %s12136_s9 }
 0x1f9   : > { %s1235_s26 = scalar_lea.sflag [#allocation6], %s1234_s15 }
 0x1fa   : > { %11440 = dma.done.wait (%p14525_p9), %s1235_s26, 768  }
 0x1fb   : > { %11442 = vsyncadd (%p14525_p9), %s1235_s26, 4294966528  ;;  %s9546_s7 = sshll.u32 %s12133_s12, 4  ;;  %p14526_p8 = scmp.eq.s32.totalorder %s11776_s11, 0 }
 0x1fc   : > { %s12155_s0 = scalar_lea.vmem [#allocation7], %s9546_s7 }
 0x1fd   : > { %11444 = dma.done.wait (%p14526_p8), [#allocation9], 1024   ;;  %p14527_p4 = pmov %p14526_p8 }
 0x1ff   : > { %11446 = vsyncadd (%p14527_p4), [#allocation9], 4294966272  ;;  %p14528_p3 = pmov %p14527_p4 }
 0x201   : > { %11448 = dma.done.wait (%p14528_p3), [#allocation12], 2048   ;;  %p14529_p10 = pmov %p14528_p3 }
 0x202   : > { %p14530_p12 = pmov %p14528_p3 }
 0x203   : > { %11450 = vsyncadd (%p14529_p10), [#allocation12], 4294965248 }
 0x204   : > { %11452 = dma.done.wait (%p14530_p12), [#allocation15], 2048   ;;  %p14531_p11 = pmov %p14528_p3 }
 0x205   : > { %p14532_p1 = pmov %p14528_p3 }
 0x206   : > { %11454 = vsyncadd (%p14531_p11), [#allocation15], 4294965248 }
 0x207   : > { %11456 = dma.done.wait (%p14532_p1), [#allocation18], 2048   ;;  %p14533_p7 = pmov %p14532_p1 }
 0x208   : > { %p14534_p2 = pmov %p14532_p1 }
 0x209   : > { %11458 = vsyncadd (%p14533_p7), [#allocation18], 4294965248 }
 0x20a   : > { %11460 = dma.done.wait (%p14534_p2), [#allocation21], 2048   ;;  %p14535_p5 = pmov %p14532_p1 }
 0x20b   : > { %p14536_p13 = pmov %p14532_p1 }
 0x20c   : > { %11462 = vsyncadd (%p14535_p5), [#allocation21], 4294965248 }
 0x20d   : > { %11464 = dma.done.wait (%p14536_p13), [#allocation24], 3072   ;;  %p14537_p0 = pmov %p14532_p1 }
 0x20f   : > { %11466 = vsyncadd (%p14537_p0), [#allocation24], 4294964224  ;;  %p14538_p6 = pmov %p14537_p0 }
 0x210   : > { %p14539_p9 = pmov %p14537_p0 }
 0x211   : > { %11468 = dma.done.wait (%p14538_p6), [#allocation27], 1024  }
 0x212   : > { %11470 = vsyncadd (%p14539_p9), [#allocation27], 4294966272  ;;  %v10601_v0 = vld [vmem:[#allocation11] sm:$0xff]   ;;  %v10602_v1 = vld [vmem:[#allocation11 + $0x8] sm:$0xff]   ;;  %s14540_s18 = sld [smem:[#allocation48_spill]]  ;;  %s14545_s29 = sld [smem:[#allocation43_spill]] }
 0x213   : > { %9973 = vmatprep.subr.bf16.mxu0 %v10601_v0  ;;  %v10603_v2 = vld [vmem:[#allocation11 + $0x10] sm:$0xff]   ;;  %v10604_v3 = vld [vmem:[#allocation11 + $0x18] sm:$0xff]   ;;  %v1412_v4 = vld [vmem:[%s12140_s20] sm:$0xff]  ;;  %s14546_s16 = sld [smem:[#allocation46_spill]]  ;;  %p1407_p8 = scmp.lt.s32.totalorder %s11776_s11, 1  ;;  %vm2757_vm0 = vcmask 130048  }
 0x214   : > { %9974 = vmatpush3.bf16.msra.mxu0 %v10601_v0  ;;  %v1413_v5 = vld [vmem:[%s12140_s20 + $0x8] sm:$0xff]  ;;  %v10605_v7 = vld [vmem:[#allocation11 + $0x20] sm:$0xff]   ;;  %v10607_v9 = vld [vmem:[#allocation11 + $0x30] sm:$0xff]   ;;  %s14548_s28 = sld [smem:[#allocation52_spill]]  ;;  %s14549_s3 = sld [smem:[#allocation50_spill]]  ;;  %vm4182_vm1 = vcmask 261120  }
 0x215   : > { %9975 = vmatprep.subr.bf16.mxu0 %v10602_v1  ;;  %v1430_v6 = vpack.c.bf16 %v1413_v5, %v1412_v4  ;;  %v10606_v8 = vld [vmem:[#allocation11 + $0x28] sm:$0xff]   ;;  %v10608_v10 = vld [vmem:[#allocation11 + $0x38] sm:$0xff]   ;;  %v1414_v11 = vld [vmem:[%s12140_s20 + $0x10] sm:$0xff]  ;;  %s1408_s17 = scalar_select %p1407_p8, %s11776_s11, 1  ;;  %v1605_v5 = vlaneseq  ;;  %vm5435_vm2 = vcmask 523264   ;;  %vm5440_vm3 = vcmask 785408  }
 0x216   : > { %v1415_v12 = vld [vmem:[%s12140_s20 + $0x18] sm:$0xff]  ;;  %v1418_v15 = vld [vmem:[%s12148_s10 + $0x10] sm:$0xff]  ;;  %v1416_v18 = vld [vmem:[%s12148_s10] sm:$0xff]  ;;  %s14550_s14 = sld [smem:[#allocation53_spill]]  ;;  %s14551_s4 = sld [smem:[#allocation57_spill]]  ;;  %vm11559_vm4 = vmmov 0  }
 0x217   : > { %9989 = vmatprep.mubr.bf16.mxu0 %v1430_v6  ;;  %v1431_v13 = vpack.c.bf16 %v1415_v12, %v1414_v11  ;;  %v1419_v26 = vld [vmem:[%s12148_s10 + $0x18] sm:$0xff]  ;;  %v1417_v28 = vld [vmem:[%s12148_s10 + $0x8] sm:$0xff]  ;;  %v10609_v31 = vld [vmem:[#allocation13] sm:$0xff]   ;;  %s9562_s24 = sshll.u32 %s1408_s17, 3  ;;  %s11551_s20 = smov 96  }
 0x218   : > { %9976 = vmatpush3.bf16.msra.mxu0 %v10602_v1  ;;  %v9563_v14 = vld [vmem:[%s14540_s18] ss:$0 sm:$0xff]  ;;  %9993 = vmatprep.subr.bf16.mxu1 %v10609_v31  ;;  %v10611_v49 = vld [vmem:[#allocation13 + $0x8] sm:$0xff]   ;;  %v10613_v51 = vld [vmem:[#allocation13 + $0x10] sm:$0xff]   ;;  %s1410_s23 = scalar_lea.vmem %s14545_s29, %s9562_s24  ;;  %s14552_s15 = sld [smem:[#allocation56_spill]] }
 0x219   : > { %9977 = vmatprep.subr.bf16.mxu0 %v10603_v2  ;;  %v10610_v32 = vld [vmem:[#allocation14] sm:$0xff]   ;;  %9994 = vmatpush3.bf16.msra.mxu1 %v10609_v31  ;;  %v10612_v50 = vld [vmem:[#allocation14 + $0x8] sm:$0xff]   ;;  %v10614_v52 = vld [vmem:[#allocation14 + $0x10] sm:$0xff]   ;;  %s11552_s26 = smov 64   ;;  %s11553_s10 = smov 32  }
 0x21a   : > { %9995 = vmatprep.subr.bf16.mxu1 %v10611_v49  ;;  %v10615_v53 = vld [vmem:[#allocation13 + $0x18] sm:$0xff]   ;;  %v10617_v55 = vld [vmem:[#allocation13 + $0x20] sm:$0xff]   ;;  %v10619_v57 = vld [vmem:[#allocation13 + $0x28] sm:$0xff]   ;;  %s11556_s7 = smov 112   ;;  %s11557_s18 = smov 16  }
 0x21b   : > { %v10616_v54 = vld [vmem:[#allocation14 + $0x18] sm:$0xff]   ;;  %v10618_v56 = vld [vmem:[#allocation14 + $0x20] sm:$0xff]   ;;  %v10620_v58 = vld [vmem:[#allocation14 + $0x28] sm:$0xff]   ;;  %s14556_s29 = sld [smem:[#allocation55_spill]]  ;;  %s14563_s17 = sld [smem:[#allocation65_spill]] }
 0x21c   : > { %9978 = vmatpush3.bf16.msra.mxu0 %v10603_v2  ;;  %v10621_v59 = vld [vmem:[#allocation13 + $0x30] sm:$0xff]   ;;  %v10623_v61 = vld [vmem:[#allocation13 + $0x38] sm:$0xff]   ;;  %v10625_v63 = vld [vmem:[#allocation16] sm:$0xff]   ;;  %s14564_s24 = sld [smem:[#allocation64_spill]]  ;;  %p14573_p3 = scmp.ne.s32.totalorder %s14508_s21, 0 }
 0x21d   : > { %9979 = vmatprep.subr.bf16.mxu0 %v10604_v3  ;;  %9996 = vmatpush3.bf16.msra.mxu1 %v10611_v49  ;;  %v10622_v60 = vld [vmem:[#allocation14 + $0x30] sm:$0xff]   ;;  %v10624_v62 = vld [vmem:[#allocation14 + $0x38] sm:$0xff]  }
 0x21e   : > { %9997 = vmatprep.subr.bf16.mxu1 %v10613_v51  ;;  %v10631_v49 = vld [vmem:[#allocation16 + $0x30] sm:$0xff]  }
 0x220   : > { %9980 = vmatpush3.bf16.msra.mxu0 %v10604_v3 }
 0x221   : > { %9981 = vmatprep.subr.bf16.mxu0 %v10605_v7  ;;  %9998 = vmatpush3.bf16.msra.mxu1 %v10613_v51  ;;  %v9582_v51 = vld [vmem:[%s14548_s28] ss:$0 sm:$0xff]  ;;  %s14566_s28 = sld [smem:[#allocation63_spill]] }
 0x222   : > { %9999 = vmatprep.subr.bf16.mxu1 %v10615_v53 }
 0x224   : > { %9982 = vmatpush3.bf16.msra.mxu0 %v10605_v7 }
 0x225   : > { %9983 = vmatprep.subr.bf16.mxu0 %v10606_v8  ;;  %10000 = vmatpush3.bf16.msra.mxu1 %v10615_v53  ;;  %v9572_v53 = vld [vmem:[%s14549_s3] ss:$0 sm:$0xff]  ;;  %s14567_s3 = sld [smem:[#allocation66_spill]] }
 0x226   : > { %10001 = vmatprep.subr.bf16.mxu1 %v10617_v55 }
 0x228   : > { %9984 = vmatpush3.bf16.msra.mxu0 %v10606_v8  ;;  %v1556_v8 = vld [vmem:[%s14546_s16] sm:$0x3f]  ;;  %s14562_s16 = sld [smem:[#allocation58_spill]] }
 0x229   : > { %9985 = vmatprep.subr.bf16.mxu0 %v10607_v9  ;;  %10002 = vmatpush3.bf16.msra.mxu1 %v10617_v55 }
 0x22a   : > { %10003 = vmatprep.subr.bf16.mxu1 %v10619_v57 }
 0x22c   : > { %9986 = vmatpush3.bf16.msra.mxu0 %v10607_v9  ;;  %v1557_v9 = vld [vmem:[%s1410_s23] sm:$0x3f]  ;;  %s14565_s23 = sld [smem:[#allocation61_spill]] }
 0x22d   : > { %9987 = vmatprep.subr.bf16.mxu0 %v10608_v10  ;;  %10004 = vmatpush3.bf16.msra.mxu1 %v10619_v57 }
 0x22e   : > { %10005 = vmatprep.subr.bf16.mxu1 %v10621_v59 }
 0x230   : > { %9988 = vmatpush3.bf16.msra.mxu0 %v10608_v10 }
 0x231   : > { %10013 = vmatprep.subr.bf16.mxu0 %v10610_v32  ;;  %10006 = vmatpush3.bf16.msra.mxu1 %v10621_v59 }
 0x232   : > { %10007 = vmatprep.subr.bf16.mxu1 %v10623_v61 }
 0x233   : > { %9990 = vmatmul.mubr.bf16.vlgmr.msra.gmra.mrb[0].mxu0 %v1431_v13  ;;  %v12230_v13 = vadd.f32 %v1557_v9, %v1556_v8 }
 0x234   : > { %10014 = vmatpush3.bf16.msra.mxu0 %v10610_v32 }
 0x235   : > { %10015 = vmatprep.subr.bf16.mxu0 %v10612_v50  ;;  %10008 = vmatpush3.bf16.msra.mxu1 %v10623_v61 }
 0x236   : > { %10033 = vmatprep.subr.bf16.mxu1 %v10625_v63 }
 0x238   : > { %10016 = vmatpush3.bf16.msra.mxu0 %v10612_v50  ;;  %v10632_v50 = vld [vmem:[#allocation16 + $0x38] sm:$0xff]  }
 0x239   : > { %10017 = vmatprep.subr.bf16.mxu0 %v10614_v52 }
 0x23c   : > { %10018 = vmatpush3.bf16.msra.mxu0 %v10614_v52 }
 0x23d   : > { %10019 = vmatprep.subr.bf16.mxu0 %v10616_v54 }
 0x240   : > { %10020 = vmatpush3.bf16.msra.mxu0 %v10616_v54 }
 0x241   : > { %10021 = vmatprep.subr.bf16.mxu0 %v10618_v56 }
 0x244   : > { %10022 = vmatpush3.bf16.msra.mxu0 %v10618_v56 }
 0x245   : > { %10023 = vmatprep.subr.bf16.mxu0 %v10620_v58 }
 0x248   : > { %10024 = vmatpush3.bf16.msra.mxu0 %v10620_v58 }
 0x249   : > { %10025 = vmatprep.subr.bf16.mxu0 %v10622_v60 }
 0x24c   : > { %10026 = vmatpush3.bf16.msra.mxu0 %v10622_v60 }
 0x24d   : > { %10027 = vmatprep.subr.bf16.mxu0 %v10624_v62 }
 0x250   : > { %10028 = vmatpush3.bf16.msra.mxu0 %v10624_v62 }
 0x306   : > { %v9991_v16 = vpop.f32.mrb[0].mxu0 }
 0x307   : > { %v1546_v17 = vadd.f32 %v9991_v16, %v9563_v14  ;;  %v1537_v19 = vpop.f32.mrb[1].mxu0 }
 0x308   : > { %v1538_v20 = vadd.f32 %v9563_v14, %v1537_v19  ;;  %v9992_v21 = vpop.f32.mrb[2].mxu0 }
 0x309   : > { %v12192_v22 = vadd.f32 %v1546_v17, %v1418_v15  ;;  %v1549_v23 = vadd.f32 %v9992_v21, %v9563_v14  ;;  %v1540_v24 = vpop.f32.mrb[3].mxu0  ;;  %v12235_v17 = vadd.f32 1.0, %v12230_v13 }
 0x30a   : > { %v12194_v25 = vadd.f32 %v1538_v20, %v1416_v18  ;;  %v1541_v27 = vadd.f32 %v9563_v14, %v1540_v24  ;;  %v12232_v14 = vshrl.u32 %v1605_v5, 7 }
 0x30b   : > { %14541 = vst [vmem:[#allocation76_spill] sm:$0xff] %v12192_v22  ;;  %1563 = vadd.xlane.f32.xlu1 %v12192_v22  ;;  %v12200_v29 = vadd.f32 %v1549_v23, %v1419_v26  ;;  %14547 = vst [vmem:[#allocation80_spill] sm:$0xff] %v12235_v17 }
 0x30c   : > { %14542 = vst [vmem:[#allocation77_spill] sm:$0xff] %v12194_v25  ;;  %1559 = vadd.xlane.f32.xlu0 %v12194_v25  ;;  %v12202_v30 = vadd.f32 %v1541_v27, %v1417_v28  ;;  %v14455_v18 = vsub.s32 1, %v12232_v14  ;;  %v14456_v23 = vsub.s32 0, %v12232_v14 }
 0x30d   : > { %14543 = vst [vmem:[#allocation78_spill] sm:$0xff] %v12200_v29 }
 0x30e   : > { %14544 = vst [vmem:[#allocation79_spill] sm:$0xff] %v12202_v30  ;;  %v1608_v21 = vrot.slane %v12235_v17, %v14455_v18  ;;  %v1616_v31 = vrot.slane %v12230_v13, %v14456_v23 }
 0x30f   : > { %1565 = vadd.xlane.f32.xlu1 %v12200_v29 }
 0x310   : > { %1561 = vadd.xlane.f32.xlu0 %v12202_v30 }
 0x398   : > { %v1564_v33 = vpop.xlane.xlu1 %1563 }
 0x399   : > { %v1560_v34 = vpop.xlane.xlu0 %1559  ;;  %v1570_v35 = vmul.f32 0.0078125, %v1564_v33 }
 0x39a   : > { %v1568_v36 = vmul.f32 0.0078125, %v1560_v34 }
 0x39b   : > { %v12212_v43 = vsub.f32 %v12192_v22, %v1570_v35 }
 0x39c   : > { %v1566_v37 = vpop.xlane.xlu1 %1565  ;;  %v12207_v38 = vsub.f32 %v12194_v25, %v1568_v36 }
 0x39d   : > { %v1562_v39 = vpop.xlane.xlu0 %1561  ;;  %v1571_v40 = vmul.f32 0.0078125, %v1566_v37  ;;  %v1578_v45 = vmul.f32 %v12212_v43, %v12212_v43 }
 0x39e   : > { %v1569_v41 = vmul.f32 0.0078125, %v1562_v39  ;;  %v1576_v42 = vmul.f32 %v12207_v38, %v12207_v38 }
 0x39f   : > { %v12222_v47 = vsub.f32 %v12200_v29, %v1571_v40 }
 0x3a0   : > { %1580 = vadd.xlane.f32.xlu0 %v1576_v42  ;;  %v12215_v44 = vsub.f32 %v12202_v30, %v1569_v41 }
 0x3a1   : > { %v1579_v48 = vmul.f32 %v12222_v47, %v12222_v47 }
 0x3a2   : > { %v1577_v46 = vmul.f32 %v12215_v44, %v12215_v44 }
 0x3a4   : > { %1584 = vadd.xlane.f32.xlu0 %v1578_v45  ;;  %1582 = vadd.xlane.f32.xlu1 %v1577_v46  ;;  %v10626_v45 = vld [vmem:[#allocation16 + $0x8] sm:$0xff]   ;;  %v10628_v46 = vld [vmem:[#allocation16 + $0x18] sm:$0xff]  }
 0x3a8   : > { %1586 = vadd.xlane.f32.xlu1 %v1579_v48  ;;  %v10630_v48 = vld [vmem:[#allocation16 + $0x28] sm:$0xff]  }
 0x42d   : > { %v1581_v0 = vpop.xlane.xlu0 %1580 }
 0x42e   : > { %v1588_v1 = vmul.f32 0.0078125, %v1581_v0 }
 0x430   : > { %v1592_v2 = vadd.f32 1e-06, %v1588_v1 }
 0x431   : > { %v1583_v3 = vpop.xlane.xlu1 %1582  ;;  %v1585_v4 = vpop.xlane.xlu0 %1584 }
 0x432   : > { %10721 = vrsqrt.f32 %v1592_v2  ;;  %v1589_v6 = vmul.f32 0.0078125, %v1583_v3  ;;  %v1590_v7 = vmul.f32 0.0078125, %v1585_v4 }
 0x434   : > { %v1593_v10 = vadd.f32 1e-06, %v1589_v6  ;;  %v1594_v11 = vadd.f32 1e-06, %v1590_v7 }
 0x435   : > { %v1587_v12 = vpop.xlane.xlu1 %1586 }
 0x436   : > { %10723 = vrsqrt.f32 %v1593_v10  ;;  %v1591_v15 = vmul.f32 0.0078125, %v1587_v12 }
 0x437   : > { %10725 = vrsqrt.f32 %v1594_v11 }
 0x438   : > { %v1595_v16 = vadd.f32 1e-06, %v1591_v15  ;;  %v12276_v15 = vld [vmem:[%s14550_s14] ss:$0 sm:$0xff]  ;;  %s14569_s14 = sld [smem:[#allocation67_spill]] }
 0x43a   : > { %10727 = vrsqrt.f32 %v1595_v16 }
 0x43c   : > { %v10722_v19 = vpop.eup %10721 }
 0x43d   : > { %v1600_v20 = vmul.f32 %v10722_v19, %v12207_v38 }
 0x43f   : > { %v1609_v28 = vmul.f32 %v1608_v21, %v1600_v20 }
 0x440   : > { %v10724_v24 = vpop.eup %10723 }
 0x441   : > { %v10726_v26 = vpop.eup %10725  ;;  %v1601_v27 = vmul.f32 %v10724_v24, %v12215_v44  ;;  %v1617_v35 = vadd.f32 %v1616_v31, %v1609_v28 }
 0x442   : > { %v1602_v32 = vmul.f32 %v10726_v26, %v12212_v43  ;;  %v10627_v43 = vld [vmem:[#allocation16 + $0x10] sm:$0xff]  }
 0x443   : > { %v1610_v33 = vmul.f32 %v1608_v21, %v1601_v27 }
 0x444   : > { %v10728_v34 = vpop.eup %10727  ;;  %v1611_v38 = vmul.f32 %v1608_v21, %v1602_v32 }
 0x445   : > { %v1618_v36 = vadd.f32 %v1616_v31, %v1610_v33  ;;  %v1603_v37 = vmul.f32 %v10728_v34, %v12222_v47  ;;  %v10629_v47 = vld [vmem:[#allocation16 + $0x20] sm:$0xff]  }
 0x446   : > { %v1619_v41 = vadd.f32 %v1616_v31, %v1611_v38 }
 0x447   : > { %v1621_v39 = vpack.c.bf16 %v1618_v36, %v1617_v35  ;;  %v1612_v40 = vmul.f32 %v1608_v21, %v1603_v37 }
 0x449   : > { %10009 = vmatprep.mubr.bf16.mxu1 %v1621_v39  ;;  %10029 = vmatprep.mubr.bf16.mxu0 %v1621_v39  ;;  %v1620_v42 = vadd.f32 %v1616_v31, %v1612_v40 }
 0x44b   : > { %v1622_v44 = vpack.c.bf16 %v1620_v42, %v1619_v41 }
 0x44d   : > { %10010 = vmatmul.mubr.bf16.vlgmr.msra.gmra.mrb[0].mxu1 %v1622_v44  ;;  %10030 = vmatmul.mubr.bf16.vlgmr.msra.gmra.mrb[4].mxu0 %v1622_v44 }
 0x44e   : > { %10034 = vmatpush3.bf16.msra.mxu1 %v10625_v63  ;;  %10049 = vmatprep.mubr.bf16.mxu1 %v1621_v39 }
 0x44f   : > { %10035 = vmatprep.subr.bf16.mxu1 %v10626_v45 }
 0x452   : > { %10036 = vmatpush3.bf16.msra.mxu1 %v10626_v45 }
 0x453   : > { %10037 = vmatprep.subr.bf16.mxu1 %v10627_v43 }
 0x456   : > { %10038 = vmatpush3.bf16.msra.mxu1 %v10627_v43 }
 0x457   : > { %10039 = vmatprep.subr.bf16.mxu1 %v10628_v46 }
 0x45a   : > { %10040 = vmatpush3.bf16.msra.mxu1 %v10628_v46 }
 0x45b   : > { %10041 = vmatprep.subr.bf16.mxu1 %v10629_v47 }
 0x45e   : > { %10042 = vmatpush3.bf16.msra.mxu1 %v10629_v47 }
 0x45f   : > { %10043 = vmatprep.subr.bf16.mxu1 %v10630_v48 }
 0x462   : > { %10044 = vmatpush3.bf16.msra.mxu1 %v10630_v48 }
 0x463   : > { %10045 = vmatprep.subr.bf16.mxu1 %v10631_v49 }
 0x466   : > { %10046 = vmatpush3.bf16.msra.mxu1 %v10631_v49 }
 0x467   : > { %10047 = vmatprep.subr.bf16.mxu1 %v10632_v50 }
 0x46a   : > { %10048 = vmatpush3.bf16.msra.mxu1 %v10632_v50 }
 0x46d   : > { %10050 = vmatmul.mubr.bf16.vlgmr.msra.gmra.mrb[4].mxu1 %v1622_v44  ;;  %v9591_v44 = vld [vmem:[%s14551_s4] ss:$0 sm:$0xff]  ;;  %s14572_s4 = sld [smem:[#allocation68_spill]] }
 0x520   : > { %v10011_v52 = vpop.f32.mrb[0].mxu1  ;;  %v10031_v54 = vpop.f32.mrb[4].mxu0 }
 0x521   : > { %v1896_v55 = vadd.f32 %v10031_v54, %v9582_v51  ;;  %v1728_v56 = vpop.f32.mrb[1].mxu1  ;;  %v1887_v57 = vpop.f32.mrb[5].mxu0  ;;  %v12251_v60 = vadd.f32 %v10011_v52, %v9572_v53 }
 0x522   : > { %v10012_v58 = vpop.f32.mrb[2].mxu1  ;;  %v10032_v59 = vpop.f32.mrb[6].mxu0  ;;  %v1888_v3 = vadd.f32 %v9582_v51, %v1887_v57  ;;  %v12265_v7 = vadd.f32 %v9572_v53, %v1728_v56 }
 0x523   : > { %v12253_v61 = vadd.f32 %v10032_v59, %v9582_v51  ;;  %v1731_v62 = vpop.f32.mrb[3].mxu1  ;;  %v1890_v63 = vpop.f32.mrb[7].mxu0  ;;  %v1905_v0 = vmul.f32 %v1896_v55, %v1896_v55  ;;  %v12255_v1 = vadd.f32 %v10012_v58, %v9572_v53  ;;  %v1746_v4 = vmul.f32 %v12251_v60, %v12251_v60  ;;  %v9581_v58 = vld [vmem:[%s14552_s15] ss:$0 sm:$0xff] }
 0x524   : > { %v12261_v5 = vadd.f32 %v9582_v51, %v1890_v63  ;;  %v1903_v8 = vmul.f32 %v1888_v3, %v1888_v3  ;;  %v12267_v9 = vadd.f32 %v9572_v53, %v1731_v62  ;;  %v1744_v11 = vmul.f32 %v12265_v7, %v12265_v7 }
 0x525   : > { %1911 = vadd.xlane.f32.xlu0 %v1905_v0  ;;  %v1906_v2 = vmul.f32 %v12253_v61, %v12253_v61  ;;  %v1747_v6 = vmul.f32 %v12255_v1, %v12255_v1 }
 0x526   : > { %v1904_v10 = vmul.f32 %v12261_v5, %v12261_v5  ;;  %v1745_v12 = vmul.f32 %v12267_v9, %v12267_v9 }
 0x527   : > { %1913 = vadd.xlane.f32.xlu1 %v1906_v2 }
 0x529   : > { %1752 = vadd.xlane.f32.xlu0 %v1746_v4 }
 0x52b   : > { %1754 = vadd.xlane.f32.xlu1 %v1747_v6 }
 0x52d   : > { %1907 = vadd.xlane.f32.xlu0 %v1903_v8 }
 0x52f   : > { %1909 = vadd.xlane.f32.xlu1 %v1904_v10 }
 0x531   : > { %1748 = vadd.xlane.f32.xlu0 %v1744_v11 }
 0x533   : > { %1750 = vadd.xlane.f32.xlu1 %v1745_v12 }
 0x540   : > { %v10051_v16 = vpop.f32.mrb[4].mxu1 }
 0x541   : > { %v12279_v19 = vadd.f32 %v10051_v16, %v12276_v15  ;;  %v12281_v20 = vpop.f32.mrb[5].mxu1 }
 0x542   : > { %v10052_v21 = vpop.f32.mrb[6].mxu1 }
 0x543   : > { %v12284_v24 = vadd.f32 %v10052_v21, %v12276_v15  ;;  %v12286_v26 = vpop.f32.mrb[7].mxu1 }
 0x5b2   : > { %v1912_v27 = vpop.xlane.xlu0 %1911 }
 0x5b3   : > { %v1917_v28 = vmul.f32 0.0078125, %v1912_v27 }
 0x5b4   : > { %v1914_v31 = vpop.xlane.xlu1 %1913 }
 0x5b5   : > { %v1921_v32 = vadd.f32 1e-06, %v1917_v28  ;;  %v1918_v33 = vmul.f32 0.0078125, %v1914_v31  ;;  %v11554_v28 = vmov 1983009808  }
 0x5b6   : > { %v1753_v34 = vpop.xlane.xlu0 %1752  ;;  %v2104_v31 = vunpack.c.l.s4 %v11554_v28 }
 0x5b7   : > { %10729 = vrsqrt.f32 %v1921_v32  ;;  %v1758_v35 = vmul.f32 0.0078125, %v1753_v34  ;;  %v1922_v36 = vadd.f32 1e-06, %v1918_v33  ;;  %v11555_v33 = vmov 1934713408  }
 0x5b8   : > { %v1755_v41 = vpop.xlane.xlu1 %1754  ;;  %v2136_v34 = vunpack.c.l.s4 %v11555_v33 }
 0x5b9   : > { %v1762_v37 = vadd.f32 1e-06, %v1758_v35  ;;  %10731 = vrsqrt.f32 %v1922_v36  ;;  %v1759_v43 = vmul.f32 0.0078125, %v1755_v41 }
 0x5ba   : > { %v1908_v38 = vpop.xlane.xlu0 %1907  ;;  %v2137_v36 = vunpack.c.0.s8 %v2136_v34 }
 0x5bb   : > { %v1915_v39 = vmul.f32 0.0078125, %v1908_v38  ;;  %10733 = vrsqrt.f32 %v1762_v37  ;;  %v1763_v48 = vadd.f32 1e-06, %v1759_v43 }
 0x5bc   : > { %v1910_v56 = vpop.xlane.xlu1 %1909 }
 0x5bd   : > { %v1919_v40 = vadd.f32 1e-06, %v1915_v39  ;;  %v1916_v59 = vmul.f32 0.0078125, %v1910_v56 }
 0x5be   : > { %v1749_v50 = vpop.xlane.xlu0 %1748 }
 0x5bf   : > { %10735 = vrsqrt.f32 %v1919_v40  ;;  %v1756_v53 = vmul.f32 0.0078125, %v1749_v50 }
 0x5c0   : > { %10737 = vrsqrt.f32 %v1763_v48 }
 0x5c1   : > { %v10730_v42 = vpop.eup %10729  ;;  %v1760_v62 = vadd.f32 1e-06, %v1756_v53 }
 0x5c2   : > { %v1929_v45 = vmul.f32 %v10730_v42, %v1896_v55 }
 0x5c3   : > { %v10732_v47 = vpop.eup %10731  ;;  %10739 = vrsqrt.f32 %v1760_v62 }
 0x5c4   : > { %v12289_v46 = vmul.f32 %v9591_v44, %v1929_v45  ;;  %v1930_v54 = vmul.f32 %v10732_v47, %v12253_v61  ;;  %v12368_v45 = vsub.s32 %v2137_v36, %v12232_v14 }
 0x5c5   : > { %v10734_v49 = vpop.eup %10733 }
 0x5c6   : > { %2830 = vrot.lane.b32.xlu0 %v12289_v46, %s11551_s20  ;;  %v1770_v55 = vmul.f32 %v10734_v49, %v12251_v60  ;;  %v12304_v63 = vmul.f32 %v9591_v44, %v1930_v54  ;;  %v1920_v60 = vadd.f32 1e-06, %v1916_v59 }
 0x5c8   : > { %v12306_v0 = vmul.f32 %v9581_v58, %v1770_v55  ;;  %10741 = vrsqrt.f32 %v1920_v60 }
 0x5c9   : > { %v10736_v51 = vpop.eup %10735 }
 0x5ca   : > { %v1927_v52 = vmul.f32 %v10736_v51, %v1888_v3  ;;  %2842 = vrot.lane.b32.xlu0 %v12289_v46, %s11552_s26  ;;  %v10738_v61 = vpop.eup %10737  ;;  %v1751_v3 = vpop.xlane.xlu1 %1750 }
 0x5cb   : > { %v1771_v2 = vmul.f32 %v10738_v61, %v12255_v1  ;;  %v1757_v4 = vmul.f32 0.0078125, %v1751_v3 }
 0x5cc   : > { %v12297_v57 = vmul.f32 %v9591_v44, %v1927_v52 }
 0x5cd   : > { %v12321_v6 = vmul.f32 %v9581_v58, %v1771_v2  ;;  %v10740_v8 = vpop.eup %10739  ;;  %v1761_v10 = vadd.f32 1e-06, %v1757_v4 }
 0x5ce   : > { %2838 = vrot.lane.b32.xlu1 %v12297_v57, %s11552_s26  ;;  %2854 = vrot.lane.b32.xlu0 %v12289_v46, %s11553_s10  ;;  %v1768_v1 = vmul.f32 %v10740_v8, %v12265_v7 }
 0x5cf   : > { %10743 = vrsqrt.f32 %v1761_v10 }
 0x5d0   : > { %v12333_v16 = vmul.f32 %v9581_v58, %v1768_v1 }
 0x5d2   : > { %2832 = vrot.lane.b32.xlu1 %v12304_v63, %s11551_s20  ;;  %2069 = vrot.lane.b32.xlu0 %v12306_v0, %s11551_s20  ;;  %v10742_v11 = vpop.eup %10741 }
 0x5d3   : > { %v1928_v12 = vmul.f32 %v10742_v11, %v12261_v5 }
 0x5d5   : > { %v12339_v21 = vmul.f32 %v9591_v44, %v1928_v12 }
 0x5d6   : > { %2844 = vrot.lane.b32.xlu1 %v12304_v63, %s11552_s26  ;;  %2081 = vrot.lane.b32.xlu0 %v12306_v0, %s11552_s26 }
 0x5d9   : > { %v10744_v7 = vpop.eup %10743 }
 0x5da   : > { %2856 = vrot.lane.b32.xlu1 %v12304_v63, %s11553_s10  ;;  %2093 = vrot.lane.b32.xlu0 %v12306_v0, %s11553_s10  ;;  %v1769_v5 = vmul.f32 %v10744_v7, %v12267_v9  ;;  %v2105_v9 = vunpack.c.0.s8 %v2104_v31 }
 0x5dc   : > { %v12352_v27 = vmul.f32 %v9581_v58, %v1769_v5  ;;  %v12361_v37 = vsub.s32 %v2105_v9, %v12232_v14 }
 0x5de   : > { %2071 = vrot.lane.b32.xlu1 %v12321_v6, %s11551_s20  ;;  %2826 = vrot.lane.b32.xlu0 %v12297_v57, %s11551_s20 }
 0x5e2   : > { %2083 = vrot.lane.b32.xlu1 %v12321_v6, %s11552_s26  ;;  %2850 = vrot.lane.b32.xlu0 %v12297_v57, %s11553_s10 }
 0x5e6   : > { %2095 = vrot.lane.b32.xlu1 %v12321_v6, %s11553_s10  ;;  %2065 = vrot.lane.b32.xlu0 %v12333_v16, %s11551_s20 }
 0x5ea   : > { %2828 = vrot.lane.b32.xlu1 %v12339_v21, %s11551_s20  ;;  %2077 = vrot.lane.b32.xlu0 %v12333_v16, %s11552_s26 }
 0x5ee   : > { %2840 = vrot.lane.b32.xlu1 %v12339_v21, %s11552_s26  ;;  %2089 = vrot.lane.b32.xlu0 %v12333_v16, %s11553_s10 }
 0x5f2   : > { %2852 = vrot.lane.b32.xlu1 %v12339_v21, %s11553_s10 }
 0x5f6   : > { %2067 = vrot.lane.b32.xlu1 %v12352_v27, %s11551_s20 }
 0x5fa   : > { %2079 = vrot.lane.b32.xlu1 %v12352_v27, %s11552_s26 }
 0x5fe   : > { %2091 = vrot.lane.b32.xlu1 %v12352_v27, %s11553_s10 }
 0x638   : > { %v2831_v32 = vpop.permute.xlu0 %2830 }
 0x63c   : > { %v2843_v35 = vpop.permute.xlu0 %2842 }
 0x63d   : > { %v2998_v38 = vcombine.low %v12289_v46, %v2843_v35  ;;  %v2999_v39 = vcombine.high %v12289_v46, %v2843_v35 }
 0x63f   : > { %v3006_v43 = vrot.slane %v2998_v38, %v12361_v37  ;;  %v3013_v47 = vrot.slane %v2999_v39, %v12361_v37 }
 0x640   : > { %v12365_v40 = vpop.permute.xlu1 %2838  ;;  %v2855_v41 = vpop.permute.xlu0 %2854 }
 0x641   : > { %v3014_v42 = vcombine.low %v2831_v32, %v2855_v41  ;;  %v3015_v44 = vcombine.high %v2831_v32, %v2855_v41 }
 0x643   : > { %v3022_v48 = vrot.slane %v3014_v42, %v12361_v37  ;;  %v3029_v49 = vrot.slane %v3015_v44, %v12361_v37 }
 0x644   : > { %v2833_v50 = vpop.permute.xlu1 %2832  ;;  %v2070_v51 = vpop.permute.xlu0 %2069 }
 0x645   : > { %v3030_v52 = vcombine.low %v3006_v43, %v3022_v48  ;;  %v3031_v46 = vcombine.high %v3006_v43, %v3022_v48  ;;  %v3046_v53 = vcombine.low %v3013_v47, %v3029_v49  ;;  %v3047_v54 = vcombine.high %v3013_v47, %v3029_v49 }
 0x647   : > { %v3038_v55 = vrot.slane %v3030_v52, %v12368_v45  ;;  %v3045_v56 = vrot.slane %v3031_v46, %v12368_v45  ;;  %v3054_v58 = vrot.slane %v3046_v53, %v12368_v45  ;;  %v3061_v59 = vrot.slane %v3047_v54, %v12368_v45 }
 0x648   : > { %v2845_v62 = vpop.permute.xlu1 %2844  ;;  %v2082_v60 = vpop.permute.xlu0 %2081 }
 0x649   : > { %v3270_v61 = vcombine.low %v3038_v55, %v3045_v56  ;;  %v9613_v2 = vcombine.high %v3038_v55, %v3045_v56  ;;  %v3286_v3 = vcombine.low %v3054_v58, %v3061_v59  ;;  %v9614_v4 = vcombine.high %v3054_v58, %v3061_v59 }
 0x64a   : > { %v3066_v8 = vcombine.low %v12304_v63, %v2845_v62  ;;  %v3067_v10 = vcombine.high %v12304_v63, %v2845_v62  ;;  %v2237_v38 = vcombine.low %v12306_v0, %v2082_v60  ;;  %v2238_v49 = vcombine.high %v12306_v0, %v2082_v60 }
 0x64b   : > { %v12381_v1 = vrot.slane %v3270_v61, %v12361_v37  ;;  %v12384_v11 = vrot.slane %v9613_v2, %v12361_v37  ;;  %v12387_v12 = vrot.slane %v3286_v3, %v12361_v37  ;;  %v12390_v7 = vrot.slane %v9614_v4, %v12361_v37 }
 0x64c   : > { %v2857_v5 = vpop.permute.xlu1 %2856  ;;  %v2094_v32 = vpop.permute.xlu0 %2093  ;;  %v3074_v34 = vrot.slane %v3066_v8, %v12361_v37  ;;  %v3081_v9 = vrot.slane %v3067_v10, %v12361_v37  ;;  %v2245_v58 = vrot.slane %v2237_v38, %v12361_v37  ;;  %v2252_v2 = vrot.slane %v2238_v49, %v12361_v37 }
 0x64d   : > { %v3082_v28 = vcombine.low %v2833_v50, %v2857_v5  ;;  %v3083_v31 = vcombine.high %v2833_v50, %v2857_v5  ;;  %v3302_v33 = vcombine.low %v12381_v1, %v12384_v11  ;;  %v3318_v63 = vcombine.low %v12387_v12, %v12390_v7 }
 0x64e   : > { %v2253_v39 = vcombine.low %v2070_v51, %v2094_v32  ;;  %v2254_v41 = vcombine.high %v2070_v51, %v2094_v32 }
 0x64f   : > { %v3090_v35 = vrot.slane %v3082_v28, %v12361_v37  ;;  %v3097_v36 = vrot.slane %v3083_v31, %v12361_v37  ;;  %v3310_v50 = vrot.slane %v3302_v33, %v12368_v45  ;;  %v3326_v52 = vrot.slane %v3318_v63, %v12368_v45 }
 0x650   : > { %v2072_v42 = vpop.permute.xlu1 %2071  ;;  %v2261_v51 = vrot.slane %v2253_v39, %v12361_v37  ;;  %v2268_v59 = vrot.slane %v2254_v41, %v12361_v37 }
 0x651   : > { %v3098_v44 = vcombine.low %v3074_v34, %v3090_v35  ;;  %v3099_v43 = vcombine.high %v3074_v34, %v3090_v35  ;;  %v3114_v47 = vcombine.low %v3081_v9, %v3097_v36  ;;  %v3115_v48 = vcombine.high %v3081_v9, %v3097_v36 }
 0x652   : > { %v12412_v3 = vcombine.low %v3310_v50, %v3326_v52  ;;  %v2269_v4 = vcombine.low %v2245_v58, %v2261_v51  ;;  %v2270_v8 = vcombine.high %v2245_v58, %v2261_v51  ;;  %v2285_v5 = vcombine.low %v2252_v2, %v2268_v59 }
 0x653   : > { %v3106_v46 = vrot.slane %v3098_v44, %v12368_v45  ;;  %v3113_v53 = vrot.slane %v3099_v43, %v12368_v45  ;;  %v3122_v54 = vrot.slane %v3114_v47, %v12368_v45  ;;  %v3129_v55 = vrot.slane %v3115_v48, %v12368_v45 }
 0x654   : > { %v2084_v56 = vpop.permute.xlu1 %2083  ;;  %v2286_v28 = vcombine.high %v2252_v2, %v2268_v59  ;;  %3426 = vrot.lane.b32.xlu0 %v12412_v3, %s11556_s7  ;;  %v12429_v35 = vcombine.high %v3310_v50, %v3326_v52  ;;  %v2277_v36 = vrot.slane %v2269_v4, %v12368_v45  ;;  %v2284_v38 = vrot.slane %v2270_v8, %v12368_v45 }
 0x655   : > { %v3338_v0 = vcombine.low %v3106_v46, %v3113_v53  ;;  %v9615_v62 = vcombine.high %v3106_v46, %v3113_v53  ;;  %v3354_v60 = vcombine.low %v3122_v54, %v3129_v55  ;;  %v9616_v61 = vcombine.high %v3122_v54, %v3129_v55 }
 0x656   : > { %v2305_v9 = vcombine.low %v12321_v6, %v2084_v56  ;;  %v2293_v41 = vrot.slane %v2285_v5, %v12368_v45  ;;  %v2300_v44 = vrot.slane %v2286_v28, %v12368_v45  ;;  %v2306_v47 = vcombine.high %v12321_v6, %v2084_v56 }
 0x657   : > { %v12417_v32 = vrot.slane %v3338_v0, %v12361_v37  ;;  %v12420_v33 = vrot.slane %v9615_v62, %v12361_v37  ;;  %v12423_v63 = vrot.slane %v3354_v60, %v12361_v37  ;;  %v12426_v34 = vrot.slane %v9616_v61, %v12361_v37 }
 0x658   : > { %v2096_v10 = vpop.permute.xlu1 %2095  ;;  %3434 = vrot.lane.b32.xlu0 %v12429_v35, %s11556_s7  ;;  %v2313_v50 = vrot.slane %v2305_v9, %v12361_v37  ;;  %v9605_v46 = vcombine.high %v2277_v36, %v2284_v38  ;;  %v2525_v53 = vcombine.low %v2293_v41, %v2300_v44  ;;  %v9606_v6 = vcombine.high %v2293_v41, %v2300_v44 }
 0x659   : > { %v2321_v31 = vcombine.low %v2072_v42, %v2096_v10  ;;  %v2322_v39 = vcombine.high %v2072_v42, %v2096_v10  ;;  %v3370_v48 = vcombine.low %v12417_v32, %v12420_v33  ;;  %v3386_v49 = vcombine.low %v12423_v63, %v12426_v34 }
 0x65a   : > { %v2509_v42 = vcombine.low %v2277_v36, %v2284_v38  ;;  %v2320_v51 = vrot.slane %v2306_v47, %v12361_v37  ;;  %v12460_v4 = vrot.slane %v9605_v46, %v12361_v37  ;;  %v12465_v8 = vrot.slane %v2525_v53, %v12361_v37 }
 0x65b   : > { %v2329_v43 = vrot.slane %v2321_v31, %v12361_v37  ;;  %v2336_v52 = vrot.slane %v2322_v39, %v12361_v37  ;;  %v3378_v56 = vrot.slane %v3370_v48, %v12368_v45  ;;  %v3394_v58 = vrot.slane %v3386_v49, %v12368_v45 }
 0x65c   : > { %3474 = vrot.lane.b32.xlu0 %v12412_v3, %s11557_s18  ;;  %v12457_v2 = vrot.slane %v2509_v42, %v12361_v37  ;;  %v12468_v10 = vrot.slane %v9606_v6, %v12361_v37  ;;  %v12489_v42 = vpop.permute.xlu1 %2828 }
 0x65d   : > { %v2337_v54 = vcombine.low %v2313_v50, %v2329_v43  ;;  %v2338_v55 = vcombine.high %v2313_v50, %v2329_v43  ;;  %v2353_v59 = vcombine.low %v2320_v51, %v2336_v52  ;;  %v2354_v0 = vcombine.high %v2320_v51, %v2336_v52  ;;  %v2827_v43 = vpop.permute.xlu0 %2826 }
 0x65e   : > { %v12450_v62 = vcombine.low %v3378_v56, %v3394_v58  ;;  %v2541_v5 = vcombine.low %v12457_v2, %v12460_v4  ;;  %v12474_v9 = vcombine.high %v3378_v56, %v3394_v58  ;;  %v2557_v39 = vcombine.low %v12465_v8, %v12468_v10 }
 0x65f   : > { %v2345_v60 = vrot.slane %v2337_v54, %v12368_v45  ;;  %v2352_v61 = vrot.slane %v2338_v55, %v12368_v45  ;;  %v2361_v28 = vrot.slane %v2353_v59, %v12368_v45  ;;  %v2368_v31 = vrot.slane %v2354_v0, %v12368_v45 }
 0x660   : > { %3482 = vrot.lane.b32.xlu0 %v12429_v35, %s11557_s18  ;;  %3428 = vrot.lane.b32.xlu1 %v12450_v62, %s11556_s7  ;;  %v2549_v38 = vrot.slane %v2541_v5, %v12368_v45  ;;  %v2565_v44 = vrot.slane %v2557_v39, %v12368_v45  ;;  %v2841_v59 = vpop.permute.xlu1 %2840  ;;  %v3303_v0 = vcombine.high %v12381_v1, %v12384_v11 }
 0x661   : > { %v2577_v36 = vcombine.low %v2345_v60, %v2352_v61  ;;  %v9607_v41 = vcombine.high %v2345_v60, %v2352_v61  ;;  %v2593_v47 = vcombine.low %v2361_v28, %v2368_v31  ;;  %v9608_v48 = vcombine.high %v2361_v28, %v2368_v31  ;;  %v2851_v6 = vpop.permute.xlu0 %2850 }
 0x662   : > { %v12482_v49 = vcombine.low %v2549_v38, %v2565_v44  ;;  %v12502_v54 = vcombine.high %v2549_v38, %v2565_v44  ;;  %v3319_v60 = vcombine.high %v12387_v12, %v12390_v7  ;;  %v2878_v5 = vcombine.low %v2827_v43, %v2851_v6 }
 0x663   : > { %v12485_v50 = vrot.slane %v2577_v36, %v12361_v37  ;;  %v12494_v52 = vrot.slane %v9607_v41, %v12361_v37  ;;  %v12497_v46 = vrot.slane %v2593_v47, %v12361_v37  ;;  %v12500_v53 = vrot.slane %v9608_v48, %v12361_v37 }
 0x664   : > { %3436 = vrot.lane.b32.xlu1 %v12474_v9, %s11556_s7  ;;  %2665 = vrot.lane.b32.xlu0 %v12482_v49, %s11556_s7  ;;  %v2879_v31 = vcombine.high %v2827_v43, %v2851_v6  ;;  %v3317_v36 = vrot.slane %v3303_v0, %v12368_v45  ;;  %v3333_v38 = vrot.slane %v3319_v60, %v12368_v45  ;;  %v2853_v7 = vpop.permute.xlu1 %2852 }
 0x665   : > { %v2609_v55 = vcombine.low %v12485_v50, %v12494_v52  ;;  %v2625_v51 = vcombine.low %v12497_v46, %v12500_v53  ;;  %v12522_v28 = vpop.permute.xlu0 %2065  ;;  %v2862_v1 = vcombine.low %v12297_v57, %v12365_v40  ;;  %v2863_v12 = vcombine.high %v12297_v57, %v12365_v40 }
 0x666   : > { %v2886_v39 = vrot.slane %v2878_v5, %v12361_v37  ;;  %v2893_v41 = vrot.slane %v2879_v31, %v12361_v37  ;;  %v12540_v44 = vcombine.low %v3317_v36, %v3333_v38  ;;  %v3371_v48 = vcombine.high %v12417_v32, %v12420_v33 }
 0x667   : > { %v2617_v56 = vrot.slane %v2609_v55, %v12368_v45  ;;  %v2633_v58 = vrot.slane %v2625_v51, %v12368_v45  ;;  %v2870_v43 = vrot.slane %v2862_v1, %v12361_v37  ;;  %v3387_v57 = vcombine.high %v12423_v63, %v12426_v34 }
 0x668   : > { %3476 = vrot.lane.b32.xlu1 %v12450_v62, %s11557_s18  ;;  %2673 = vrot.lane.b32.xlu0 %v12502_v54, %s11556_s7  ;;  %v2877_v40 = vrot.slane %v2863_v12, %v12361_v37  ;;  %v2946_v6 = vcombine.low %v12489_v42, %v2853_v7  ;;  %v12553_v0 = vpop.permute.xlu1 %2067  ;;  %v12555_v32 = vcombine.high %v3317_v36, %v3333_v38 }
 0x669   : > { %v12518_v61 = vcombine.low %v2617_v56, %v2633_v58  ;;  %v12530_v11 = vcombine.high %v2617_v56, %v2633_v58  ;;  %v2078_v47 = vpop.permute.xlu0 %2077  ;;  %v2894_v55 = vcombine.low %v2870_v43, %v2886_v39  ;;  %v2895_v51 = vcombine.high %v2870_v43, %v2886_v39 }
 0x66a   : > { %v2910_v56 = vcombine.low %v2877_v40, %v2893_v41  ;;  %v2911_v58 = vcombine.high %v2877_v40, %v2893_v41  ;;  %v2930_v33 = vcombine.low %v12339_v21, %v2841_v59  ;;  %v2947_v63 = vcombine.high %v12489_v42, %v2853_v7 }
 0x66b   : > { %v3385_v34 = vrot.slane %v3371_v48, %v12368_v45  ;;  %v3401_v60 = vrot.slane %v3387_v57, %v12368_v45  ;;  %v2931_v5 = vcombine.high %v12339_v21, %v2841_v59  ;;  %v2954_v1 = vrot.slane %v2946_v6, %v12361_v37 }
 0x66c   : > { %3484 = vrot.lane.b32.xlu1 %v12474_v9, %s11557_s18  ;;  %2713 = vrot.lane.b32.xlu0 %v12482_v49, %s11557_s18  ;;  %v2542_v36 = vcombine.high %v12457_v2, %v12460_v4  ;;  %v2558_v42 = vcombine.high %v12465_v8, %v12468_v10  ;;  %v2902_v38 = vrot.slane %v2894_v55, %v12368_v45  ;;  %v12584_v48 = vpop.permute.xlu1 %2079 }
 0x66d   : > { %v2090_v31 = vpop.permute.xlu0 %2089  ;;  %v2909_v12 = vrot.slane %v2895_v51, %v12368_v45  ;;  %v2918_v21 = vrot.slane %v2910_v56, %v12368_v45  ;;  %v2925_v59 = vrot.slane %v2911_v58, %v12368_v45  ;;  %v2101_v7 = vcombine.low %v12333_v16, %v2078_v47 }
 0x66e   : > { %v2938_v39 = vrot.slane %v2930_v33, %v12361_v37  ;;  %v2961_v41 = vrot.slane %v2947_v63, %v12361_v37  ;;  %v12578_v43 = vcombine.low %v3385_v34, %v3401_v60  ;;  %v2102_v2 = vcombine.high %v12333_v16, %v2078_v47 }
 0x66f   : > { %v2945_v4 = vrot.slane %v2931_v5, %v12361_v37  ;;  %v2117_v8 = vcombine.low %v12522_v28, %v2090_v31  ;;  %v2118_v10 = vcombine.high %v12522_v28, %v2090_v31  ;;  %v2556_v55 = vrot.slane %v2542_v36, %v12368_v45 }
 0x670   : > { %2667 = vrot.lane.b32.xlu1 %v12518_v61, %s11556_s7  ;;  %2721 = vrot.lane.b32.xlu0 %v12502_v54, %s11557_s18  ;;  %v2962_v57 = vcombine.low %v2938_v39, %v2954_v1  ;;  %v2963_v40 = vcombine.high %v2938_v39, %v2954_v1  ;;  %v2572_v16 = vrot.slane %v2558_v42, %v12368_v45 }
 0x671   : > { %v3134_v47 = vcombine.low %v2902_v38, %v2909_v12  ;;  %v9609_v6 = vcombine.high %v2902_v38, %v2909_v12  ;;  %v3150_v51 = vcombine.low %v2918_v21, %v2925_v59  ;;  %v9610_v56 = vcombine.high %v2918_v21, %v2925_v59 }
 0x672   : > { %v2978_v58 = vcombine.low %v2945_v4, %v2961_v41  ;;  %v2979_v28 = vcombine.high %v2945_v4, %v2961_v41  ;;  %v12592_v33 = vcombine.high %v3385_v34, %v3401_v60  ;;  %v2109_v63 = vrot.slane %v2101_v7, %v12361_v37  ;;  %v2092_v60 = vpop.permute.xlu1 %2091 }
 0x673   : > { %v2125_v5 = vrot.slane %v2117_v8, %v12361_v37  ;;  %v2132_v31 = vrot.slane %v2118_v10, %v12361_v37  ;;  %v2116_v1 = vrot.slane %v2102_v2, %v12361_v37  ;;  %v2970_v36 = vrot.slane %v2962_v57, %v12368_v45 }
 0x674   : > { %2675 = vrot.lane.b32.xlu1 %v12530_v11, %s11556_s7  ;;  %3442 = vrot.lane.b32.xlu0 %v12540_v44, %s11556_s7  ;;  %v2977_v42 = vrot.slane %v2963_v40, %v12368_v45  ;;  %v12604_v34 = vcombine.low %v2556_v55, %v2572_v16  ;;  %v12607_v38 = vrot.slane %v3134_v47, %v12361_v37 }
 0x675   : > { %v12610_v12 = vrot.slane %v9609_v6, %v12361_v37  ;;  %v12613_v21 = vrot.slane %v3150_v51, %v12361_v37  ;;  %v12616_v59 = vrot.slane %v9610_v56, %v12361_v37  ;;  %v2986_v7 = vrot.slane %v2978_v58, %v12368_v45 }
 0x676   : > { %v2993_v39 = vrot.slane %v2979_v28, %v12368_v45  ;;  %v2610_v41 = vcombine.high %v12485_v50, %v12494_v52  ;;  %v2626_v2 = vcombine.high %v12497_v46, %v12500_v53  ;;  %v2133_v4 = vcombine.low %v2109_v63, %v2125_v5 }
 0x677   : > { %v2134_v8 = vcombine.high %v2109_v63, %v2125_v5  ;;  %v2149_v10 = vcombine.low %v2116_v1, %v2132_v31  ;;  %v2150_v57 = vcombine.high %v2116_v1, %v2132_v31  ;;  %v3202_v40 = vcombine.low %v2970_v36, %v2977_v42 }
 0x678   : > { %2715 = vrot.lane.b32.xlu1 %v12518_v61, %s11557_s18  ;;  %3450 = vrot.lane.b32.xlu0 %v12555_v32, %s11556_s7  ;;  %v9611_v47 = vcombine.high %v2970_v36, %v2977_v42  ;;  %v2169_v6 = vcombine.low %v12352_v27, %v12584_v48  ;;  %v2185_v51 = vcombine.low %v12553_v0, %v2092_v60 }
 0x679   : > { %v2186_v50 = vcombine.high %v12553_v0, %v2092_v60  ;;  %v12632_v52 = vcombine.high %v2556_v55, %v2572_v16  ;;  %v3166_v46 = vcombine.low %v12607_v38, %v12610_v12  ;;  %v3182_v53 = vcombine.low %v12613_v21, %v12616_v59 }
 0x67a   : > { %v3218_v56 = vcombine.low %v2986_v7, %v2993_v39  ;;  %v9612_v58 = vcombine.high %v2986_v7, %v2993_v39  ;;  %v2624_v28 = vrot.slane %v2610_v41, %v12368_v45  ;;  %v2640_v63 = vrot.slane %v2626_v2, %v12368_v45 }
 0x67b   : > { %v2141_v5 = vrot.slane %v2133_v4, %v12368_v45  ;;  %v2148_v31 = vrot.slane %v2134_v8, %v12368_v45  ;;  %v2170_v0 = vcombine.high %v12352_v27, %v12584_v48  ;;  %v2157_v55 = vrot.slane %v2149_v10, %v12368_v45 }
 0x67c   : > { %2723 = vrot.lane.b32.xlu1 %v12530_v11, %s11557_s18  ;;  %3490 = vrot.lane.b32.xlu0 %v12540_v44, %s11557_s18  ;;  %v2164_v16 = vrot.slane %v2150_v57, %v12368_v45  ;;  %v2177_v1 = vrot.slane %v2169_v6, %v12361_v37  ;;  %v2193_v36 = vrot.slane %v2185_v51, %v12361_v37 }
 0x67d   : > { %v2200_v42 = vrot.slane %v2186_v50, %v12361_v37  ;;  %v3174_v60 = vrot.slane %v3166_v46, %v12368_v45  ;;  %v3190_v27 = vrot.slane %v3182_v53, %v12368_v45  ;;  %v12656_v48 = vrot.slane %v3202_v40, %v12361_v37 }
 0x67e   : > { %v12658_v7 = vcombine.low %v2624_v28, %v2640_v63  ;;  %v12661_v39 = vrot.slane %v9611_v47, %v12361_v37  ;;  %v12664_v41 = vrot.slane %v3218_v56, %v12361_v37  ;;  %v12667_v2 = vrot.slane %v9612_v58, %v12361_v37 }
 0x67f   : > { %v2184_v4 = vrot.slane %v2170_v0, %v12361_v37  ;;  %v2373_v8 = vcombine.low %v2141_v5, %v2148_v31  ;;  %v9601_v10 = vcombine.high %v2141_v5, %v2148_v31  ;;  %v2201_v57 = vcombine.low %v2177_v1, %v2193_v36 }
 0x680   : > { %3444 = vrot.lane.b32.xlu1 %v12578_v43, %s11556_s7  ;;  %3498 = vrot.lane.b32.xlu0 %v12555_v32, %s11557_s18  ;;  %v2202_v40 = vcombine.high %v2177_v1, %v2193_v36  ;;  %v2389_v47 = vcombine.low %v2157_v55, %v2164_v16  ;;  %v9602_v6 = vcombine.high %v2157_v55, %v2164_v16 }
 0x681   : > { %v2217_v51 = vcombine.low %v2184_v4, %v2200_v42  ;;  %v12674_v50 = vcombine.low %v3174_v60, %v3190_v27  ;;  %v2218_v46 = vcombine.high %v2184_v4, %v2200_v42  ;;  %v12676_v53 = vcombine.high %v2624_v28, %v2640_v63 }
 0x682   : > { %v3234_v56 = vcombine.low %v12656_v48, %v12661_v39  ;;  %v3250_v58 = vcombine.low %v12664_v41, %v12667_v2  ;;  %v2209_v5 = vrot.slane %v2201_v57, %v12368_v45  ;;  %v2216_v31 = vrot.slane %v2202_v40, %v12368_v45 }
 0x683   : > { %v12689_v0 = vrot.slane %v2373_v8, %v12361_v37  ;;  %v12691_v28 = vcombine.high %v3174_v60, %v3190_v27  ;;  %v12694_v63 = vrot.slane %v9601_v10, %v12361_v37  ;;  %v12697_v55 = vrot.slane %v2389_v47, %v12361_v37 }
 0x684   : > { %3452 = vrot.lane.b32.xlu1 %v12592_v33, %s11556_s7  ;;  %2681 = vrot.lane.b32.xlu0 %v12604_v34, %s11556_s7  ;;  %v2404_v16 = vrot.slane %v9602_v6, %v12361_v37  ;;  %v2225_v1 = vrot.slane %v2217_v51, %v12368_v45  ;;  %v2232_v36 = vrot.slane %v2218_v46, %v12368_v45 }
 0x685   : > { %v3242_v42 = vrot.slane %v3234_v56, %v12368_v45  ;;  %v3258_v4 = vrot.slane %v3250_v58, %v12368_v45  ;;  %v2441_v60 = vcombine.low %v2209_v5, %v2216_v31  ;;  %v2405_v27 = vcombine.low %v12689_v0, %v12694_v63 }
 0x686   : > { %v2421_v8 = vcombine.low %v12697_v55, %v2404_v16  ;;  %v9603_v10 = vcombine.high %v2209_v5, %v2216_v31  ;;  %v2457_v57 = vcombine.low %v2225_v1, %v2232_v36  ;;  %v9604_v40 = vcombine.high %v2225_v1, %v2232_v36 }
 0x687   : > { %v12711_v47 = vcombine.low %v3242_v42, %v3258_v4  ;;  %v2413_v6 = vrot.slane %v2405_v27, %v12368_v45  ;;  %v2448_v46 = vrot.slane %v2441_v60, %v12361_v37  ;;  %v12720_v56 = vcombine.high %v3242_v42, %v3258_v4 }
 0x688   : > { %3492 = vrot.lane.b32.xlu1 %v12578_v43, %s11557_s18  ;;  %2689 = vrot.lane.b32.xlu0 %v12632_v52, %s11556_s7  ;;  %v2429_v51 = vrot.slane %v2421_v8, %v12368_v45  ;;  %v2456_v58 = vrot.slane %v9603_v10, %v12361_v37  ;;  %v2464_v5 = vrot.slane %v2457_v57, %v12361_v37 }
 0x689   : > { %v2472_v31 = vrot.slane %v9604_v40, %v12361_v37  ;;  %v3167_v8 = vcombine.high %v12607_v38, %v12610_v12  ;;  %v3183_v10 = vcombine.high %v12613_v21, %v12616_v59  ;;  %v3235_v12 = vcombine.high %v12656_v48, %v12661_v39 }
 0x68a   : > { %v12729_v1 = vcombine.low %v2413_v6, %v2429_v51  ;;  %v2473_v36 = vcombine.low %v2448_v46, %v2456_v58  ;;  %v12735_v42 = vcombine.high %v2413_v6, %v2429_v51  ;;  %v3251_v21 = vcombine.high %v12664_v41, %v12667_v2 }
 0x68b   : > { %v2489_v27 = vcombine.low %v2464_v5, %v2472_v31  ;;  %v3181_v40 = vrot.slane %v3167_v8, %v12368_v45  ;;  %v3197_v6 = vrot.slane %v3183_v10, %v12368_v45  ;;  %v2406_v48 = vcombine.high %v12689_v0, %v12694_v63 }
 0x68c   : > { %3500 = vrot.lane.b32.xlu1 %v12592_v33, %s11557_s18  ;;  %2729 = vrot.lane.b32.xlu0 %v12604_v34, %s11557_s18  ;;  %v2481_v4 = vrot.slane %v2473_v36, %v12368_v45  ;;  %v3249_v36 = vrot.slane %v3235_v12, %v12368_v45  ;;  %v2422_v39 = vcombine.high %v12697_v55, %v2404_v16 }
 0x68d   : > { %v2497_v60 = vrot.slane %v2489_v27, %v12368_v45  ;;  %v12761_v38 = vcombine.low %v3181_v40, %v3197_v6  ;;  %v12771_v59 = vcombine.high %v3181_v40, %v3197_v6  ;;  %v3265_v27 = vrot.slane %v3251_v21, %v12368_v45 }
 0x68e   : > { %v2420_v2 = vrot.slane %v2406_v48, %v12368_v45  ;;  %v2474_v63 = vcombine.high %v2448_v46, %v2456_v58  ;;  %v2490_v55 = vcombine.high %v2464_v5, %v2472_v31 }
 0x68f   : > { %v12747_v57 = vcombine.low %v2481_v4, %v2497_v60  ;;  %v12755_v51 = vcombine.high %v2481_v4, %v2497_v60  ;;  %v12782_v41 = vcombine.low %v3249_v36, %v3265_v27  ;;  %v2436_v4 = vrot.slane %v2422_v39, %v12368_v45  ;;  %v12833_v39 = vld [vmem:[#allocation8 + $0x10] sm:$0xff] }
 0x690   : > { %2683 = vrot.lane.b32.xlu1 %v12658_v7, %s11556_s7  ;;  %3422 = vrot.lane.b32.xlu0 %v12674_v50, %s11556_s7  ;;  %v12790_v60 = vcombine.high %v3249_v36, %v3265_v27  ;;  %v2488_v10 = vrot.slane %v2474_v63, %v12368_v45  ;;  %v2504_v40 = vrot.slane %v2490_v55, %v12368_v45  ;;  %v12830_v27 = vld [vmem:[#allocation10 + $0x10] sm:$0xff] }
 0x691   : > { %v12796_v0 = vcombine.low %v2420_v2, %v2436_v4  ;;  %v12802_v8 = vcombine.high %v2420_v2, %v2436_v4  ;;  %v12828_v36 = vadd.f32 %v12276_v15, %v12281_v20  ;;  %v12837_v2 = vld [vmem:[#allocation8 + $0x18] sm:$0xff] }
 0x692   : > { %v12810_v46 = vcombine.low %v2488_v10, %v2504_v40  ;;  %v12816_v5 = vcombine.high %v2488_v10, %v2504_v40  ;;  %v12839_v4 = vld [vmem:[#allocation10 + $0x18] sm:$0xff]  ;;  %v3536_v40 = vmul.f32 %v12412_v3, %v12833_v39 }
 0x694   : > { %2691 = vrot.lane.b32.xlu1 %v12676_v53, %s11556_s7  ;;  %3430 = vrot.lane.b32.xlu0 %v12691_v28, %s11556_s7 }
 0x698   : > { %2731 = vrot.lane.b32.xlu1 %v12658_v7, %s11557_s18  ;;  %3470 = vrot.lane.b32.xlu0 %v12674_v50, %s11557_s18 }
 0x69c   : > { %3424 = vrot.lane.b32.xlu1 %v12711_v47, %s11556_s7  ;;  %3478 = vrot.lane.b32.xlu0 %v12691_v28, %s11557_s18 }
 0x6a0   : > { %3432 = vrot.lane.b32.xlu1 %v12720_v56, %s11556_s7  ;;  %2661 = vrot.lane.b32.xlu0 %v12729_v1, %s11556_s7 }
 0x6a4   : > { %3472 = vrot.lane.b32.xlu1 %v12711_v47, %s11557_s18  ;;  %2669 = vrot.lane.b32.xlu0 %v12735_v42, %s11556_s7 }
 0x6a8   : > { %3480 = vrot.lane.b32.xlu1 %v12720_v56, %s11557_s18  ;;  %2709 = vrot.lane.b32.xlu0 %v12729_v1, %s11557_s18 }
 0x6ac   : > { %2663 = vrot.lane.b32.xlu1 %v12747_v57, %s11556_s7  ;;  %2717 = vrot.lane.b32.xlu0 %v12735_v42, %s11557_s18 }
 0x6b0   : > { %2671 = vrot.lane.b32.xlu1 %v12755_v51, %s11556_s7  ;;  %3438 = vrot.lane.b32.xlu0 %v12761_v38, %s11556_s7 }
 0x6b4   : > { %2711 = vrot.lane.b32.xlu1 %v12747_v57, %s11557_s18  ;;  %3446 = vrot.lane.b32.xlu0 %v12771_v59, %s11556_s7 }
 0x6b8   : > { %2719 = vrot.lane.b32.xlu1 %v12755_v51, %s11557_s18  ;;  %3486 = vrot.lane.b32.xlu0 %v12761_v38, %s11557_s18 }
 0x6bc   : > { %3440 = vrot.lane.b32.xlu1 %v12782_v41, %s11556_s7  ;;  %3494 = vrot.lane.b32.xlu0 %v12771_v59, %s11557_s18 }
 0x6c0   : > { %3448 = vrot.lane.b32.xlu1 %v12790_v60, %s11556_s7  ;;  %2677 = vrot.lane.b32.xlu0 %v12796_v0, %s11556_s7 }
 0x6c4   : > { %3488 = vrot.lane.b32.xlu1 %v12782_v41, %s11557_s18  ;;  %2685 = vrot.lane.b32.xlu0 %v12802_v8, %s11556_s7 }
 0x6c6   : > { %v3427_v16 = vpop.permute.xlu0 %3426 }
 0x6c8   : > { %3496 = vrot.lane.b32.xlu1 %v12790_v60, %s11557_s18  ;;  %2725 = vrot.lane.b32.xlu0 %v12796_v0, %s11557_s18 }
 0x6ca   : > { %v3435_v6 = vpop.permute.xlu0 %3434 }
 0x6cc   : > { %2679 = vrot.lane.b32.xlu1 %v12810_v46, %s11556_s7  ;;  %2733 = vrot.lane.b32.xlu0 %v12802_v8, %s11557_s18 }
 0x6ce   : > { %v3475_v58 = vpop.permute.xlu0 %3474 }
 0x6cf   : > { %v3520_v48 = vsel %vm2757_vm0, %v3427_v16, %v3475_v58  ;;  %v3537_v58 = vmul.f32 %v12450_v62, %v12837_v2 }
 0x6d0   : > { %2687 = vrot.lane.b32.xlu1 %v12816_v5, %s11556_s7  ;;  %2737 = vrot.lane.b32.xlu0 %v12632_v52, %s11557_s18  ;;  %v3552_v63 = vmul.f32 %v3520_v48, %v12830_v27  ;;  %s9169_s7 = scalar_lea.sflag [#allocation30], %s12133_s12 }
 0x6d2   : > { %v3429_v31 = vpop.permute.xlu1 %3428  ;;  %v3483_v12 = vpop.permute.xlu0 %3482  ;;  %v3568_v48 = vadd.f32 %v3552_v63, %v3536_v40  ;;  %v3541_v63 = vmul.f32 %v12474_v9, %v12837_v2 }
 0x6d3   : > { %v3524_v55 = vsel %vm2757_vm0, %v3435_v6, %v3483_v12  ;;  %v3540_v12 = vmul.f32 %v12429_v35, %v12833_v39 }
 0x6d4   : > { %2727 = vrot.lane.b32.xlu1 %v12810_v46, %s11557_s18  ;;  %3586 = vrot.lane.b32.xlu0 %v12828_v36, %s11551_s20  ;;  %v3556_v23 = vmul.f32 %v3524_v55, %v12830_v27 }
 0x6d6   : > { %v3437_v21 = vpop.permute.xlu1 %3436  ;;  %v2666_v10 = vpop.permute.xlu0 %2665  ;;  %v3572_v55 = vadd.f32 %v3556_v23, %v3540_v12  ;;  %v2777_v12 = vmul.f32 %v12518_v61, %v12837_v2  ;;  %v2781_v61 = vmul.f32 %v12530_v11, %v12837_v2 }
 0x6d8   : > { %2735 = vrot.lane.b32.xlu1 %v12816_v5, %s11557_s18  ;;  %3610 = vrot.lane.b32.xlu0 %v12828_v36, %s11553_s10 }
 0x6da   : > { %v3477_v20 = vpop.permute.xlu1 %3476  ;;  %v2674_v3 = vpop.permute.xlu0 %2673 }
 0x6db   : > { %v3521_v16 = vsel %vm2757_vm0, %v3429_v31, %v3477_v20  ;;  %v12858_v31 = vadd.f32 %v12276_v15, %v12286_v26 }
 0x6dc   : > { %v3553_v18 = vmul.f32 %v3521_v16, %v12839_v4  ;;  %2739 = vrot.lane.b32.xlu1 %v12676_v53, %s11557_s18 }
 0x6de   : > { %v3569_v17 = vadd.f32 %v3553_v18, %v3537_v58  ;;  %v3485_v6 = vpop.permute.xlu1 %3484  ;;  %v2714_v15 = vpop.permute.xlu0 %2713 }
 0x6df   : > { %v3525_v62 = vsel %vm2757_vm0, %v3437_v21, %v3485_v6  ;;  %v2760_v21 = vsel %vm2757_vm0, %v2666_v10, %v2714_v15 }
 0x6e0   : > { %v12863_v20 = vpack.c.bf16 %v3569_v17, %v3568_v48  ;;  %v3557_v18 = vmul.f32 %v3525_v62, %v12839_v4  ;;  %3588 = vrot.lane.b32.xlu1 %v12858_v31, %s11551_s20  ;;  %v2792_v23 = vmul.f32 %v2760_v21, %v12830_v27  ;;  %v2776_v62 = vmul.f32 %v12482_v49, %v12833_v39 }
 0x6e2   : > { %v3573_v16 = vadd.f32 %v3557_v18, %v3541_v63  ;;  %v2668_v40 = vpop.permute.xlu1 %2667  ;;  %v2722_v35 = vpop.permute.xlu0 %2721  ;;  %v12885_v18 = vadd.f32 %v2792_v23, %v2776_v62 }
 0x6e3   : > { %v2764_v48 = vsel %vm2757_vm0, %v2674_v3, %v2722_v35 }
 0x6e4   : > { %v12870_v26 = vpack.c.bf16 %v3573_v16, %v3572_v55  ;;  %3598 = vrot.lane.b32.xlu1 %v12828_v36, %s11552_s26  ;;  %v2796_v55 = vmul.f32 %v2764_v48, %v12830_v27 }
 0x6e6   : > { %v2676_v17 = vpop.permute.xlu1 %2675  ;;  %v3443_v9 = vpop.permute.xlu0 %3442 }
 0x6e8   : > { %3600 = vrot.lane.b32.xlu1 %v12858_v31, %s11552_s26 }
 0x6ea   : > { %v2716_v58 = vpop.permute.xlu1 %2715  ;;  %v3451_v10 = vpop.permute.xlu0 %3450 }
 0x6eb   : > { %v2761_v6 = vsel %vm2757_vm0, %v2668_v40, %v2716_v58  ;;  %v2780_v40 = vmul.f32 %v12502_v54, %v12833_v39 }
 0x6ec   : > { %v2793_v63 = vmul.f32 %v2761_v6, %v12839_v4 }
 0x6ed   : > { %v12898_v23 = vadd.f32 %v2796_v55, %v2780_v40  ;;  %v3544_v55 = vmul.f32 %v12540_v44, %v12833_v39  ;;  %v3545_v40 = vmul.f32 %v12578_v43, %v12837_v2  ;;  %v3549_v44 = vmul.f32 %v12592_v33, %v12837_v2 }
 0x6ee   : > { %v12888_v16 = vadd.f32 %v2793_v63, %v2777_v12  ;;  %v2724_v15 = vpop.permute.xlu1 %2723  ;;  %v3491_v21 = vpop.permute.xlu0 %3490  ;;  %v2784_v33 = vmul.f32 %v12604_v34, %v12833_v39 }
 0x6ef   : > { %v2765_v3 = vsel %vm2757_vm0, %v2676_v17, %v2724_v15  ;;  %v3528_v54 = vsel %vm2757_vm0, %v3443_v9, %v3491_v21 }
 0x6f0   : > { %v2797_v35 = vmul.f32 %v2765_v3, %v12839_v4  ;;  %v3560_v63 = vmul.f32 %v3528_v54, %v12830_v27 }
 0x6f2   : > { %v12900_v58 = vadd.f32 %v2797_v35, %v2781_v61  ;;  %v3445_v48 = vpop.permute.xlu1 %3444  ;;  %v3499_v6 = vpop.permute.xlu0 %3498  ;;  %v3576_v17 = vadd.f32 %v3560_v63, %v3544_v55 }
 0x6f3   : > { %v3532_v11 = vsel %vm2757_vm0, %v3451_v10, %v3499_v6  ;;  %v3548_v10 = vmul.f32 %v12555_v32, %v12833_v39 }
 0x6f4   : > { %v3564_v9 = vmul.f32 %v3532_v11, %v12830_v27 }
 0x6f6   : > { %v3453_v62 = vpop.permute.xlu1 %3452  ;;  %v2682_v12 = vpop.permute.xlu0 %2681 }
 0x6fa   : > { %v3493_v15 = vpop.permute.xlu1 %3492  ;;  %v12913_v35 = vpop.permute.xlu0 %2689 }
 0x6fb   : > { %v3529_v3 = vsel %vm2757_vm0, %v3445_v48, %v3493_v15  ;;  %v3580_v15 = vadd.f32 %v3564_v9, %v3548_v10 }
 0x6fc   : > { %v3561_v61 = vmul.f32 %v3529_v3, %v12839_v4 }
 0x6fe   : > { %v3577_v21 = vadd.f32 %v3561_v61, %v3545_v40  ;;  %v3501_v54 = vpop.permute.xlu1 %3500  ;;  %v2730_v6 = vpop.permute.xlu0 %2729 }
 0x6ff   : > { %v3533_v49 = vsel %vm2757_vm0, %v3453_v62, %v3501_v54  ;;  %v2768_v62 = vsel %vm2757_vm0, %v2682_v12, %v2730_v6 }
 0x700   : > { %v12919_v48 = vpack.c.bf16 %v3577_v21, %v3576_v17  ;;  %v3565_v43 = vmul.f32 %v3533_v49, %v12839_v4  ;;  %v2800_v32 = vmul.f32 %v2768_v62, %v12830_v27  ;;  %v2785_v49 = vmul.f32 %v12658_v7, %v12837_v2  ;;  %v12947_v62 = vld [vmem:[#allocation8 + $0x8] sm:$0xff] }
 0x702   : > { %v3581_v3 = vadd.f32 %v3565_v43, %v3549_v44  ;;  %v2684_v63 = vpop.permute.xlu1 %2683  ;;  %v3423_v11 = vpop.permute.xlu0 %3422  ;;  %v12936_v10 = vadd.f32 %v2800_v32, %v2784_v33 }
 0x704   : > { %v12924_v55 = vpack.c.bf16 %v3581_v3, %v3580_v15  ;;  %v12942_v3 = vld [vmem:[#allocation10] sm:$0xff] }
 0x706   : > { %v12926_v40 = vpop.permute.xlu1 %2691  ;;  %v3431_v61 = vpop.permute.xlu0 %3430 }
 0x70a   : > { %v2732_v17 = vpop.permute.xlu1 %2731  ;;  %v3471_v54 = vpop.permute.xlu0 %3470 }
 0x70b   : > { %v2769_v21 = vsel %vm2757_vm0, %v2684_v63, %v2732_v17  ;;  %v3518_v34 = vsel %vm2757_vm0, %v3423_v11, %v3471_v54  ;;  %v12945_v63 = vld [vmem:[#allocation8] sm:$0xff]  ;;  %v12949_v17 = vld [vmem:[#allocation10 + $0x8] sm:$0xff]  ;;  %v3535_v11 = vmul.f32 %v12711_v47, %v12947_v62 }
 0x70c   : > { %v2801_v9 = vmul.f32 %v2769_v21, %v12839_v4  ;;  %v3550_v32 = vmul.f32 %v3518_v34, %v12942_v3 }
 0x70e   : > { %v12938_v44 = vadd.f32 %v2801_v9, %v2785_v49  ;;  %v3425_v12 = vpop.permute.xlu1 %3424  ;;  %v3479_v6 = vpop.permute.xlu0 %3478  ;;  %v3534_v9 = vmul.f32 %v12674_v50, %v12945_v63  ;;  %v3539_v50 = vmul.f32 %v12720_v56, %v12947_v62 }
 0x70f   : > { %v3522_v33 = vsel %vm2757_vm0, %v3431_v61, %v3479_v6  ;;  %v3538_v61 = vmul.f32 %v12691_v28, %v12945_v63 }
 0x710   : > { %v3566_v22 = vadd.f32 %v3550_v32, %v3534_v9  ;;  %v3554_v30 = vmul.f32 %v3522_v33, %v12942_v3 }
 0x712   : > { %v3433_v15 = vpop.permute.xlu1 %3432  ;;  %v2662_v7 = vpop.permute.xlu0 %2661 }
 0x716   : > { %v3473_v21 = vpop.permute.xlu1 %3472  ;;  %v2670_v43 = vpop.permute.xlu0 %2669 }
 0x717   : > { %v3519_v49 = vsel %vm2757_vm0, %v3425_v12, %v3473_v21  ;;  %v3570_v21 = vadd.f32 %v3554_v30, %v3538_v61  ;;  %v2774_v61 = vmul.f32 %v12729_v1, %v12945_v63  ;;  %v2778_v1 = vmul.f32 %v12735_v42, %v12945_v63 }
 0x718   : > { %v3551_v54 = vmul.f32 %v3519_v49, %v12949_v17 }
 0x71a   : > { %v3567_v25 = vadd.f32 %v3551_v54, %v3535_v11  ;;  %v3481_v29 = vpop.permute.xlu1 %3480  ;;  %v2710_v47 = vpop.permute.xlu0 %2709  ;;  %v4193_v11 = vsel %vm4182_vm1, %v12863_v20, 0 }
 0x71b   : > { %v3523_v34 = vsel %vm2757_vm0, %v3433_v15, %v3481_v29  ;;  %v2758_v56 = vsel %vm2757_vm0, %v2662_v7, %v2710_v47  ;;  %v2775_v7 = vmul.f32 %v12747_v57, %v12947_v62  ;;  %v2779_v57 = vmul.f32 %v12755_v51, %v12947_v62 }
 0x71c   : > { %v4174_v12 = vpack.c.bf16 %v3567_v25, %v3566_v22  ;;  %v3555_v6 = vmul.f32 %v3523_v34, %v12949_v17  ;;  %v2790_v15 = vmul.f32 %v2758_v56, %v12942_v3 }
 0x71e   : > { %v3571_v49 = vadd.f32 %v3555_v6, %v3539_v50  ;;  %v2664_v32 = vpop.permute.xlu1 %2663  ;;  %10285 = vmatprep.subr.msk.bf16.mxu0 %vm4182_vm1, %v4174_v12  ;;  %v4190_v33 = vsel %vm4182_vm1, %v4174_v12, 0  ;;  %v2718_v22 = vpop.permute.xlu0 %2717  ;;  %v2806_v6 = vadd.f32 %v2790_v15, %v2774_v61  ;;  %v3542_v61 = vmul.f32 %v12761_v38, %v12945_v63 }
 0x71f   : > { %10054 = vmatpush3.bf16.xpose.msra.mxu0 %v4190_v33  ;;  %v2762_v54 = vsel %vm2757_vm0, %v2670_v43, %v2718_v22  ;;  %v3547_v38 = vmul.f32 %v12790_v60, %v12947_v62 }
 0x720   : > { %v4176_v29 = vpack.c.bf16 %v3571_v49, %v3570_v21  ;;  %10286 = vmatprep.subr.msk.bf16.mxu0 %vm4182_vm1, %v12863_v20  ;;  %v2794_v47 = vmul.f32 %v2762_v54, %v12942_v3  ;;  %v4254_v20 = vsel %vm4182_vm1, %v12870_v26, 0 }
 0x722   : > { %v2672_v25 = vpop.permute.xlu1 %2671  ;;  %10287 = vmatprep.subr.msk.bf16.mxu1 %vm4182_vm1, %v4176_v29  ;;  %v4251_v28 = vsel %vm4182_vm1, %v4176_v29, 0  ;;  %v3439_v30 = vpop.permute.xlu0 %3438  ;;  %v2810_v22 = vadd.f32 %v2794_v47, %v2778_v1 }
 0x723   : > { %10062 = vmatpush3.bf16.xpose.msra.mxu1 %v4251_v28 }
 0x724   : > { %10288 = vmatprep.subr.msk.bf16.mxu1 %vm4182_vm1, %v12870_v26  ;;  %v14553_v26 = vpack.c.bf16 %v12888_v16, %v12885_v18 }
 0x726   : > { %v2712_v9 = vpop.permute.xlu1 %2711  ;;  %v3447_v50 = vpop.permute.xlu0 %3446 }
 0x727   : > { %v2759_v34 = vsel %vm2757_vm0, %v2664_v32, %v2712_v9  ;;  %10056 = vmatpush3.bf16.xpose.msra.mxu0 %v4193_v11  ;;  %v14554_v9 = vpack.c.bf16 %v12900_v58, %v12898_v23 }
 0x728   : > { %v2791_v12 = vmul.f32 %v2759_v34, %v12949_v17 }
 0x72a   : > { %v2807_v21 = vadd.f32 %v2791_v12, %v2775_v7  ;;  %v2720_v49 = vpop.permute.xlu1 %2719  ;;  %v3487_v29 = vpop.permute.xlu0 %3486  ;;  %v3543_v7 = vmul.f32 %v12782_v41, %v12947_v62 }
 0x72b   : > { %v2763_v43 = vsel %vm2757_vm0, %v2672_v25, %v2720_v49  ;;  %10064 = vmatpush3.bf16.xpose.msra.mxu1 %v4254_v20  ;;  %v3526_v51 = vsel %vm2757_vm0, %v3439_v30, %v3487_v29 }
 0x72c   : > { %v4166_v32 = vpack.c.bf16 %v2807_v21, %v2806_v6  ;;  %v2795_v33 = vmul.f32 %v2763_v43, %v12949_v17  ;;  %v3558_v54 = vmul.f32 %v3526_v51, %v12942_v3 }
 0x72e   : > { %v2811_v28 = vadd.f32 %v2795_v33, %v2779_v57  ;;  %v3441_v56 = vpop.permute.xlu1 %3440  ;;  %10057 = vmatprep.mubr.msk.bf16.mxu0 %vm4182_vm1, %v4166_v32  ;;  %v3495_v15 = vpop.permute.xlu0 %3494  ;;  %v3574_v23 = vadd.f32 %v3558_v54, %v3542_v61 }
 0x72f   : > { %10058 = vmatmul.mubr.msk.bf16.vlgmr.msra.gmra.mrb[8].mxu0 %vm4182_vm1, %v14553_v26  ;;  %v3530_v18 = vsel %vm2757_vm0, %v3447_v50, %v3495_v15  ;;  %v3546_v50 = vmul.f32 %v12771_v59, %v12945_v63  ;;  %v4315_v26 = vsel %vm4182_vm1, %v12919_v48, 0 }
 0x730   : > { %v4168_v25 = vpack.c.bf16 %v2811_v28, %v2810_v22  ;;  %v3562_v58 = vmul.f32 %v3530_v18, %v12942_v3 }
 0x732   : > { %v3449_v42 = vpop.permute.xlu1 %3448  ;;  %10065 = vmatprep.mubr.msk.bf16.mxu1 %vm4182_vm1, %v4168_v25  ;;  %v2678_v11 = vpop.permute.xlu0 %2677  ;;  %v3578_v43 = vadd.f32 %v3562_v58, %v3546_v50 }
 0x733   : > { %10066 = vmatmul.mubr.msk.bf16.vlgmr.msra.gmra.mrb[8].mxu1 %vm4182_vm1, %v14554_v9  ;;  %v2783_v9 = vmul.f32 %v12810_v46, %v12947_v62 }
 0x736   : > { %v3489_v34 = vpop.permute.xlu1 %3488  ;;  %v2686_v12 = vpop.permute.xlu0 %2685 }
 0x737   : > { %v3527_v16 = vsel %vm2757_vm0, %v3441_v56, %v3489_v34 }
 0x738   : > { %v3559_v30 = vmul.f32 %v3527_v16, %v12949_v17 }
 0x73a   : > { %v3575_v6 = vadd.f32 %v3559_v30, %v3543_v7  ;;  %v3497_v47 = vpop.permute.xlu1 %3496  ;;  %v2726_v41 = vpop.permute.xlu0 %2725  ;;  %v2787_v30 = vmul.f32 %v12816_v5, %v12947_v62 }
 0x73b   : > { %v3531_v21 = vsel %vm2757_vm0, %v3449_v42, %v3497_v47  ;;  %v2766_v22 = vsel %vm2757_vm0, %v2678_v11, %v2726_v41  ;;  %v2782_v42 = vmul.f32 %v12796_v0, %v12945_v63  ;;  %v2786_v0 = vmul.f32 %v12802_v8, %v12945_v63 }
 0x73c   : > { %v4178_v49 = vpack.c.bf16 %v3575_v6, %v3574_v23  ;;  %v3563_v20 = vmul.f32 %v3531_v21, %v12949_v17  ;;  %v2798_v28 = vmul.f32 %v2766_v22, %v12942_v3  ;;  %v14555_v6 = vpack.c.bf16 %v12938_v44, %v12936_v10 }
 0x73d   : > { %v2788_v8 = vmul.f32 %v12632_v52, %v12833_v39  ;;  %v2789_v63 = vmul.f32 %v12676_v53, %v12837_v2 }
 0x73e   : > { %v3579_v1 = vadd.f32 %v3563_v20, %v3547_v38  ;;  %v2680_v32 = vpop.permute.xlu1 %2679  ;;  %10289 = vmatprep.subr.msk.bf16.mxu0 %vm4182_vm1, %v4178_v49  ;;  %v4312_v57 = vsel %vm4182_vm1, %v4178_v49, 0  ;;  %v2734_v59 = vpop.permute.xlu0 %2733  ;;  %v2814_v54 = vadd.f32 %v2798_v28, %v2782_v42 }
 0x73f   : > { %10070 = vmatpush3.bf16.xpose.msra.mxu0 %v4312_v57  ;;  %v2770_v25 = vsel %vm2757_vm0, %v2686_v12, %v2734_v59 }
 0x740   : > { %v4180_v33 = vpack.c.bf16 %v3579_v1, %v3578_v43  ;;  %10290 = vmatprep.subr.msk.bf16.mxu0 %vm4182_vm1, %v12919_v48  ;;  %v2802_v34 = vmul.f32 %v2770_v25, %v12942_v3  ;;  %v4376_v48 = vsel %vm4182_vm1, %v12924_v55, 0 }
 0x742   : > { %v2688_v29 = vpop.permute.xlu1 %2687  ;;  %10291 = vmatprep.subr.msk.bf16.mxu1 %vm4182_vm1, %v4180_v33  ;;  %v4373_v60 = vsel %vm4182_vm1, %v4180_v33, 0  ;;  %v2738_v51 = vpop.permute.xlu0 %2737  ;;  %v2818_v12 = vadd.f32 %v2802_v34, %v2786_v0 }
 0x743   : > { %10078 = vmatpush3.bf16.xpose.msra.mxu1 %v4373_v60  ;;  %v2772_v61 = vsel %vm2757_vm0, %v12913_v35, %v2738_v51 }
 0x744   : > { %10292 = vmatprep.subr.msk.bf16.mxu1 %vm4182_vm1, %v12924_v55  ;;  %v2804_v23 = vmul.f32 %v2772_v61, %v12830_v27 }
 0x746   : > { %v2728_v56 = vpop.permute.xlu1 %2727  ;;  %v2820_v62 = vadd.f32 %v2804_v23, %v2788_v8  ;;  %v13145_v34 = vpop.permute.xlu0 %3586 }
 0x747   : > { %v2767_v15 = vsel %vm2757_vm0, %v2680_v32, %v2728_v56  ;;  %10072 = vmatpush3.bf16.xpose.msra.mxu0 %v4315_v26 }
 0x748   : > { %v2799_v11 = vmul.f32 %v2767_v15, %v12949_v17 }
 0x74a   : > { %v2815_v18 = vadd.f32 %v2799_v11, %v2783_v9  ;;  %v2736_v16 = vpop.permute.xlu1 %2735 }
 0x74b   : > { %v2771_v7 = vsel %vm2757_vm0, %v2688_v29, %v2736_v16  ;;  %10080 = vmatpush3.bf16.xpose.msra.mxu1 %v4376_v48  ;;  %v13147_v16 = vpop.permute.xlu0 %3610 }
 0x74c   : > { %v4170_v46 = vpack.c.bf16 %v2815_v18, %v2814_v54  ;;  %v2803_v3 = vmul.f32 %v2771_v7, %v12949_v17 }
 0x74e   : > { %v2819_v58 = vadd.f32 %v2803_v3, %v2787_v30  ;;  %v2740_v55 = vpop.permute.xlu1 %2739  ;;  %10073 = vmatprep.mubr.msk.bf16.mxu0 %vm4182_vm1, %v4170_v46 }
 0x74f   : > { %v2773_v35 = vsel %vm2757_vm0, %v12926_v40, %v2740_v55  ;;  %10074 = vmatmul.mubr.msk.bf16.vlgmr.msra.gmra.mrb[12].mxu0 %vm4182_vm1, %v14555_v6 }
 0x750   : > { %v4172_v5 = vpack.c.bf16 %v2819_v58, %v2818_v12  ;;  %v2805_v27 = vmul.f32 %v2773_v35, %v12839_v4 }
 0x752   : > { %v2821_v17 = vadd.f32 %v2805_v27, %v2789_v63  ;;  %10081 = vmatprep.mubr.msk.bf16.mxu1 %vm4182_vm1, %v4172_v5  ;;  %v13143_v54 = vpop.permute.xlu1 %3588 }
 0x754   : > { %v4173_v47 = vpack.c.bf16 %v2821_v17, %v2820_v62 }
 0x756   : > { %10082 = vmatmul.mubr.msk.bf16.vlgmr.msra.gmra.mrb[12].mxu1 %vm4182_vm1, %v4173_v47  ;;  %v3599_v18 = vpop.permute.xlu1 %3598 }
 0x75a   : > { %v13149_v48 = vpop.permute.xlu1 %3600 }
 0x802   : > { %v13065_v40 = vpop.f32.mrb[8].mxu0 }
 0x803   : > { %v13067_v10 = vpop.f32.mrb[9].mxu0  ;;  %v4433_v52 = vsel %vm4182_vm1, %v13065_v40, -inf }
 0x804   : > { %4434 = vmax.xlane.f32.xlu0 %v4433_v52  ;;  %v13071_v39 = vpop.f32.mrb[10].mxu0  ;;  %v4427_v20 = vsel %vm4182_vm1, %v13067_v10, -inf }
 0x805   : > { %v13073_v53 = vpop.f32.mrb[11].mxu0  ;;  %v4436_v2 = vsel %vm4182_vm1, %v13071_v39, -inf }
 0x806   : > { %4437 = vmax.xlane.f32.xlu1 %v4436_v2  ;;  %v13077_v4 = vpop.f32.mrb[8].mxu1  ;;  %v4430_v41 = vsel %vm4182_vm1, %v13073_v53, -inf }
 0x807   : > { %v13079_v44 = vpop.f32.mrb[9].mxu1  ;;  %v4445_v21 = vsel %vm4182_vm1, %v13077_v4, -inf }
 0x808   : > { %4446 = vmax.xlane.f32.xlu0 %v4445_v21  ;;  %v13083_v50 = vpop.f32.mrb[10].mxu1  ;;  %v4439_v43 = vsel %vm4182_vm1, %v13079_v44, -inf }
 0x809   : > { %v13085_v49 = vpop.f32.mrb[11].mxu1  ;;  %v4448_v38 = vsel %vm4182_vm1, %v13083_v50, -inf }
 0x80a   : > { %4449 = vmax.xlane.f32.xlu1 %v4448_v38  ;;  %v4442_v1 = vsel %vm4182_vm1, %v13085_v49, -inf }
 0x80c   : > { %4428 = vmax.xlane.f32.xlu0 %v4427_v20 }
 0x80e   : > { %4431 = vmax.xlane.f32.xlu1 %v4430_v41 }
 0x810   : > { %4440 = vmax.xlane.f32.xlu0 %v4439_v43 }
 0x814   : > { %4443 = vmax.xlane.f32.xlu0 %v4442_v1 }
 0x822   : > { %v13097_v32 = vpop.f32.mrb[12].mxu0 }
 0x823   : > { %v13099_v57 = vpop.f32.mrb[13].mxu0  ;;  %v4457_v33 = vsel %vm4182_vm1, %v13097_v32, -inf }
 0x824   : > { %4458 = vmax.xlane.f32.xlu0 %v4457_v33  ;;  %v13103_v59 = vpop.f32.mrb[14].mxu0  ;;  %v4451_v42 = vsel %vm4182_vm1, %v13099_v57, -inf }
 0x825   : > { %v13105_v29 = vpop.f32.mrb[15].mxu0  ;;  %v4460_v60 = vsel %vm4182_vm1, %v13103_v59, -inf }
 0x826   : > { %4461 = vmax.xlane.f32.xlu1 %v4460_v60  ;;  %v4454_v51 = vsel %vm4182_vm1, %v13105_v29, -inf  ;;  %v3623_v60 = vcombine.high %v12828_v36, %v3599_v18 }
 0x829   : > { %v13109_v22 = vpop.f32.mrb[12].mxu1 }
 0x82a   : > { %v13111_v28 = vpop.f32.mrb[13].mxu1  ;;  %v4469_v56 = vsel %vm4182_vm1, %v13109_v22, -inf }
 0x82b   : > { %4470 = vmax.xlane.f32.xlu0 %v4469_v56  ;;  %v13115_v26 = vpop.f32.mrb[14].mxu1  ;;  %v4463_v9 = vsel %vm4182_vm1, %v13111_v28, -inf  ;;  %v3638_v56 = vcombine.low %v13145_v34, %v13147_v16 }
 0x82c   : > { %v13117_v25 = vpop.f32.mrb[15].mxu1  ;;  %v4472_v15 = vsel %vm4182_vm1, %v13115_v26, -inf }
 0x82d   : > { %4473 = vmax.xlane.f32.xlu1 %v4472_v15  ;;  %v4466_v11 = vsel %vm4182_vm1, %v13117_v25, -inf }
 0x82f   : > { %4452 = vmax.xlane.f32.xlu0 %v4451_v42 }
 0x831   : > { %4455 = vmax.xlane.f32.xlu1 %v4454_v51  ;;  %v3639_v51 = vcombine.high %v13145_v34, %v13147_v16 }
 0x833   : > { %4464 = vmax.xlane.f32.xlu0 %v4463_v9 }
 0x835   : > { %4467 = vmax.xlane.f32.xlu1 %v4466_v11 }
 0x846   : > { %3612 = vrot.lane.b32.xlu1 %v12858_v31, %s11553_s10 }
 0x849   : > { %3590 = vrot.lane.b32.xlu0 %v12279_v19, %s11551_s20 }
 0x84a   : > { %3592 = vrot.lane.b32.xlu1 %v12284_v24, %s11551_s20 }
 0x84d   : > { %3602 = vrot.lane.b32.xlu0 %v12279_v19, %s11552_s26 }
 0x84e   : > { %3604 = vrot.lane.b32.xlu1 %v12284_v24, %s11552_s26 }
 0x851   : > { %3614 = vrot.lane.b32.xlu0 %v12279_v19, %s11553_s10 }
 0x852   : > { %3616 = vrot.lane.b32.xlu1 %v12284_v24, %s11553_s10 }
 0x891   : > { %v4435_v61 = vpop.xlane.xlu0 %4434 }
 0x892   : > { %v4477_v7 = vsub.f32 %v13065_v40, %v4435_v61 }
 0x893   : > { %v4438_v0 = vpop.xlane.xlu1 %4437 }
 0x894   : > { %v4495_v46 = vmul.f32 1.442695, %v4477_v7  ;;  %v4478_v30 = vsub.f32 %v13071_v39, %v4438_v0  ;;  %v3653_v7 = vrot.slane %v3639_v51, %v12361_v37 }
 0x895   : > { %v4447_v3 = vpop.xlane.xlu0 %4446 }
 0x896   : > { %10745 = vpow2.f32 %v4495_v46  ;;  %v4497_v12 = vmul.f32 1.442695, %v4478_v30  ;;  %v4481_v23 = vsub.f32 %v13077_v4, %v4447_v3 }
 0x897   : > { %v4450_v58 = vpop.xlane.xlu1 %4449 }
 0x898   : > { %10747 = vpow2.f32 %v4497_v12  ;;  %v4503_v55 = vmul.f32 1.442695, %v4481_v23  ;;  %v4482_v35 = vsub.f32 %v13083_v50, %v4450_v58 }
 0x899   : > { %v4429_v6 = vpop.xlane.xlu0 %4428 }
 0x89a   : > { %10749 = vpow2.f32 %v4503_v55  ;;  %v4505_v8 = vmul.f32 1.442695, %v4482_v35  ;;  %v4475_v5 = vsub.f32 %v13067_v10, %v4429_v6 }
 0x89b   : > { %v4432_v63 = vpop.xlane.xlu1 %4431 }
 0x89c   : > { %10751 = vpow2.f32 %v4505_v8  ;;  %v4491_v27 = vmul.f32 1.442695, %v4475_v5  ;;  %v4476_v62 = vsub.f32 %v13073_v53, %v4432_v63 }
 0x89d   : > { %v4441_v17 = vpop.xlane.xlu0 %4440 }
 0x89e   : > { %10753 = vpow2.f32 %v4491_v27  ;;  %v4493_v47 = vmul.f32 1.442695, %v4476_v62  ;;  %v4479_v40 = vsub.f32 %v13079_v44, %v4441_v17 }
 0x8a0   : > { %v13158_v52 = vpop.eup %10745  ;;  %10755 = vpow2.f32 %v4493_v47  ;;  %v4499_v39 = vmul.f32 1.442695, %v4479_v40 }
 0x8a1   : > { %v4444_v2 = vpop.xlane.xlu0 %4443  ;;  %v4529_v4 = vsel %vm4182_vm1, %v13158_v52, 0.0 }
 0x8a2   : > { %v13162_v21 = vpop.eup %10747  ;;  %10757 = vpow2.f32 %v4499_v39  ;;  %v4480_v10 = vsub.f32 %v13085_v49, %v4444_v2  ;;  %4530 = vadd.xlane.f32.xlu0 %v4529_v4  ;;  %v3622_v49 = vcombine.low %v12828_v36, %v3599_v18  ;;  %v3637_v36 = vrot.slane %v3623_v60, %v12361_v37 }
 0x8a3   : > { %v4532_v53 = vsel %vm4182_vm1, %v13162_v21, 0.0  ;;  %v3646_v18 = vrot.slane %v3638_v56, %v12361_v37 }
 0x8a4   : > { %v13167_v50 = vpop.eup %10749  ;;  %v4501_v44 = vmul.f32 1.442695, %v4480_v10  ;;  %4533 = vadd.xlane.f32.xlu1 %v4532_v53  ;;  %v3630_v9 = vrot.slane %v3622_v49, %v12361_v37  ;;  %v3670_v16 = vcombine.low %v3637_v36, %v3653_v7  ;;  %v3671_v3 = vcombine.high %v3637_v36, %v3653_v7 }
 0x8a5   : > { %v4541_v38 = vsel %vm4182_vm1, %v13167_v50, 0.0 }
 0x8a6   : > { %v13171_v20 = vpop.eup %10751  ;;  %10759 = vpow2.f32 %v4501_v44  ;;  %4542 = vadd.xlane.f32.xlu0 %v4541_v38  ;;  %v3654_v0 = vcombine.low %v3630_v9, %v3646_v18  ;;  %v3655_v46 = vcombine.high %v3630_v9, %v3646_v18  ;;  %v3678_v8 = vrot.slane %v3670_v16, %v12368_v45 }
 0x8a7   : > { %v4544_v41 = vsel %vm4182_vm1, %v13171_v20, 0.0  ;;  %v3685_v5 = vrot.slane %v3671_v3, %v12368_v45 }
 0x8a8   : > { %v13175_v43 = vpop.eup %10753  ;;  %4545 = vadd.xlane.f32.xlu1 %v4544_v41  ;;  %v3662_v35 = vrot.slane %v3654_v0, %v12368_v45  ;;  %v3669_v6 = vrot.slane %v3655_v46, %v12368_v45  ;;  %v3690_v46 = vcombine.low %v12858_v31, %v13149_v48 }
 0x8a9   : > { %v4523_v1 = vsel %vm4182_vm1, %v13175_v43, 0.0  ;;  %v3910_v47 = vcombine.low %v3678_v8, %v3685_v5  ;;  %v9618_v40 = vcombine.high %v3678_v8, %v3685_v5 }
 0x8aa   : > { %v13180_v33 = vpop.eup %10755  ;;  %4524 = vadd.xlane.f32.xlu0 %v4523_v1  ;;  %v3894_v62 = vcombine.low %v3662_v35, %v3669_v6  ;;  %v9617_v17 = vcombine.high %v3662_v35, %v3669_v6 }
 0x8ab   : > { %v4526_v15 = vsel %vm4182_vm1, %v13180_v33, 0.0  ;;  %v3917_v49 = vrot.slane %v3910_v47, %v12361_v37 }
 0x8ac   : > { %v13187_v42 = vpop.eup %10757  ;;  %4527 = vadd.xlane.f32.xlu1 %v4526_v15  ;;  %v3901_v44 = vrot.slane %v3894_v62, %v12361_v37  ;;  %v3909_v41 = vrot.slane %v9617_v17, %v12361_v37 }
 0x8ad   : > { %v4535_v11 = vsel %vm4182_vm1, %v13187_v42, 0.0 }
 0x8ae   : > { %4536 = vadd.xlane.f32.xlu0 %v4535_v11  ;;  %v3926_v36 = vcombine.low %v3901_v44, %v3909_v41  ;;  %v3927_v16 = vcombine.high %v3901_v44, %v3909_v41 }
 0x8b0   : > { %v13196_v61 = vpop.eup %10759  ;;  %v13247_v62 = vrot.slane %v3927_v16, %v12368_v45 }
 0x8b1   : > { %v4459_v30 = vpop.xlane.xlu0 %4458  ;;  %v4538_v34 = vsel %vm4182_vm1, %v13196_v61, 0.0 }
 0x8b2   : > { %v4485_v12 = vsub.f32 %v13097_v32, %v4459_v30  ;;  %4539 = vadd.xlane.f32.xlu1 %v4538_v34 }
 0x8b3   : > { %v4462_v23 = vpop.xlane.xlu1 %4461 }
 0x8b4   : > { %v4511_v58 = vmul.f32 1.442695, %v4485_v12  ;;  %v4486_v55 = vsub.f32 %v13103_v59, %v4462_v23  ;;  %v13230_v12 = vrot.slane %v3926_v36, %v12368_v45 }
 0x8b6   : > { %10761 = vpow2.f32 %v4511_v58  ;;  %v4513_v63 = vmul.f32 1.442695, %v4486_v55 }
 0x8b8   : > { %10763 = vpow2.f32 %v4513_v63  ;;  %v4471_v27 = vpop.xlane.xlu0 %4470 }
 0x8b9   : > { %v4489_v32 = vsub.f32 %v13109_v22, %v4471_v27  ;;  %v3925_v22 = vrot.slane %v9618_v40, %v12361_v37 }
 0x8ba   : > { %v4474_v39 = vpop.xlane.xlu1 %4473 }
 0x8bb   : > { %v4519_v59 = vmul.f32 1.442695, %v4489_v32  ;;  %v4490_v2 = vsub.f32 %v13115_v26, %v4474_v39  ;;  %v3942_v18 = vcombine.low %v3917_v49, %v3925_v22  ;;  %v3943_v23 = vcombine.high %v3917_v49, %v3925_v22 }
 0x8bc   : > { %v4453_v4 = vpop.xlane.xlu0 %4452 }
 0x8bd   : > { %v4521_v10 = vmul.f32 1.442695, %v4490_v2  ;;  %v4483_v53 = vsub.f32 %v13099_v57, %v4453_v4  ;;  %10765 = vpow2.f32 %v4519_v59  ;;  %v13255_v40 = vrot.slane %v3943_v23, %v12368_v45 }
 0x8be   : > { %v4456_v38 = vpop.xlane.xlu1 %4455 }
 0x8bf   : > { %10767 = vpow2.f32 %v4521_v10  ;;  %v4507_v1 = vmul.f32 1.442695, %v4483_v53  ;;  %v4484_v60 = vsub.f32 %v13105_v29, %v4456_v38 }
 0x8c0   : > { %v13215_v56 = vpop.eup %10761  ;;  %v4465_v26 = vpop.xlane.xlu0 %4464 }
 0x8c1   : > { %10769 = vpow2.f32 %v4507_v1  ;;  %v4509_v15 = vmul.f32 1.442695, %v4484_v60  ;;  %v4487_v57 = vsub.f32 %v13111_v28, %v4465_v26  ;;  %v4553_v51 = vsel %vm4182_vm1, %v13215_v56, 0.0 }
 0x8c2   : > { %v13220_v9 = vpop.eup %10763  ;;  %v4468_v11 = vpop.xlane.xlu1 %4467  ;;  %4554 = vadd.xlane.f32.xlu0 %v4553_v51  ;;  %v3691_v28 = vcombine.high %v12858_v31, %v13149_v48  ;;  %v3698_v31 = vrot.slane %v3690_v46, %v12361_v37 }
 0x8c3   : > { %10771 = vpow2.f32 %v4509_v15  ;;  %v4515_v7 = vmul.f32 1.442695, %v4487_v57  ;;  %v4488_v29 = vsub.f32 %v13117_v25, %v4468_v11  ;;  %v4556_v0 = vsel %vm4182_vm1, %v13220_v9, 0.0 }
 0x8c4   : > { %4557 = vadd.xlane.f32.xlu1 %v4556_v0  ;;  %v3591_v30 = vpop.permute.xlu0 %3590  ;;  %v13233_v25 = vrot.slane %v3942_v18, %v12368_v45  ;;  %v3705_v48 = vrot.slane %v3691_v28, %v12361_v37 }
 0x8c5   : > { %10773 = vpow2.f32 %v4515_v7  ;;  %v4517_v34 = vmul.f32 1.442695, %v4488_v29 }
 0x8c6   : > { %v3613_v3 = vpop.permute.xlu1 %3612  ;;  %v3958_v17 = vcombine.low %v13230_v12, %v13233_v25  ;;  %v3959_v47 = vcombine.high %v13230_v12, %v13233_v25 }
 0x8c7   : > { %v3706_v58 = vcombine.low %v13143_v54, %v3613_v3  ;;  %v3707_v55 = vcombine.high %v13143_v54, %v3613_v3  ;;  %v13237_v35 = vpop.eup %10765  ;;  %10775 = vpow2.f32 %v4517_v34 }
 0x8c8   : > { %v3603_v6 = vpop.permute.xlu0 %3602  ;;  %v13266_v41 = vsel %vm4182_vm1, %v13237_v35, 0.0 }
 0x8c9   : > { %v13241_v8 = vpop.eup %10767  ;;  %v3714_v5 = vrot.slane %v3706_v58, %v12361_v37  ;;  %v3721_v63 = vrot.slane %v3707_v55, %v12361_v37  ;;  %v3758_v27 = vcombine.low %v12279_v19, %v3603_v6  ;;  %v3759_v54 = vcombine.high %v12279_v19, %v3603_v6 }
 0x8ca   : > { %v3593_v32 = vpop.permute.xlu1 %3592  ;;  %v4568_v38 = vsel %vm4182_vm1, %v13241_v8, 0.0 }
 0x8cb   : > { %v13257_v39 = vpop.eup %10769  ;;  %v3722_v59 = vcombine.low %v3698_v31, %v3714_v5  ;;  %v3723_v2 = vcombine.high %v3698_v31, %v3714_v5  ;;  %v3738_v4 = vcombine.low %v3705_v48, %v3721_v63  ;;  %v3739_v10 = vcombine.high %v3705_v48, %v3721_v63 }
 0x8cc   : > { %v3766_v53 = vrot.slane %v3758_v27, %v12361_v37  ;;  %v3615_v44 = vpop.permute.xlu0 %3614  ;;  %v4547_v19 = vsel %vm4182_vm1, %v13257_v39, 0.0  ;;  %v3773_v15 = vrot.slane %v3759_v54, %v12361_v37 }
 0x8cd   : > { %v13268_v49 = vpop.eup %10771  ;;  %v3730_v22 = vrot.slane %v3722_v59, %v12368_v45  ;;  %v3737_v1 = vrot.slane %v3723_v2, %v12368_v45  ;;  %v3746_v60 = vrot.slane %v3738_v4, %v12368_v45  ;;  %v3753_v26 = vrot.slane %v3739_v10, %v12368_v45  ;;  %4548 = vadd.xlane.f32.xlu0 %v4547_v19 }
 0x8ce   : > { %v3774_v57 = vcombine.low %v3591_v30, %v3615_v44  ;;  %v3775_v51 = vcombine.high %v3591_v30, %v3615_v44  ;;  %v3605_v11 = vpop.permute.xlu1 %3604  ;;  %v4550_v36 = vsel %vm4182_vm1, %v13268_v49, 0.0 }
 0x8cf   : > { %v13277_v18 = vpop.eup %10773  ;;  %v3962_v7 = vcombine.low %v3730_v22, %v3737_v1  ;;  %v9619_v29 = vcombine.high %v3730_v22, %v3737_v1  ;;  %v3978_v0 = vcombine.low %v3746_v60, %v3753_v26  ;;  %v9620_v46 = vcombine.high %v3746_v60, %v3753_v26  ;;  %4551 = vadd.xlane.f32.xlu1 %v4550_v36 }
 0x8d0   : > { %v3782_v28 = vrot.slane %v3774_v57, %v12361_v37  ;;  %v3789_v34 = vrot.slane %v3775_v51, %v12361_v37  ;;  %v3826_v16 = vcombine.low %v12284_v24, %v3605_v11  ;;  %v3827_v3 = vcombine.high %v12284_v24, %v3605_v11 }
 0x8d1   : > { %v4559_v30 = vsel %vm4182_vm1, %v13277_v18, 0.0  ;;  %v13286_v23 = vrot.slane %v3962_v7, %v12361_v37  ;;  %v13289_v58 = vrot.slane %v9619_v29, %v12361_v37  ;;  %v13292_v55 = vrot.slane %v3978_v0, %v12361_v37  ;;  %v13294_v31 = vpop.eup %10775 }
 0x8d2   : > { %v3790_v48 = vcombine.low %v3766_v53, %v3782_v28  ;;  %v3791_v6 = vcombine.high %v3766_v53, %v3782_v28  ;;  %v3806_v5 = vcombine.low %v3773_v15, %v3789_v34  ;;  %v3807_v63 = vcombine.high %v3773_v15, %v3789_v34  ;;  %4560 = vadd.xlane.f32.xlu0 %v4559_v30  ;;  %v3617_v24 = vpop.permute.xlu1 %3616 }
 0x8d3   : > { %v3834_v27 = vrot.slane %v3826_v16, %v12361_v37  ;;  %v3841_v54 = vrot.slane %v3827_v3, %v12361_v37  ;;  %v3842_v59 = vcombine.low %v3593_v32, %v3617_v24  ;;  %v3843_v2 = vcombine.high %v3593_v32, %v3617_v24  ;;  %4569 = vadd.xlane.f32.xlu1 %v4568_v38 }
 0x8d4   : > { %v3798_v4 = vrot.slane %v3790_v48, %v12368_v45  ;;  %v3805_v10 = vrot.slane %v3791_v6, %v12368_v45  ;;  %v3814_v44 = vrot.slane %v3806_v5, %v12368_v45  ;;  %v3821_v19 = vrot.slane %v3807_v63, %v12368_v45 }
 0x8d5   : > { %v3850_v53 = vrot.slane %v3842_v59, %v12361_v37  ;;  %v3857_v22 = vrot.slane %v3843_v2, %v12361_v37  ;;  %v4562_v1 = vsel %vm4182_vm1, %v13294_v31, 0.0  ;;  %v3993_v60 = vrot.slane %v9620_v46, %v12361_v37 }
 0x8d6   : > { %v4030_v26 = vcombine.low %v3798_v4, %v3805_v10  ;;  %v9621_v32 = vcombine.high %v3798_v4, %v3805_v10  ;;  %v4046_v38 = vcombine.low %v3814_v44, %v3821_v19  ;;  %v9622_v15 = vcombine.high %v3814_v44, %v3821_v19  ;;  %4563 = vadd.xlane.f32.xlu0 %v4562_v1 }
 0x8d7   : > { %v3858_v57 = vcombine.low %v3834_v27, %v3850_v53  ;;  %v3859_v51 = vcombine.high %v3834_v27, %v3850_v53  ;;  %v3874_v11 = vcombine.low %v3841_v54, %v3857_v22  ;;  %v3875_v36 = vcombine.high %v3841_v54, %v3857_v22 }
 0x8d8   : > { %v3994_v7 = vcombine.low %v13286_v23, %v13289_v58  ;;  %v4010_v29 = vcombine.low %v13292_v55, %v3993_v60  ;;  %v4037_v0 = vrot.slane %v4030_v26, %v12361_v37  ;;  %v4045_v28 = vrot.slane %v9621_v32, %v12361_v37 }
 0x8d9   : > { %v3866_v46 = vrot.slane %v3858_v57, %v12368_v45  ;;  %v3873_v34 = vrot.slane %v3859_v51, %v12368_v45  ;;  %v3882_v16 = vrot.slane %v3874_v11, %v12368_v45  ;;  %v3889_v3 = vrot.slane %v3875_v36, %v12368_v45 }
 0x8da   : > { %4566 = vadd.xlane.f32.xlu0 %v13266_v41  ;;  %v4002_v30 = vrot.slane %v3994_v7, %v12368_v45  ;;  %v4018_v48 = vrot.slane %v4010_v29, %v12368_v45  ;;  %v4053_v6 = vrot.slane %v4046_v38, %v12361_v37  ;;  %v4061_v5 = vrot.slane %v9622_v15, %v12361_v37 }
 0x8db   : > { %v4098_v63 = vcombine.low %v3866_v46, %v3873_v34  ;;  %v9623_v24 = vcombine.high %v3866_v46, %v3873_v34  ;;  %v4114_v27 = vcombine.low %v3882_v16, %v3889_v3  ;;  %v9624_v54 = vcombine.high %v3882_v16, %v3889_v3 }
 0x8dc   : > { %v4026_v59 = vcombine.low %v4002_v30, %v4018_v48  ;;  %v4027_v2 = vcombine.high %v4002_v30, %v4018_v48  ;;  %v4062_v4 = vcombine.low %v4037_v0, %v4045_v28  ;;  %v4078_v10 = vcombine.low %v4053_v6, %v4061_v5 }
 0x8dd   : > { %v4105_v44 = vrot.slane %v4098_v63, %v12361_v37  ;;  %v4113_v41 = vrot.slane %v9623_v24, %v12361_v37  ;;  %v4121_v19 = vrot.slane %v4114_v27, %v12361_v37  ;;  %v4129_v53 = vrot.slane %v9624_v54, %v12361_v37 }
 0x8de   : > { %v4611_v22 = vpack.c.bf16 %v4026_v59, %v3958_v17  ;;  %v4613_v1 = vpack.c.bf16 %v4027_v2, %v3959_v47  ;;  %v4070_v26 = vrot.slane %v4062_v4, %v12368_v45  ;;  %v4086_v32 = vrot.slane %v4078_v10, %v12368_v45 }
 0x8df   : > { %v4130_v38 = vcombine.low %v4105_v44, %v4113_v41  ;;  %v4146_v15 = vcombine.low %v4121_v19, %v4129_v53  ;;  %v3995_v57 = vcombine.high %v13286_v23, %v13289_v58  ;;  %v4011_v51 = vcombine.high %v13292_v55, %v3993_v60 }
 0x8e0   : > { %10085 = vmatprep.subr.bf16.mxu0 %v4611_v22  ;;  %10093 = vmatprep.subr.bf16.mxu1 %v4613_v1  ;;  %v4094_v11 = vcombine.low %v4070_v26, %v4086_v32  ;;  %v3960_v17 = vcombine.low %v13247_v62, %v13255_v40  ;;  %v4063_v36 = vcombine.high %v4037_v0, %v4045_v28 }
 0x8e1   : > { %10086 = vmatpush3.bf16.msra.mxu0 %v4611_v22  ;;  %10094 = vmatpush3.bf16.msra.mxu1 %v4613_v1  ;;  %v4138_v12 = vrot.slane %v4130_v38, %v12368_v45  ;;  %v4154_v25 = vrot.slane %v4146_v15, %v12368_v45  ;;  %v4009_v47 = vrot.slane %v3995_v57, %v12368_v45 }
 0x8e2   : > { %v4025_v7 = vrot.slane %v4011_v51, %v12368_v45  ;;  %v4077_v23 = vrot.slane %v4063_v36, %v12368_v45  ;;  %v4079_v58 = vcombine.high %v4053_v6, %v4061_v5  ;;  %v4131_v55 = vcombine.high %v4105_v44, %v4113_v41 }
 0x8e3   : > { %v4162_v60 = vcombine.low %v4138_v12, %v4154_v25  ;;  %v4095_v29 = vcombine.high %v4070_v26, %v4086_v32  ;;  %v4163_v46 = vcombine.high %v4138_v12, %v4154_v25  ;;  %v4147_v34 = vcombine.high %v4121_v19, %v4129_v53 }
 0x8e4   : > { %v4028_v16 = vcombine.low %v4009_v47, %v4025_v7  ;;  %v4029_v0 = vcombine.high %v4009_v47, %v4025_v7  ;;  %v4093_v28 = vrot.slane %v4079_v58, %v12368_v45  ;;  %v4145_v3 = vrot.slane %v4131_v55, %v12368_v45 }
 0x8e5   : > { %v4612_v30 = vpack.c.bf16 %v4162_v60, %v4094_v11  ;;  %v4614_v48 = vpack.c.bf16 %v4163_v46, %v4095_v29  ;;  %v3961_v63 = vcombine.high %v13247_v62, %v13255_v40  ;;  %v4161_v24 = vrot.slane %v4147_v34, %v12368_v45 }
 0x8e6   : > { %v4615_v27 = vpack.c.bf16 %v4028_v16, %v3960_v17  ;;  %v4096_v6 = vcombine.low %v4077_v23, %v4093_v28  ;;  %v4097_v5 = vcombine.high %v4077_v23, %v4093_v28 }
 0x8e7   : > { %10087 = vmatprep.subr.bf16.mxu0 %v4612_v30  ;;  %10095 = vmatprep.subr.bf16.mxu1 %v4614_v48  ;;  %v4617_v54 = vpack.c.bf16 %v4029_v0, %v3961_v63  ;;  %v4164_v59 = vcombine.low %v4145_v3, %v4161_v24  ;;  %v4165_v2 = vcombine.high %v4145_v3, %v4161_v24 }
 0x8e8   : > { %10088 = vmatpush3.bf16.msra.mxu0 %v4612_v30  ;;  %10096 = vmatpush3.bf16.msra.mxu1 %v4614_v48 }
 0x8e9   : > { %10101 = vmatprep.subr.bf16.mxu0 %v4615_v27  ;;  %10109 = vmatprep.subr.bf16.mxu1 %v4617_v54  ;;  %v4616_v4 = vpack.c.bf16 %v4164_v59, %v4096_v6  ;;  %v4618_v10 = vpack.c.bf16 %v4165_v2, %v4097_v5 }
 0x92f   : > { %v4531_v44 = vpop.xlane.xlu0 %4530 }
 0x931   : > { %v4534_v41 = vpop.xlane.xlu1 %4533 }
 0x932   : > { %10777 = vrcp.f32 %v4534_v41  ;;  %v10634_v41 = vld [vmem:[#allocation17 + $0x8] sm:$0xff]  }
 0x933   : > { %v4543_v19 = vpop.xlane.xlu0 %4542 }
 0x935   : > { %v4546_v62 = vpop.xlane.xlu1 %4545 }
 0x937   : > { %v4525_v40 = vpop.xlane.xlu0 %4524 }
 0x938   : > { %10779 = vrcp.f32 %v4525_v40 }
 0x939   : > { %10781 = vrcp.f32 %v4531_v44  ;;  %v4528_v53 = vpop.xlane.xlu1 %4527  ;;  %v10633_v44 = vld [vmem:[#allocation17] sm:$0xff]  }
 0x93a   : > { %10783 = vrcp.f32 %v4528_v53 }
 0x93b   : > { %v4537_v22 = vpop.xlane.xlu0 %4536  ;;  %10785 = vrcp.f32 %v4546_v62 }
 0x93c   : > { %10787 = vrcp.f32 %v4537_v22  ;;  %v10778_v26 = vpop.eup %10777 }
 0x93d   : > { %10789 = vrcp.f32 %v4543_v19  ;;  %v4590_v57 = vmul.f32 %v10778_v26, %v13162_v21 }
 0x93f   : > { %v4540_v1 = vpop.xlane.xlu1 %4539 }
 0x940   : > { %10791 = vrcp.f32 %v4540_v1 }
 0x942   : > { %v10780_v32 = vpop.eup %10779 }
 0x943   : > { %v10782_v38 = vpop.eup %10781  ;;  %v4587_v51 = vmul.f32 %v10780_v32, %v13175_v43 }
 0x944   : > { %v10784_v15 = vpop.eup %10783  ;;  %v4589_v17 = vmul.f32 %v10782_v38, %v13158_v52 }
 0x945   : > { %v4588_v11 = vmul.f32 %v10784_v15, %v13180_v33  ;;  %v10786_v36 = vpop.eup %10785 }
 0x946   : > { %v10788_v25 = vpop.eup %10787  ;;  %v4604_v47 = vpack.c.bf16 %v4590_v57, %v4589_v17  ;;  %v4594_v58 = vmul.f32 %v10786_v36, %v13171_v20 }
 0x947   : > { %v4603_v12 = vpack.c.bf16 %v4588_v11, %v4587_v51  ;;  %v10790_v7 = vpop.eup %10789  ;;  %v4591_v21 = vmul.f32 %v10788_v25, %v13187_v42 }
 0x948   : > { %v4593_v33 = vmul.f32 %v10790_v7, %v13167_v50 }
 0x949   : > { %10089 = vmatprep.mubr.msk.bf16.mxu0 %vm4182_vm1, %v4603_v12 }
 0x94a   : > { %v10792_v23 = vpop.eup %10791  ;;  %10090 = vmatmul.mubr.msk.bf16.vlgmr.msra.gmra.mrb[16].mxu0 %vm4182_vm1, %v4604_v47  ;;  %v4606_v55 = vpack.c.bf16 %v4594_v58, %v4593_v33 }
 0x94b   : > { %10102 = vmatpush3.bf16.msra.mxu0 %v4615_v27  ;;  %v4592_v43 = vmul.f32 %v10792_v23, %v13196_v61 }
 0x94c   : > { %10103 = vmatprep.subr.bf16.mxu0 %v4616_v4 }
 0x94d   : > { %v4605_v52 = vpack.c.bf16 %v4592_v43, %v4591_v21 }
 0x94f   : > { %10104 = vmatpush3.bf16.msra.mxu0 %v4616_v4  ;;  %10097 = vmatprep.mubr.msk.bf16.mxu1 %vm4182_vm1, %v4605_v52  ;;  %v4555_v20 = vpop.xlane.xlu0 %4554 }
 0x950   : > { %10098 = vmatmul.mubr.msk.bf16.vlgmr.msra.gmra.mrb[16].mxu1 %vm4182_vm1, %v4606_v55  ;;  %10117 = vmatprep.subr.bf16.mxu0 %v10633_v44 }
 0x951   : > { %10110 = vmatpush3.bf16.msra.mxu1 %v4617_v54  ;;  %v4558_v60 = vpop.xlane.xlu1 %4557 }
 0x952   : > { %10111 = vmatprep.subr.bf16.mxu1 %v4618_v10  ;;  %10793 = vrcp.f32 %v4558_v60 }
 0x955   : > { %10112 = vmatpush3.bf16.msra.mxu1 %v4618_v10 }
 0x95a   : > { %v4549_v29 = vpop.xlane.xlu0 %4548 }
 0x95b   : > { %10795 = vrcp.f32 %v4549_v29 }
 0x95c   : > { %10797 = vrcp.f32 %v4555_v20  ;;  %v4552_v42 = vpop.xlane.xlu1 %4551  ;;  %v10794_v34 = vpop.eup %10793 }
 0x95d   : > { %10799 = vrcp.f32 %v4552_v42  ;;  %v4598_v3 = vmul.f32 %v10794_v34, %v13220_v9 }
 0x95f   : > { %v4561_v50 = vpop.xlane.xlu0 %4560 }
 0x960   : > { %10801 = vrcp.f32 %v4561_v50  ;;  %v4570_v61 = vpop.xlane.xlu1 %4569 }
 0x963   : > { %v4564_v46 = vpop.xlane.xlu0 %4563 }
 0x964   : > { %10803 = vrcp.f32 %v4564_v46 }
 0x965   : > { %v10796_v16 = vpop.eup %10795  ;;  %10805 = vrcp.f32 %v4570_v61 }
 0x966   : > { %v10798_v0 = vpop.eup %10797  ;;  %v4595_v48 = vmul.f32 %v10796_v16, %v13257_v39 }
 0x967   : > { %v10800_v28 = vpop.eup %10799  ;;  %v4567_v30 = vpop.xlane.xlu0 %4566  ;;  %v4597_v24 = vmul.f32 %v10798_v0, %v13215_v56 }
 0x968   : > { %10807 = vrcp.f32 %v4567_v30  ;;  %v4596_v63 = vmul.f32 %v10800_v28, %v13268_v49 }
 0x969   : > { %v4608_v6 = vpack.c.bf16 %v4598_v3, %v4597_v24 }
 0x96a   : > { %v4607_v27 = vpack.c.bf16 %v4596_v63, %v4595_v48  ;;  %v10802_v5 = vpop.eup %10801 }
 0x96b   : > { %v4599_v59 = vmul.f32 %v10802_v5, %v13277_v18  ;;  %v10635_v18 = vld [vmem:[#allocation17 + $0x10] sm:$0xff]  }
 0x96c   : > { %10105 = vmatprep.mubr.msk.bf16.mxu0 %vm4182_vm1, %v4607_v27 }
 0x96d   : > { %10106 = vmatmul.mubr.msk.bf16.vlgmr.msra.gmra.mrb[20].mxu0 %vm4182_vm1, %v4608_v6 }
 0x96e   : > { %v10804_v54 = vpop.eup %10803  ;;  %10118 = vmatpush3.bf16.msra.mxu0 %v10633_v44 }
 0x96f   : > { %v4600_v9 = vmul.f32 %v10804_v54, %v13294_v31  ;;  %v10806_v2 = vpop.eup %10805  ;;  %10119 = vmatprep.subr.bf16.mxu0 %v10634_v41  ;;  %v10636_v31 = vld [vmem:[#allocation17 + $0x18] sm:$0xff]  }
 0x970   : > { %v4602_v39 = vmul.f32 %v10806_v2, %v13241_v8 }
 0x971   : > { %v4609_v4 = vpack.c.bf16 %v4600_v9, %v4599_v59 }
 0x972   : > { %v10808_v10 = vpop.eup %10807  ;;  %10120 = vmatpush3.bf16.msra.mxu0 %v10634_v41 }
 0x973   : > { %v4601_v49 = vmul.f32 %v10808_v10, %v13237_v35  ;;  %10113 = vmatprep.mubr.msk.bf16.mxu1 %vm4182_vm1, %v4609_v4  ;;  %10121 = vmatprep.subr.bf16.mxu0 %v10635_v18 }
 0x975   : > { %v4610_v56 = vpack.c.bf16 %v4602_v39, %v4601_v49 }
 0x976   : > { %10122 = vmatpush3.bf16.msra.mxu0 %v10635_v18 }
 0x977   : > { %10114 = vmatmul.mubr.msk.bf16.vlgmr.msra.gmra.mrb[20].mxu1 %vm4182_vm1, %v4610_v56  ;;  %10123 = vmatprep.subr.bf16.mxu0 %v10636_v31 }
 0x97a   : > { %10124 = vmatpush3.bf16.msra.mxu0 %v10636_v31 }
 0xa1d   : > { %v10091_v8 = vpop.f32.mrb[16].mxu0 }
 0xa1e   : > { %v4659_v19 = vpop.f32.mrb[17].mxu0 }
 0xa1f   : > { %v10092_v35 = vpop.f32.mrb[18].mxu0 }
 0xa20   : > { %v4662_v62 = vpop.f32.mrb[19].mxu0 }
 0xa23   : > { %v10099_v40 = vpop.f32.mrb[16].mxu1 }
 0xa24   : > { %v4714_v53 = vpop.f32.mrb[17].mxu1 }
 0xa25   : > { %v13372_v22 = vpop.f32.mrb[18].mxu1 }
 0xa26   : > { %v13374_v1 = vpop.f32.mrb[19].mxu1 }
 0xa40   : > { %v10107_v26 = vpop.f32.mrb[20].mxu0 }
 0xa41   : > { %v4975_v32 = vcombine.low %v10091_v8, %v10107_v26  ;;  %v4976_v38 = vcombine.high %v10091_v8, %v10107_v26  ;;  %v4769_v15 = vpop.f32.mrb[21].mxu0 }
 0xa42   : > { %v4839_v57 = vcombine.low %v4659_v19, %v4769_v15  ;;  %v4840_v51 = vcombine.high %v4659_v19, %v4769_v15  ;;  %v10108_v11 = vpop.f32.mrb[22].mxu0 }
 0xa43   : > { %v5043_v17 = vcombine.low %v10092_v35, %v10108_v11  ;;  %v5044_v36 = vcombine.high %v10092_v35, %v10108_v11  ;;  %v4772_v12 = vpop.f32.mrb[23].mxu0  ;;  %v4983_v7 = vrot.slane %v4975_v32, %v12361_v37  ;;  %v4990_v23 = vrot.slane %v4976_v38, %v12361_v37 }
 0xa44   : > { %v4907_v25 = vcombine.low %v4662_v62, %v4772_v12  ;;  %v4908_v47 = vcombine.high %v4662_v62, %v4772_v12  ;;  %v4847_v58 = vrot.slane %v4839_v57, %v12361_v37  ;;  %v4854_v21 = vrot.slane %v4840_v51, %v12361_v37 }
 0xa45   : > { %v13381_v33 = vrot.slane %v5043_v17, %v12361_v37  ;;  %v13384_v52 = vrot.slane %v5044_v36, %v12361_v37 }
 0xa46   : > { %v13387_v29 = vrot.slane %v4907_v25, %v12361_v37  ;;  %v13390_v42 = vrot.slane %v4908_v47, %v12361_v37 }
 0xa4a   : > { %v10115_v43 = vpop.f32.mrb[20].mxu1 }
 0xa4b   : > { %v4991_v55 = vcombine.low %v10099_v40, %v10115_v43  ;;  %v4992_v20 = vcombine.high %v10099_v40, %v10115_v43  ;;  %v4824_v60 = vpop.f32.mrb[21].mxu1 }
 0xa4c   : > { %v4855_v50 = vcombine.low %v4714_v53, %v4824_v60  ;;  %v4856_v61 = vcombine.high %v4714_v53, %v4824_v60  ;;  %v10116_v46 = vpop.f32.mrb[22].mxu1 }
 0xa4d   : > { %v4999_v34 = vrot.slane %v4991_v55, %v12361_v37  ;;  %v5006_v16 = vrot.slane %v4992_v20, %v12361_v37  ;;  %v5059_v0 = vcombine.low %v13372_v22, %v10116_v46  ;;  %v5060_v28 = vcombine.high %v13372_v22, %v10116_v46  ;;  %v4827_v3 = vpop.f32.mrb[23].mxu1 }
 0xa4e   : > { %v4863_v30 = vrot.slane %v4855_v50, %v12361_v37  ;;  %v4870_v48 = vrot.slane %v4856_v61, %v12361_v37  ;;  %v4923_v63 = vcombine.low %v13374_v1, %v4827_v3  ;;  %v4924_v24 = vcombine.high %v13374_v1, %v4827_v3 }
 0xa4f   : > { %v5007_v27 = vcombine.low %v4983_v7, %v4999_v34  ;;  %v5008_v6 = vcombine.high %v4983_v7, %v4999_v34  ;;  %v5023_v5 = vcombine.low %v4990_v23, %v5006_v16  ;;  %v5024_v54 = vcombine.high %v4990_v23, %v5006_v16 }
 0xa50   : > { %v4871_v59 = vcombine.low %v4847_v58, %v4863_v30  ;;  %v4872_v9 = vcombine.high %v4847_v58, %v4863_v30  ;;  %v4887_v2 = vcombine.low %v4854_v21, %v4870_v48  ;;  %v4888_v4 = vcombine.high %v4854_v21, %v4870_v48 }
 0xa51   : > { %v5015_v10 = vrot.slane %v5007_v27, %v12368_v45  ;;  %v5022_v39 = vrot.slane %v5008_v6, %v12368_v45  ;;  %v5031_v49 = vrot.slane %v5023_v5, %v12368_v45  ;;  %v5038_v56 = vrot.slane %v5024_v54, %v12368_v45 }
 0xa52   : > { %v4879_v44 = vrot.slane %v4871_v59, %v12368_v45  ;;  %v4886_v41 = vrot.slane %v4872_v9, %v12368_v45  ;;  %v4895_v18 = vrot.slane %v4887_v2, %v12368_v45  ;;  %v4902_v31 = vrot.slane %v4888_v4, %v12368_v45 }
 0xa53   : > { %v5247_v8 = vcombine.low %v5015_v10, %v5022_v39  ;;  %v9645_v19 = vcombine.high %v5015_v10, %v5022_v39  ;;  %v5263_v35 = vcombine.low %v5031_v49, %v5038_v56  ;;  %v9646_v62 = vcombine.high %v5031_v49, %v5038_v56  ;;  %v10637_v10 = vld [vmem:[#allocation17 + $0x20] sm:$0xff]  }
 0xa54   : > { %v5111_v40 = vcombine.low %v4879_v44, %v4886_v41  ;;  %v9641_v53 = vcombine.high %v4879_v44, %v4886_v41  ;;  %v5127_v22 = vcombine.low %v4895_v18, %v4902_v31  ;;  %v9642_v1 = vcombine.high %v4895_v18, %v4902_v31  ;;  %10125 = vmatprep.subr.bf16.mxu0 %v10637_v10 }
 0xa55   : > { %v13409_v26 = vrot.slane %v5247_v8, %v12361_v37  ;;  %v13412_v32 = vrot.slane %v9645_v19, %v12361_v37  ;;  %v13415_v38 = vrot.slane %v5263_v35, %v12361_v37  ;;  %v13418_v15 = vrot.slane %v9646_v62, %v12361_v37  ;;  %10126 = vmatpush3.bf16.msra.mxu0 %v10637_v10  ;;  %v10650_v10 = vld [vmem:[#allocation19 + $0x8] sm:$0xff]  }
 0xa56   : > { %v13421_v57 = vrot.slane %v5111_v40, %v12361_v37  ;;  %v13424_v51 = vrot.slane %v9641_v53, %v12361_v37  ;;  %v13427_v11 = vrot.slane %v5127_v22, %v12361_v37  ;;  %v13430_v17 = vrot.slane %v9642_v1, %v12361_v37 }
 0xa57   : > { %v5067_v36 = vrot.slane %v5059_v0, %v12361_v37  ;;  %v5074_v12 = vrot.slane %v5060_v28, %v12361_v37  ;;  %v4931_v25 = vrot.slane %v4923_v63, %v12361_v37  ;;  %v4938_v47 = vrot.slane %v4924_v24, %v12361_v37 }
 0xa58   : > { %v5279_v7 = vcombine.low %v13409_v26, %v13412_v32  ;;  %v5295_v23 = vcombine.low %v13415_v38, %v13418_v15  ;;  %v5143_v58 = vcombine.low %v13421_v57, %v13424_v51  ;;  %v5159_v21 = vcombine.low %v13427_v11, %v13430_v17 }
 0xa59   : > { %v5075_v43 = vcombine.low %v13381_v33, %v5067_v36  ;;  %v5076_v55 = vcombine.high %v13381_v33, %v5067_v36  ;;  %v5091_v20 = vcombine.low %v13384_v52, %v5074_v12  ;;  %v5092_v60 = vcombine.high %v13384_v52, %v5074_v12 }
 0xa5a   : > { %v4939_v50 = vcombine.low %v13387_v29, %v4931_v25  ;;  %v4940_v61 = vcombine.high %v13387_v29, %v4931_v25  ;;  %v4955_v46 = vcombine.low %v13390_v42, %v4938_v47  ;;  %v4956_v34 = vcombine.high %v13390_v42, %v4938_v47 }
 0xa5b   : > { %v5083_v16 = vrot.slane %v5075_v43, %v12368_v45  ;;  %v5090_v0 = vrot.slane %v5076_v55, %v12368_v45  ;;  %v5099_v28 = vrot.slane %v5091_v20, %v12368_v45  ;;  %v5106_v33 = vrot.slane %v5092_v60, %v12368_v45 }
 0xa5c   : > { %v4947_v3 = vrot.slane %v4939_v50, %v12368_v45  ;;  %v4954_v52 = vrot.slane %v4940_v61, %v12368_v45  ;;  %v4963_v30 = vrot.slane %v4955_v46, %v12368_v45  ;;  %v4970_v29 = vrot.slane %v4956_v34, %v12368_v45 }
 0xa5d   : > { %v5315_v48 = vcombine.low %v5083_v16, %v5090_v0  ;;  %v9647_v63 = vcombine.high %v5083_v16, %v5090_v0  ;;  %v5331_v24 = vcombine.low %v5099_v28, %v5106_v33  ;;  %v9648_v42 = vcombine.high %v5099_v28, %v5106_v33 }
 0xa5e   : > { %v5179_v27 = vcombine.low %v4947_v3, %v4954_v52  ;;  %v9643_v6 = vcombine.high %v4947_v3, %v4954_v52  ;;  %v5195_v5 = vcombine.low %v4963_v30, %v4970_v29  ;;  %v9644_v54 = vcombine.high %v4963_v30, %v4970_v29 }
 0xa5f   : > { %v5322_v59 = vrot.slane %v5315_v48, %v12361_v37  ;;  %v5330_v9 = vrot.slane %v9647_v63, %v12361_v37  ;;  %v5338_v2 = vrot.slane %v5331_v24, %v12361_v37  ;;  %v5346_v4 = vrot.slane %v9648_v42, %v12361_v37  ;;  %v10640_v42 = vld [vmem:[#allocation17 + $0x38] sm:$0xff]  }
 0xa60   : > { %v5186_v39 = vrot.slane %v5179_v27, %v12361_v37  ;;  %v5194_v49 = vrot.slane %v9643_v6, %v12361_v37  ;;  %v5202_v56 = vrot.slane %v5195_v5, %v12361_v37  ;;  %v5210_v44 = vrot.slane %v9644_v54, %v12361_v37 }
 0xa61   : > { %v13469_v41 = vrot.slane %v5279_v7, %v12368_v45  ;;  %v13472_v18 = vrot.slane %v5295_v23, %v12368_v45  ;;  %v5347_v31 = vcombine.low %v5322_v59, %v5330_v9  ;;  %v5363_v8 = vcombine.low %v5338_v2, %v5346_v4  ;;  %v10638_v23 = vld [vmem:[#allocation17 + $0x28] sm:$0xff]  }
 0xa62   : > { %v13475_v19 = vrot.slane %v5143_v58, %v12368_v45  ;;  %v13478_v35 = vrot.slane %v5159_v21, %v12368_v45  ;;  %v5211_v62 = vcombine.low %v5186_v39, %v5194_v49  ;;  %v5227_v40 = vcombine.low %v5202_v56, %v5210_v44  ;;  %10127 = vmatprep.subr.bf16.mxu0 %v10638_v23 }
 0xa63   : > { %v5312_v53 = vcombine.high %v13469_v41, %v13472_v18  ;;  %v13483_v22 = vrot.slane %v5347_v31, %v12368_v45  ;;  %v13486_v1 = vrot.slane %v5363_v8, %v12368_v45  ;;  %v5280_v36 = vcombine.high %v13409_v26, %v13412_v32  ;;  %10128 = vmatpush3.bf16.msra.mxu0 %v10638_v23 }
 0xa64   : > { %v5176_v12 = vcombine.high %v13475_v19, %v13478_v35  ;;  %v13493_v25 = vrot.slane %v5211_v62, %v12368_v45  ;;  %v13496_v47 = vrot.slane %v5227_v40, %v12368_v45  ;;  %v5296_v7 = vcombine.high %v13415_v38, %v13418_v15  ;;  %v10639_v38 = vld [vmem:[#allocation17 + $0x30] sm:$0xff]  }
 0xa65   : > { %v5380_v58 = vcombine.high %v13483_v22, %v13486_v1  ;;  %v5294_v21 = vrot.slane %v5280_v36, %v12368_v45  ;;  %v5348_v43 = vcombine.high %v5322_v59, %v5330_v9  ;;  %v5364_v26 = vcombine.high %v5338_v2, %v5346_v4  ;;  %10129 = vmatprep.subr.bf16.mxu0 %v10639_v38  ;;  %v10649_v4 = vld [vmem:[#allocation19] sm:$0xff]  }
 0xa66   : > { %v5244_v32 = vcombine.high %v13493_v25, %v13496_v47  ;;  %v5310_v55 = vrot.slane %v5296_v7, %v12368_v45  ;;  %v5144_v20 = vcombine.high %v13421_v57, %v13424_v51  ;;  %v5160_v60 = vcombine.high %v13427_v11, %v13430_v17  ;;  %10137 = vmatprep.subr.bf16.mxu1 %v10649_v4 }
 0xa67   : > { %v10541_v15 = vpack.i.bf16 %v5380_v58, %v5312_v53  ;;  %v5362_v50 = vrot.slane %v5348_v43, %v12368_v45  ;;  %v5378_v61 = vrot.slane %v5364_v26, %v12368_v45  ;;  %v5212_v46 = vcombine.high %v5186_v39, %v5194_v49  ;;  %10130 = vmatpush3.bf16.msra.mxu0 %v10639_v38  ;;  %v10651_v39 = vld [vmem:[#allocation19 + $0x10] sm:$0xff]   ;;  %v10652_v49 = vld [vmem:[#allocation19 + $0x18] sm:$0xff]  }
 0xa68   : > { %v10551_v34 = vpack.i.bf16 %v5244_v32, %v5176_v12  ;;  %v5313_v16 = vcombine.low %v5294_v21, %v5310_v55  ;;  %v5158_v0 = vrot.slane %v5144_v20, %v12368_v45  ;;  %v5174_v28 = vrot.slane %v5160_v60, %v12368_v45  ;;  %10131 = vmatprep.subr.bf16.mxu0 %v10640_v42 }
 0xa69   : > { %10542 = vrot.lane.b32.xlu1 %v10541_v15, %s11553_s10  ;;  %v5381_v57 = vcombine.low %v5362_v50, %v5378_v61  ;;  %v5226_v51 = vrot.slane %v5212_v46, %v12368_v45  ;;  %v5228_v11 = vcombine.high %v5202_v56, %v5210_v44  ;;  %v5314_v17 = vcombine.high %v5294_v21, %v5310_v55  ;;  %v10653_v56 = vld [vmem:[#allocation19 + $0x20] sm:$0xff]  }
 0xa6a   : > { %10552 = vrot.lane.b32.xlu0 %v10551_v34, %s11553_s10  ;;  %v5178_v33 = vcombine.high %v5158_v0, %v5174_v28  ;;  %v5177_v3 = vcombine.low %v5158_v0, %v5174_v28  ;;  %v5382_v52 = vcombine.high %v5362_v50, %v5378_v61  ;;  %v5311_v30 = vcombine.low %v13469_v41, %v13472_v18  ;;  %v10641_v34 = vld [vmem:[#allocation20] sm:$0xff]   ;;  %v10642_v0 = vld [vmem:[#allocation20 + $0x8] sm:$0xff]   ;;  %v10643_v28 = vld [vmem:[#allocation20 + $0x10] sm:$0xff]  }
 0xa6b   : > { %v10546_v29 = vpack.i.bf16 %v5381_v57, %v5313_v16  ;;  %v5242_v48 = vrot.slane %v5228_v11, %v12368_v45  ;;  %v5379_v63 = vcombine.low %v13483_v22, %v13486_v1  ;;  %v5175_v24 = vcombine.low %v13475_v19, %v13478_v35  ;;  %10132 = vmatpush3.bf16.msra.mxu0 %v10640_v42  ;;  %v10644_v57 = vld [vmem:[#allocation20 + $0x18] sm:$0xff]   ;;  %v10646_v11 = vld [vmem:[#allocation20 + $0x28] sm:$0xff]   ;;  %v9649_v42 = vld [vmem:[%s14556_s29] ss:$0 sm:$0xff]  ;;  %s11561_s29 = smov [#allocation29]  }
 0xa6c   : > { %v10566_v27 = vpack.i.bf16 %v5382_v52, %v5314_v17  ;;  %v5243_v6 = vcombine.low %v13493_v25, %v13496_v47  ;;  %v11558_v2 = vmov 0.0   ;;  %10138 = vmatpush3.bf16.msra.mxu1 %v10649_v4  ;;  %v10647_v17 = vld [vmem:[#allocation20 + $0x30] sm:$0xff]   ;;  %v1421_v52 = vld [vmem:[%s12155_s0 + $0x8] sm:$0xff] }
 0xa6d   : > { %10547 = vrot.lane.b32.xlu1 %v10546_v29, %s11552_s26  ;;  %v5246_v5 = vcombine.high %v5226_v51, %v5242_v48  ;;  %v5245_v54 = vcombine.low %v5226_v51, %v5242_v48  ;;  %10157 = vmatprep.subr.bf16.mxu0 %v11558_v2  ;;  %v10645_v51 = vld [vmem:[#allocation20 + $0x20] sm:$0xff]   ;;  %v10654_v29 = vld [vmem:[#allocation19 + $0x28] sm:$0xff]   ;;  %v10655_v48 = vld [vmem:[#allocation19 + $0x30] sm:$0xff]  }
 0xa6e   : > { %10139 = vmatprep.subr.bf16.mxu1 %v10650_v10 }
 0xa6f   : > { %v10561_v59 = vpack.i.bf16 %v5246_v5, %v5178_v33  ;;  %v10556_v9 = vpack.i.bf16 %v5245_v54, %v5177_v3  ;;  %v10648_v33 = vld [vmem:[#allocation20 + $0x38] sm:$0xff]   ;;  %v1420_v3 = vld [vmem:[%s12155_s0] sm:$0xff]  ;;  %s14557_s0 = sld [smem:[#allocation60_spill]] }
 0xa70   : > { %10140 = vmatpush3.bf16.msra.mxu1 %v10650_v10 }
 0xa71   : > { %10562 = vrot.lane.b32.xlu0 %v10561_v59, %s11551_s20  ;;  %10557 = vrot.lane.b32.xlu1 %v10556_v9, %s11552_s26 }
 0xa72   : > { %10141 = vmatprep.subr.bf16.mxu1 %v10651_v39 }
 0xa74   : > { %10142 = vmatpush3.bf16.msra.mxu1 %v10651_v39 }
 0xa75   : > { %10567 = vrot.lane.b32.xlu1 %v10566_v27, %s11551_s20  ;;  %10143 = vmatprep.subr.bf16.mxu1 %v10652_v49 }
 0xa78   : > { %10144 = vmatpush3.bf16.msra.mxu1 %v10652_v49 }
 0xa79   : > { %10145 = vmatprep.subr.bf16.mxu1 %v10653_v56 }
 0xa7c   : > { %10146 = vmatpush3.bf16.msra.mxu1 %v10653_v56 }
 0xa7d   : > { %10147 = vmatprep.subr.bf16.mxu1 %v10654_v29 }
 0xa80   : > { %10148 = vmatpush3.bf16.msra.mxu1 %v10654_v29 }
 0xa81   : > { %10149 = vmatprep.subr.bf16.mxu1 %v10655_v48 }
 0xa84   : > { %10150 = vmatpush3.bf16.msra.mxu1 %v10655_v48  ;;  %v9677_v48 = vld [vmem:[%s14563_s17] ss:$0 sm:$0xff] }
 0xadb   : > { %v10543_v44 = vpop.permute.xlu1 %10542 }
 0xadc   : > { %v10553_v41 = vpop.permute.xlu0 %10552  ;;  %v10545_v19 = vunpack.i.h.bf16 %v10543_v44  ;;  %v10544_v35 = vunpack.i.l.bf16 %v10543_v44 }
 0xadd   : > { %v10555_v31 = vunpack.i.h.bf16 %v10553_v41  ;;  %v10554_v8 = vunpack.i.l.bf16 %v10553_v41 }
 0xade   : > { %v5433_v21 = vsel %vm4182_vm1, %v5311_v30, %v10544_v35  ;;  %v5434_v55 = vsel %vm4182_vm1, %v5379_v63, %v10545_v19  ;;  %v13554_v30 = vpack.c.bf16 %v1421_v52, %v1420_v3  ;;  %v10656_v63 = vld [vmem:[#allocation19 + $0x38] sm:$0xff]  }
 0xadf   : > { %v10548_v18 = vpop.permute.xlu1 %10547  ;;  %v5431_v53 = vsel %vm4182_vm1, %v5175_v24, %v10554_v8  ;;  %v5432_v22 = vsel %vm4182_vm1, %v5243_v6, %v10555_v31  ;;  %10151 = vmatprep.subr.bf16.mxu1 %v10656_v63  ;;  %v5569_v24 = vsub.s32 2, %v12232_v14  ;;  %v14559_v8 = vld [vmem:[#allocation77_spill] sm:$0xff]  ;;  %v14560_v35 = vld [vmem:[#allocation79_spill] sm:$0xff] }
 0xae0   : > { %v10550_v12 = vunpack.i.h.bf16 %v10548_v18  ;;  %v10549_v25 = vunpack.i.l.bf16 %v10548_v18  ;;  %10152 = vmatpush3.bf16.msra.mxu1 %v10656_v63  ;;  %v14558_v18 = vld [vmem:[#allocation78_spill] sm:$0xff] }
 0xae1   : > { %10177 = vmatprep.subr.bf16.mxu1 %v11558_v2  ;;  %v5570_v6 = vrot.slane %v12230_v13, %v5569_v24 }
 0xae2   : > { %v5438_v15 = vsel %vm5435_vm2, %v5433_v21, %v10549_v25  ;;  %v5439_v50 = vsel %vm5435_vm2, %v5434_v55, %v10550_v12 }
 0xae3   : > { %v10563_v62 = vpop.permute.xlu0 %10562  ;;  %v10558_v40 = vpop.permute.xlu1 %10557 }
 0xae4   : > { %v10560_v1 = vunpack.i.h.bf16 %v10558_v40  ;;  %v10559_v36 = vunpack.i.l.bf16 %v10558_v40  ;;  %v10565_v47 = vunpack.i.h.bf16 %v10563_v62  ;;  %v10564_v7 = vunpack.i.l.bf16 %v10563_v62  ;;  %v14561_v40 = vld [vmem:[#allocation76_spill] sm:$0xff] }
 0xae6   : > { %v5436_v23 = vsel %vm5435_vm2, %v5431_v53, %v10559_v36  ;;  %v5437_v58 = vsel %vm5435_vm2, %v5432_v22, %v10560_v1  ;;  %v9668_v36 = vld [vmem:[%s14557_s0] ss:$0 sm:$0xff]  ;;  %s11367_s0 = sshll.u32 %s11561_s29, 4  ;;  %s11368_s0 = int_to_ptr.vmem [resolvable:$false] %s11367_s0 }
 0xae7   : > { %v10568_v43 = vpop.permute.xlu1 %10567  ;;  %v5441_v26 = vsel %vm5440_vm3, %v5436_v23, %v10564_v7  ;;  %v5442_v32 = vsel %vm5440_vm3, %v5437_v58, %v10565_v47 }
 0xae8   : > { %v10570_v20 = vunpack.i.h.bf16 %v10568_v43  ;;  %v10569_v60 = vunpack.i.l.bf16 %v10568_v43  ;;  %v5445_v38 = vpack.c.bf16 %v5442_v32, %v5441_v26 }
 0xaea   : > { %v5444_v61 = vsel %vm5440_vm3, %v5439_v50, %v10570_v20  ;;  %v5443_v46 = vsel %vm5440_vm3, %v5438_v15, %v10569_v60  ;;  %10133 = vmatprep.mubr.bf16.mxu0 %v5445_v38  ;;  %v9658_v20 = vld [vmem:[%s14562_s16] ss:$0 sm:$0xff]  ;;  %s11369_s16 = scalar_lea.vmem %s11368_s0, 1024 }
 0xaeb   : > { %v5446_v16 = vpack.c.bf16 %v5444_v61, %v5443_v46 }
 0xaed   : > { %10134 = vmatmul.mubr.bf16.vlgmr.msra.gmra.mrb[24].mxu0 %v5446_v16 }
 0xaee   : > { %10158 = vmatpush3.bf16.msra.mxu0 %v10641_v34  ;;  %10173 = vmatprep.mubr.msk.bf16.mxu0 %vm11559_vm4, %v11558_v2 }
 0xaef   : > { %10159 = vmatprep.subr.bf16.mxu0 %v11558_v2 }
 0xaf2   : > { %10160 = vmatpush3.bf16.msra.mxu0 %v10642_v0 }
 0xaf3   : > { %10161 = vmatprep.subr.bf16.mxu0 %v11558_v2 }
 0xaf6   : > { %10162 = vmatpush3.bf16.msra.mxu0 %v10643_v28 }
 0xaf7   : > { %10163 = vmatprep.subr.bf16.mxu0 %v11558_v2 }
 0xafa   : > { %10164 = vmatpush3.bf16.msra.mxu0 %v10644_v57 }
 0xafb   : > { %10165 = vmatprep.subr.bf16.mxu0 %v11558_v2 }
 0xafe   : > { %10166 = vmatpush3.bf16.msra.mxu0 %v10645_v51 }
 0xaff   : > { %10167 = vmatprep.subr.bf16.mxu0 %v11558_v2 }
 0xb02   : > { %10168 = vmatpush3.bf16.msra.mxu0 %v10646_v11 }
 0xb03   : > { %10169 = vmatprep.subr.bf16.mxu0 %v11558_v2 }
 0xb06   : > { %10170 = vmatpush3.bf16.msra.mxu0 %v10647_v17 }
 0xb07   : > { %10171 = vmatprep.subr.bf16.mxu0 %v11558_v2 }
 0xb0a   : > { %10172 = vmatpush3.bf16.msra.mxu0 %v10648_v33 }
 0xb0d   : > { %10174 = vmatmul.mubr.bf16.vlgmr.msra.gmra.mrb[28].mxu0 %v13554_v30 }
 0xbc0   : > { %v10135_v27 = vpop.f32.mrb[24].mxu0 }
 0xbc1   : > { %v5561_v5 = vadd.f32 %v10135_v27, %v9649_v42  ;;  %v5552_v54 = vpop.f32.mrb[25].mxu0  ;;  %v10657_v27 = vld [vmem:[#allocation22] sm:$0xff]  }
 0xbc2   : > { %v5553_v59 = vadd.f32 %v9649_v42, %v5552_v54  ;;  %v10136_v9 = vpop.f32.mrb[26].mxu0  ;;  %v10660_v54 = vld [vmem:[#allocation22 + $0x18] sm:$0xff]  }
 0xbc3   : > { %v5564_v4 = vadd.f32 %v10136_v9, %v9649_v42  ;;  %v5555_v10 = vpop.f32.mrb[27].mxu0  ;;  %v5573_v56 = vmul.f32 %v5570_v6, %v5561_v5  ;;  %v10659_v5 = vld [vmem:[#allocation22 + $0x10] sm:$0xff]   ;;  %v10662_v9 = vld [vmem:[#allocation22 + $0x28] sm:$0xff]  }
 0xbc4   : > { %v5571_v39 = vmul.f32 %v5570_v6, %v5553_v59  ;;  %v5556_v49 = vadd.f32 %v9649_v42, %v5555_v10  ;;  %v10661_v59 = vld [vmem:[#allocation22 + $0x20] sm:$0xff]   ;;  %v10664_v10 = vld [vmem:[#allocation22 + $0x38] sm:$0xff]  }
 0xbc5   : > { %v5574_v44 = vmul.f32 %v5570_v6, %v5564_v4  ;;  %v13571_v53 = vadd.f32 %v5573_v56, %v14561_v40  ;;  %v10663_v4 = vld [vmem:[#allocation22 + $0x30] sm:$0xff]  }
 0xbc6   : > { %v5572_v41 = vmul.f32 %v5570_v6, %v5556_v49  ;;  %v13565_v19 = vadd.f32 %v5571_v39, %v14559_v8  ;;  %v10658_v6 = vld [vmem:[#allocation22 + $0x8] sm:$0xff]  }
 0xbc7   : > { %v13562_v31 = vadd.f32 %v5574_v44, %v14558_v18 }
 0xbc8   : > { %v13568_v62 = vadd.f32 %v5572_v41, %v14560_v35 }
 0xbc9   : > { %v5580_v1 = vpack.c.bf16 %v13562_v31, %v13571_v53 }
 0xbca   : > { %v5579_v22 = vpack.c.bf16 %v13568_v62, %v13565_v19 }
 0xbcc   : > { %10153 = vmatprep.mubr.bf16.mxu1 %v5579_v22 }
 0xbcd   : > { %10154 = vmatmul.mubr.bf16.vlgmr.msra.gmra.mrb[24].mxu1 %v5580_v1 }
 0xbce   : > { %10193 = vmatprep.mubr.msk.bf16.mxu1 %vm11559_vm4, %v11558_v2  ;;  %10178 = vmatpush3.bf16.msra.mxu1 %v10657_v27 }
 0xbcf   : > { %10179 = vmatprep.subr.bf16.mxu1 %v11558_v2 }
 0xbd2   : > { %10180 = vmatpush3.bf16.msra.mxu1 %v10658_v6 }
 0xbd3   : > { %10181 = vmatprep.subr.bf16.mxu1 %v11558_v2 }
 0xbd6   : > { %10182 = vmatpush3.bf16.msra.mxu1 %v10659_v5 }
 0xbd7   : > { %10183 = vmatprep.subr.bf16.mxu1 %v11558_v2 }
 0xbda   : > { %10184 = vmatpush3.bf16.msra.mxu1 %v10660_v54 }
 0xbdb   : > { %10185 = vmatprep.subr.bf16.mxu1 %v11558_v2 }
 0xbde   : > { %10186 = vmatpush3.bf16.msra.mxu1 %v10661_v59 }
 0xbdf   : > { %10187 = vmatprep.subr.bf16.mxu1 %v11558_v2 }
 0xbe0   : > { %v5846_v12 = vpop.f32.mrb[28].mxu0 }
 0xbe1   : > { %v5847_v25 = vadd.f32 %v9668_v36, %v5846_v12  ;;  %v10175_v47 = vpop.f32.mrb[29].mxu0 }
 0xbe2   : > { %v5849_v7 = vpop.f32.mrb[30].mxu0  ;;  %10188 = vmatpush3.bf16.msra.mxu1 %v10662_v9 }
 0xbe3   : > { %v5854_v23 = vmul.f32 %v5847_v25, %v5847_v25  ;;  %v5850_v58 = vadd.f32 %v9668_v36, %v5849_v7  ;;  %v10176_v21 = vpop.f32.mrb[31].mxu0  ;;  %10189 = vmatprep.subr.bf16.mxu1 %v11558_v2 }
 0xbe5   : > { %v5855_v43 = vmul.f32 %v5850_v58, %v5850_v58  ;;  %5856 = vadd.xlane.f32.xlu0 %v5854_v23 }
 0xbe6   : > { %10190 = vmatpush3.bf16.msra.mxu1 %v10663_v4 }
 0xbe7   : > { %5858 = vadd.xlane.f32.xlu1 %v5855_v43  ;;  %10191 = vmatprep.subr.bf16.mxu1 %v11558_v2 }
 0xbea   : > { %10192 = vmatpush3.bf16.msra.mxu1 %v10664_v10 }
 0xbed   : > { %10194 = vmatmul.mubr.bf16.vlgmr.msra.gmra.mrb[28].mxu1 %v13554_v30 }
 0xc72   : > { %v5857_v55 = vpop.xlane.xlu0 %5856 }
 0xc73   : > { %v5860_v38 = vmul.f32 0.0078125, %v5857_v55 }
 0xc74   : > { %v5859_v26 = vpop.xlane.xlu1 %5858 }
 0xc75   : > { %v5861_v32 = vmul.f32 0.0078125, %v5859_v26  ;;  %v5862_v57 = vadd.f32 1e-06, %v5860_v38 }
 0xc77   : > { %v5863_v15 = vadd.f32 1e-06, %v5861_v32  ;;  %v13627_v32 = vld [vmem:[%s14564_s24] ss:$0 sm:$0xff] }
 0xc79   : > { %10809 = vrsqrt.f32 %v5863_v15 }
 0xc7a   : > { %10811 = vrsqrt.f32 %v5862_v57 }
 0xc83   : > { %v10810_v3 = vpop.eup %10809 }
 0xc84   : > { %v5867_v52 = vmul.f32 %v10810_v3, %v5850_v58  ;;  %v10812_v29 = vpop.eup %10811 }
 0xc85   : > { %v5866_v63 = vmul.f32 %v10812_v29, %v5847_v25 }
 0xc86   : > { %v13598_v24 = vmul.f32 %v9677_v48, %v5867_v52 }
 0xc87   : > { %v13602_v42 = vmul.f32 %v9677_v48, %v5866_v63 }
 0xca0   : > { %v10155_v60 = vpop.f32.mrb[24].mxu1 }
 0xca1   : > { %v5686_v50 = vpop.f32.mrb[25].mxu1  ;;  %v13591_v11 = vadd.f32 %v10155_v60, %v9658_v20 }
 0xca2   : > { %v13581_v61 = vadd.f32 %v9658_v20, %v5686_v50  ;;  %v10156_v46 = vpop.f32.mrb[26].mxu1 }
 0xca3   : > { %v13583_v34 = vadd.f32 %v10156_v46, %v9658_v20  ;;  %v5689_v16 = vpop.f32.mrb[27].mxu1  ;;  %v5704_v33 = vmul.f32 %v13591_v11, %v13591_v11 }
 0xca4   : > { %v5702_v0 = vmul.f32 %v13581_v61, %v13581_v61  ;;  %v13587_v28 = vadd.f32 %v9658_v20, %v5689_v16 }
 0xca5   : > { %v5705_v51 = vmul.f32 %v13583_v34, %v13583_v34 }
 0xca6   : > { %5706 = vadd.xlane.f32.xlu0 %v5702_v0  ;;  %v5703_v17 = vmul.f32 %v13587_v28, %v13587_v28 }
 0xca7   : > { %5712 = vadd.xlane.f32.xlu1 %v5705_v51 }
 0xcaa   : > { %5708 = vadd.xlane.f32.xlu0 %v5703_v17 }
 0xcae   : > { %5710 = vadd.xlane.f32.xlu0 %v5704_v33 }
 0xcb8   : > { %6576 = vrot.lane.b32.xlu1 %v13598_v24, %s11551_s20 }
 0xcbc   : > { %6580 = vrot.lane.b32.xlu1 %v13602_v42, %s11552_s26 }
 0xcc0   : > { %6582 = vrot.lane.b32.xlu1 %v13598_v24, %s11552_s26 }
 0xcc4   : > { %6588 = vrot.lane.b32.xlu1 %v13598_v24, %s11553_s10  ;;  %6574 = vrot.lane.b32.xlu0 %v13602_v42, %s11551_s20 }
 0xcc8   : > { %6586 = vrot.lane.b32.xlu0 %v13602_v42, %s11553_s10 }
 0xd33   : > { %v5707_v39 = vpop.xlane.xlu0 %5706 }
 0xd34   : > { %v5714_v49 = vmul.f32 0.0078125, %v5707_v39  ;;  %v5713_v56 = vpop.xlane.xlu1 %5712 }
 0xd35   : > { %v5717_v44 = vmul.f32 0.0078125, %v5713_v56 }
 0xd36   : > { %v5718_v41 = vadd.f32 1e-06, %v5714_v49 }
 0xd37   : > { %v5721_v18 = vadd.f32 1e-06, %v5717_v44  ;;  %v5709_v8 = vpop.xlane.xlu0 %5708 }
 0xd38   : > { %10813 = vrsqrt.f32 %v5718_v41  ;;  %v5715_v35 = vmul.f32 0.0078125, %v5709_v8  ;;  %v6577_v40 = vpop.permute.xlu1 %6576 }
 0xd39   : > { %10815 = vrsqrt.f32 %v5721_v18 }
 0xd3a   : > { %v5719_v22 = vadd.f32 1e-06, %v5715_v35 }
 0xd3b   : > { %v5711_v1 = vpop.xlane.xlu0 %5710 }
 0xd3c   : > { %10817 = vrsqrt.f32 %v5719_v22  ;;  %v5716_v36 = vmul.f32 0.0078125, %v5711_v1  ;;  %v6581_v2 = vpop.permute.xlu1 %6580 }
 0xd3d   : > { %v6592_v30 = vcombine.low %v13602_v42, %v6581_v2  ;;  %v6593_v7 = vcombine.high %v13602_v42, %v6581_v2 }
 0xd3e   : > { %v5720_v12 = vadd.f32 1e-06, %v5716_v36 }
 0xd3f   : > { %v6575_v25 = vpop.permute.xlu0 %6574  ;;  %v6600_v20 = vrot.slane %v6592_v30, %v12361_v37  ;;  %v6607_v46 = vrot.slane %v6593_v7, %v12361_v37 }
 0xd40   : > { %10819 = vrsqrt.f32 %v5720_v12  ;;  %v6583_v47 = vpop.permute.xlu1 %6582 }
 0xd41   : > { %v6660_v58 = vcombine.low %v13598_v24, %v6583_v47  ;;  %v6661_v43 = vcombine.high %v13598_v24, %v6583_v47 }
 0xd42   : > { %v10814_v23 = vpop.eup %10813 }
 0xd43   : > { %v10816_v21 = vpop.eup %10815  ;;  %v6587_v26 = vpop.permute.xlu0 %6586  ;;  %v13632_v50 = vmul.f32 %v10814_v23, %v13581_v61  ;;  %v6668_v51 = vrot.slane %v6660_v58, %v12361_v37  ;;  %v6675_v52 = vrot.slane %v6661_v43, %v12361_v37 }
 0xd44   : > { %v5729_v55 = vmul.f32 %v10816_v21, %v13583_v34  ;;  %v6608_v60 = vcombine.low %v6575_v25, %v6587_v26  ;;  %v6609_v38 = vcombine.high %v6575_v25, %v6587_v26  ;;  %v6589_v15 = vpop.permute.xlu1 %6588 }
 0xd45   : > { %v6676_v16 = vcombine.low %v6577_v40, %v6589_v15  ;;  %v6677_v0 = vcombine.high %v6577_v40, %v6589_v15 }
 0xd46   : > { %v10818_v57 = vpop.eup %10817  ;;  %v6616_v17 = vrot.slane %v6608_v60, %v12361_v37  ;;  %v6623_v33 = vrot.slane %v6609_v38, %v12361_v37  ;;  %v13639_v34 = vmul.f32 %v13627_v32, %v5729_v55 }
 0xd47   : > { %v5727_v3 = vmul.f32 %v10818_v57, %v13587_v28  ;;  %v6684_v61 = vrot.slane %v6676_v16, %v12361_v37  ;;  %v6691_v29 = vrot.slane %v6677_v0, %v12361_v37 }
 0xd48   : > { %v6624_v48 = vcombine.low %v6600_v20, %v6616_v17  ;;  %v6625_v63 = vcombine.high %v6600_v20, %v6616_v17  ;;  %v6640_v24 = vcombine.low %v6607_v46, %v6623_v33  ;;  %v6641_v42 = vcombine.high %v6607_v46, %v6623_v33  ;;  %5998 = vrot.lane.b32.xlu1 %v13639_v34, %s11551_s20 }
 0xd49   : > { %v6692_v27 = vcombine.low %v6668_v51, %v6684_v61  ;;  %v6693_v6 = vcombine.high %v6668_v51, %v6684_v61  ;;  %v6708_v5 = vcombine.low %v6675_v52, %v6691_v29  ;;  %v6709_v54 = vcombine.high %v6675_v52, %v6691_v29 }
 0xd4a   : > { %v10820_v59 = vpop.eup %10819  ;;  %v6632_v28 = vrot.slane %v6624_v48, %v12368_v45  ;;  %v6639_v9 = vrot.slane %v6625_v63, %v12368_v45  ;;  %v6648_v4 = vrot.slane %v6640_v24, %v12368_v45  ;;  %v6655_v10 = vrot.slane %v6641_v42, %v12368_v45 }
 0xd4b   : > { %v5728_v39 = vmul.f32 %v10820_v59, %v13591_v11  ;;  %v6700_v49 = vrot.slane %v6692_v27, %v12368_v45  ;;  %v6707_v56 = vrot.slane %v6693_v6, %v12368_v45  ;;  %v6716_v44 = vrot.slane %v6708_v5, %v12368_v45 }
 0xd4c   : > { %v6728_v41 = vcombine.low %v6632_v28, %v6639_v9  ;;  %v9695_v18 = vcombine.high %v6632_v28, %v6639_v9  ;;  %v6744_v8 = vcombine.low %v6648_v4, %v6655_v10  ;;  %v9696_v35 = vcombine.high %v6648_v4, %v6655_v10  ;;  %6010 = vrot.lane.b32.xlu1 %v13639_v34, %s11552_s26  ;;  %v13716_v10 = vpop.f32.mrb[28].mxu1 }
 0xd4d   : > { %v6723_v40 = vrot.slane %v6709_v54, %v12368_v45  ;;  %v6796_v22 = vcombine.low %v6700_v49, %v6707_v56  ;;  %v9697_v1 = vcombine.high %v6700_v49, %v6707_v56  ;;  %v13659_v36 = vmul.f32 %v13627_v32, %v5728_v39  ;;  %v10195_v39 = vpop.f32.mrb[29].mxu1 }
 0xd4e   : > { %v6735_v11 = vrot.slane %v6728_v41, %v12361_v37  ;;  %v6743_v2 = vrot.slane %v9695_v18, %v12361_v37  ;;  %v6751_v12 = vrot.slane %v6744_v8, %v12361_v37  ;;  %v6759_v25 = vrot.slane %v9696_v35, %v12361_v37  ;;  %v13718_v56 = vpop.f32.mrb[30].mxu1 }
 0xd4f   : > { %v6803_v30 = vrot.slane %v6796_v22, %v12361_v37  ;;  %v6811_v47 = vrot.slane %v9697_v1, %v12361_v37  ;;  %v6812_v7 = vcombine.low %v6716_v44, %v6723_v40  ;;  %v9698_v23 = vcombine.high %v6716_v44, %v6723_v40  ;;  %5996 = vrot.lane.b32.xlu0 %v13659_v36, %s11551_s20  ;;  %v10196_v44 = vpop.f32.mrb[31].mxu1 }
 0xd50   : > { %v13670_v58 = vmul.f32 %v13627_v32, %v5727_v3  ;;  %v6760_v21 = vcombine.low %v6735_v11, %v6743_v2  ;;  %v6776_v43 = vcombine.low %v6751_v12, %v6759_v25  ;;  %v6761_v26 = vcombine.high %v6735_v11, %v6743_v2 }
 0xd51   : > { %v6819_v55 = vrot.slane %v6812_v7, %v12361_v37  ;;  %v6827_v20 = vrot.slane %v9698_v23, %v12361_v37  ;;  %v6828_v60 = vcombine.low %v6803_v30, %v6811_v47  ;;  %v6777_v38 = vcombine.high %v6751_v12, %v6759_v25 }
 0xd52   : > { %5994 = vrot.lane.b32.xlu1 %v13670_v58, %s11551_s20  ;;  %v6768_v15 = vrot.slane %v6760_v21, %v12368_v45  ;;  %v6784_v46 = vrot.slane %v6776_v43, %v12368_v45  ;;  %v6775_v16 = vrot.slane %v6761_v26, %v12368_v45  ;;  %v6829_v0 = vcombine.high %v6803_v30, %v6811_v47 }
 0xd53   : > { %6008 = vrot.lane.b32.xlu0 %v13659_v36, %s11552_s26  ;;  %v6836_v57 = vrot.slane %v6828_v60, %v12368_v45  ;;  %v6844_v51 = vcombine.low %v6819_v55, %v6827_v20  ;;  %v6791_v17 = vrot.slane %v6777_v38, %v12368_v45  ;;  %v6845_v33 = vcombine.high %v6819_v55, %v6827_v20 }
 0xd54   : > { %v13685_v3 = vmul.f32 %v13627_v32, %v13632_v50  ;;  %v6843_v52 = vrot.slane %v6829_v0, %v12368_v45  ;;  %v6792_v61 = vcombine.low %v6768_v15, %v6784_v46  ;;  %v6793_v48 = vcombine.high %v6768_v15, %v6784_v46 }
 0xd55   : > { %v6852_v29 = vrot.slane %v6844_v51, %v12368_v45  ;;  %v6859_v63 = vrot.slane %v6845_v33, %v12368_v45  ;;  %v6794_v27 = vcombine.low %v6775_v16, %v6791_v17  ;;  %v6795_v32 = vcombine.high %v6775_v16, %v6791_v17 }
 0xd56   : > { %6006 = vrot.lane.b32.xlu1 %v13670_v58, %s11552_s26 }
 0xd57   : > { %5992 = vrot.lane.b32.xlu0 %v13685_v3, %s11551_s20  ;;  %v6860_v24 = vcombine.low %v6836_v57, %v6852_v29  ;;  %v6861_v42 = vcombine.high %v6836_v57, %v6852_v29  ;;  %v6862_v6 = vcombine.low %v6843_v52, %v6859_v63  ;;  %v6863_v50 = vcombine.high %v6843_v52, %v6859_v63 }
 0xd59   : > { %v7164_v5 = vpack.c.bf16 %v6860_v24, %v6792_v61  ;;  %v7165_v54 = vpack.c.bf16 %v6861_v42, %v6793_v48  ;;  %v13700_v9 = vpack.c.bf16 %v6862_v6, %v6794_v27  ;;  %v13702_v4 = vpack.c.bf16 %v6863_v50, %v6795_v32 }
 0xd5a   : > { %6018 = vrot.lane.b32.xlu1 %v13670_v58, %s11553_s10 }
 0xd5b   : > { %10293 = vmatprep.subr.msk.bf16.mxu0 %vm4182_vm1, %v7164_v5  ;;  %10294 = vmatprep.subr.msk.bf16.mxu1 %vm4182_vm1, %v7165_v54  ;;  %v7175_v59 = vsel %vm4182_vm1, %v7164_v5, 0  ;;  %v7233_v28 = vsel %vm4182_vm1, %v7165_v54, 0 }
 0xd5c   : > { %10198 = vmatpush3.bf16.xpose.msra.mxu0 %v7175_v59  ;;  %10204 = vmatpush3.bf16.xpose.msra.mxu1 %v7233_v28 }
 0xd5d   : > { %6004 = vrot.lane.b32.xlu0 %v13685_v3, %s11552_s26  ;;  %10295 = vmatprep.subr.msk.bf16.mxu0 %vm4182_vm1, %v13700_v9 }
 0xd5e   : > { %10296 = vmatprep.subr.msk.bf16.mxu1 %vm4182_vm1, %v13702_v4  ;;  %6022 = vrot.lane.b32.xlu1 %v13639_v34, %s11553_s10 }
 0xd61   : > { %6016 = vrot.lane.b32.xlu0 %v13685_v3, %s11553_s10 }
 0xd65   : > { %6020 = vrot.lane.b32.xlu0 %v13659_v36, %s11553_s10 }
 0xdba   : > { %v5999_v49 = vpop.permute.xlu1 %5998 }
 0xdbe   : > { %v6011_v41 = vpop.permute.xlu1 %6010 }
 0xdbf   : > { %v6232_v2 = vcombine.low %v13639_v34, %v6011_v41  ;;  %v6233_v12 = vcombine.high %v13639_v34, %v6011_v41 }
 0xdc1   : > { %v13720_v18 = vpop.permute.xlu0 %5996  ;;  %v6240_v55 = vrot.slane %v6232_v2, %v12361_v37 }
 0xdc4   : > { %v5995_v8 = vpop.permute.xlu1 %5994 }
 0xdc5   : > { %v13722_v35 = vpop.permute.xlu0 %6008 }
 0xdc6   : > { %v6164_v29 = vcombine.low %v13659_v36, %v13722_v35  ;;  %v6165_v48 = vcombine.high %v13659_v36, %v13722_v35 }
 0xdc8   : > { %v6007_v40 = vpop.permute.xlu1 %6006 }
 0xdc9   : > { %v5993_v22 = vpop.permute.xlu0 %5992  ;;  %v6096_v1 = vcombine.low %v13670_v58, %v6007_v40  ;;  %v6097_v11 = vcombine.high %v13670_v58, %v6007_v40  ;;  %v6247_v58 = vrot.slane %v6233_v12, %v12361_v37 }
 0xdcb   : > { %v6104_v7 = vrot.slane %v6096_v1, %v12361_v37  ;;  %v6111_v23 = vrot.slane %v6097_v11, %v12361_v37 }
 0xdcc   : > { %v6019_v25 = vpop.permute.xlu1 %6018 }
 0xdcd   : > { %v6112_v30 = vcombine.low %v5995_v8, %v6019_v25  ;;  %v6113_v47 = vcombine.high %v5995_v8, %v6019_v25 }
 0xdcf   : > { %v6120_v21 = vrot.slane %v6112_v30, %v12361_v37  ;;  %v6127_v43 = vrot.slane %v6113_v47, %v12361_v37  ;;  %v6005_v26 = vpop.permute.xlu0 %6004 }
 0xdd0   : > { %v6023_v20 = vpop.permute.xlu1 %6022  ;;  %v6028_v46 = vcombine.low %v13685_v3, %v6005_v26  ;;  %v6029_v16 = vcombine.high %v13685_v3, %v6005_v26 }
 0xdd1   : > { %v6128_v60 = vcombine.low %v6104_v7, %v6120_v21  ;;  %v6129_v38 = vcombine.high %v6104_v7, %v6120_v21  ;;  %v6144_v34 = vcombine.low %v6111_v23, %v6127_v43  ;;  %v6145_v15 = vcombine.high %v6111_v23, %v6127_v43 }
 0xdd2   : > { %v6248_v0 = vcombine.low %v5999_v49, %v6023_v20  ;;  %v6249_v57 = vcombine.high %v5999_v49, %v6023_v20  ;;  %v6036_v39 = vrot.slane %v6028_v46, %v12361_v37  ;;  %v6043_v49 = vrot.slane %v6029_v16, %v12361_v37 }
 0xdd3   : > { %v6136_v51 = vrot.slane %v6128_v60, %v12368_v45  ;;  %v6143_v17 = vrot.slane %v6129_v38, %v12368_v45  ;;  %v6152_v33 = vrot.slane %v6144_v34, %v12368_v45  ;;  %v6159_v52 = vrot.slane %v6145_v15, %v12368_v45  ;;  %v6017_v61 = vpop.permute.xlu0 %6016 }
 0xdd4   : > { %v6256_v63 = vrot.slane %v6248_v0, %v12361_v37  ;;  %v6263_v3 = vrot.slane %v6249_v57, %v12361_v37  ;;  %v6044_v27 = vcombine.low %v5993_v22, %v6017_v61  ;;  %v6045_v6 = vcombine.high %v5993_v22, %v6017_v61 }
 0xdd5   : > { %v6368_v24 = vcombine.low %v6136_v51, %v6143_v17  ;;  %v9689_v42 = vcombine.high %v6136_v51, %v6143_v17  ;;  %v6384_v59 = vcombine.low %v6152_v33, %v6159_v52  ;;  %v9690_v28 = vcombine.high %v6152_v33, %v6159_v52 }
 0xdd6   : > { %v6264_v32 = vcombine.low %v6240_v55, %v6256_v63  ;;  %v6265_v50 = vcombine.high %v6240_v55, %v6256_v63  ;;  %v6280_v5 = vcombine.low %v6247_v58, %v6263_v3  ;;  %v6281_v54 = vcombine.high %v6247_v58, %v6263_v3 }
 0xdd7   : > { %v13753_v35 = vrot.slane %v6368_v24, %v12361_v37  ;;  %v13756_v40 = vrot.slane %v9689_v42, %v12361_v37  ;;  %v6052_v22 = vrot.slane %v6044_v27, %v12361_v37  ;;  %v6059_v1 = vrot.slane %v6045_v6, %v12361_v37  ;;  %v6021_v11 = vpop.permute.xlu0 %6020 }
 0xdd8   : > { %v6272_v36 = vrot.slane %v6264_v32, %v12368_v45  ;;  %v6279_v44 = vrot.slane %v6265_v50, %v12368_v45  ;;  %v6288_v41 = vrot.slane %v6280_v5, %v12368_v45  ;;  %v6295_v8 = vrot.slane %v6281_v54, %v12368_v45 }
 0xdd9   : > { %v6060_v47 = vcombine.low %v6036_v39, %v6052_v22  ;;  %v6061_v7 = vcombine.high %v6036_v39, %v6052_v22  ;;  %v6076_v23 = vcombine.low %v6043_v49, %v6059_v1  ;;  %v6077_v21 = vcombine.high %v6043_v49, %v6059_v1 }
 0xdda   : > { %v6504_v2 = vcombine.low %v6272_v36, %v6279_v44  ;;  %v9693_v12 = vcombine.high %v6272_v36, %v6279_v44  ;;  %v6520_v25 = vcombine.low %v6288_v41, %v6295_v8  ;;  %v9694_v30 = vcombine.high %v6288_v41, %v6295_v8 }
 0xddb   : > { %v13761_v43 = vrot.slane %v6384_v59, %v12361_v37  ;;  %v13764_v26 = vrot.slane %v9690_v28, %v12361_v37  ;;  %v6180_v55 = vcombine.low %v13720_v18, %v6021_v11  ;;  %v6181_v58 = vcombine.high %v13720_v18, %v6021_v11 }
 0xddc   : > { %v6068_v20 = vrot.slane %v6060_v47, %v12368_v45  ;;  %v6075_v60 = vrot.slane %v6061_v7, %v12368_v45  ;;  %v6084_v38 = vrot.slane %v6076_v23, %v12368_v45  ;;  %v6091_v34 = vrot.slane %v6077_v21, %v12368_v45 }
 0xddd   : > { %v13773_v15 = vrot.slane %v6504_v2, %v12361_v37  ;;  %v13776_v46 = vrot.slane %v9693_v12, %v12361_v37  ;;  %v13779_v16 = vrot.slane %v6520_v25, %v12361_v37  ;;  %v13782_v0 = vrot.slane %v9694_v30, %v12361_v37 }
 0xdde   : > { %v6300_v18 = vcombine.low %v6068_v20, %v6075_v60  ;;  %v9687_v57 = vcombine.high %v6068_v20, %v6075_v60  ;;  %v6316_v51 = vcombine.low %v6084_v38, %v6091_v34  ;;  %v9688_v17 = vcombine.high %v6084_v38, %v6091_v34 }
 0xddf   : > { %v6172_v33 = vrot.slane %v6164_v29, %v12361_v37  ;;  %v6179_v52 = vrot.slane %v6165_v48, %v12361_v37  ;;  %v6188_v42 = vrot.slane %v6180_v55, %v12361_v37  ;;  %v6195_v27 = vrot.slane %v6181_v58, %v12361_v37 }
 0xde0   : > { %v6307_v61 = vrot.slane %v6300_v18, %v12361_v37  ;;  %v6315_v63 = vrot.slane %v9687_v57, %v12361_v37  ;;  %v6323_v3 = vrot.slane %v6316_v51, %v12361_v37  ;;  %v6331_v24 = vrot.slane %v9688_v17, %v12361_v37 }
 0xde1   : > { %v6400_v6 = vcombine.low %v13753_v35, %v13756_v40  ;;  %v6416_v29 = vcombine.low %v13761_v43, %v13764_v26  ;;  %v6536_v48 = vcombine.low %v13773_v15, %v13776_v46  ;;  %v6552_v32 = vcombine.low %v13779_v16, %v13782_v0 }
 0xde2   : > { %v6332_v50 = vcombine.low %v6307_v61, %v6315_v63  ;;  %v6348_v5 = vcombine.low %v6323_v3, %v6331_v24  ;;  %v6196_v54 = vcombine.low %v6172_v33, %v6188_v42  ;;  %v6197_v59 = vcombine.high %v6172_v33, %v6188_v42 }
 0xde3   : > { %v6212_v28 = vcombine.low %v6179_v52, %v6195_v27  ;;  %v6213_v39 = vcombine.high %v6179_v52, %v6195_v27  ;;  %v6408_v44 = vrot.slane %v6400_v6, %v12368_v45  ;;  %v6424_v41 = vrot.slane %v6416_v29, %v12368_v45 }
 0xde4   : > { %v6340_v49 = vrot.slane %v6332_v50, %v12368_v45  ;;  %v6356_v36 = vrot.slane %v6348_v5, %v12368_v45  ;;  %v6204_v8 = vrot.slane %v6196_v54, %v12368_v45  ;;  %v6211_v22 = vrot.slane %v6197_v59, %v12368_v45 }
 0xde5   : > { %v6220_v1 = vrot.slane %v6212_v28, %v12368_v45  ;;  %v6227_v11 = vrot.slane %v6213_v39, %v12368_v45  ;;  %v6432_v12 = vcombine.low %v6408_v44, %v6424_v41  ;;  %v6433_v30 = vcombine.high %v6408_v44, %v6424_v41 }
 0xde6   : > { %v6364_v2 = vcombine.low %v6340_v49, %v6356_v36  ;;  %v6365_v25 = vcombine.high %v6340_v49, %v6356_v36  ;;  %v6436_v47 = vcombine.low %v6204_v8, %v6211_v22  ;;  %v9691_v7 = vcombine.high %v6204_v8, %v6211_v22 }
 0xde7   : > { %v6452_v23 = vcombine.low %v6220_v1, %v6227_v11  ;;  %v9692_v21 = vcombine.high %v6220_v1, %v6227_v11  ;;  %v6333_v20 = vcombine.high %v6307_v61, %v6315_v63  ;;  %v6349_v60 = vcombine.high %v6323_v3, %v6331_v24 }
 0xde8   : > { %v7156_v55 = vpack.c.bf16 %v6432_v12, %v6364_v2  ;;  %v7158_v58 = vpack.c.bf16 %v6433_v30, %v6365_v25  ;;  %v6443_v38 = vrot.slane %v6436_v47, %v12361_v37  ;;  %v6451_v34 = vrot.slane %v9691_v7, %v12361_v37 }
 0xde9   : > { %v6459_v18 = vrot.slane %v6452_v23, %v12361_v37  ;;  %v6467_v57 = vrot.slane %v9692_v21, %v12361_v37  ;;  %v6544_v51 = vrot.slane %v6536_v48, %v12368_v45  ;;  %v6560_v17 = vrot.slane %v6552_v32, %v12368_v45 }
 0xdea   : > { %10199 = vmatprep.mubr.msk.bf16.mxu0 %vm4182_vm1, %v7156_v55  ;;  %10205 = vmatprep.mubr.msk.bf16.mxu1 %vm4182_vm1, %v7158_v58  ;;  %v6401_v33 = vcombine.high %v13753_v35, %v13756_v40  ;;  %v6468_v52 = vcombine.low %v6443_v38, %v6451_v34  ;;  %v6347_v63 = vrot.slane %v6333_v20, %v12368_v45  ;;  %v7349_v41 = vsel %vm4182_vm1, %v13702_v4, 0 }
 0xdeb   : > { %v6484_v61 = vcombine.low %v6459_v18, %v6467_v57  ;;  %v6363_v3 = vrot.slane %v6349_v60, %v12368_v45  ;;  %v6469_v24 = vcombine.high %v6443_v38, %v6451_v34  ;;  %v6485_v42 = vcombine.high %v6459_v18, %v6467_v57 }
 0xdec   : > { %v6417_v27 = vcombine.high %v13761_v43, %v13764_v26  ;;  %v6537_v6 = vcombine.high %v13773_v15, %v13776_v46  ;;  %v6476_v29 = vrot.slane %v6468_v52, %v12368_v45  ;;  %v6415_v35 = vrot.slane %v6401_v33, %v12368_v45 }
 0xded   : > { %v6492_v48 = vrot.slane %v6484_v61, %v12368_v45  ;;  %v6553_v40 = vcombine.high %v13779_v16, %v13782_v0  ;;  %v6568_v32 = vcombine.low %v6544_v51, %v6560_v17  ;;  %v6569_v50 = vcombine.high %v6544_v51, %v6560_v17 }
 0xdee   : > { %v6431_v5 = vrot.slane %v6417_v27, %v12368_v45  ;;  %v6366_v28 = vcombine.low %v6347_v63, %v6363_v3  ;;  %v6367_v43 = vcombine.high %v6347_v63, %v6363_v3  ;;  %v6483_v26 = vrot.slane %v6469_v24, %v12368_v45 }
 0xdef   : > { %v6500_v54 = vcombine.low %v6476_v29, %v6492_v48  ;;  %v6501_v59 = vcombine.high %v6476_v29, %v6492_v48  ;;  %v6499_v15 = vrot.slane %v6485_v42, %v12368_v45  ;;  %v6551_v44 = vrot.slane %v6537_v6, %v12368_v45 }
 0xdf0   : > { %v6434_v49 = vcombine.low %v6415_v35, %v6431_v5  ;;  %v6435_v36 = vcombine.high %v6415_v35, %v6431_v5  ;;  %v7291_v16 = vsel %vm4182_vm1, %v13700_v9, 0  ;;  %v6567_v0 = vrot.slane %v6553_v40, %v12368_v45 }
 0xdf1   : > { %v7157_v46 = vpack.c.bf16 %v6568_v32, %v6500_v54  ;;  %v7159_v39 = vpack.c.bf16 %v6569_v50, %v6501_v59  ;;  %v6502_v1 = vcombine.low %v6483_v26, %v6499_v15  ;;  %v6503_v11 = vcombine.high %v6483_v26, %v6499_v15  ;;  %v9678_v54 = vld [vmem:[%s14565_s23] ss:$0 sm:$0xff] }
 0xdf2   : > { %v7160_v8 = vpack.c.bf16 %v6434_v49, %v6366_v28  ;;  %v7162_v22 = vpack.c.bf16 %v6435_v36, %v6367_v43  ;;  %v6570_v9 = vcombine.low %v6551_v44, %v6567_v0  ;;  %v6571_v2 = vcombine.high %v6551_v44, %v6567_v0 }
 0xdf3   : > { %10200 = vmatmul.mubr.msk.bf16.vlgmr.msra.gmra.mrb[32].mxu0 %vm4182_vm1, %v7157_v46  ;;  %10206 = vmatmul.mubr.msk.bf16.vlgmr.msra.gmra.mrb[32].mxu1 %vm4182_vm1, %v7159_v39  ;;  %v13904_v59 = vadd.f32 %v9678_v54, %v13718_v56  ;;  %v13909_v28 = vadd.f32 %v9678_v54, %v13716_v10 }
 0xdf4   : > { %10210 = vmatpush3.bf16.xpose.msra.mxu0 %v7291_v16  ;;  %10216 = vmatpush3.bf16.xpose.msra.mxu1 %v7349_v41  ;;  %v7161_v12 = vpack.c.bf16 %v6570_v9, %v6502_v1  ;;  %v7163_v25 = vpack.c.bf16 %v6571_v2, %v6503_v11 }
 0xdf5   : > { %10211 = vmatprep.mubr.msk.bf16.mxu0 %vm4182_vm1, %v7160_v8  ;;  %10217 = vmatprep.mubr.msk.bf16.mxu1 %vm4182_vm1, %v7162_v22 }
 0xdfb   : > { %10212 = vmatmul.mubr.msk.bf16.vlgmr.msra.gmra.mrb[36].mxu0 %vm4182_vm1, %v7161_v12  ;;  %10218 = vmatmul.mubr.msk.bf16.vlgmr.msra.gmra.mrb[36].mxu1 %vm4182_vm1, %v7163_v25 }
 0xec6   : > { %v10201_v30 = vpop.f32.mrb[32].mxu0  ;;  %v13844_v4 = vpop.f32.mrb[32].mxu1 }
 0xec7   : > { %v13846_v47 = vpop.f32.mrb[33].mxu0  ;;  %v13848_v7 = vpop.f32.mrb[33].mxu1  ;;  %v7406_v23 = vsel %vm2757_vm0, %v10201_v30, -inf  ;;  %v7418_v38 = vsel %vm2757_vm0, %v13844_v4, -inf }
 0xec8   : > { %v13851_v21 = vpop.f32.mrb[34].mxu1  ;;  %7407 = vmax.xlane.f32.xlu0 %v7406_v23  ;;  %v10202_v55 = vpop.f32.mrb[34].mxu0  ;;  %v7400_v33 = vsel %vm2757_vm0, %v13846_v47, -inf  ;;  %v7412_v42 = vsel %vm2757_vm0, %v13848_v7, -inf }
 0xec9   : > { %v13853_v58 = vpop.f32.mrb[35].mxu0  ;;  %v13855_v20 = vpop.f32.mrb[35].mxu1  ;;  %v7409_v60 = vsel %vm2757_vm0, %v10202_v55, -inf  ;;  %v7421_v34 = vsel %vm2757_vm0, %v13851_v21, -inf }
 0xeca   : > { %7410 = vmax.xlane.f32.xlu1 %v7409_v60  ;;  %v7403_v24 = vsel %vm2757_vm0, %v13853_v58, -inf  ;;  %v7415_v6 = vsel %vm2757_vm0, %v13855_v20, -inf }
 0xecc   : > { %7419 = vmax.xlane.f32.xlu0 %v7418_v38 }
 0xece   : > { %v13862_v18 = vpop.f32.mrb[36].mxu1  ;;  %7422 = vmax.xlane.f32.xlu1 %v7421_v34  ;;  %v13864_v57 = vpop.f32.mrb[36].mxu0 }
 0xecf   : > { %v13866_v51 = vpop.f32.mrb[37].mxu0  ;;  %v13868_v17 = vpop.f32.mrb[37].mxu1  ;;  %v7430_v48 = vsel %vm2757_vm0, %v13864_v57, -inf  ;;  %v7442_v40 = vsel %vm2757_vm0, %v13862_v18, -inf }
 0xed0   : > { %v13872_v52 = vpop.f32.mrb[38].mxu1  ;;  %7401 = vmax.xlane.f32.xlu0 %v7400_v33  ;;  %v13874_v61 = vpop.f32.mrb[38].mxu0  ;;  %v7424_v50 = vsel %vm2757_vm0, %v13866_v51, -inf  ;;  %v7436_v5 = vsel %vm2757_vm0, %v13868_v17, -inf }
 0xed1   : > { %v13876_v63 = vpop.f32.mrb[39].mxu0  ;;  %v13878_v3 = vpop.f32.mrb[39].mxu1  ;;  %v7433_v27 = vsel %vm2757_vm0, %v13874_v61, -inf  ;;  %v7445_v29 = vsel %vm2757_vm0, %v13872_v52, -inf }
 0xed2   : > { %7404 = vmax.xlane.f32.xlu1 %v7403_v24  ;;  %v7427_v35 = vsel %vm2757_vm0, %v13876_v63, -inf  ;;  %v7439_v32 = vsel %vm2757_vm0, %v13878_v3, -inf }
 0xed4   : > { %7413 = vmax.xlane.f32.xlu0 %v7412_v42 }
 0xed6   : > { %7434 = vmax.xlane.f32.xlu1 %v7433_v27 }
 0xed8   : > { %7416 = vmax.xlane.f32.xlu0 %v7415_v6 }
 0xeda   : > { %7446 = vmax.xlane.f32.xlu1 %v7445_v29 }
 0xedc   : > { %7431 = vmax.xlane.f32.xlu0 %v7430_v48 }
 0xede   : > { %7428 = vmax.xlane.f32.xlu1 %v7427_v35 }
 0xee0   : > { %7443 = vmax.xlane.f32.xlu0 %v7442_v40 }
 0xee2   : > { %7440 = vmax.xlane.f32.xlu1 %v7439_v32 }
 0xee4   : > { %7425 = vmax.xlane.f32.xlu0 %v7424_v50 }
 0xee8   : > { %7437 = vmax.xlane.f32.xlu0 %v7436_v5 }
 0xef3   : > { %6868 = vrot.lane.b32.xlu1 %v13904_v59, %s11551_s20 }
 0xef7   : > { %6872 = vrot.lane.b32.xlu1 %v13909_v28, %s11552_s26 }
 0xefb   : > { %6874 = vrot.lane.b32.xlu1 %v13904_v59, %s11552_s26 }
 0xefe   : > { %6866 = vrot.lane.b32.xlu0 %v13909_v28, %s11551_s20 }
 0xeff   : > { %6880 = vrot.lane.b32.xlu1 %v13904_v59, %s11553_s10 }
 0xf02   : > { %6878 = vrot.lane.b32.xlu0 %v13909_v28, %s11553_s10 }
 0xf55   : > { %v7408_v56 = vpop.xlane.xlu0 %7407 }
 0xf56   : > { %v7450_v43 = vsub.f32 %v10201_v30, %v7408_v56 }
 0xf57   : > { %v7411_v26 = vpop.xlane.xlu1 %7410 }
 0xf58   : > { %v7468_v10 = vmul.f32 1.442695, %v7450_v43  ;;  %v7451_v15 = vsub.f32 %v10202_v55, %v7411_v26 }
 0xf59   : > { %v7420_v46 = vpop.xlane.xlu0 %7419 }
 0xf5a   : > { %10821 = vpow2.f32 %v7468_v10  ;;  %v7470_v39 = vmul.f32 1.442695, %v7451_v15  ;;  %v7454_v49 = vsub.f32 %v13844_v4, %v7420_v46 }
 0xf5b   : > { %v7423_v36 = vpop.xlane.xlu1 %7422 }
 0xf5c   : > { %10823 = vpow2.f32 %v7470_v39  ;;  %v7476_v44 = vmul.f32 1.442695, %v7454_v49  ;;  %v7455_v16 = vsub.f32 %v13851_v21, %v7423_v36 }
 0xf5d   : > { %v7402_v0 = vpop.xlane.xlu0 %7401 }
 0xf5e   : > { %10825 = vpow2.f32 %v7476_v44  ;;  %v7478_v41 = vmul.f32 1.442695, %v7455_v16  ;;  %v7448_v8 = vsub.f32 %v13846_v47, %v7402_v0 }
 0xf5f   : > { %v7405_v22 = vpop.xlane.xlu1 %7404 }
 0xf60   : > { %10827 = vpow2.f32 %v7478_v41  ;;  %v7464_v1 = vmul.f32 1.442695, %v7448_v8  ;;  %v7449_v11 = vsub.f32 %v13853_v58, %v7405_v22 }
 0xf61   : > { %v7414_v9 = vpop.xlane.xlu0 %7413 }
 0xf62   : > { %10829 = vpow2.f32 %v7464_v1  ;;  %v7466_v2 = vmul.f32 1.442695, %v7449_v11  ;;  %v7452_v12 = vsub.f32 %v13848_v7, %v7414_v9 }
 0xf63   : > { %v7435_v25 = vpop.xlane.xlu1 %7434 }
 0xf64   : > { %v13926_v30 = vpop.eup %10821  ;;  %10831 = vpow2.f32 %v7466_v2  ;;  %v7472_v4 = vmul.f32 1.442695, %v7452_v12  ;;  %v7459_v23 = vsub.f32 %v13874_v61, %v7435_v25 }
 0xf65   : > { %v7417_v21 = vpop.xlane.xlu0 %7416  ;;  %v7502_v47 = vsel %vm2757_vm0, %v13926_v30, 0.0 }
 0xf66   : > { %v13931_v55 = vpop.eup %10823  ;;  %10833 = vpow2.f32 %v7472_v4  ;;  %v7453_v58 = vsub.f32 %v13855_v20, %v7417_v21  ;;  %7503 = vadd.xlane.f32.xlu0 %v7502_v47  ;;  %v7486_v34 = vmul.f32 1.442695, %v7459_v23 }
 0xf67   : > { %v7447_v60 = vpop.xlane.xlu1 %7446  ;;  %v7505_v7 = vsel %vm2757_vm0, %v13931_v55, 0.0 }
 0xf68   : > { %v13936_v38 = vpop.eup %10825  ;;  %v7474_v33 = vmul.f32 1.442695, %v7453_v58  ;;  %7506 = vadd.xlane.f32.xlu1 %v7505_v7  ;;  %v7463_v48 = vsub.f32 %v13872_v52, %v7447_v60 }
 0xf69   : > { %v7432_v61 = vpop.xlane.xlu0 %7431  ;;  %v7514_v24 = vsel %vm2757_vm0, %v13936_v38, 0.0 }
 0xf6a   : > { %v13940_v42 = vpop.eup %10827  ;;  %10835 = vpow2.f32 %v7474_v33  ;;  %v7458_v27 = vsub.f32 %v13864_v57, %v7432_v61  ;;  %7515 = vadd.xlane.f32.xlu0 %v7514_v24  ;;  %v7494_v52 = vmul.f32 1.442695, %v7463_v48 }
 0xf6b   : > { %v7429_v20 = vpop.xlane.xlu1 %7428  ;;  %v7517_v6 = vsel %vm2757_vm0, %v13940_v42, 0.0  ;;  %10837 = vpow2.f32 %v7486_v34 }
 0xf6c   : > { %v13945_v29 = vpop.eup %10829  ;;  %v7484_v35 = vmul.f32 1.442695, %v7458_v27  ;;  %v7457_v40 = vsub.f32 %v13876_v63, %v7429_v20  ;;  %7518 = vadd.xlane.f32.xlu1 %v7517_v6 }
 0xf6d   : > { %v7444_v32 = vpop.xlane.xlu0 %7443  ;;  %v7496_v50 = vsel %vm2757_vm0, %v13945_v29, 0.0 }
 0xf6e   : > { %v13951_v5 = vpop.eup %10831  ;;  %10839 = vpow2.f32 %v7484_v35  ;;  %v7482_v57 = vmul.f32 1.442695, %v7457_v40  ;;  %7497 = vadd.xlane.f32.xlu0 %v7496_v50  ;;  %v7462_v16 = vsub.f32 %v13862_v18, %v7444_v32 }
 0xf6f   : > { %v7441_v54 = vpop.xlane.xlu1 %7440  ;;  %v7499_v56 = vsel %vm2757_vm0, %v13951_v5, 0.0 }
 0xf70   : > { %v13955_v43 = vpop.eup %10833  ;;  %10841 = vpow2.f32 %v7482_v57  ;;  %7500 = vadd.xlane.f32.xlu1 %v7499_v56  ;;  %v7461_v8 = vsub.f32 %v13878_v3, %v7441_v54  ;;  %v7492_v18 = vmul.f32 1.442695, %v7462_v16 }
 0xf71   : > { %v7426_v63 = vpop.xlane.xlu0 %7425  ;;  %v7508_v26 = vsel %vm2757_vm0, %v13955_v43, 0.0  ;;  %10843 = vpow2.f32 %v7494_v52 }
 0xf72   : > { %v7456_v10 = vsub.f32 %v13866_v51, %v7426_v63  ;;  %7509 = vadd.xlane.f32.xlu0 %v7508_v26  ;;  %v7490_v4 = vmul.f32 1.442695, %v7461_v8 }
 0xf73   : > { %v6869_v15 = vpop.permute.xlu1 %6868 }
 0xf74   : > { %v13960_v46 = vpop.eup %10835  ;;  %v7480_v39 = vmul.f32 1.442695, %v7456_v10 }
 0xf75   : > { %v7438_v49 = vpop.xlane.xlu0 %7437  ;;  %v7511_v36 = vsel %vm2757_vm0, %v13960_v46, 0.0  ;;  %v13964_v44 = vpop.eup %10837 }
 0xf76   : > { %10845 = vpow2.f32 %v7480_v39  ;;  %v7460_v0 = vsub.f32 %v13868_v17, %v7438_v49  ;;  %7512 = vadd.xlane.f32.xlu1 %v7511_v36  ;;  %v7529_v9 = vsel %vm2757_vm0, %v13964_v44, 0.0 }
 0xf77   : > { %v6873_v41 = vpop.permute.xlu1 %6872 }
 0xf78   : > { %v13968_v51 = vpop.eup %10839  ;;  %v7488_v22 = vmul.f32 1.442695, %v7460_v0  ;;  %v6884_v17 = vcombine.low %v13909_v28, %v6873_v41  ;;  %v6885_v12 = vcombine.high %v13909_v28, %v6873_v41 }
 0xf79   : > { %v6867_v1 = vpop.permute.xlu0 %6866  ;;  %v7526_v11 = vsel %vm2757_vm0, %v13968_v51, 0.0 }
 0xf7a   : > { %v13975_v2 = vpop.eup %10841  ;;  %7527 = vadd.xlane.f32.xlu0 %v7526_v11  ;;  %7530 = vadd.xlane.f32.xlu1 %v7529_v9  ;;  %10847 = vpow2.f32 %v7488_v22  ;;  %v6892_v60 = vrot.slane %v6884_v17, %v12361_v37  ;;  %v6899_v7 = vrot.slane %v6885_v12, %v12361_v37 }
 0xf7b   : > { %v6875_v25 = vpop.permute.xlu1 %6874  ;;  %v7523_v23 = vsel %vm2757_vm0, %v13975_v2, 0.0  ;;  %v13981_v21 = vpop.eup %10843  ;;  %10849 = vpow2.f32 %v7492_v18 }
 0xf7c   : > { %v6952_v34 = vcombine.low %v13904_v59, %v6875_v25  ;;  %v6953_v28 = vcombine.high %v13904_v59, %v6875_v25  ;;  %10851 = vpow2.f32 %v7490_v4  ;;  %v7541_v35 = vsel %vm2757_vm0, %v13981_v21, 0.0 }
 0xf7d   : > { %v6879_v3 = vpop.permute.xlu0 %6878 }
 0xf7e   : > { %v6900_v47 = vcombine.low %v6867_v1, %v6879_v3  ;;  %v6901_v58 = vcombine.high %v6867_v1, %v6879_v3  ;;  %7524 = vadd.xlane.f32.xlu1 %v7523_v23  ;;  %v6960_v57 = vrot.slane %v6952_v34, %v12361_v37  ;;  %v6967_v54 = vrot.slane %v6953_v28, %v12361_v37 }
 0xf7f   : > { %v6881_v33 = vpop.permute.xlu1 %6880 }
 0xf80   : > { %v13987_v61 = vpop.eup %10845  ;;  %v6908_v24 = vrot.slane %v6900_v47, %v12361_v37  ;;  %v6915_v27 = vrot.slane %v6901_v58, %v12361_v37  ;;  %v6968_v20 = vcombine.low %v6869_v15, %v6881_v33  ;;  %v6969_v6 = vcombine.high %v6869_v15, %v6881_v33 }
 0xf81   : > { %v7520_v48 = vsel %vm2757_vm0, %v13987_v61, 0.0 }
 0xf82   : > { %v6916_v40 = vcombine.low %v6892_v60, %v6908_v24  ;;  %v6917_v32 = vcombine.high %v6892_v60, %v6908_v24  ;;  %v6932_v50 = vcombine.low %v6899_v7, %v6915_v27  ;;  %v6933_v59 = vcombine.high %v6899_v7, %v6915_v27  ;;  %7521 = vadd.xlane.f32.xlu0 %v7520_v48 }
 0xf83   : > { %v6976_v56 = vrot.slane %v6968_v20, %v12361_v37  ;;  %v6983_v52 = vrot.slane %v6969_v6, %v12361_v37  ;;  %7542 = vadd.xlane.f32.xlu1 %v7541_v35 }
 0xf84   : > { %v6924_v63 = vrot.slane %v6916_v40, %v12368_v45  ;;  %v6931_v26 = vrot.slane %v6917_v32, %v12368_v45  ;;  %v6940_v10 = vrot.slane %v6932_v50, %v12368_v45  ;;  %v6947_v15 = vrot.slane %v6933_v59, %v12368_v45  ;;  %v14003_v1 = vpop.eup %10847 }
 0xf85   : > { %v6984_v39 = vcombine.low %v6960_v57, %v6976_v56  ;;  %v6985_v49 = vcombine.high %v6960_v57, %v6976_v56  ;;  %v7000_v36 = vcombine.low %v6967_v54, %v6983_v52  ;;  %v7001_v16 = vcombine.high %v6967_v54, %v6983_v52  ;;  %v14009_v12 = vpop.eup %10849 }
 0xf86   : > { %v7020_v0 = vcombine.low %v6924_v63, %v6931_v26  ;;  %v9699_v41 = vcombine.high %v6924_v63, %v6931_v26  ;;  %v7036_v8 = vcombine.low %v6940_v10, %v6947_v15  ;;  %v9700_v22 = vcombine.high %v6940_v10, %v6947_v15  ;;  %v14017_v27 = vpop.eup %10851 }
 0xf87   : > { %v6992_v11 = vrot.slane %v6984_v39, %v12368_v45  ;;  %v6999_v9 = vrot.slane %v6985_v49, %v12368_v45  ;;  %v7008_v18 = vrot.slane %v7000_v36, %v12368_v45  ;;  %v7015_v17 = vrot.slane %v7001_v16, %v12368_v45 }
 0xf88   : > { %v7027_v25 = vrot.slane %v7020_v0, %v12361_v37  ;;  %v7035_v4 = vrot.slane %v9699_v41, %v12361_v37  ;;  %v7043_v3 = vrot.slane %v7036_v8, %v12361_v37  ;;  %v7051_v23 = vrot.slane %v9700_v22, %v12361_v37 }
 0xf89   : > { %v7088_v47 = vcombine.low %v6992_v11, %v6999_v9  ;;  %v9701_v58 = vcombine.high %v6992_v11, %v6999_v9  ;;  %v7104_v60 = vcombine.low %v7008_v18, %v7015_v17  ;;  %v9702_v7 = vcombine.high %v7008_v18, %v7015_v17 }
 0xf8a   : > { %v7532_v34 = vsel %vm2757_vm0, %v14003_v1, 0.0  ;;  %v7052_v28 = vcombine.low %v7027_v25, %v7035_v4  ;;  %v7068_v33 = vcombine.low %v7043_v3, %v7051_v23  ;;  %v7053_v24 = vcombine.high %v7027_v25, %v7035_v4 }
 0xf8b   : > { %v7095_v20 = vrot.slane %v7088_v47, %v12361_v37  ;;  %v7103_v6 = vrot.slane %v9701_v58, %v12361_v37  ;;  %v7111_v48 = vrot.slane %v7104_v60, %v12361_v37  ;;  %v7119_v35 = vrot.slane %v9702_v7, %v12361_v37  ;;  %7533 = vadd.xlane.f32.xlu0 %v7532_v34 }
 0xf8c   : > { %v7060_v40 = vrot.slane %v7052_v28, %v12368_v45  ;;  %v7076_v32 = vrot.slane %v7068_v33, %v12368_v45  ;;  %v7069_v50 = vcombine.high %v7043_v3, %v7051_v23  ;;  %v7535_v52 = vsel %vm2757_vm0, %v14017_v27, 0.0 }
 0xf8d   : > { %v7120_v59 = vcombine.low %v7095_v20, %v7103_v6  ;;  %v7136_v57 = vcombine.low %v7111_v48, %v7119_v35  ;;  %v7121_v54 = vcombine.high %v7095_v20, %v7103_v6  ;;  %v7137_v56 = vcombine.high %v7111_v48, %v7119_v35 }
 0xf8e   : > { %v7067_v63 = vrot.slane %v7053_v24, %v12368_v45  ;;  %v7083_v26 = vrot.slane %v7069_v50, %v12368_v45  ;;  %v7084_v36 = vcombine.low %v7060_v40, %v7076_v32  ;;  %v7085_v16 = vcombine.high %v7060_v40, %v7076_v32 }
 0xf8f   : > { %7536 = vadd.xlane.f32.xlu0 %v7535_v52  ;;  %v7128_v10 = vrot.slane %v7120_v59, %v12368_v45  ;;  %v7144_v15 = vrot.slane %v7136_v57, %v12368_v45  ;;  %v7135_v39 = vrot.slane %v7121_v54, %v12368_v45  ;;  %v7151_v49 = vrot.slane %v7137_v56, %v12368_v45 }
 0xf90   : > { %v7538_v11 = vsel %vm2757_vm0, %v14009_v12, 0.0  ;;  %v7086_v17 = vcombine.low %v7067_v63, %v7083_v26  ;;  %v7087_v25 = vcombine.high %v7067_v63, %v7083_v26 }
 0xf91   : > { %v7152_v0 = vcombine.low %v7128_v10, %v7144_v15  ;;  %v7153_v41 = vcombine.high %v7128_v10, %v7144_v15  ;;  %v7154_v8 = vcombine.low %v7135_v39, %v7151_v49  ;;  %v7155_v22 = vcombine.high %v7135_v39, %v7151_v49 }
 0xf93   : > { %7539 = vadd.xlane.f32.xlu0 %v7538_v11  ;;  %v7584_v9 = vpack.c.bf16 %v7152_v0, %v7084_v36  ;;  %v7585_v18 = vpack.c.bf16 %v7153_v41, %v7085_v16  ;;  %v7586_v4 = vpack.c.bf16 %v7154_v8, %v7086_v17  ;;  %v7587_v3 = vpack.c.bf16 %v7155_v22, %v7087_v25 }
 0xf95   : > { %10221 = vmatprep.subr.bf16.mxu0 %v7584_v9  ;;  %10227 = vmatprep.subr.bf16.mxu1 %v7585_v18 }
 0xf96   : > { %10222 = vmatpush3.bf16.msra.mxu0 %v7584_v9  ;;  %10228 = vmatpush3.bf16.msra.mxu1 %v7585_v18 }
 0xf97   : > { %10233 = vmatprep.subr.bf16.mxu0 %v7586_v4  ;;  %10239 = vmatprep.subr.bf16.mxu1 %v7587_v3 }
 0xff3   : > { %v7504_v23 = vpop.xlane.xlu0 %7503 }
 0xff5   : > { %v7507_v47 = vpop.xlane.xlu1 %7506 }
 0xff6   : > { %10853 = vrcp.f32 %v7507_v47 }
 0xff7   : > { %v7516_v58 = vpop.xlane.xlu0 %7515 }
 0xff9   : > { %v7519_v60 = vpop.xlane.xlu1 %7518 }
 0xffb   : > { %v7498_v7 = vpop.xlane.xlu0 %7497 }
 0xffc   : > { %10855 = vrcp.f32 %v7498_v7  ;;  %v10665_v7 = vld [vmem:[#allocation23] sm:$0xff]  }
 0xffd   : > { %10857 = vrcp.f32 %v7504_v23  ;;  %v7501_v34 = vpop.xlane.xlu1 %7500 }
 0xffe   : > { %10859 = vrcp.f32 %v7501_v34  ;;  %v10666_v34 = vld [vmem:[#allocation23 + $0x8] sm:$0xff]  }
 0xfff   : > { %v7510_v28 = vpop.xlane.xlu0 %7509  ;;  %10861 = vrcp.f32 %v7519_v60 }
0x1000   : > { %10863 = vrcp.f32 %v7510_v28  ;;  %v10854_v24 = vpop.eup %10853 }
0x1001   : > { %10865 = vrcp.f32 %v7516_v58  ;;  %v7563_v40 = vmul.f32 %v10854_v24, %v13931_v55 }
0x1003   : > { %v7513_v33 = vpop.xlane.xlu1 %7512 }
0x1004   : > { %10867 = vrcp.f32 %v7513_v33 }
0x1006   : > { %v10856_v20 = vpop.eup %10855 }
0x1007   : > { %v10858_v6 = vpop.eup %10857  ;;  %v7531_v48 = vpop.xlane.xlu1 %7530  ;;  %v7560_v50 = vmul.f32 %v10856_v20, %v13945_v29 }
0x1008   : > { %v10860_v35 = vpop.eup %10859  ;;  %v7528_v32 = vpop.xlane.xlu0 %7527  ;;  %v7562_v57 = vmul.f32 %v10858_v6, %v13926_v30 }
0x1009   : > { %v7561_v59 = vmul.f32 %v10860_v35, %v13951_v5  ;;  %v10862_v54 = vpop.eup %10861  ;;  %10869 = vrcp.f32 %v7528_v32 }
0x100a   : > { %v10864_v63 = vpop.eup %10863  ;;  %v7577_v26 = vpack.c.bf16 %v7563_v40, %v7562_v57  ;;  %10871 = vrcp.f32 %v7531_v48  ;;  %v7567_v55 = vmul.f32 %v10862_v54, %v13940_v42 }
0x100b   : > { %v7525_v56 = vpop.xlane.xlu1 %7524  ;;  %v7576_v52 = vpack.c.bf16 %v7561_v59, %v7560_v50  ;;  %v10866_v10 = vpop.eup %10865  ;;  %v7564_v30 = vmul.f32 %v10864_v63, %v13955_v43 }
0x100c   : > { %10873 = vrcp.f32 %v7525_v56  ;;  %v7566_v39 = vmul.f32 %v10866_v10, %v13936_v38 }
0x100d   : > { %10223 = vmatprep.mubr.msk.bf16.mxu0 %vm2757_vm0, %v7576_v52 }
0x100e   : > { %v10868_v15 = vpop.eup %10867  ;;  %10224 = vmatmul.mubr.msk.bf16.vlgmr.msra.gmra.mrb[40].mxu0 %vm2757_vm0, %v7577_v26  ;;  %v7579_v36 = vpack.c.bf16 %v7567_v55, %v7566_v39 }
0x100f   : > { %10234 = vmatpush3.bf16.msra.mxu0 %v7586_v4  ;;  %v7522_v29 = vpop.xlane.xlu0 %7521  ;;  %v7565_v5 = vmul.f32 %v10868_v15, %v13960_v46 }
0x1010   : > { %10875 = vrcp.f32 %v7522_v29  ;;  %v7543_v11 = vpop.xlane.xlu1 %7542  ;;  %10245 = vmatprep.subr.bf16.mxu0 %v10665_v7 }
0x1011   : > { %v7578_v49 = vpack.c.bf16 %v7565_v5, %v7564_v30 }
0x1013   : > { %10229 = vmatprep.mubr.msk.bf16.mxu1 %vm2757_vm0, %v7578_v49  ;;  %v10870_v42 = vpop.eup %10869 }
0x1014   : > { %10230 = vmatmul.mubr.msk.bf16.vlgmr.msra.gmra.mrb[40].mxu1 %vm2757_vm0, %v7579_v36  ;;  %v10872_v16 = vpop.eup %10871  ;;  %v7570_v22 = vmul.f32 %v10870_v42, %v13968_v51 }
0x1015   : > { %10240 = vmatpush3.bf16.msra.mxu1 %v7587_v3  ;;  %v7571_v43 = vmul.f32 %v10872_v16, %v13964_v44 }
0x1016   : > { %v10874_v0 = vpop.eup %10873 }
0x1017   : > { %v7569_v46 = vmul.f32 %v10874_v0, %v13975_v2  ;;  %v7581_v17 = vpack.c.bf16 %v7571_v43, %v7570_v22 }
0x1018   : > { %v7534_v41 = vpop.xlane.xlu0 %7533 }
0x1019   : > { %10877 = vrcp.f32 %v7534_v41 }
0x101a   : > { %v10876_v8 = vpop.eup %10875 }
0x101b   : > { %v7568_v38 = vmul.f32 %v10876_v8, %v13987_v61 }
0x101c   : > { %v7537_v9 = vpop.xlane.xlu0 %7536 }
0x101d   : > { %10879 = vrcp.f32 %v7537_v9  ;;  %v7580_v18 = vpack.c.bf16 %v7569_v46, %v7568_v38 }
0x101e   : > { %10881 = vrcp.f32 %v7543_v11 }
0x101f   : > { %10235 = vmatprep.mubr.msk.bf16.mxu0 %vm2757_vm0, %v7580_v18 }
0x1020   : > { %v7540_v25 = vpop.xlane.xlu0 %7539  ;;  %10236 = vmatmul.mubr.msk.bf16.vlgmr.msra.gmra.mrb[44].mxu0 %vm2757_vm0, %v7581_v17 }
0x1021   : > { %10883 = vrcp.f32 %v7540_v25  ;;  %10246 = vmatpush3.bf16.msra.mxu0 %v10665_v7 }
0x1022   : > { %10247 = vmatprep.subr.bf16.mxu0 %v10666_v34 }
0x1023   : > { %v10878_v51 = vpop.eup %10877 }
0x1024   : > { %v7572_v44 = vmul.f32 %v10878_v51, %v14003_v1  ;;  %v10667_v1 = vld [vmem:[#allocation23 + $0x10] sm:$0xff]  }
0x1025   : > { %10248 = vmatpush3.bf16.msra.mxu0 %v10666_v34 }
0x1026   : > { %10249 = vmatprep.subr.bf16.mxu0 %v10667_v1 }
0x1027   : > { %v10880_v4 = vpop.eup %10879 }
0x1028   : > { %v7573_v61 = vmul.f32 %v10880_v4, %v14017_v27  ;;  %v10882_v3 = vpop.eup %10881  ;;  %v10668_v27 = vld [vmem:[#allocation23 + $0x18] sm:$0xff]  }
0x1029   : > { %v7575_v47 = vmul.f32 %v10882_v3, %v13981_v21  ;;  %10250 = vmatpush3.bf16.msra.mxu0 %v10667_v1 }
0x102a   : > { %v7582_v2 = vpack.c.bf16 %v7573_v61, %v7572_v44  ;;  %10251 = vmatprep.subr.bf16.mxu0 %v10668_v27 }
0x102b   : > { %v10884_v23 = vpop.eup %10883 }
0x102c   : > { %v7574_v58 = vmul.f32 %v10884_v23, %v14009_v12  ;;  %10241 = vmatprep.mubr.msk.bf16.mxu1 %vm2757_vm0, %v7582_v2 }
0x102d   : > { %10252 = vmatpush3.bf16.msra.mxu0 %v10668_v27 }
0x102e   : > { %v7583_v60 = vpack.c.bf16 %v7575_v47, %v7574_v58 }
0x1030   : > { %10242 = vmatmul.mubr.msk.bf16.vlgmr.msra.gmra.mrb[44].mxu1 %vm2757_vm0, %v7583_v60 }
0x10e1   : > { %v10225_v21 = vpop.f32.mrb[40].mxu0 }
0x10e2   : > { %v7628_v28 = vpop.f32.mrb[41].mxu0 }
0x10e3   : > { %v10226_v12 = vpop.f32.mrb[42].mxu0 }
0x10e4   : > { %v7631_v33 = vpop.f32.mrb[43].mxu0 }
0x10e7   : > { %v10231_v24 = vpop.f32.mrb[40].mxu1 }
0x10e8   : > { %v7683_v20 = vpop.f32.mrb[41].mxu1 }
0x10e9   : > { %v14059_v6 = vpop.f32.mrb[42].mxu1 }
0x10ea   : > { %v14061_v48 = vpop.f32.mrb[43].mxu1 }
0x10f3   : > { %v10237_v35 = vpop.f32.mrb[44].mxu0 }
0x10f4   : > { %v7944_v40 = vcombine.low %v10225_v21, %v10237_v35  ;;  %v7945_v32 = vcombine.high %v10225_v21, %v10237_v35  ;;  %v7738_v50 = vpop.f32.mrb[45].mxu0 }
0x10f5   : > { %v7808_v59 = vcombine.low %v7628_v28, %v7738_v50  ;;  %v7809_v57 = vcombine.high %v7628_v28, %v7738_v50  ;;  %v10238_v54 = vpop.f32.mrb[46].mxu0 }
0x10f6   : > { %v8012_v56 = vcombine.low %v10226_v12, %v10238_v54  ;;  %v8013_v52 = vcombine.high %v10226_v12, %v10238_v54  ;;  %v7741_v63 = vpop.f32.mrb[47].mxu0  ;;  %v7952_v15 = vrot.slane %v7944_v40, %v12361_v37  ;;  %v7959_v55 = vrot.slane %v7945_v32, %v12361_v37 }
0x10f7   : > { %v7876_v26 = vcombine.low %v7631_v33, %v7741_v63  ;;  %v7877_v10 = vcombine.high %v7631_v33, %v7741_v63  ;;  %v7816_v29 = vrot.slane %v7808_v59, %v12361_v37  ;;  %v7823_v30 = vrot.slane %v7809_v57, %v12361_v37 }
0x10f8   : > { %v14068_v39 = vrot.slane %v8012_v56, %v12361_v37  ;;  %v14071_v49 = vrot.slane %v8013_v52, %v12361_v37 }
0x10f9   : > { %v14074_v0 = vrot.slane %v7876_v26, %v12361_v37  ;;  %v14077_v41 = vrot.slane %v7877_v10, %v12361_v37 }
0x1103   : > { %v10243_v5 = vpop.f32.mrb[44].mxu1 }
0x1104   : > { %v7960_v36 = vcombine.low %v10231_v24, %v10243_v5  ;;  %v7961_v42 = vcombine.high %v10231_v24, %v10243_v5  ;;  %v7793_v16 = vpop.f32.mrb[45].mxu1 }
0x1105   : > { %v7824_v8 = vcombine.low %v7683_v20, %v7793_v16  ;;  %v7825_v22 = vcombine.high %v7683_v20, %v7793_v16  ;;  %v10244_v43 = vpop.f32.mrb[46].mxu1 }
0x1106   : > { %v7968_v38 = vrot.slane %v7960_v36, %v12361_v37  ;;  %v7975_v46 = vrot.slane %v7961_v42, %v12361_v37  ;;  %v8028_v11 = vcombine.low %v14059_v6, %v10244_v43  ;;  %v8029_v9 = vcombine.high %v14059_v6, %v10244_v43  ;;  %v7796_v18 = vpop.f32.mrb[47].mxu1 }
0x1107   : > { %v7832_v17 = vrot.slane %v7824_v8, %v12361_v37  ;;  %v7839_v25 = vrot.slane %v7825_v22, %v12361_v37  ;;  %v7892_v51 = vcombine.low %v14061_v48, %v7796_v18  ;;  %v7893_v4 = vcombine.high %v14061_v48, %v7796_v18 }
0x1108   : > { %v7976_v44 = vcombine.low %v7952_v15, %v7968_v38  ;;  %v7977_v61 = vcombine.high %v7952_v15, %v7968_v38  ;;  %v7992_v3 = vcombine.low %v7959_v55, %v7975_v46  ;;  %v7993_v2 = vcombine.high %v7959_v55, %v7975_v46 }
0x1109   : > { %v7840_v23 = vcombine.low %v7816_v29, %v7832_v17  ;;  %v7841_v47 = vcombine.high %v7816_v29, %v7832_v17  ;;  %v7856_v58 = vcombine.low %v7823_v30, %v7839_v25  ;;  %v7857_v60 = vcombine.high %v7823_v30, %v7839_v25 }
0x110a   : > { %v7984_v7 = vrot.slane %v7976_v44, %v12368_v45  ;;  %v7991_v34 = vrot.slane %v7977_v61, %v12368_v45  ;;  %v8000_v1 = vrot.slane %v7992_v3, %v12368_v45  ;;  %v8007_v27 = vrot.slane %v7993_v2, %v12368_v45 }
0x110b   : > { %v7848_v21 = vrot.slane %v7840_v23, %v12368_v45  ;;  %v7855_v28 = vrot.slane %v7841_v47, %v12368_v45  ;;  %v7864_v12 = vrot.slane %v7856_v58, %v12368_v45  ;;  %v7871_v33 = vrot.slane %v7857_v60, %v12368_v45 }
0x110c   : > { %v8216_v24 = vcombine.low %v7984_v7, %v7991_v34  ;;  %v9723_v20 = vcombine.high %v7984_v7, %v7991_v34  ;;  %v8232_v6 = vcombine.low %v8000_v1, %v8007_v27  ;;  %v9724_v48 = vcombine.high %v8000_v1, %v8007_v27 }
0x110d   : > { %v8080_v35 = vcombine.low %v7848_v21, %v7855_v28  ;;  %v9719_v40 = vcombine.high %v7848_v21, %v7855_v28  ;;  %v8096_v32 = vcombine.low %v7864_v12, %v7871_v33  ;;  %v9720_v50 = vcombine.high %v7864_v12, %v7871_v33  ;;  %v10669_v21 = vld [vmem:[#allocation23 + $0x20] sm:$0xff]  }
0x110e   : > { %v14096_v59 = vrot.slane %v8216_v24, %v12361_v37  ;;  %v14099_v57 = vrot.slane %v9723_v20, %v12361_v37  ;;  %v14102_v54 = vrot.slane %v8232_v6, %v12361_v37  ;;  %v14105_v56 = vrot.slane %v9724_v48, %v12361_v37  ;;  %10253 = vmatprep.subr.bf16.mxu0 %v10669_v21 }
0x110f   : > { %v14108_v52 = vrot.slane %v8080_v35, %v12361_v37  ;;  %v14111_v63 = vrot.slane %v9719_v40, %v12361_v37  ;;  %v14114_v26 = vrot.slane %v8096_v32, %v12361_v37  ;;  %v14117_v10 = vrot.slane %v9720_v50, %v12361_v37  ;;  %10254 = vmatpush3.bf16.msra.mxu0 %v10669_v21 }
0x1110   : > { %v8036_v15 = vrot.slane %v8028_v11, %v12361_v37  ;;  %v8043_v55 = vrot.slane %v8029_v9, %v12361_v37  ;;  %v7900_v29 = vrot.slane %v7892_v51, %v12361_v37  ;;  %v7907_v30 = vrot.slane %v7893_v4, %v12361_v37 }
0x1111   : > { %v8248_v5 = vcombine.low %v14096_v59, %v14099_v57  ;;  %v8264_v36 = vcombine.low %v14102_v54, %v14105_v56  ;;  %v8112_v42 = vcombine.low %v14108_v52, %v14111_v63  ;;  %v8128_v16 = vcombine.low %v14114_v26, %v14117_v10 }
0x1112   : > { %v8044_v8 = vcombine.low %v14068_v39, %v8036_v15  ;;  %v8045_v22 = vcombine.high %v14068_v39, %v8036_v15  ;;  %v8060_v43 = vcombine.low %v14071_v49, %v8043_v55  ;;  %v8061_v38 = vcombine.high %v14071_v49, %v8043_v55 }
0x1113   : > { %v7908_v46 = vcombine.low %v14074_v0, %v7900_v29  ;;  %v7909_v11 = vcombine.high %v14074_v0, %v7900_v29  ;;  %v7924_v9 = vcombine.low %v14077_v41, %v7907_v30  ;;  %v7925_v18 = vcombine.high %v14077_v41, %v7907_v30 }
0x1114   : > { %v8052_v17 = vrot.slane %v8044_v8, %v12368_v45  ;;  %v8059_v25 = vrot.slane %v8045_v22, %v12368_v45  ;;  %v8068_v51 = vrot.slane %v8060_v43, %v12368_v45  ;;  %v8075_v39 = vrot.slane %v8061_v38, %v12368_v45  ;;  %v10670_v8 = vld [vmem:[#allocation23 + $0x28] sm:$0xff]  }
0x1115   : > { %v7916_v4 = vrot.slane %v7908_v46, %v12368_v45  ;;  %v7923_v49 = vrot.slane %v7909_v11, %v12368_v45  ;;  %v7932_v44 = vrot.slane %v7924_v9, %v12368_v45  ;;  %v7939_v0 = vrot.slane %v7925_v18, %v12368_v45  ;;  %10255 = vmatprep.subr.bf16.mxu0 %v10670_v8 }
0x1116   : > { %v8284_v61 = vcombine.low %v8052_v17, %v8059_v25  ;;  %v9725_v3 = vcombine.high %v8052_v17, %v8059_v25  ;;  %v8300_v2 = vcombine.low %v8068_v51, %v8075_v39  ;;  %v9726_v41 = vcombine.high %v8068_v51, %v8075_v39  ;;  %10256 = vmatpush3.bf16.msra.mxu0 %v10670_v8 }
0x1117   : > { %v8148_v23 = vcombine.low %v7916_v4, %v7923_v49  ;;  %v9721_v47 = vcombine.high %v7916_v4, %v7923_v49  ;;  %v8164_v58 = vcombine.low %v7932_v44, %v7939_v0  ;;  %v9722_v60 = vcombine.high %v7932_v44, %v7939_v0 }
0x1118   : > { %v8291_v7 = vrot.slane %v8284_v61, %v12361_v37  ;;  %v8299_v34 = vrot.slane %v9725_v3, %v12361_v37  ;;  %v8307_v1 = vrot.slane %v8300_v2, %v12361_v37  ;;  %v8315_v27 = vrot.slane %v9726_v41, %v12361_v37 }
0x1119   : > { %v8155_v28 = vrot.slane %v8148_v23, %v12361_v37  ;;  %v8163_v12 = vrot.slane %v9721_v47, %v12361_v37  ;;  %v8171_v33 = vrot.slane %v8164_v58, %v12361_v37  ;;  %v8179_v24 = vrot.slane %v9722_v60, %v12361_v37  ;;  %v10672_v58 = vld [vmem:[#allocation23 + $0x38] sm:$0xff]  }
0x111a   : > { %v14156_v20 = vrot.slane %v8248_v5, %v12368_v45  ;;  %v14159_v6 = vrot.slane %v8264_v36, %v12368_v45  ;;  %v8316_v48 = vcombine.low %v8291_v7, %v8299_v34  ;;  %v8332_v35 = vcombine.low %v8307_v1, %v8315_v27 }
0x111b   : > { %v14162_v40 = vrot.slane %v8112_v42, %v12368_v45  ;;  %v14165_v32 = vrot.slane %v8128_v16, %v12368_v45  ;;  %v8180_v50 = vcombine.low %v8155_v28, %v8163_v12  ;;  %v8196_v15 = vcombine.low %v8171_v33, %v8179_v24 }
0x111c   : > { %v8281_v37 = vcombine.high %v14156_v20, %v14159_v6  ;;  %v14170_v55 = vrot.slane %v8316_v48, %v12368_v45  ;;  %v14173_v29 = vrot.slane %v8332_v35, %v12368_v45  ;;  %v8249_v30 = vcombine.high %v14096_v59, %v14099_v57 }
0x111d   : > { %v8145_v5 = vcombine.high %v14162_v40, %v14165_v32  ;;  %v14180_v36 = vrot.slane %v8180_v50, %v12368_v45  ;;  %v14183_v42 = vrot.slane %v8196_v15, %v12368_v45  ;;  %v8265_v16 = vcombine.high %v14102_v54, %v14105_v56  ;;  %v10671_v54 = vld [vmem:[#allocation23 + $0x30] sm:$0xff]  }
0x111e   : > { %v8349_v22 = vcombine.high %v14170_v55, %v14173_v29  ;;  %v8263_v43 = vrot.slane %v8249_v30, %v12368_v45  ;;  %v8317_v38 = vcombine.high %v8291_v7, %v8299_v34  ;;  %v8333_v59 = vcombine.high %v8307_v1, %v8315_v27  ;;  %10257 = vmatprep.subr.bf16.mxu0 %v10671_v54 }
0x111f   : > { %v8213_v57 = vcombine.high %v14180_v36, %v14183_v42  ;;  %v8279_v46 = vrot.slane %v8265_v16, %v12368_v45  ;;  %v8113_v11 = vcombine.high %v14108_v52, %v14111_v63  ;;  %v8129_v9 = vcombine.high %v14114_v26, %v14117_v10  ;;  %10258 = vmatpush3.bf16.msra.mxu0 %v10671_v54 }
0x1120   : > { %v10571_v56 = vpack.i.bf16 %v8349_v22, %v8281_v37  ;;  %v8331_v18 = vrot.slane %v8317_v38, %v12368_v45  ;;  %v8347_v17 = vrot.slane %v8333_v59, %v12368_v45  ;;  %v8181_v25 = vcombine.high %v8155_v28, %v8163_v12  ;;  %10259 = vmatprep.subr.bf16.mxu0 %v10672_v58 }
0x1121   : > { %v10581_v51 = vpack.i.bf16 %v8213_v57, %v8145_v5  ;;  %v8282_v39 = vcombine.low %v8263_v43, %v8279_v46  ;;  %v8127_v4 = vrot.slane %v8113_v11, %v12368_v45  ;;  %v8143_v49 = vrot.slane %v8129_v9, %v12368_v45 }
0x1122   : > { %10572 = vrot.lane.b32.xlu1 %v10571_v56, %s11553_s10  ;;  %v8350_v52 = vcombine.low %v8331_v18, %v8347_v17  ;;  %v8195_v63 = vrot.slane %v8181_v25, %v12368_v45  ;;  %v8197_v26 = vcombine.high %v8171_v33, %v8179_v24  ;;  %v8283_v10 = vcombine.high %v8263_v43, %v8279_v46 }
0x1123   : > { %10582 = vrot.lane.b32.xlu0 %v10581_v51, %s11553_s10  ;;  %v8147_v44 = vcombine.high %v8127_v4, %v8143_v49  ;;  %v8146_v0 = vcombine.low %v8127_v4, %v8143_v49  ;;  %v8351_v61 = vcombine.high %v8331_v18, %v8347_v17  ;;  %v8280_v3 = vcombine.low %v14156_v20, %v14159_v6  ;;  %v9727_v18 = vld [vmem:[%s14566_s28] ss:$0 sm:$0xff] }
0x1124   : > { %v10576_v2 = vpack.i.bf16 %v8350_v52, %v8282_v39  ;;  %v8211_v41 = vrot.slane %v8197_v26, %v12368_v45  ;;  %v8348_v23 = vcombine.low %v14170_v55, %v14173_v29  ;;  %v8144_v47 = vcombine.low %v14162_v40, %v14165_v32  ;;  %10260 = vmatpush3.bf16.msra.mxu0 %v10672_v58 }
0x1125   : > { %v10596_v60 = vpack.i.bf16 %v8351_v61, %v8283_v10  ;;  %v8212_v7 = vcombine.low %v14180_v36, %v14183_v42  ;;  %v10675_v61 = vld [vmem:[%s14567_s3 + $0x4] ss:$8 sps:$4 sm:$0xff]  }
0x1126   : > { %10577 = vrot.lane.b32.xlu1 %v10576_v2, %s11552_s26  ;;  %v8215_v34 = vcombine.high %v8195_v63, %v8211_v41  ;;  %v8214_v1 = vcombine.low %v8195_v63, %v8211_v41  ;;  %8708 = vmatprep.subr.bf16.mxu1 %v10675_v61 }
0x1128   : > { %v10591_v27 = vpack.i.bf16 %v8215_v34, %v8147_v44  ;;  %v10586_v21 = vpack.i.bf16 %v8214_v1, %v8146_v0 }
0x112a   : > { %10592 = vrot.lane.b32.xlu0 %v10591_v27, %s11551_s20  ;;  %10587 = vrot.lane.b32.xlu1 %v10586_v21, %s11552_s26  ;;  %s9789_s26 = sshll.u32 %s11776_s11, 9 }
0x112b   : > { %s14341_s10 = scalar_lea.hbm %s11753_s27, %s9789_s26 }
0x112e   : > { %10597 = vrot.lane.b32.xlu1 %v10596_v60, %s11551_s20  ;;  %s1406_s20 = scalar_lea.vmem [#allocation29], %s12136_s9 }
0x112f   : > { %s9198_s15 = sshll.u32 %s1406_s20, 4  ;;  %s14336_s15 = int_to_ptr.vmem [resolvable:$true] %s9198_s15 }
0x1130   : > { %s11363_s18 = scalar_lea.vmem %s14336_s15, 512  ;;  %p11370_p11 = scmp.lt.s32.totalorder %s14336_s15, %s11368_s0 }
0x1131   : > { %p11364_p4 = scmp.ne.s32.totalorder %s14336_s15, %s11363_s18  ;;  %p11371_p1 = scmp.lt.s32.totalorder %s11369_s16, %s11363_s18 }
0x1133   : > { %p11365_p10 = pnand %p11364_p4, %p14573_p3  ;;  %p11372_p7 = por %p11371_p1, %p11370_p11 }
0x1135   : > { %p11366_p12 = pneg %p11365_p10 }
0x1137   : > { %p11373_p2 = pnand %p11372_p7, %p11366_p12 }
0x1194   : > { %v10573_v45 = vpop.permute.xlu1 %10572 }
0x1195   : > { %v10583_v28 = vpop.permute.xlu0 %10582  ;;  %v10575_v20 = vunpack.i.h.bf16 %v10573_v45  ;;  %v10574_v6 = vunpack.i.l.bf16 %v10573_v45 }
0x1196   : > { %v10585_v33 = vunpack.i.h.bf16 %v10583_v28  ;;  %v10584_v24 = vunpack.i.l.bf16 %v10583_v28 }
0x1197   : > { %v8402_v42 = vsel %vm4182_vm1, %v8280_v3, %v10574_v6  ;;  %v8403_v43 = vsel %vm4182_vm1, %v8348_v23, %v10575_v20  ;;  %v10678_v3 = vld [vmem:[%s14567_s3 + $0x14] ss:$8 sps:$4 sm:$0xff]   ;;  %v10682_v6 = vld [vmem:[%s14567_s3 + $0x30] ss:$8 sps:$4 sm:$0xff]  }
0x1198   : > { %v10578_v12 = vpop.permute.xlu1 %10577  ;;  %v8400_v40 = vsel %vm4182_vm1, %v8144_v47, %v10584_v24  ;;  %v8401_v32 = vsel %vm4182_vm1, %v8212_v7, %v10585_v33  ;;  %v10679_v33 = vld [vmem:[%s14567_s3 + $0x20] ss:$8 sps:$4 sm:$0xff]   ;;  %v10681_v24 = vld [vmem:[%s14567_s3 + $0x24] ss:$8 sps:$4 sm:$0xff]   ;;  %v10684_v20 = vld [vmem:[%s14567_s3 + $0x34] ss:$8 sps:$4 sm:$0xff]  }
0x1199   : > { %v10580_v37 = vunpack.i.h.bf16 %v10578_v12  ;;  %v10579_v55 = vunpack.i.l.bf16 %v10578_v12 }
0x119b   : > { %v8406_v46 = vsel %vm5435_vm2, %v8402_v42, %v10579_v55  ;;  %v8407_v11 = vsel %vm5435_vm2, %v8403_v43, %v10580_v37  ;;  %v10691_v37 = vld [vmem:[%s14567_s3 + $0x60] ss:$8 sps:$4 sm:$0xff]   ;;  %v10696_v55 = vld [vmem:[%s14567_s3 + $0x74] ss:$8 sps:$4 sm:$0xff]  }
0x119c   : > { %v10593_v48 = vpop.permute.xlu0 %10592  ;;  %v10588_v35 = vpop.permute.xlu1 %10587 }
0x119d   : > { %v10590_v50 = vunpack.i.h.bf16 %v10588_v35  ;;  %v10589_v15 = vunpack.i.l.bf16 %v10588_v35  ;;  %v10595_v29 = vunpack.i.h.bf16 %v10593_v48  ;;  %v10594_v30 = vunpack.i.l.bf16 %v10593_v48  ;;  %v10687_v48 = vld [vmem:[%s14567_s3 + $0x44] ss:$8 sps:$4 sm:$0xff]  }
0x119e   : > { %v11560_v35 = vmov 0  }
0x119f   : > { %v8404_v5 = vsel %vm5435_vm2, %v8400_v40, %v10589_v15  ;;  %v8405_v36 = vsel %vm5435_vm2, %v8401_v32, %v10590_v50  ;;  %8740 = vmatprep.mubr.bf16.mxu1 %v11560_v35  ;;  %v10685_v40 = vld [vmem:[%s14567_s3 + $0x40] ss:$8 sps:$4 sm:$0xff]   ;;  %v10690_v32 = vld [vmem:[%s14567_s3 + $0x54] ss:$8 sps:$4 sm:$0xff]   ;;  %v10688_v50 = vld [vmem:[%s14567_s3 + $0x50] ss:$8 sps:$4 sm:$0xff]  }
0x11a0   : > { %v10598_v16 = vpop.permute.xlu1 %10597  ;;  %v8408_v8 = vsel %vm5440_vm3, %v8404_v5, %v10594_v30  ;;  %v8409_v22 = vsel %vm5440_vm3, %v8405_v36, %v10595_v29  ;;  %v10693_v15 = vld [vmem:[%s14567_s3 + $0x64] ss:$8 sps:$4 sm:$0xff]   ;;  %v10694_v29 = vld [vmem:[%s14567_s3 + $0x70] ss:$8 sps:$4 sm:$0xff]  }
0x11a1   : > { %v10600_v38 = vunpack.i.h.bf16 %v10598_v16  ;;  %v10599_v59 = vunpack.i.l.bf16 %v10598_v16  ;;  %v8412_v57 = vpack.c.bf16 %v8409_v22, %v8408_v8 }
0x11a3   : > { %v8411_v9 = vsel %vm5440_vm3, %v8407_v11, %v10600_v38  ;;  %v8410_v54 = vsel %vm5440_vm3, %v8406_v46, %v10599_v59  ;;  %10261 = vmatprep.mubr.bf16.mxu0 %v8412_v57  ;;  %v8584_v46 = vsub.s32 4, %v12232_v14 }
0x11a4   : > { %v8413_v56 = vpack.c.bf16 %v8411_v9, %v8410_v54  ;;  %v14568_v9 = vld [vmem:[#allocation80_spill] sm:$0xff] }
0x11a5   : > { %v8585_v54 = vrot.slane %v14568_v9, %v8584_v46 }
0x11a6   : > { %10262 = vmatmul.mubr.bf16.vlgmr.msra.gmra.mrb[48].mxu0 %v8413_v56  ;;  %v8592_v56 = vsub.s32 3, %v12232_v14 }
0x1279   : > { %v10263_v17 = vpop.f32.mrb[48].mxu0 }
0x127a   : > { %v8519_v25 = vpop.f32.mrb[49].mxu0  ;;  %v8528_v49 = vadd.f32 %v10263_v17, %v9727_v18 }
0x127b   : > { %v8520_v51 = vadd.f32 %v9727_v18, %v8519_v25  ;;  %v10264_v39 = vpop.f32.mrb[50].mxu0 }
0x127c   : > { %v8522_v4 = vpop.f32.mrb[51].mxu0  ;;  %v14238_v10 = vadd.f32 %v8528_v49, %v13571_v53  ;;  %v8531_v44 = vadd.f32 %v10264_v39, %v9727_v18 }
0x127d   : > { %v14231_v52 = vadd.f32 %v8520_v51, %v13565_v19  ;;  %v8523_v63 = vadd.f32 %v9727_v18, %v8522_v4  ;;  %v10673_v19 = vld [vmem:[%s14567_s3] ss:$8 sps:$4 sm:$0xff]   ;;  %v8593_v4 = vrot.slane %v12230_v13, %v8592_v56 }
0x127e   : > { %v14243_v0 = vadd.f32 %v8531_v44, %v13562_v31  ;;  %8709 = vmatpush1.bf16.msra.mxu1 %v10673_v19 }
0x127f   : > { %v14234_v26 = vadd.f32 %v8523_v63, %v13568_v62  ;;  %8538 = vadd.xlane.f32.xlu0 %v14231_v52  ;;  %v10676_v62 = vld [vmem:[%s14567_s3 + $0x10] ss:$8 sps:$4 sm:$0xff]   ;;  %8710 = vmatprep.subr.bf16.mxu1 %v10678_v3 }
0x1281   : > { %8540 = vadd.xlane.f32.xlu1 %v14234_v26 }
0x1282   : > { %8711 = vmatpush1.bf16.msra.mxu1 %v10676_v62 }
0x1283   : > { %8542 = vadd.xlane.f32.xlu0 %v14238_v10  ;;  %8712 = vmatprep.subr.bf16.mxu1 %v10681_v24  ;;  %v10708_v24 = vld [vmem:[#allocation25 + $0x28] sm:$0xff]  }
0x1286   : > { %8713 = vmatpush1.bf16.msra.mxu1 %v10679_v33  ;;  %v10707_v33 = vld [vmem:[#allocation25 + $0x68] sm:$0xff]  }
0x1287   : > { %8544 = vadd.xlane.f32.xlu0 %v14243_v0  ;;  %8714 = vmatprep.subr.bf16.mxu1 %v10684_v20  ;;  %v10709_v20 = vld [vmem:[#allocation25 + $0x70] sm:$0xff]  }
0x128a   : > { %8715 = vmatpush1.bf16.msra.mxu1 %v10682_v6  ;;  %v10710_v6 = vld [vmem:[#allocation25 + $0x30] sm:$0xff]  }
0x128b   : > { %8716 = vmatprep.subr.bf16.mxu1 %v10687_v48  ;;  %v10711_v48 = vld [vmem:[#allocation25 + $0x78] sm:$0xff]  }
0x128e   : > { %8717 = vmatpush1.bf16.msra.mxu1 %v10685_v40  ;;  %v10713_v40 = vld [vmem:[#allocation26] sm:$0xff]  }
0x128f   : > { %8718 = vmatprep.subr.bf16.mxu1 %v10690_v32  ;;  %v10714_v32 = vld [vmem:[#allocation26 + $0x8] sm:$0xff]  }
0x1292   : > { %8719 = vmatpush1.bf16.msra.mxu1 %v10688_v50  ;;  %v10715_v50 = vld [vmem:[#allocation26 + $0x10] sm:$0xff]  }
0x1293   : > { %8720 = vmatprep.subr.bf16.mxu1 %v10693_v15  ;;  %v8616_v15 = vld [vmem:[%s14569_s14] sm:$0x3] }
0x1296   : > { %8721 = vmatpush1.bf16.msra.mxu1 %v10691_v37  ;;  %v14570_v37 = vsub.s32 0, %v12232_v14 }
0x1297   : > { %8722 = vmatprep.subr.bf16.mxu1 %v10696_v55 }
0x1298   : > { %v8621_v55 = vrot.slane %v8616_v15, %v14570_v37 }
0x129a   : > { %8723 = vmatpush1.bf16.msra.mxu1 %v10694_v29  ;;  %v14571_v29 = vsub.s32 1, %v12232_v14 }
0x129b   : > { %10265 = vmatprep.subr.bf16.mxu1 %v10713_v40 }
0x130c   : > { %v8539_v53 = vpop.xlane.xlu0 %8538 }
0x130d   : > { %v8546_v2 = vmul.f32 0.0078125, %v8539_v53 }
0x130e   : > { %v8541_v41 = vpop.xlane.xlu1 %8540 }
0x130f   : > { %v14251_v23 = vsub.f32 %v14231_v52, %v8546_v2  ;;  %v8547_v47 = vmul.f32 0.0078125, %v8541_v41 }
0x1310   : > { %v8543_v31 = vpop.xlane.xlu0 %8542 }
0x1311   : > { %v8551_v58 = vsub.f32 %v14234_v26, %v8547_v47  ;;  %v8548_v60 = vmul.f32 0.0078125, %v8543_v31  ;;  %v8554_v7 = vmul.f32 %v14251_v23, %v14251_v23 }
0x1313   : > { %v14257_v34 = vsub.f32 %v14238_v10, %v8548_v60  ;;  %8558 = vadd.xlane.f32.xlu0 %v8554_v7  ;;  %v8555_v1 = vmul.f32 %v8551_v58, %v8551_v58  ;;  %v10698_v60 = vld [vmem:[#allocation25] sm:$0xff]   ;;  %v10699_v7 = vld [vmem:[#allocation25 + $0x48] sm:$0xff]  }
0x1314   : > { %v8545_v27 = vpop.xlane.xlu0 %8544 }
0x1315   : > { %v8549_v21 = vmul.f32 0.0078125, %v8545_v27  ;;  %8560 = vadd.xlane.f32.xlu1 %v8555_v1  ;;  %v8556_v45 = vmul.f32 %v14257_v34, %v14257_v34  ;;  %v10700_v1 = vld [vmem:[#allocation25 + $0x8] sm:$0xff]   ;;  %v10701_v27 = vld [vmem:[#allocation25 + $0x50] sm:$0xff]  }
0x1317   : > { %v8553_v28 = vsub.f32 %v14243_v0, %v8549_v21  ;;  %8562 = vadd.xlane.f32.xlu0 %v8556_v45  ;;  %v10703_v21 = vld [vmem:[#allocation25 + $0x58] sm:$0xff]  }
0x1318   : > { %v10704_v45 = vld [vmem:[#allocation25 + $0x18] sm:$0xff]  }
0x1319   : > { %v8557_v12 = vmul.f32 %v8553_v28, %v8553_v28 }
0x131b   : > { %8564 = vadd.xlane.f32.xlu1 %v8557_v12  ;;  %v10706_v12 = vld [vmem:[#allocation25 + $0x20] sm:$0xff]  }
0x13a0   : > { %v8559_v30 = vpop.xlane.xlu0 %8558 }
0x13a1   : > { %v8566_v5 = vmul.f32 0.0078125, %v8559_v30  ;;  %v8625_v30 = vrot.slane %v8616_v15, %v14571_v29 }
0x13a2   : > { %v8561_v36 = vpop.xlane.xlu1 %8560 }
0x13a3   : > { %v8570_v42 = vadd.f32 1e-06, %v8566_v5  ;;  %v8567_v16 = vmul.f32 0.0078125, %v8561_v36 }
0x13a4   : > { %v8563_v8 = vpop.xlane.xlu0 %8562 }
0x13a5   : > { %10885 = vrsqrt.f32 %v8570_v42  ;;  %v8571_v22 = vadd.f32 1e-06, %v8567_v16  ;;  %v8568_v43 = vmul.f32 0.0078125, %v8563_v8 }
0x13a7   : > { %10887 = vrsqrt.f32 %v8571_v22  ;;  %v8572_v38 = vadd.f32 1e-06, %v8568_v43 }
0x13a8   : > { %v8565_v59 = vpop.xlane.xlu1 %8564 }
0x13a9   : > { %10889 = vrsqrt.f32 %v8572_v38  ;;  %v8569_v57 = vmul.f32 0.0078125, %v8565_v59 }
0x13ab   : > { %v8573_v11 = vadd.f32 1e-06, %v8569_v57 }
0x13ad   : > { %10891 = vrsqrt.f32 %v8573_v11 }
0x13af   : > { %v10886_v18 = vpop.eup %10885 }
0x13b0   : > { %v8578_v17 = vmul.f32 %v10886_v18, %v14251_v23 }
0x13b1   : > { %v10888_v25 = vpop.eup %10887 }
0x13b2   : > { %v8579_v51 = vmul.f32 %v10888_v25, %v8551_v58  ;;  %v8586_v39 = vmul.f32 %v8585_v54, %v8578_v17  ;;  %v10697_v58 = vld [vmem:[#allocation25 + $0x40] sm:$0xff]  }
0x13b3   : > { %v10890_v49 = vpop.eup %10889  ;;  %9935 = vmatprep.subr.bf16.mxu0 %v10697_v58 }
0x13b4   : > { %v8587_v63 = vmul.f32 %v8585_v54, %v8579_v51  ;;  %v8594_v44 = vadd.f32 %v8593_v4, %v8586_v39  ;;  %v8580_v61 = vmul.f32 %v10890_v49, %v14257_v34  ;;  %9936 = vmatpush3.bf16.msra.mxu0 %v10698_v60  ;;  %v10702_v34 = vld [vmem:[#allocation25 + $0x10] sm:$0xff]  }
0x13b5   : > { %9937 = vmatprep.subr.bf16.mxu0 %v10699_v7 }
0x13b6   : > { %v8595_v19 = vadd.f32 %v8593_v4, %v8587_v63  ;;  %v8588_v2 = vmul.f32 %v8585_v54, %v8580_v61 }
0x13b7   : > { %v10892_v3 = vpop.eup %10891 }
0x13b8   : > { %v8598_v62 = vpack.c.bf16 %v8595_v19, %v8594_v44  ;;  %v8581_v53 = vmul.f32 %v10892_v3, %v8553_v28  ;;  %v8596_v23 = vadd.f32 %v8593_v4, %v8588_v2  ;;  %9938 = vmatpush3.bf16.msra.mxu0 %v10700_v1  ;;  %v10705_v28 = vld [vmem:[#allocation25 + $0x60] sm:$0xff]  }
0x13b9   : > { %9939 = vmatprep.subr.bf16.mxu0 %v10701_v27 }
0x13ba   : > { %8741 = vmatmul.mubr.bf16.vlgmr.msra.gmra.mrb[48].mxu1 %v8598_v62  ;;  %v8589_v41 = vmul.f32 %v8585_v54, %v8581_v53 }
0x13bb   : > { %8750 = vmatprep.mubr.bf16.mxu1 %v11560_v35  ;;  %v10712_v35 = vld [vmem:[#allocation25 + $0x38] sm:$0xff]   ;;  %10266 = vmatpush3.bf16.msra.mxu1 %v10713_v40 }
0x13bc   : > { %v8597_v47 = vadd.f32 %v8593_v4, %v8589_v41  ;;  %9940 = vmatpush3.bf16.msra.mxu0 %v10702_v34  ;;  %10267 = vmatprep.subr.bf16.mxu1 %v10714_v32 }
0x13bd   : > { %9941 = vmatprep.subr.bf16.mxu0 %v10703_v21 }
0x13be   : > { %v8599_v31 = vpack.c.bf16 %v8597_v47, %v8596_v23 }
0x13bf   : > { %10268 = vmatpush3.bf16.msra.mxu1 %v10714_v32 }
0x13c0   : > { %9942 = vmatpush3.bf16.msra.mxu0 %v10704_v45  ;;  %10269 = vmatprep.subr.bf16.mxu1 %v10715_v50 }
0x13c1   : > { %9943 = vmatprep.subr.bf16.mxu0 %v10705_v28 }
0x13c2   : > { %8751 = vmatmul.mubr.bf16.gmra.mrb[52].mxu1 %v8599_v31 }
0x13c3   : > { %10270 = vmatpush3.bf16.msra.mxu1 %v10715_v50 }
0x13c4   : > { %9944 = vmatpush3.bf16.msra.mxu0 %v10706_v12 }
0x13c5   : > { %9945 = vmatprep.subr.bf16.mxu0 %v10707_v33 }
0x13c8   : > { %9946 = vmatpush3.bf16.msra.mxu0 %v10708_v24 }
0x13c9   : > { %9947 = vmatprep.subr.bf16.mxu0 %v10709_v20 }
0x13cc   : > { %9948 = vmatpush3.bf16.msra.mxu0 %v10710_v6 }
0x13cd   : > { %9949 = vmatprep.subr.bf16.mxu0 %v10711_v48 }
0x13d0   : > { %9950 = vmatpush3.bf16.msra.mxu0 %v10712_v35 }
0x148d   : > { %v8742_v5 = vpop.f32.mrb[48].mxu1 }
0x148e   : > { %v14285_v36 = vadd.f32 %v8742_v5, %v8621_v55  ;;  %v8744_v42 = vpop.f32.mrb[49].mxu1 }
0x148f   : > { %v14287_v16 = vadd.f32 %v8744_v42, %v8625_v30  ;;  %v8746_v8 = vpop.f32.mrb[50].mxu1 }
0x1490   : > { %v8769_v22 = vmul.f32 0.044715, %v14285_v36  ;;  %v14290_v43 = vadd.f32 %v8746_v8, %v8621_v55  ;;  %v8748_v38 = vpop.f32.mrb[51].mxu1 }
0x1491   : > { %v8770_v59 = vmul.f32 0.044715, %v14287_v16  ;;  %v14293_v57 = vadd.f32 %v8748_v38, %v8625_v30  ;;  %v8761_v38 = vmul.f32 0.5, %v14285_v36 }
0x1492   : > { %v8777_v46 = vmul.f32 %v8769_v22, %v14285_v36  ;;  %v8771_v11 = vmul.f32 0.044715, %v14290_v43 }
0x1493   : > { %v8778_v9 = vmul.f32 %v8770_v59, %v14287_v16  ;;  %v8772_v54 = vmul.f32 0.044715, %v14293_v57  ;;  %v8763_v59 = vmul.f32 0.5, %v14290_v43 }
0x1494   : > { %v8785_v56 = vmul.f32 %v8777_v46, %v14285_v36  ;;  %v8779_v18 = vmul.f32 %v8771_v11, %v14290_v43  ;;  %v8762_v11 = vmul.f32 0.5, %v14287_v16 }
0x1495   : > { %v8786_v17 = vmul.f32 %v8778_v9, %v14287_v16  ;;  %v8780_v25 = vmul.f32 %v8772_v54, %v14293_v57  ;;  %v8752_v51 = vpop.f32.mrb[52].mxu1  ;;  %v8764_v9 = vmul.f32 0.5, %v14293_v57 }
0x1496   : > { %v8793_v39 = vadd.f32 %v8785_v56, %v14285_v36  ;;  %v8787_v4 = vmul.f32 %v8779_v18, %v14290_v43  ;;  %v14305_v49 = vadd.f32 %v8752_v51, %v8621_v55  ;;  %v8754_v63 = vpop.f32.mrb[53].mxu1 }
0x1497   : > { %v8788_v44 = vmul.f32 %v8780_v25, %v14293_v57  ;;  %v14308_v19 = vadd.f32 %v8754_v63, %v8625_v30  ;;  %v8756_v61 = vpop.f32.mrb[54].mxu1  ;;  %v8794_v3 = vadd.f32 %v8786_v17, %v14287_v16 }
0x1498   : > { %v8801_v62 = vmul.f32 0.7978846, %v8793_v39  ;;  %v8795_v53 = vadd.f32 %v8787_v4, %v14290_v43  ;;  %v8773_v2 = vmul.f32 0.044715, %v14305_v49  ;;  %v8757_v41 = vadd.f32 %v8756_v61, %v8621_v55  ;;  %v8758_v47 = vpop.f32.mrb[55].mxu1 }
0x1499   : > { %v8774_v23 = vmul.f32 0.044715, %v14308_v19  ;;  %v8759_v31 = vadd.f32 %v8758_v47, %v8625_v30  ;;  %v8796_v58 = vadd.f32 %v8788_v44, %v14293_v57  ;;  %v8802_v60 = vmul.f32 0.7978846, %v8794_v3 }
0x149a   : > { %10893 = vtanh.f32 %v8801_v62  ;;  %v8803_v7 = vmul.f32 0.7978846, %v8795_v53  ;;  %v8781_v1 = vmul.f32 %v8773_v2, %v14305_v49  ;;  %v8775_v27 = vmul.f32 0.044715, %v8757_v41 }
0x149b   : > { %v8782_v34 = vmul.f32 %v8774_v23, %v14308_v19  ;;  %v8776_v21 = vmul.f32 0.044715, %v8759_v31  ;;  %v8804_v45 = vmul.f32 0.7978846, %v8796_v58  ;;  %10895 = vtanh.f32 %v8802_v60 }
0x149c   : > { %10897 = vtanh.f32 %v8803_v7  ;;  %v8789_v28 = vmul.f32 %v8781_v1, %v14305_v49  ;;  %v8783_v12 = vmul.f32 %v8775_v27, %v8757_v41  ;;  %v8765_v43 = vmul.f32 0.5, %v14305_v49  ;;  %v10716_v27 = vld [vmem:[#allocation26 + $0x18] sm:$0xff]  }
0x149d   : > { %v8790_v33 = vmul.f32 %v8782_v34, %v14308_v19  ;;  %v8784_v24 = vmul.f32 %v8776_v21, %v8759_v31  ;;  %10899 = vtanh.f32 %v8804_v45  ;;  %v8767_v16 = vmul.f32 0.5, %v8757_v41  ;;  %10271 = vmatprep.subr.bf16.mxu1 %v10716_v27  ;;  %v10717_v34 = vld [vmem:[#allocation26 + $0x20] sm:$0xff]  }
0x149e   : > { %v8791_v20 = vmul.f32 %v8783_v12, %v8757_v41  ;;  %v8797_v6 = vadd.f32 %v8789_v28, %v14305_v49  ;;  %v8766_v57 = vmul.f32 0.5, %v14308_v19  ;;  %v8768_v53 = vmul.f32 0.5, %v8759_v31  ;;  %10272 = vmatpush3.bf16.msra.mxu1 %v10716_v27  ;;  %v10718_v49 = vld [vmem:[#allocation26 + $0x28] sm:$0xff]   ;;  %v9752_v45 = vld [vmem:[%s14572_s4] ss:$0 sm:$0xff] }
0x149f   : > { %v8792_v48 = vmul.f32 %v8784_v24, %v8759_v31  ;;  %v8798_v35 = vadd.f32 %v8790_v33, %v14308_v19  ;;  %10273 = vmatprep.subr.bf16.mxu1 %v10717_v34  ;;  %v10719_v19 = vld [vmem:[#allocation26 + $0x30] sm:$0xff]  }
0x14a0   : > { %v8799_v40 = vadd.f32 %v8791_v20, %v8757_v41  ;;  %v8805_v32 = vmul.f32 0.7978846, %v8797_v6  ;;  %v10720_v41 = vld [vmem:[#allocation26 + $0x38] sm:$0xff]  }
0x14a1   : > { %v8800_v50 = vadd.f32 %v8792_v48, %v8759_v31  ;;  %v8806_v15 = vmul.f32 0.7978846, %v8798_v35  ;;  %v9023_v31 = vsub.s32 5, %v12232_v14 }
0x14a2   : > { %v8807_v37 = vmul.f32 0.7978846, %v8799_v40  ;;  %10901 = vtanh.f32 %v8805_v32  ;;  %10274 = vmatpush3.bf16.msra.mxu1 %v10717_v34 }
0x14a3   : > { %v8808_v55 = vmul.f32 0.7978846, %v8800_v50  ;;  %10903 = vtanh.f32 %v8806_v15  ;;  %10275 = vmatprep.subr.bf16.mxu1 %v10718_v49  ;;  %v9024_v33 = vrot.slane %v12230_v13, %v9023_v31 }
0x14a4   : > { %v10894_v29 = vpop.eup %10893  ;;  %10905 = vtanh.f32 %v8807_v37 }
0x14a5   : > { %v10896_v30 = vpop.eup %10895  ;;  %v8817_v5 = vadd.f32 1.0, %v10894_v29  ;;  %10907 = vtanh.f32 %v8808_v55 }
0x14a6   : > { %v10898_v42 = vpop.eup %10897  ;;  %v8818_v8 = vadd.f32 1.0, %v10896_v30  ;;  %10276 = vmatpush3.bf16.msra.mxu1 %v10718_v49 }
0x14a7   : > { %v10900_v22 = vpop.eup %10899  ;;  %v8819_v46 = vadd.f32 1.0, %v10898_v42  ;;  %v8825_v56 = vmul.f32 %v8817_v5, %v8761_v38  ;;  %10277 = vmatprep.subr.bf16.mxu1 %v10719_v19 }
0x14a8   : > { %v8820_v54 = vadd.f32 1.0, %v10900_v22  ;;  %v8826_v17 = vmul.f32 %v8818_v8, %v8762_v11 }
0x14a9   : > { %v8827_v18 = vmul.f32 %v8819_v46, %v8763_v59 }
0x14aa   : > { %v8828_v25 = vmul.f32 %v8820_v54, %v8764_v9  ;;  %10278 = vmatpush3.bf16.msra.mxu1 %v10719_v19 }
0x14ab   : > { %v8833_v51 = vpack.c.bf16 %v8827_v18, %v8825_v56  ;;  %10279 = vmatprep.subr.bf16.mxu1 %v10720_v41 }
0x14ac   : > { %v10902_v39 = vpop.eup %10901  ;;  %v8834_v4 = vpack.c.bf16 %v8828_v25, %v8826_v17 }
0x14ad   : > { %v10904_v63 = vpop.eup %10903  ;;  %v8821_v44 = vadd.f32 1.0, %v10902_v39 }
0x14ae   : > { %v10906_v61 = vpop.eup %10905  ;;  %9004 = vmatprep.mubr.bf16.mxu0 %v8834_v4  ;;  %v8822_v36 = vadd.f32 1.0, %v10904_v63  ;;  %10280 = vmatpush3.bf16.msra.mxu1 %v10720_v41 }
0x14af   : > { %v10908_v3 = vpop.eup %10907  ;;  %9005 = vmatmul.mubr.bf16.vlgmr.msra.gmra.mrb[52].mxu0 %v8833_v51  ;;  %v8823_v62 = vadd.f32 1.0, %v10906_v61  ;;  %v8829_v47 = vmul.f32 %v8821_v44, %v8765_v43 }
0x14b0   : > { %v8824_v2 = vadd.f32 1.0, %v10908_v3  ;;  %v8830_v58 = vmul.f32 %v8822_v36, %v8766_v57 }
0x14b1   : > { %v8831_v23 = vmul.f32 %v8823_v62, %v8767_v16 }
0x14b2   : > { %v8832_v60 = vmul.f32 %v8824_v2, %v8768_v53 }
0x14b3   : > { %v8835_v7 = vpack.c.bf16 %v8831_v23, %v8829_v47 }
0x14b4   : > { %v8836_v1 = vpack.c.bf16 %v8832_v60, %v8830_v58 }
0x14b6   : > { %9012 = vmatprep.mubr.bf16.mxu0 %v8836_v1 }
0x14b7   : > { %9013 = vmatmul.mubr.bf16.gmra.mrb[56].mxu0 %v8835_v7 }
0x1582   : > { %v9951_v21 = vpop.f32.mrb[52].mxu0 }
0x1583   : > { %v9952_v28 = vpop.f32.mrb[53].mxu0 }
0x1584   : > { %v9953_v12 = vadd.f32 %v9952_v28, %v9951_v21  ;;  %v9954_v24 = vpop.f32.mrb[54].mxu0 }
0x1585   : > { %v9955_v20 = vpop.f32.mrb[55].mxu0 }
0x1586   : > { %v9007_v6 = vadd.f32 %v9953_v12, %v9752_v45  ;;  %v9956_v48 = vadd.f32 %v9955_v20, %v9954_v24 }
0x1588   : > { %v9025_v35 = vmul.f32 %v9024_v33, %v9007_v6  ;;  %v9010_v40 = vadd.f32 %v9956_v48, %v9752_v45 }
0x158a   : > { %v9026_v32 = vmul.f32 %v9024_v33, %v9010_v40  ;;  %v9957_v50 = vpop.f32.mrb[56].mxu0  ;;  %v9029_v15 = vadd.f32 %v9025_v35, %v14231_v52 }
0x158b   : > { %v9958_v37 = vpop.f32.mrb[57].mxu0 }
0x158c   : > { %v9959_v55 = vadd.f32 %v9958_v37, %v9957_v50  ;;  %v9960_v14 = vpop.f32.mrb[58].mxu0  ;;  %v9030_v29 = vadd.f32 %v9026_v32, %v14234_v26  ;;  %9159 = vst [vmem:[%s1406_s20] sm:$0xff] %v9029_v15 }
0x158d   : > { %v9961_v30 = vpop.f32.mrb[59].mxu0 }
0x158e   : > { %v9015_v13 = vadd.f32 %v9959_v55, %v9752_v45  ;;  %v9962_v5 = vadd.f32 %v9961_v30, %v9960_v14  ;;  %v9033_v42 = vpack.c.bf16 %v9030_v29, %v9029_v15  ;;  %9160 = vst [vmem:[%s1406_s20 + $0x8] sm:$0xff] %v9030_v29 }
0x1590   : > { %v9027_v8 = vmul.f32 %v9024_v33, %v9015_v13  ;;  %v9018_v22 = vadd.f32 %v9962_v5, %v9752_v45  ;;  %10281 = vmatprep.mubr.bf16.mxu1 %v9033_v42 }
0x1592   : > { %v9031_v52 = vadd.f32 %v9027_v8, %v14238_v10  ;;  %v9028_v38 = vmul.f32 %v9024_v33, %v9018_v22 }
0x1594   : > { %9161 = vst [vmem:[%s1406_s20 + $0x10] sm:$0xff] %v9031_v52  ;;  %v9032_v26 = vadd.f32 %v9028_v38, %v14243_v0 }
0x1596   : > { %v9034_v59 = vpack.c.bf16 %v9032_v26, %v9031_v52  ;;  %9162 = vst [vmem:[%s1406_s20 + $0x18] sm:$0xff] %v9032_v26 }
0x1598   : > { %10282 = vmatmul.mubr.bf16.vlgmr.msra.gmra.mrb[56].mxu1 %v9034_v59 }
0x1599   : > { %11376 = shalt.err (!%p11373_p2)
}
0x159a   : > { %s11377_s17 = scalar_lea.hbm %s14341_s10, 512  ;;  %s11381_s24 = scalar_lea.hbm %s11753_s27, 1024 }
0x159b   : > { %p11378_p5 = scmp.ne.s32.totalorder %s14341_s10, %s11377_s17  ;;  %p11382_p6 = scmp.lt.u32.totalorder %s14341_s10, %s11753_s27 }
0x159c   : > { %p11383_p9 = scmp.lt.u32.totalorder %s11381_s24, %s11377_s17  ;;  %p11385_p4 = scmp.lt.u32.totalorder %s11377_s17, %s14341_s10 }
0x159d   : > { %p11379_p13 = pnand %p11378_p5, %p14573_p3 }
0x159e   : > { %p11384_p8 = por %p11383_p9, %p11382_p6 }
0x159f   : > { %p11380_p0 = pneg %p11379_p13 }
0x15a0   : > { %p11386_p10 = por %p11385_p4, %p11384_p8 }
0x15a2   : > { %p11387_p12 = pnand %p11386_p10, %p11380_p0 }
0x15a4   : > { %11390 = shalt.err (!%p11387_p12)
}
0x15a5   : > { %s11562_s23 = smov 128   ;;  %s14574_s28 = sld [smem:[#allocation69_spill]] }
0x15a6   : > { %s11563_s14 = smov 8   ;;  %s14575_s4 = sld [smem:[#allocation70_spill]] }
0x15a7   : > { %10356 = dma.vmem_to_hbm [thread:$0]  (%p14573_p3), %s14336_s15, 512, %s14341_s10, %s9169_s7, %s11562_s23, %s11562_s23, %s11563_s14  }
0x15a8   : > { %s1399_s20 = scalar_lea.vmem [#allocation28], %s12136_s9  ;;  %s9164_s9 = scalar_lea.sflag [#allocation4], %s12133_s12 }
0x15a9   : > { %s9182_s18 = sshll.u32 %s1399_s20, 4  ;;  %s11564_s7 = smov [#allocation28]   ;;  %s14368_s18 = int_to_ptr.vmem [resolvable:$true] %s9182_s18 }
0x15aa   : > { %s11391_s10 = scalar_lea.vmem %s14368_s18, 512  ;;  %s11395_s29 = sshll.u32 %s11564_s7, 4  ;;  %s11396_s29 = int_to_ptr.vmem [resolvable:$false] %s11395_s29 }
0x15ab   : > { %v9769_v10 = vld [vmem:[%s14574_s28] ss:$0 sm:$0xff]  ;;  %p11392_p11 = scmp.ne.s32.totalorder %s14368_s18, %s11391_s10  ;;  %s11397_s0 = scalar_lea.vmem %s11396_s29, 1024 }
0x15ac   : > { %s14373_s15 = scalar_lea.hbm %s14575_s4, %s9789_s26  ;;  %p11398_p2 = scmp.lt.s32.totalorder %s14368_s18, %s11396_s29 }
0x15ad   : > { %p11393_p1 = pnand %p11392_p11, %p14573_p3  ;;  %p11399_p5 = scmp.lt.s32.totalorder %s11397_s0, %s11391_s10 }
0x15af   : > { %p11394_p7 = pneg %p11393_p1  ;;  %p11400_p13 = por %p11399_p5, %p11398_p2 }
0x15b1   : > { %p11401_p0 = pnand %p11400_p13, %p11394_p7 }
0x166b   : > { %v10283_v0 = vpop.f32.mrb[56].mxu1 }
0x166c   : > { %v9149_v46 = vadd.f32 %v10283_v0, %v9769_v10  ;;  %v9140_v11 = vpop.f32.mrb[57].mxu1 }
0x166d   : > { %v9141_v9 = vadd.f32 %v9769_v10, %v9140_v11  ;;  %v10284_v54 = vpop.f32.mrb[58].mxu1 }
0x166e   : > { %9157 = vst [vmem:[%s1399_s20 + $0x10] sm:$0xff] %v9149_v46  ;;  %v9152_v56 = vadd.f32 %v10284_v54, %v9769_v10  ;;  %v9143_v18 = vpop.f32.mrb[59].mxu1 }
0x166f   : > { %9155 = vst [vmem:[%s1399_s20] sm:$0xff] %v9141_v9  ;;  %v9144_v17 = vadd.f32 %v9769_v10, %v9143_v18 }
0x1670   : > { %9158 = vst [vmem:[%s1399_s20 + $0x18] sm:$0xff] %v9152_v56 }
0x1671   : > { %9156 = vst [vmem:[%s1399_s20 + $0x8] sm:$0xff] %v9144_v17 }
0x1672   : > { %11404 = shalt.err (!%p11401_p0)
}
0x1673   : > { %s11405_s11 = scalar_lea.hbm %s14373_s15, 512  ;;  %s11409_s26 = scalar_lea.hbm %s14575_s4, 1024 }
0x1674   : > { %p11406_p6 = scmp.ne.s32.totalorder %s14373_s15, %s11405_s11  ;;  %p11410_p4 = scmp.lt.u32.totalorder %s14373_s15, %s14575_s4 }
0x1675   : > { %p11411_p10 = scmp.lt.u32.totalorder %s11409_s26, %s11405_s11  ;;  %p11413_p11 = scmp.lt.u32.totalorder %s11405_s11, %s14373_s15 }
0x1676   : > { %p11407_p9 = pnand %p11406_p6, %p14573_p3 }
0x1677   : > { %p11412_p12 = por %p11411_p10, %p11410_p4 }
0x1678   : > { %p11408_p8 = pneg %p11407_p9 }
0x1679   : > { %p11414_p1 = por %p11413_p11, %p11412_p12 }
0x167b   : > { %p11415_p7 = pnand %p11414_p1, %p11408_p8 }
0x167d   : > { %11418 = shalt.err (!%p11415_p7)
}
0x167e   : > { %10355 = dma.vmem_to_hbm [thread:$0]  (%p14573_p3), %s14368_s18, 512, %s14373_s15, %s9164_s9, %s11562_s23, %s11562_s23, %s11563_s14  }
0x167f PF: > { %s14576_s16 = sld [smem:[#allocation71_spill]]  ;;  %s14577_s17 = sld [smem:[#allocation75_spill]] }
0x1680   : > { %p14579_p5 = scmp.ge.s32.totalorder %s11493_s2, 2 }
0x1685   : > { %s9213_s24 = sand.u32 1, %s14576_s16   ;;  %p14578_p2 = scmp.ne.s32.totalorder %s14577_s17, 0 }
0x1686   : > { %s9214_s28 = scalar_lea.sflag [#allocation4], %s9213_s24 }
0x1687   : > { %p10410_p13 = pnand %p14579_p5, %p14578_p2 }
0x1689   : > { %11472 = dma.done.wait (!%p10410_p13), %s9214_s28, 512  }
0x168a   : > { %11474 = vsyncadd (!%p10410_p13), %s9214_s28, 4294966784  ;;  %s9223_s21 = scalar_lea.sflag [#allocation30], %s9213_s24 }
0x168b   : > { %11476 = dma.done.wait (!%p10410_p13), %s9223_s21, 512  }
0x168c   : > { %11478 = vsyncadd (!%p10410_p13), %s9223_s21, 4294966784  ;;  %s14580_s2 = sld [smem:[#allocation73_spill]]  ;;  %s14581_s12 = sld [smem:[#allocation72_spill]] }
0x168d   : > { %s14582_s0 = sld [smem:[#allocation74_spill]]  ;;  %s14583_s28 = smov %s11485_s1 }
0x1692   : > { %p100_p3 = scmp.ge.s32.totalorder %s14580_s2, 4   ;;  %s14584_s1 = smov %s14581_s12 }
0x1694   :  { %102 = sbr.rel (!%p100_p3) target bundleno = 92 (0x5c), region = 337 }
0x169b   :  { %9228 = vsyncpa [#allocation3], 1 }
0x169c   :  { %9230 = vsyncpa [#allocation3 + $0x1], 1 }
0x169d   :  { %9231 = vsyncpa [#allocation6], 1 }
0x169e   :  { %9233 = vsyncpa [#allocation6 + $0x1], 1 }
0x169f   :  { %9234 = vsyncpa [#allocation9], 1 }
0x16a0   :  { %9235 = vsyncpa [#allocation12], 1 }
0x16a1   :  { %9236 = vsyncpa [#allocation15], 1 }
0x16a2   :  { %9237 = vsyncpa [#allocation18], 1 }
0x16a3   :  { %9238 = vsyncpa [#allocation21], 1 }
0x16a4   :  { %9239 = vsyncpa [#allocation24], 1 }
0x16a5   :  { %9240 = vsyncpa [#allocation27], 1 }
0x16a6   :  { %9241 = vsyncpa [#allocation4], 1 }
0x16a7   :  { %9243 = vsyncpa [#allocation4 + $0x1], 1 }
0x16a8   :  { %9244 = vsyncpa [#allocation30], 1 }
0x16a9   :  { %9246 = vsyncpa [#allocation30 + $0x1], 1 }

</bundles_post_ra>
